<compile_context>
chip_gen: v7x
topology: tpu7x:2x2x1
jax: 0.10.0
libtpu: 0.0.40
codegen_flags: <defaults>
</compile_context>

<pallas_src>
import functools
import math

import jax
import jax.numpy as jnp
import numpy as np
from jax.experimental import pallas as pl
from jax.experimental.pallas import tpu as pltpu


def _round_up(x: int, m: int) -> int:
    return ((x + m - 1) // m) * m


def _is_pow2(n: int) -> bool:
    return n > 0 and (n & (n - 1)) == 0


def _group_width(num_heads: int) -> int:
    """Lanes reserved per key head in the score / vw slab."""
    if _is_pow2(num_heads):
        # H * CG becomes a multiple of 128 -> roll-based row max, aligned slabs.
        return max(num_heads, 8, 128 // num_heads)
    return _round_up(num_heads, 8)


@functools.lru_cache(maxsize=None)
def make_critic_kernel(num_heads, head_dim, group_width, q_pad, v_pad, g_pad,
                       use_roll):
    H, D, CG = num_heads, head_dim, group_width
    S = H * D
    HHD = H * S               # width of the replicated-Q slab / q*k products
    HCG = H * CG              # width of the score / vw slab
    PQ, PV, PG = q_pad, v_pad, g_pad

    def critic_kernel(x_ref, w_ref, b_ref, seg_ref, sumg_ref, bfc_ref, o_ref):
        x = x_ref[...]
        # Fused projection: one MXU matmul yields [Q_rep | vw | K].
        h = jnp.dot(x.astype(w_ref.dtype), w_ref[...],
                    preferred_element_type=jnp.float32) + b_ref[...]
        q_rep = h[:, :HHD]                    # lane (i*H+j)*D+d = q[head i, d]
        vw = h[:, PQ:PQ + HCG]                # lane j*CG+i = <v_head_j, wfc_head_i>
        k = h[:, PQ + PV:PQ + PV + S]         # lane j*D+d = k[head j, d]

        # Tile K across the H query heads (cheap lane work; Q's replication is
        # free because it lives in the weights).
        k_rep = k if H == 1 else jnp.concatenate([k] * H, axis=-1)   # (TB, HHD)

        # All H*H scores: lane-dense multiply + segment-sum matmul.
        prod = q_rep * k_rep
        scores = jnp.dot(prod, seg_ref[...],
                         preferred_element_type=jnp.float32)          # (TB, HCG)
        # lane j*CG + i = score(query head i, key head j); lanes with
        # (lane % CG) >= H are zero padding and never mix with real groups.

        # Row max over key heads: same-group lanes sit CG apart.
        if use_roll:
            m = scores
            shift = CG
            while shift < HCG:                     # log2(H) XLU lane rotations
                m = jnp.maximum(m, pltpu.roll(m, shift=shift, axis=1))
                shift *= 2
        else:
            mm = scores[:, :CG]
            for j in range(1, H):
                mm = jnp.maximum(mm, scores[:, j * CG:(j + 1) * CG])
            m = jnp.concatenate([mm] * H, axis=1)

        e = jnp.exp(scores - m)                                        # one wide EUP exp

        # Fused group sums: softmax denominators and fc numerators in ONE matmul.
        both = jnp.concatenate([e, e * vw], axis=-1)                   # (TB, 2*HCG)
        sums = jnp.dot(both, sumg_ref[...],
                       preferred_element_type=jnp.float32)             # (TB, 2*PG)
        denom = sums[:, :PG]     # >= 1 everywhere (padding columns sum H ones)
        num = sums[:, PG:]       # zero outside the H real head columns

        inv = pl.reciprocal(denom, approx=True)
        inv = inv * (2.0 - denom * inv)            # one Newton step -> ~f32 exact
        contrib = num * inv                        # (TB, PG) per-head value terms

        # Lane-dense output: one aligned XLU transpose, sublane reduce over
        # heads, then a full-width (1, TB) row store.
        row = jnp.sum(jnp.transpose(contrib), axis=0, keepdims=True)   # (1, TB)
        o_ref[...] = row + bfc_ref[0]

    return critic_kernel


def prepare_critic_params(params, num_heads, mxu_dtype=jnp.float32):
    """One-time (outside the hot path) weight folding for the fused kernel."""
    wq_t = jnp.asarray(params["wq"], jnp.float32).T      # (S, S), (in, out)
    wk_t = jnp.asarray(params["wk"], jnp.float32).T
    wv_t = jnp.asarray(params["wv"], jnp.float32).T
    bq = jnp.asarray(params["bq"], jnp.float32)
    bk = jnp.asarray(params["bk"], jnp.float32)
    bv = jnp.asarray(params["bv"], jnp.float32)

    S = wq_t.shape[0]
    H = num_heads
    assert S % H == 0, "state_dim must be divisible by num_heads"
    D = S // H
    CG = _group_width(H)
    HHD = H * S
    HCG = H * CG
    PQ = _round_up(HHD, 128)
    PV = _round_up(HCG, 128)
    PG = _round_up(CG, 128)
    scale = 1.0 / math.sqrt(D)

    # Q replicated over key heads: column (i*H + j)*D + d carries q-head i.
    wq_rep = jnp.broadcast_to(wq_t.reshape(S, H, 1, D), (S, H, H, D)).reshape(S, HHD)
    bq_rep = jnp.broadcast_to(bq.reshape(1, H, 1, D), (1, H, H, D)).reshape(1, HHD)

    # fc weights per head with out.transpose(1,2).reshape folded in:
    # wfc_head[i, d] = W_fc[0, d*H + i].
    wfc_head = np.asarray(params["wfc"], np.float32)[0].reshape(D, H).T   # (H, D)

    # vw = v @ M folded into the projection: column j*CG+i = <v_head_j, wfc_head_i>.
    M = np.zeros((S, HCG), np.float32)
    for j in range(H):
        for i in range(H):
            M[j * D:(j + 1) * D, j * CG + i] = wfc_head[i]
    M = jnp.asarray(M)
    wvm = wv_t @ M                                   # (S, HCG)
    bvm = bv.reshape(1, S) @ M                       # (1, HCG)

    def pad_cols(a, width):
        return jnp.pad(a, ((0, 0), (0, width - a.shape[1])))

    # Fused projection weights: [Q_rep (pad to PQ) | vw (pad to PV) | K].
    w_all = jnp.concatenate(
        [pad_cols(wq_rep, PQ), pad_cols(wvm, PV), wk_t], axis=1).astype(mxu_dtype)
    b_all = jnp.concatenate(
        [pad_cols(bq_rep, PQ), pad_cols(bvm, PV), bk.reshape(1, S)], axis=1)

    # Segment-sum matrix: adds the D lanes of pair (i, j) into lane j*CG + i,
    # with the 1/sqrt(D) softmax scale folded in.
    seg = np.zeros((HHD, HCG), np.float32)
    for i in range(H):
        for j in range(H):
            base = (i * H + j) * D
            seg[base:base + D, j * CG + i] = scale

    # Fused group-sum matrix: left half -> softmax denominators (every column
    # nonzero so reciprocals stay finite), right half -> fc numerators in the
    # first H lanes only.
    sumg = np.zeros((2 * HCG, 2 * PG), np.float32)
    for c in range(PG):
        i = c % CG
        for j in range(H):
            sumg[j * CG + i, c] = 1.0
    for i in range(H):
        for j in range(H):
            sumg[HCG + j * CG + i, PG + i] = 1.0

    return {
        "w_all": w_all,                                   # (S, PQ + PV + S)
        "b_all": b_all,                                   # (1, PQ + PV + S)
        "seg": jnp.asarray(seg),                          # (HHD, HCG)
        "sumg": jnp.asarray(sumg),                        # (2*HCG, 2*PG)
        "bfc": jnp.asarray(params["bfc"], jnp.float32).reshape(1),   # SMEM scalar
    }


@functools.partial(jax.jit, static_argnames=("block_b",))
def critic_forward_pallas(x, prep, *, block_b=None):
    """x: (B, state_dim) float32.  prep: output of prepare_critic_params."""
    w_all, b_all, seg, sumg, bfc = (
        prep["w_all"], prep["b_all"], prep["seg"], prep["sumg"], prep["bfc"])

    B, S = x.shape
    HHD, HCG = seg.shape
    H = HHD // S
    D = S // H
    CG = HCG // H
    PQ = _round_up(HHD, 128)
    PV = _round_up(HCG, 128)
    PG = sumg.shape[1] // 2
    W = w_all.shape[1]
    assert W == PQ + PV + S
    use_roll = _is_pow2(H) and (HCG % 128 == 0)

    # Batch tiling: large 128-aligned tiles amortize per-step grid overhead and
    # keep weights VMEM-resident; aim for >= 2 steps so the "parallel" batch
    # axis can shard across v7x's two TensorCores.
    if block_b is None:
        target_steps = max(2, pl.cdiv(B, 1024))
        TB = _round_up(pl.cdiv(B, target_steps), 128)
    else:
        TB = _round_up(block_b, 128)
    TB = max(128, min(TB, 1024))
    Bp = _round_up(B, TB)
    if Bp != B:
        x = jnp.pad(x, ((0, Bp - B), (0, 0)))
    grid = (Bp // TB,)

    kernel = make_critic_kernel(H, D, CG, PQ, PV, PG, use_roll)

    # VMEM budget: resident (pipeline-buffered) weights + x/out tiles + slack
    # for elementwise intermediates; capped so it stays legal on v7x (64 MiB).
    weight_bytes = 4 * (w_all.size + b_all.size + seg.size + sumg.size)
    tile_bytes = 4 * TB * (S + 1) * 2
    inter_bytes = 4 * TB * (W + 2 * HHD + 4 * HCG + 4 * PG)
    vmem_limit = int(min(64 * 1024 * 1024,
                         max(32 * 1024 * 1024,
                             2 * weight_bytes + tile_bytes + inter_bytes)))

    out = pl.pallas_call(
        kernel,
        out_shape=jax.ShapeDtypeStruct((1, Bp), jnp.float32),
        grid=grid,
        in_specs=[
            pl.BlockSpec((TB, S), lambda i: (i, 0)),            # x (batch tiles)
            pl.BlockSpec((S, W), lambda i: (0, 0)),             # fused weights (resident)
            pl.BlockSpec((1, W), lambda i: (0, 0)),             # fused biases
            pl.BlockSpec((HHD, HCG), lambda i: (0, 0)),         # segment-sum (scaled)
            pl.BlockSpec((2 * HCG, 2 * PG), lambda i: (0, 0)),  # fused group-sum
            pl.BlockSpec(memory_space=pltpu.MemorySpace.SMEM),  # bfc scalar
        ],
        out_specs=pl.BlockSpec((1, TB), lambda i: (0, i)),      # lane-dense rows
        compiler_params=pltpu.CompilerParams(
            dimension_semantics=("parallel",),
            vmem_limit_bytes=vmem_limit),
    )(x, w_all, b_all, seg, sumg, bfc)

    return out[0, :B].reshape(B, 1)


def critic_forward_ref(x, params, num_heads):
    """Pure-JAX reference matching the PyTorch forward exactly."""
    B, S = x.shape
    D = S // num_heads
    q = (x @ params["wq"].T + params["bq"]).reshape(B, num_heads, D)
    k = (x @ params["wk"].T + params["bk"]).reshape(B, num_heads, D)
    v = (x @ params["wv"].T + params["bv"]).reshape(B, num_heads, D)
    scores = jnp.einsum("bid,bjd->bij", q, k) / math.sqrt(D)
    attn = jax.nn.softmax(scores, axis=-1)
    out = jnp.einsum("bij,bjd->bid", attn, v)
    out = jnp.transpose(out, (0, 2, 1)).reshape(B, S)
    return out @ params["wfc"].T + params["bfc"]


def init_params(key, state_dim):
    """Deterministic init mimicking nn.Linear's U(-1/sqrt(in), 1/sqrt(in))."""
    ks = jax.random.split(key, 8)
    bound = 1.0 / math.sqrt(state_dim)

    def u(k, shape, b):
        return jax.random.uniform(k, shape, jnp.float32, -b, b)

    return {
        "wq": u(ks[0], (state_dim, state_dim), bound),
        "bq": u(ks[1], (state_dim,), bound),
        "wk": u(ks[2], (state_dim, state_dim), bound),
        "bk": u(ks[3], (state_dim,), bound),
        "wv": u(ks[4], (state_dim, state_dim), bound),
        "bv": u(ks[5], (state_dim,), bound),
        "wfc": u(ks[6], (1, state_dim), bound),
        "bfc": u(ks[7], (1,), bound),
    }


if __name__ == "__main__":
    # Keep all f32 matmuls exact so kernel and reference agree to ~1e-6
    # (otherwise TPU einsums default to bf16 passes).
    jax.config.update("jax_default_matmul_precision", "highest")

    BATCH = 300         # not a tile multiple -> exercises padding + a 2-step grid
    NUM_HEADS = 4
    STATE_DIM = 32      # head_dim = 8

    key = jax.random.PRNGKey(0)
    k_x, k_p = jax.random.split(key)
    x = jax.random.normal(k_x, (BATCH, STATE_DIM), jnp.float32)
    params = init_params(k_p, STATE_DIM)

    # Weight folding happens once, outside the hot path.
    prep = prepare_critic_params(params, NUM_HEADS)

    out = critic_forward_pallas(x, prep)
    out = jax.block_until_ready(out)

    ref = critic_forward_ref(x, params, NUM_HEADS)
    np.testing.assert_allclose(np.asarray(out), np.asarray(ref),
                               rtol=2e-5, atol=2e-5)

    print("KERNEL_OK")
</pallas_src>

<mosaic_0001>
module attributes {stable_mosaic.version = 11 : i64} {
  func.func @critic_kernel(%arg0: i32, %arg1: memref<256x32xf32, #tpu.memory_space<vmem>>, %arg2: memref<32x288xf32, #tpu.memory_space<vmem>>, %arg3: memref<1x288xf32, #tpu.memory_space<vmem>>, %arg4: memref<128x128xf32, #tpu.memory_space<vmem>>, %arg5: memref<256x256xf32, #tpu.memory_space<vmem>>, %arg6: memref<1xf32, #tpu.memory_space<smem>>, %arg7: memref<1x256xf32, #tpu.memory_space<vmem>>) attributes {dimension_semantics = [#tpu.dimension_semantics<parallel>], iteration_bounds = array<i64: 2>, scalar_prefetch = 0 : i64, scratch_operands = 0 : i64, tpu.core_type = #tpu.core_type<tc>, window_params = [{transform_indices = @transform_0, window_bounds = array<i64: 256, 32>}, {pipeline_mode = #tpu.pipeline_mode<synchronous>, transform_indices = @transform_1, window_bounds = array<i64: 32, 288>}, {pipeline_mode = #tpu.pipeline_mode<synchronous>, transform_indices = @transform_2, window_bounds = array<i64: 1, 288>}, {pipeline_mode = #tpu.pipeline_mode<synchronous>, transform_indices = @transform_3, window_bounds = array<i64: 128, 128>}, {pipeline_mode = #tpu.pipeline_mode<synchronous>, transform_indices = @transform_4, window_bounds = array<i64: 256, 256>}, {transform_indices = @transform_5, window_bounds = array<i64: 1>}, {transform_indices = @transform_6, window_bounds = array<i64: 1, 256>}]} {
    %c0 = arith.constant 0 : index
    %c0_0 = arith.constant 0 : index
    %0 = vector.load %arg1[%c0, %c0_0] : memref<256x32xf32, #tpu.memory_space<vmem>>, vector<256x32xf32>
    %c0_1 = arith.constant 0 : index
    %c0_2 = arith.constant 0 : index
    %1 = vector.load %arg2[%c0_1, %c0_2] : memref<32x288xf32, #tpu.memory_space<vmem>>, vector<32x288xf32>
    %cst = arith.constant dense<0.000000e+00> : vector<256x288xf32>
    %2 = tpu.matmul %0, %1, %cst {dimension_numbers = #tpu.dot_dimension_numbers<[1], [0], [0], [1], [0, 0, 1, 1], [], []>, precision = #tpu.contract_precision<fp32>} : vector<256x32xf32>, vector<32x288xf32>, vector<256x288xf32> -> vector<256x288xf32>
    %c0_3 = arith.constant 0 : index
    %c0_4 = arith.constant 0 : index
    %3 = vector.load %arg3[%c0_3, %c0_4] : memref<1x288xf32, #tpu.memory_space<vmem>>, vector<1x288xf32>
    %4 = vector.broadcast %3 : vector<1x288xf32> to vector<256x288xf32>
    %5 = arith.addf %2, %4 : vector<256x288xf32>
    %6 = vector.extract_strided_slice %5 {offsets = [0, 0], sizes = [256, 128], strides = [1, 1]} : vector<256x288xf32> to vector<256x128xf32>
    %7 = vector.extract_strided_slice %5 {offsets = [0, 128], sizes = [256, 128], strides = [1, 1]} : vector<256x288xf32> to vector<256x128xf32>
    %8 = vector.extract_strided_slice %5 {offsets = [0, 256], sizes = [256, 32], strides = [1, 1]} : vector<256x288xf32> to vector<256x32xf32>
    %9 = tpu.concatenate %8, %8, %8, %8 in 1 : vector<256x32xf32>, vector<256x32xf32>, vector<256x32xf32>, vector<256x32xf32> -> vector<256x128xf32>
    %10 = arith.mulf %6, %9 : vector<256x128xf32>
    %c0_5 = arith.constant 0 : index
    %c0_6 = arith.constant 0 : index
    %11 = vector.load %arg4[%c0_5, %c0_6] : memref<128x128xf32, #tpu.memory_space<vmem>>, vector<128x128xf32>
    %cst_7 = arith.constant dense<0.000000e+00> : vector<256x128xf32>
    %12 = tpu.matmul %10, %11, %cst_7 {dimension_numbers = #tpu.dot_dimension_numbers<[1], [0], [0], [1], [0, 0, 1, 1], [], []>, precision = #tpu.contract_precision<fp32>} : vector<256x128xf32>, vector<128x128xf32>, vector<256x128xf32> -> vector<256x128xf32>
    %c32_i32 = arith.constant 32 : i32
    %13 = tpu.dynamic_rotate %12 by %c32_i32 dim 1 : vector<256x128xf32>, i32 -> vector<256x128xf32>
    %14 = arith.maximumf %12, %13 : vector<256x128xf32>
    %c64_i32 = arith.constant 64 : i32
    %15 = tpu.dynamic_rotate %14 by %c64_i32 dim 1 : vector<256x128xf32>, i32 -> vector<256x128xf32>
    %16 = arith.maximumf %14, %15 : vector<256x128xf32>
    %17 = arith.subf %12, %16 : vector<256x128xf32>
    %18 = math.exp %17 : vector<256x128xf32>
    %19 = arith.mulf %18, %7 : vector<256x128xf32>
    %20 = tpu.concatenate %18, %19 in 1 : vector<256x128xf32>, vector<256x128xf32> -> vector<256x256xf32>
    %c0_8 = arith.constant 0 : index
    %c0_9 = arith.constant 0 : index
    %21 = vector.load %arg5[%c0_8, %c0_9] : memref<256x256xf32, #tpu.memory_space<vmem>>, vector<256x256xf32>
    %cst_10 = arith.constant dense<0.000000e+00> : vector<256x256xf32>
    %22 = tpu.matmul %20, %21, %cst_10 {dimension_numbers = #tpu.dot_dimension_numbers<[1], [0], [0], [1], [0, 0, 1, 1], [], []>, precision = #tpu.contract_precision<fp32>} : vector<256x256xf32>, vector<256x256xf32>, vector<256x256xf32> -> vector<256x256xf32>
    %23 = vector.extract_strided_slice %22 {offsets = [0, 0], sizes = [256, 128], strides = [1, 1]} : vector<256x256xf32> to vector<256x128xf32>
    %24 = vector.extract_strided_slice %22 {offsets = [0, 128], sizes = [256, 128], strides = [1, 1]} : vector<256x256xf32> to vector<256x128xf32>
    %25 = tpu.reciprocal %23 {approx = true} : vector<256x128xf32> -> vector<256x128xf32>
    %26 = arith.mulf %23, %25 : vector<256x128xf32>
    %cst_11 = arith.constant 2.000000e+00 : f32
    %27 = vector.broadcast %cst_11 : f32 to vector<256x128xf32>
    %28 = arith.subf %27, %26 : vector<256x128xf32>
    %29 = arith.mulf %25, %28 : vector<256x128xf32>
    %30 = arith.mulf %24, %29 : vector<256x128xf32>
    %31 = tpu.transpose %30, [1, 0] : vector<256x128xf32> -> vector<128x256xf32>
    %cst_12 = arith.constant dense<0.000000e+00> : vector<256xf32>
    %32 = vector.multi_reduction <add>, %31, %cst_12 [0] : vector<128x256xf32> to vector<256xf32>
    %33 = vector.shape_cast %32 : vector<256xf32> to vector<1x256xf32>
    %c0_13 = arith.constant 0 : index
    %34 = memref.load %arg6[%c0_13] : memref<1xf32, #tpu.memory_space<smem>>
    %35 = vector.broadcast %34 : f32 to vector<1x256xf32>
    %36 = arith.addf %33, %35 : vector<1x256xf32>
    %c0_14 = arith.constant 0 : index
    %c0_15 = arith.constant 0 : index
    %37 = vector.load %arg7[%c0_14, %c0_15] : memref<1x256xf32, #tpu.memory_space<vmem>>, vector<1x256xf32>
    tpu.vector_store %arg7[%c0_14, %c0_15], %36 {strides = array<i32>} : memref<1x256xf32, #tpu.memory_space<vmem>>, vector<1x256xf32>,
    return
  }
  func.func @transform_0(%arg0: i32) -> (i32, i32) {
    %c0_i32 = arith.constant 0 : i32
    %c0_i32_0 = arith.constant 0 : i32
    return %arg0, %c0_i32 : i32, i32
  }
  func.func @transform_1(%arg0: i32) -> (i32, i32) {
    %c0_i32 = arith.constant 0 : i32
    %c0_i32_0 = arith.constant 0 : i32
    %c0_i32_1 = arith.constant 0 : i32
    return %c0_i32, %c0_i32_0 : i32, i32
  }
  func.func @transform_2(%arg0: i32) -> (i32, i32) {
    %c0_i32 = arith.constant 0 : i32
    %c0_i32_0 = arith.constant 0 : i32
    %c0_i32_1 = arith.constant 0 : i32
    return %c0_i32, %c0_i32_0 : i32, i32
  }
  func.func @transform_3(%arg0: i32) -> (i32, i32) {
    %c0_i32 = arith.constant 0 : i32
    %c0_i32_0 = arith.constant 0 : i32
    %c0_i32_1 = arith.constant 0 : i32
    return %c0_i32, %c0_i32_0 : i32, i32
  }
  func.func @transform_4(%arg0: i32) -> (i32, i32) {
    %c0_i32 = arith.constant 0 : i32
    %c0_i32_0 = arith.constant 0 : i32
    %c0_i32_1 = arith.constant 0 : i32
    return %c0_i32, %c0_i32_0 : i32, i32
  }
  func.func @transform_5(%arg0: i32) -> i32 {
    %c0_i32 = arith.constant 0 : i32
    %c0_i32_0 = arith.constant 0 : i32
    return %c0_i32 : i32
  }
  func.func @transform_6(%arg0: i32) -> (i32, i32) {
    %c0_i32 = arith.constant 0 : i32
    %c0_i32_0 = arith.constant 0 : i32
    return %c0_i32, %arg0 : i32, i32
  }
}

</mosaic_0001>

<bundles_post_ra>
// kernel: critic_forward_pallas.1
= control target key start
LH: loop header
LB: loop body
LE: loop exit
PB: predicated region body
PF: predicated region fallthrough
CT: control target
= control target key end

     0   :  { %s13915_s23 = smov 0   ;;  %s19223_s0 = inlined_call_operand.vmem [shape: f32[512,32], index: 0, kind: input, shape index: {}]   ;;  %s19224_s1 = inlined_call_operand.vmem [shape: f32[32,288], index: 1, kind: input, shape index: {}]   ;;  %s19225_s2 = inlined_call_operand.vmem [shape: f32[1,288], index: 2, kind: input, shape index: {}]   ;;  %s19226_s3 = inlined_call_operand.vmem [shape: f32[128,128], index: 3, kind: input, shape index: {}]   ;;  %s19227_s4 = inlined_call_operand.vmem [shape: f32[256,256], index: 4, kind: input, shape index: {}]   ;;  %s19228_s5 = inlined_call_operand.<no memory space> [shape: f32[1], index: 5, kind: input, shape index: {}]   ;;  %s19229_s6 = inlined_call_operand.vmem [shape: f32[1,512], index: 6, kind: output, shape index: {}]  }
   0x1   :  { %11 = sst [smem:[#allocation2]] %s19228_s5 }
   0x2 LB: > { %s10665_s24 = sadd.s32 4294967295, %s13870_s23   ;;  %p10669_p0 = scmp.ge.s32.totalorder %s13870_s23, 1  ;;  %s13870_s23 = sphi %s13915_s23, %s17_s23  }
   0x3   : > { %p214_p1 = scmp.lt.s32.totalorder %s13870_s23, 3 }
   0x5   : > { %p215_p2 = pnand %p10669_p0, %p214_p1 }
   0x7   : > { %218 = sbr.rel (%p215_p2) target bundleno = 3156 (0xc54), region = 44 }
   0xe   : > { %v287_v0 = vld [vmem:[%s19224_s1 + $0x8] sm:$0xff]  ;;  %v290_v1 = vld [vmem:[%s19224_s1 + $0x20] sm:$0xff]  ;;  %s10670_s30 = sshll.u32 %s10665_s24, 5  ;;  %v289_v5 = vld [vmem:[%s19224_s1 + $0x18] sm:$0xff]  ;;  %v19241_v9 = vmov 0.0   ;;  %vm315_vm0 = vcmask 261120  }
   0xf   : > { %v286_v2 = vld [vmem:[%s19224_s1] sm:$0xff]  ;;  %v412_v3 = vand.u32 4294901760, %v287_v0  ;;  %v416_v4 = vand.u32 4294901760, %v290_v1  ;;  %v13940_v7 = vld [vmem:[%s19224_s1 + $0x38] sm:$0xff]  ;;  %v13945_v8 = vld [vmem:[%s19224_s1 + $0x50] sm:$0xff]  ;;  %484 = vmatprep.mubr.f32.mxu1 %v19241_v9  ;;  %1575 = vmatprep.mubr.f32.mxu0 %v19241_v9  ;;  %v418_v10 = vand.u32 4294901760, %v289_v5 }
  0x10   : > { %v414_v6 = vand.u32 4294901760, %v286_v2  ;;  %v420_v11 = vand.u32 4294901760, %v13940_v7  ;;  %v424_v12 = vand.u32 4294901760, %v13945_v8  ;;  %v13954_v13 = vld [vmem:[%s19224_s1 + $0x30] sm:$0xff]  ;;  %v13959_v14 = vld [vmem:[%s19224_s1 + $0x48] sm:$0xff]  ;;  %p244_p3 = scmp.lt.s32.totalorder %s10670_s30, 63 }
  0x11   : > { %v13961_v15 = vpack.c.bf16 %v416_v4, %v412_v3  ;;  %v13963_v16 = vsub.f32 %v287_v0, %v412_v3  ;;  %v13965_v17 = vsub.f32 %v290_v1, %v416_v4  ;;  %v13971_v20 = vsub.f32 %v289_v5, %v418_v10  ;;  %s13873_s13 = smov 64   ;;  %s13874_s14 = smov 32  }
  0x12   : > { %v13967_v18 = vsub.f32 %v286_v2, %v414_v6  ;;  %v13969_v19 = vpack.c.bf16 %v418_v10, %v414_v6  ;;  %v13977_v21 = vpack.c.bf16 %v424_v12, %v420_v11  ;;  %s21569_s30 = smov (!%p244_p3, %s10670_s30), 63  ;;  %v422_v22 = vand.u32 4294901760, %v13954_v13  ;;  %s13875_s19 = smov 96  }
  0x13   : > { %11996 = vmatprep.subr.bf16.mxu1 %v13961_v15  ;;  %12020 = vmatprep.subr.bf16.mxu0 %v13961_v15  ;;  %v426_v23 = vand.u32 4294901760, %v13959_v14  ;;  %v19237_v24 = vand.u32 4294901760, %v13963_v16  ;;  %v19236_v25 = vand.u32 4294901760, %v13965_v17  ;;  %s10671_s17 = sshll.u32 %s21569_s30, 3  ;;  %v19233_v27 = vand.u32 4294901760, %v13971_v20  ;;  %s10672_s21 = sshll.u32 %s10665_s24, 1 }
  0x14   : > { %11998 = vmatpush1.bf16.msra.mxu1 %v13969_v19  ;;  %12022 = vmatpush1.bf16.msra.mxu0 %v13969_v19  ;;  %v19235_v26 = vand.u32 4294901760, %v13967_v18  ;;  %s14000_s20 = scalar_lea.vmem %s19223_s0, %s10671_s17  ;;  %v14077_v6 = vsub.f32 %v13940_v7, %v420_v11  ;;  %v14096_v11 = vsub.f32 %v13945_v8, %v424_v12  ;;  %vm4644_vm1 = vcmask 523264   ;;  %p250_p4 = scmp.lt.s32.totalorder %s10672_s21, 3 }
  0x15   : > { %12000 = vmatprep.subr.bf16.mxu1 %v13977_v21  ;;  %v13994_v28 = vpack.c.bf16 %v426_v23, %v422_v22  ;;  %12024 = vmatprep.subr.bf16.mxu0 %v13977_v21  ;;  %v840_v29 = vsub.f32 %v13963_v16, %v19237_v24  ;;  %v852_v30 = vsub.f32 %v13965_v17, %v19236_v25  ;;  %v254_v31 = vld [vmem:[%s14000_s20] sm:$0xff]  ;;  %v255_v33 = vld [vmem:[%s14000_s20 + $0x8] sm:$0xff]  ;;  %v256_v34 = vld [vmem:[%s14000_s20 + $0x10] sm:$0xff]  ;;  %vm4677_vm2 = vcmask 785408  }
  0x16   : > { %v846_v32 = vsub.f32 %v13967_v18, %v19235_v26  ;;  %v317_v35 = vsel %vm315_vm0, %v254_v31, 0  ;;  %v858_v36 = vsub.f32 %v13971_v20, %v19233_v27  ;;  %v320_v37 = vsel %vm315_vm0, %v255_v33, 0  ;;  %v257_v39 = vld [vmem:[%s14000_s20 + $0x18] sm:$0xff]  ;;  %v258_v40 = vld [vmem:[%s14000_s20 + $0x20] sm:$0xff]  ;;  %v259_v55 = vld [vmem:[%s14000_s20 + $0x28] sm:$0xff]  ;;  %s21571_s21 = smov (!%p250_p4, %s10672_s21), 3 }
  0x17   : > { %v323_v38 = vsel %vm315_vm0, %v256_v34, 0  ;;  %v841_v41 = vand.u32 4294901760, %v840_v29  ;;  %v853_v42 = vand.u32 4294901760, %v852_v30  ;;  %v14024_v43 = vand.u32 4294901760, %v317_v35  ;;  %v260_v63 = vld [vmem:[%s14000_s20 + $0x30] sm:$0xff]  ;;  %v261_v31 = vld [vmem:[%s14000_s20 + $0x38] sm:$0xff]  ;;  %s252_s26 = scalar_lea.vmem %s19229_s6, %s21571_s21 }
  0x18   : > { %12002 = vmatpush1.bf16.msra.mxu1 %v13994_v28  ;;  %12026 = vmatpush1.bf16.msra.mxu0 %v13994_v28  ;;  %v14026_v44 = vand.u32 4294901760, %v320_v37  ;;  %v14028_v45 = vand.u32 4294901760, %v323_v38  ;;  %v326_v46 = vsel %vm315_vm0, %v257_v39, 0  ;;  %v329_v50 = vsel %vm315_vm0, %v258_v40, 0 }
  0x19   : > { %v12003_v47 = vpack.c.bf16 %v853_v42, %v841_v41  ;;  %v14032_v48 = vsub.f32 %v317_v35, %v14024_v43  ;;  %v14034_v49 = vand.u32 4294901760, %v326_v46  ;;  %v847_v51 = vand.u32 4294901760, %v846_v32 }
  0x1a   : > { %v859_v52 = vand.u32 4294901760, %v858_v36  ;;  %v14038_v53 = vsub.f32 %v320_v37, %v14026_v44  ;;  %v14041_v54 = vsub.f32 %v323_v38, %v14028_v45  ;;  %v14050_v58 = vand.u32 4294901760, %v329_v50  ;;  %v262_v37 = vld [vmem:[%s14000_s20 + $0x40] sm:$0xff] }
  0x1b   : > { %12004 = vmatprep.subr.bf16.mxu1 %v12003_v47  ;;  %v14045_v56 = vand.u32 4294901760, %v14032_v48  ;;  %v14059_v61 = vsub.f32 %v326_v46, %v14034_v49  ;;  %v332_v62 = vsel %vm315_vm0, %v259_v55, 0  ;;  %v335_v5 = vsel %vm315_vm0, %v260_v63, 0 }
  0x1c   : > { %v14048_v57 = vand.u32 4294901760, %v14038_v53  ;;  %v14056_v60 = vand.u32 4294901760, %v14041_v54  ;;  %v12005_v0 = vpack.c.bf16 %v859_v52, %v847_v51  ;;  %v14069_v3 = vsub.f32 %v329_v50, %v14050_v58  ;;  %v263_v51 = vld [vmem:[%s14000_s20 + $0x48] sm:$0xff] }
  0x1d   : > { %20112 = vst [vmem:[#allocation3_spill] sm:$0xff] %v14045_v56  ;;  %v488_v59 = vsub.f32 %v14032_v48, %v14045_v56  ;;  %1579 = vmatmul.mubr.f32.vlgmr.msra.gmra.mrb[0].mxu0 %v14045_v56  ;;  %v14071_v4 = vand.u32 4294901760, %v332_v62  ;;  %v14086_v30 = vand.u32 4294901760, %v14059_v61  ;;  %v14091_v7 = vand.u32 4294901760, %v335_v5 }
  0x1e   : > { %20113 = vst [vmem:[#allocation4_spill] sm:$0xff] %v14048_v57  ;;  %20114 = vst [vmem:[#allocation5_spill] sm:$0xff] %v14056_v60  ;;  %v499_v1 = vsub.f32 %v14038_v53, %v14048_v57  ;;  %1584 = vmatprep.mubr.f32.mxu0 %v19241_v9  ;;  %v510_v29 = vsub.f32 %v14041_v54, %v14056_v60  ;;  %v14099_v32 = vand.u32 4294901760, %v14069_v3  ;;  %v338_v36 = vsel %vm315_vm0, %v261_v31, 0 }
  0x1f   : > { %v14066_v2 = vand.u32 4294901760, %v488_v59  ;;  %20117 = vst [vmem:[#allocation8_spill] sm:$0xff] %v14086_v30  ;;  %v14102_v33 = vsub.f32 %v332_v62, %v14071_v4  ;;  %v521_v35 = vsub.f32 %v14059_v61, %v14086_v30  ;;  %v19232_v8 = vand.u32 4294901760, %v14077_v6 }
  0x20   : > { %v14080_v10 = vand.u32 4294901760, %v499_v1  ;;  %20118 = vst [vmem:[#allocation9_spill] sm:$0xff] %v14099_v32  ;;  %v14105_v34 = vand.u32 4294901760, %v510_v29  ;;  %v14115_v12 = vsub.f32 %v335_v5, %v14091_v7  ;;  %v532_v38 = vsub.f32 %v14069_v3, %v14099_v32 }
  0x21   : > { %20115 = vst [vmem:[#allocation6_spill] sm:$0xff] %v14066_v2  ;;  %490 = vmatmul.mubr.f32.vlgmr.msra.gmra.mrb[0].mxu1 %v14066_v2  ;;  %1588 = vmatmul.mubr.f32.gmra.mrb[2].mxu0 %v14048_v57  ;;  %v14121_v39 = vand.u32 4294901760, %v14102_v33  ;;  %v14123_v40 = vand.u32 4294901760, %v338_v36  ;;  %v14126_v41 = vand.u32 4294901760, %v521_v35  ;;  %v864_v42 = vsub.f32 %v14077_v6, %v19232_v8 }
  0x22   : > { %20116 = vst [vmem:[#allocation7_spill] sm:$0xff] %v14080_v10  ;;  %12006 = vmatpush1.bf16.msra.mxu1 %v12005_v0  ;;  %495 = vmatprep.mubr.f32.mxu1 %v19241_v9  ;;  %20119 = vst [vmem:[#allocation10_spill] sm:$0xff] %v14105_v34  ;;  %v19230_v46 = vand.u32 4294901760, %v14096_v11  ;;  %v14136_v47 = vsub.f32 %v13954_v13, %v422_v22  ;;  %v341_v50 = vsel %vm315_vm0, %v262_v37, 0  ;;  %v14143_v52 = vand.u32 4294901760, %v14115_v12 }
  0x23   : > { %1593 = vmatprep.mubr.f32.mxu0 %v19241_v9  ;;  %20120 = vst [vmem:[#allocation11_spill] sm:$0xff] %v14121_v39  ;;  %20121 = vst [vmem:[#allocation12_spill] sm:$0xff] %v14126_v41  ;;  %v14148_v55 = vsub.f32 %v13959_v14, %v426_v23  ;;  %v14150_v59 = vand.u32 4294901760, %v532_v38  ;;  %v543_v13 = vsub.f32 %v14102_v33, %v14121_v39  ;;  %v14159_v62 = vand.u32 4294901760, %v341_v50  ;;  %v264_v23 = vld [vmem:[%s14000_s20 + $0x50] sm:$0xff] }
  0x24   : > { %20122 = vst [vmem:[#allocation13_spill] sm:$0xff] %v14143_v52  ;;  %v14155_v22 = vsub.f32 %v338_v36, %v14123_v40  ;;  %v344_v63 = vsel %vm315_vm0, %v263_v51, 0  ;;  %v865_v0 = vand.u32 4294901760, %v864_v42  ;;  %v876_v14 = vsub.f32 %v14096_v11, %v19230_v46 }
  0x25   : > { %501 = vmatmul.mubr.f32.gmra.mrb[2].mxu1 %v14080_v10  ;;  %1597 = vmatmul.mubr.f32.gmra.mrb[4].mxu0 %v14056_v60  ;;  %20123 = vst [vmem:[#allocation14_spill] sm:$0xff] %v14150_v59  ;;  %v19231_v1 = vand.u32 4294901760, %v14136_v47  ;;  %v554_v5 = vsub.f32 %v14115_v12, %v14143_v52  ;;  %v14174_v35 = vand.u32 4294901760, %v344_v63  ;;  %v19234_v37 = vand.u32 4294901760, %v14148_v55 }
  0x26   : > { %506 = vmatprep.mubr.f32.mxu1 %v19241_v9  ;;  %1602 = vmatprep.mubr.f32.mxu0 %v19241_v9  ;;  %v877_v29 = vand.u32 4294901760, %v876_v14  ;;  %v14172_v31 = vand.u32 4294901760, %v14155_v22  ;;  %v14181_v38 = vand.u32 4294901760, %v543_v13  ;;  %v14185_v42 = vsub.f32 %v341_v50, %v14159_v62  ;;  %v265_v14 = vld [vmem:[%s14000_s20 + $0x58] sm:$0xff] }
  0x27   : > { %v870_v36 = vsub.f32 %v14136_v47, %v19231_v1  ;;  %v347_v51 = vsel %vm315_vm0, %v264_v23, 0  ;;  %v882_v13 = vsub.f32 %v14148_v55, %v19234_v37  ;;  %v350_v50 = vsel %vm315_vm0, %v265_v14, 0 }
  0x28   : > { %20124 = vst [vmem:[#allocation15_spill] sm:$0xff] %v14172_v31  ;;  %20125 = vst [vmem:[#allocation16_spill] sm:$0xff] %v14181_v38  ;;  %v12007_v46 = vpack.c.bf16 %v877_v29, %v865_v0  ;;  %v14194_v8 = vand.u32 4294901760, %v347_v51  ;;  %v14198_v23 = vand.u32 4294901760, %v554_v5  ;;  %v565_v0 = vsub.f32 %v14155_v22, %v14172_v31 }
  0x29   : > { %512 = vmatmul.mubr.f32.gmra.mrb[4].mxu1 %v14105_v34  ;;  %1606 = vmatmul.mubr.f32.gmra.mrb[6].mxu0 %v14086_v30  ;;  %v871_v1 = vand.u32 4294901760, %v870_v36  ;;  %v883_v27 = vand.u32 4294901760, %v882_v13  ;;  %v14204_v29 = vand.u32 4294901760, %v14185_v42  ;;  %v266_v36 = vld [vmem:[%s14000_s20 + $0x60] sm:$0xff]  ;;  %v14215_v13 = vand.u32 4294901760, %v350_v50 }
  0x2a   : > { %517 = vmatprep.mubr.f32.mxu1 %v19241_v9  ;;  %1611 = vmatprep.mubr.f32.mxu0 %v19241_v9  ;;  %20126 = vst [vmem:[#allocation17_spill] sm:$0xff] %v14194_v8  ;;  %20127 = vst [vmem:[#allocation18_spill] sm:$0xff] %v14198_v23  ;;  %v14213_v5 = vsub.f32 %v347_v51, %v14194_v8  ;;  %v14218_v37 = vand.u32 4294901760, %v565_v0  ;;  %v20144_v57 = vand.u32 4294901760, %v13963_v16  ;;  %v20145_v56 = vand.u32 4294901760, %v13965_v17 }
  0x2b   : > { %12008 = vmatprep.subr.bf16.mxu1 %v12007_v46  ;;  %20128 = vst [vmem:[#allocation19_spill] sm:$0xff] %v14204_v29  ;;  %v14207_v46 = vsub.f32 %v344_v63, %v14174_v35  ;;  %v12009_v14 = vpack.c.bf16 %v883_v27, %v871_v1  ;;  %20131 = vst [vmem:[#allocation22_spill] sm:$0xff] %v14215_v13  ;;  %v576_v63 = vsub.f32 %v14185_v42, %v14204_v29  ;;  %v267_v1 = vld [vmem:[%s14000_s20 + $0x68] sm:$0xff] }
  0x2c   : > { %20130 = vst [vmem:[#allocation21_spill] sm:$0xff] %v14213_v5  ;;  %20132 = vst [vmem:[#allocation23_spill] sm:$0xff] %v14218_v37  ;;  %v353_v27 = vsel %vm315_vm0, %v266_v36, 0  ;;  %v356_v0 = vsel %vm315_vm0, %v267_v1, 0  ;;  %v14240_v36 = vand.u32 4294901760, %v14213_v5  ;;  %v14243_v24 = vsub.f32 %v350_v50, %v14215_v13  ;;  %v268_v1 = vld [vmem:[%s14000_s20 + $0x70] sm:$0xff] }
  0x2d   : > { %523 = vmatmul.mubr.f32.gmra.mrb[6].mxu1 %v14126_v41  ;;  %1615 = vmatmul.mubr.f32.gmra.mrb[8].mxu0 %v14099_v32  ;;  %20129 = vst [vmem:[#allocation20_spill] sm:$0xff] %v14207_v46  ;;  %v14224_v26 = vand.u32 4294901760, %v14207_v46  ;;  %v14230_v51 = vand.u32 4294901760, %v353_v27 }
  0x2e   : > { %528 = vmatprep.mubr.f32.mxu1 %v19241_v9  ;;  %1620 = vmatprep.mubr.f32.mxu0 %v19241_v9  ;;  %20135 = vst [vmem:[#allocation26_spill] sm:$0xff] %v14240_v36  ;;  %20136 = vst [vmem:[#allocation27_spill] sm:$0xff] %v14243_v24  ;;  %v598_v50 = vsub.f32 %v14213_v5, %v14240_v36 }
  0x2f   : > { %12010 = vmatpush1.bf16.msra.mxu1 %v12009_v14  ;;  %20133 = vst [vmem:[#allocation24_spill] sm:$0xff] %v14224_v26  ;;  %v14234_v14 = vand.u32 4294901760, %v576_v63  ;;  %v587_v25 = vsub.f32 %v14207_v46, %v14224_v26  ;;  %v14249_v63 = vsub.f32 %v353_v27, %v14230_v51  ;;  %v20140_v27 = vmov 0.0  }
  0x30   : > { %v14276_v60 = vand.u32 4294901760, %v598_v50  ;;  %v20148_v50 = vand.u32 4294901760, %v14077_v6 }
  0x31   : > { %534 = vmatmul.mubr.f32.gmra.mrb[8].mxu1 %v14150_v59  ;;  %1624 = vmatmul.mubr.f32.gmra.mrb[10].mxu0 %v14121_v39  ;;  %20134 = vst [vmem:[#allocation25_spill] sm:$0xff] %v14234_v14  ;;  %20137 = vst [vmem:[#allocation28_spill] sm:$0xff] %v14249_v63  ;;  %v269_v39 = vld [vmem:[%s14000_s20 + $0x78] sm:$0xff]  ;;  %v14267_v32 = vand.u32 4294901760, %v14249_v63 }
  0x32   : > { %539 = vmatprep.mubr.f32.mxu1 %v19241_v9  ;;  %1629 = vmatprep.mubr.f32.mxu0 %v19241_v9  ;;  %v362_v30 = vsel %vm315_vm0, %v269_v39, 0  ;;  %20143 = vst [vmem:[#allocation33_spill] sm:$0xff] %v14276_v60  ;;  %v270_v39 = vld [vmem:[%s14000_s20 + $0x80] sm:$0xff] }
  0x33   : > { %20141 = vst [vmem:[#allocation31_spill] sm:$0xff] %v14267_v32 }
  0x35   : > { %545 = vmatmul.mubr.f32.gmra.mrb[10].mxu1 %v14181_v38  ;;  %1633 = vmatmul.mubr.f32.gmra.mrb[12].mxu0 %v14143_v52  ;;  %v14260_v52 = vand.u32 4294901760, %v14243_v24  ;;  %v20154_v38 = vand.u32 4294901760, %v14148_v55 }
  0x36   : > { %550 = vmatprep.mubr.f32.mxu1 %v19241_v9  ;;  %1638 = vmatprep.mubr.f32.mxu0 %v19241_v9 }
  0x37   : > { %20139 = vst [vmem:[#allocation30_spill] sm:$0xff] %v14260_v52 }
  0x39   : > { %556 = vmatmul.mubr.f32.gmra.mrb[12].mxu1 %v14198_v23  ;;  %1642 = vmatmul.mubr.f32.gmra.mrb[14].mxu0 %v14172_v31  ;;  %v14251_v31 = vand.u32 4294901760, %v356_v0 }
  0x3a   : > { %561 = vmatprep.mubr.f32.mxu1 %v19241_v9  ;;  %1647 = vmatprep.mubr.f32.mxu0 %v19241_v9 }
  0x3d   : > { %567 = vmatmul.mubr.f32.gmra.mrb[14].mxu1 %v14218_v37  ;;  %1651 = vmatmul.mubr.f32.gmra.mrb[16].mxu0 %v14204_v29  ;;  %v14254_v29 = vand.u32 4294901760, %v587_v25  ;;  %v14270_v25 = vsub.f32 %v356_v0, %v14251_v31  ;;  %v20146_v0 = vand.u32 4294901760, %v13967_v18  ;;  %v20147_v37 = vand.u32 4294901760, %v13971_v20 }
  0x3e   : > { %572 = vmatprep.mubr.f32.mxu1 %v19241_v9  ;;  %1656 = vmatprep.mubr.f32.mxu0 %v19241_v9  ;;  %v359_v9 = vsel %vm315_vm0, %v268_v1, 0  ;;  %v609_v1 = vsub.f32 %v14243_v24, %v14260_v52 }
  0x3f   : > { %20138 = vst [vmem:[#allocation29_spill] sm:$0xff] %v14254_v29  ;;  %20142 = vst [vmem:[#allocation32_spill] sm:$0xff] %v14270_v25  ;;  %v12029_v23 = vpack.c.bf16 %v20147_v37, %v20146_v0  ;;  %v14304_v0 = vand.u32 4294901760, %v362_v30 }
  0x41   : > { %578 = vmatmul.mubr.f32.gmra.mrb[16].mxu1 %v14234_v14  ;;  %1660 = vmatmul.mubr.f32.gmra.mrb[18].mxu0 %v14224_v26  ;;  %v14272_v26 = vand.u32 4294901760, %v359_v9  ;;  %v12027_v14 = vpack.c.bf16 %v20145_v56, %v20144_v57  ;;  %v620_v56 = vsub.f32 %v14249_v63, %v14267_v32  ;;  %v14299_v57 = vand.u32 4294901760, %v14270_v25  ;;  %v282_v63 = vld [vmem:[%s14000_s20 + $0xe0] sm:$0xff] }
  0x42   : > { %583 = vmatprep.mubr.f32.mxu1 %v20140_v27  ;;  %1665 = vmatprep.mubr.f32.mxu0 %v20140_v27 }
  0x43   : > { %12028 = vmatprep.subr.bf16.mxu0 %v12027_v14  ;;  %20150 = vst [vmem:[#allocation34_spill] sm:$0xff] %v14299_v57  ;;  %v14302_v37 = vsub.f32 %v359_v9, %v14272_v26  ;;  %v14307_v14 = vand.u32 4294901760, %v609_v1  ;;  %v271_v1 = vld [vmem:[%s14000_s20 + $0x88] sm:$0xff] }
  0x44   : > { %12030 = vmatpush1.bf16.msra.mxu0 %v12029_v23  ;;  %v365_v23 = vsel %vm315_vm0, %v270_v39, 0 }
  0x45   : > { %589 = vmatmul.mubr.f32.gmra.mrb[18].mxu1 %v14254_v29  ;;  %1669 = vmatmul.mubr.f32.gmra.mrb[20].mxu0 %v14240_v36  ;;  %v20149_v36 = vand.u32 4294901760, %v14096_v11  ;;  %20151 = vst [vmem:[#allocation35_spill] sm:$0xff] %v14302_v37  ;;  %20152 = vst [vmem:[#allocation36_spill] sm:$0xff] %v14307_v14  ;;  %v14334_v39 = vand.u32 4294901760, %v365_v23 }
  0x46   : > { %594 = vmatprep.mubr.f32.mxu1 %v20140_v27  ;;  %1674 = vmatprep.mubr.f32.mxu0 %v20140_v27 }
  0x47   : > { %v12031_v29 = vpack.c.bf16 %v20149_v36, %v20148_v50  ;;  %v12011_v36 = vpack.c.bf16 %v13965_v17, %v13963_v16  ;;  %v20153_v50 = vand.u32 4294901760, %v14136_v47  ;;  %v14323_v16 = vsub.f32 %v362_v30, %v14304_v0 }
  0x48   : > { %v14326_v17 = vand.u32 4294901760, %v620_v56  ;;  %v368_v30 = vsel %vm315_vm0, %v271_v1, 0  ;;  %v14351_v9 = vsub.f32 %v365_v23, %v14334_v39 }
  0x49   : > { %600 = vmatmul.mubr.f32.gmra.mrb[20].mxu1 %v14276_v60  ;;  %1678 = vmatmul.mubr.f32.gmra.mrb[22].mxu0 %v14260_v52  ;;  %v12033_v59 = vpack.c.bf16 %v20154_v38, %v20153_v50  ;;  %20155 = vst [vmem:[#allocation37_spill] sm:$0xff] %v14323_v16  ;;  %v631_v38 = vsub.f32 %v14270_v25, %v14299_v57  ;;  %v14332_v50 = vand.u32 4294901760, %v14302_v37  ;;  %v14353_v1 = vand.u32 4294901760, %v368_v30 }
  0x4a   : > { %605 = vmatprep.mubr.f32.mxu1 %v20140_v27  ;;  %1683 = vmatprep.mubr.f32.mxu0 %v20140_v27  ;;  %20156 = vst [vmem:[#allocation38_spill] sm:$0xff] %v14326_v17  ;;  %20160 = vst [vmem:[#allocation42_spill] sm:$0xff] %v14351_v9  ;;  %v14366_v23 = vand.u32 4294901760, %v14351_v9 }
  0x4b   : > { %12032 = vmatprep.subr.bf16.mxu0 %v12031_v29  ;;  %12012 = vmatprep.subr.bf16.mxu1 %v12011_v36  ;;  %20157 = vst [vmem:[#allocation39_spill] sm:$0xff] %v14332_v50  ;;  %v14342_v29 = vand.u32 4294901760, %v14323_v16  ;;  %v14345_v56 = vand.u32 4294901760, %v631_v38  ;;  %v642_v36 = vsub.f32 %v14302_v37, %v14332_v50  ;;  %v14369_v52 = vsub.f32 %v368_v30, %v14353_v1 }
  0x4c   : > { %12034 = vmatpush1.bf16.msra.mxu0 %v12033_v59  ;;  %v272_v59 = vld [vmem:[%s14000_s20 + $0x90] sm:$0xff]  ;;  %20162 = vst [vmem:[#allocation44_spill] sm:$0xff] %v14366_v23  ;;  %v664_v30 = vsub.f32 %v14351_v9, %v14366_v23 }
  0x4d   : > { %611 = vmatmul.mubr.f32.gmra.mrb[22].mxu1 %v14307_v14  ;;  %1687 = vmatmul.mubr.f32.gmra.mrb[24].mxu0 %v14267_v32  ;;  %20158 = vst [vmem:[#allocation40_spill] sm:$0xff] %v14342_v29  ;;  %20159 = vst [vmem:[#allocation41_spill] sm:$0xff] %v14345_v56  ;;  %v273_v32 = vld [vmem:[%s14000_s20 + $0x98] sm:$0xff]  ;;  %v653_v38 = vsub.f32 %v14323_v16, %v14342_v29  ;;  %v14385_v14 = vand.u32 4294901760, %v14369_v52 }
  0x4e   : > { %616 = vmatprep.mubr.f32.mxu1 %v20140_v27  ;;  %1692 = vmatprep.mubr.f32.mxu0 %v20140_v27  ;;  %20163 = vst [vmem:[#allocation45_spill] sm:$0xff] %v14369_v52 }
  0x4f   : > { %12036 = vmatprep.subr.bf16.mxu0 %v13961_v15  ;;  %v371_v15 = vsel %vm315_vm0, %v272_v59, 0  ;;  %v274_v59 = vld [vmem:[%s14000_s20 + $0xa0] sm:$0xff]  ;;  %20165 = vst [vmem:[#allocation47_spill] sm:$0xff] %v14385_v14 }
  0x51   : > { %622 = vmatmul.mubr.f32.gmra.mrb[24].mxu1 %v14326_v17  ;;  %1696 = vmatmul.mubr.f32.gmra.mrb[26].mxu0 %v14299_v57  ;;  %v14362_v57 = vand.u32 4294901760, %v642_v36  ;;  %v14371_v17 = vand.u32 4294901760, %v371_v15  ;;  %v14377_v36 = vand.u32 4294901760, %v653_v38 }
  0x52   : > { %627 = vmatprep.mubr.f32.mxu1 %v20140_v27  ;;  %1701 = vmatprep.mubr.f32.mxu0 %v20140_v27 }
  0x53   : > { %20161 = vst [vmem:[#allocation43_spill] sm:$0xff] %v14362_v57  ;;  %20164 = vst [vmem:[#allocation46_spill] sm:$0xff] %v14377_v36  ;;  %v14388_v60 = vsub.f32 %v371_v15, %v14371_v17  ;;  %v675_v15 = vsub.f32 %v14369_v52, %v14385_v14 }
  0x55   : > { %633 = vmatmul.mubr.f32.gmra.mrb[26].mxu1 %v14345_v56  ;;  %1705 = vmatmul.mubr.f32.gmra.mrb[28].mxu0 %v14332_v50  ;;  %v374_v56 = vsel %vm315_vm0, %v273_v32, 0  ;;  %v377_v50 = vsel %vm315_vm0, %v274_v59, 0  ;;  %20166 = vst [vmem:[#allocation48_spill] sm:$0xff] %v14388_v60  ;;  %v275_v32 = vld [vmem:[%s14000_s20 + $0xa8] sm:$0xff] }
  0x56   : > { %638 = vmatprep.mubr.f32.mxu1 %v20140_v27  ;;  %1710 = vmatprep.mubr.f32.mxu0 %v20140_v27  ;;  %v14390_v41 = vand.u32 4294901760, %v374_v56  ;;  %v14395_v38 = vand.u32 4294901760, %v377_v50  ;;  %v380_v59 = vsel %vm315_vm0, %v275_v32, 0  ;;  %v276_v32 = vld [vmem:[%s14000_s20 + $0xb0] sm:$0xff] }
  0x58   : > { %v14408_v34 = vsub.f32 %v374_v56, %v14390_v41 }
  0x59   : > { %644 = vmatmul.mubr.f32.gmra.mrb[28].mxu1 %v14362_v57  ;;  %1714 = vmatmul.mubr.f32.gmra.mrb[30].mxu0 %v14342_v29  ;;  %v14399_v29 = vand.u32 4294901760, %v664_v30  ;;  %v14405_v57 = vand.u32 4294901760, %v14388_v60  ;;  %v14414_v30 = vsub.f32 %v377_v50, %v14395_v38  ;;  %v383_v50 = vsel %vm315_vm0, %v276_v32, 0  ;;  %v278_v32 = vld [vmem:[%s14000_s20 + $0xc0] sm:$0xff] }
  0x5a   : > { %649 = vmatprep.mubr.f32.mxu1 %v20140_v27  ;;  %1719 = vmatprep.mubr.f32.mxu0 %v20140_v27  ;;  %20169 = vst [vmem:[#allocation51_spill] sm:$0xff] %v14408_v34  ;;  %v14425_v10 = vand.u32 4294901760, %v14408_v34  ;;  %v14445_v52 = vand.u32 4294901760, %v383_v50 }
  0x5b   : > { %20167 = vst [vmem:[#allocation49_spill] sm:$0xff] %v14399_v29  ;;  %20168 = vst [vmem:[#allocation50_spill] sm:$0xff] %v14405_v57  ;;  %v686_v56 = vsub.f32 %v14388_v60, %v14405_v57  ;;  %v14443_v2 = vand.u32 4294901760, %v14414_v30 }
  0x5c   : > { %20170 = vst [vmem:[#allocation52_spill] sm:$0xff] %v14414_v30  ;;  %20172 = vst [vmem:[#allocation54_spill] sm:$0xff] %v14425_v10  ;;  %v697_v60 = vsub.f32 %v14408_v34, %v14425_v10  ;;  %v14462_v9 = vsub.f32 %v383_v50, %v14445_v52 }
  0x5d   : > { %655 = vmatmul.mubr.f32.gmra.mrb[30].mxu1 %v14377_v36  ;;  %1723 = vmatmul.mubr.f32.gmra.mrb[32].mxu0 %v14366_v23  ;;  %v14416_v36 = vand.u32 4294901760, %v380_v59  ;;  %v14419_v23 = vand.u32 4294901760, %v675_v15  ;;  %v277_v15 = vld [vmem:[%s14000_s20 + $0xb8] sm:$0xff]  ;;  %20175 = vst [vmem:[#allocation57_spill] sm:$0xff] %v14443_v2  ;;  %v708_v34 = vsub.f32 %v14414_v30, %v14443_v2  ;;  %v280_v30 = vld [vmem:[%s14000_s20 + $0xd0] sm:$0xff] }
  0x5e   : > { %660 = vmatprep.mubr.f32.mxu1 %v20140_v27  ;;  %1728 = vmatprep.mubr.f32.mxu0 %v20140_v27  ;;  %20178 = vst [vmem:[#allocation60_spill] sm:$0xff] %v14462_v9  ;;  %v14478_v50 = vand.u32 4294901760, %v14462_v9 }
  0x5f   : > { %20171 = vst [vmem:[#allocation53_spill] sm:$0xff] %v14419_v23 }
  0x60   : > { %20180 = vst [vmem:[#allocation62_spill] sm:$0xff] %v14478_v50 }
  0x61   : > { %666 = vmatmul.mubr.f32.gmra.mrb[32].mxu1 %v14399_v29  ;;  %1732 = vmatmul.mubr.f32.gmra.mrb[34].mxu0 %v14385_v14  ;;  %v14434_v29 = vsub.f32 %v380_v59, %v14416_v36  ;;  %v14437_v14 = vand.u32 4294901760, %v686_v56  ;;  %v386_v59 = vsel %vm315_vm0, %v277_v15, 0  ;;  %v279_v15 = vld [vmem:[%s14000_s20 + $0xc8] sm:$0xff] }
  0x62   : > { %671 = vmatprep.mubr.f32.mxu1 %v20140_v27  ;;  %1737 = vmatprep.mubr.f32.mxu0 %v20140_v27  ;;  %v14464_v16 = vand.u32 4294901760, %v386_v59 }
  0x63   : > { %20173 = vst [vmem:[#allocation55_spill] sm:$0xff] %v14434_v29  ;;  %20174 = vst [vmem:[#allocation56_spill] sm:$0xff] %v14437_v14  ;;  %v14452_v56 = vand.u32 4294901760, %v14434_v29 }
  0x65   : > { %677 = vmatmul.mubr.f32.gmra.mrb[34].mxu1 %v14419_v23  ;;  %1741 = vmatmul.mubr.f32.gmra.mrb[36].mxu0 %v14405_v57  ;;  %20176 = vst [vmem:[#allocation58_spill] sm:$0xff] %v14452_v56  ;;  %v389_v57 = vsel %vm315_vm0, %v278_v32, 0  ;;  %v14456_v23 = vand.u32 4294901760, %v697_v60  ;;  %v719_v60 = vsub.f32 %v14434_v29, %v14452_v56  ;;  %v392_v29 = vsel %vm315_vm0, %v279_v15, 0 }
  0x66   : > { %682 = vmatprep.mubr.f32.mxu1 %v20140_v27  ;;  %1746 = vmatprep.mubr.f32.mxu0 %v20140_v27  ;;  %v14471_v32 = vand.u32 4294901760, %v389_v57  ;;  %v395_v15 = vsel %vm315_vm0, %v280_v30, 0 }
  0x67   : > { %20177 = vst [vmem:[#allocation59_spill] sm:$0xff] %v14456_v23  ;;  %v14487_v37 = vand.u32 4294901760, %v719_v60 }
  0x69   : > { %688 = vmatmul.mubr.f32.gmra.mrb[36].mxu1 %v14437_v14  ;;  %1750 = vmatmul.mubr.f32.gmra.mrb[38].mxu0 %v14425_v10  ;;  %v14474_v10 = vand.u32 4294901760, %v708_v34  ;;  %v14481_v14 = vsub.f32 %v386_v59, %v14464_v16  ;;  %20182 = vst [vmem:[#allocation64_spill] sm:$0xff] %v14487_v37  ;;  %v14490_v34 = vsub.f32 %v389_v57, %v14471_v32  ;;  %v281_v57 = vld [vmem:[%s14000_s20 + $0xd8] sm:$0xff] }
  0x6a   : > { %693 = vmatprep.mubr.f32.mxu1 %v20140_v27  ;;  %1755 = vmatprep.mubr.f32.mxu0 %v20140_v27  ;;  %v730_v59 = vsub.f32 %v14462_v9, %v14478_v50  ;;  %v398_v25 = vsel %vm315_vm0, %v281_v57, 0 }
  0x6b   : > { %20179 = vst [vmem:[#allocation61_spill] sm:$0xff] %v14474_v10  ;;  %20181 = vst [vmem:[#allocation63_spill] sm:$0xff] %v14481_v14  ;;  %v14506_v60 = vand.u32 4294901760, %v14490_v34  ;;  %v14523_v24 = vand.u32 4294901760, %v398_v25 }
  0x6c   : > { %20183 = vst [vmem:[#allocation65_spill] sm:$0xff] %v14490_v34 }
  0x6d   : > { %699 = vmatmul.mubr.f32.gmra.mrb[38].mxu1 %v14456_v23  ;;  %1759 = vmatmul.mubr.f32.gmra.mrb[40].mxu0 %v14443_v2  ;;  %v14497_v2 = vand.u32 4294901760, %v14481_v14  ;;  %v14499_v23 = vand.u32 4294901760, %v392_v29  ;;  %20185 = vst [vmem:[#allocation67_spill] sm:$0xff] %v14506_v60 }
  0x6e   : > { %704 = vmatprep.mubr.f32.mxu1 %v20140_v27  ;;  %1764 = vmatprep.mubr.f32.mxu0 %v20140_v27 }
  0x6f   : > { %20184 = vst [vmem:[#allocation66_spill] sm:$0xff] %v14497_v2  ;;  %v741_v9 = vsub.f32 %v14481_v14, %v14497_v2  ;;  %v14517_v30 = vsub.f32 %v392_v29, %v14499_v23  ;;  %v752_v29 = vsub.f32 %v14490_v34, %v14506_v60  ;;  %v284_v14 = vld [vmem:[%s14000_s20 + $0xf0] sm:$0xff] }
  0x71   : > { %710 = vmatmul.mubr.f32.gmra.mrb[40].mxu1 %v14474_v10  ;;  %1768 = vmatmul.mubr.f32.gmra.mrb[42].mxu0 %v14452_v56  ;;  %v14508_v56 = vand.u32 4294901760, %v395_v15  ;;  %v14511_v10 = vand.u32 4294901760, %v730_v59  ;;  %20187 = vst [vmem:[#allocation69_spill] sm:$0xff] %v14517_v30  ;;  %v401_v59 = vsel %vm315_vm0, %v282_v63, 0  ;;  %v14533_v57 = vand.u32 4294901760, %v14517_v30  ;;  %v283_v63 = vld [vmem:[%s14000_s20 + $0xe8] sm:$0xff] }
  0x72   : > { %715 = vmatprep.mubr.f32.mxu1 %v20140_v27  ;;  %1773 = vmatprep.mubr.f32.mxu0 %v20140_v27 }
  0x73   : > { %20186 = vst [vmem:[#allocation68_spill] sm:$0xff] %v14511_v10  ;;  %20189 = vst [vmem:[#allocation71_spill] sm:$0xff] %v14533_v57 }
  0x75   : > { %721 = vmatmul.mubr.f32.gmra.mrb[42].mxu1 %v14487_v37  ;;  %1777 = vmatmul.mubr.f32.gmra.mrb[44].mxu0 %v14478_v50  ;;  %v14527_v50 = vand.u32 4294901760, %v741_v9  ;;  %v14536_v37 = vsub.f32 %v395_v15, %v14508_v56  ;;  %v14544_v9 = vand.u32 4294901760, %v752_v29  ;;  %v14553_v15 = vsub.f32 %v398_v25, %v14523_v24 }
  0x76   : > { %726 = vmatprep.mubr.f32.mxu1 %v20140_v27  ;;  %1782 = vmatprep.mubr.f32.mxu0 %v20140_v27  ;;  %v404_v29 = vsel %vm315_vm0, %v283_v63, 0 }
  0x77   : > { %20188 = vst [vmem:[#allocation70_spill] sm:$0xff] %v14527_v50  ;;  %20190 = vst [vmem:[#allocation72_spill] sm:$0xff] %v14536_v37  ;;  %v14550_v34 = vand.u32 4294901760, %v14536_v37  ;;  %v14570_v5 = vand.u32 4294901760, %v14553_v15  ;;  %v14572_v46 = vand.u32 4294901760, %v404_v29 }
  0x78   : > { %20191 = vst [vmem:[#allocation73_spill] sm:$0xff] %v14544_v9  ;;  %20193 = vst [vmem:[#allocation75_spill] sm:$0xff] %v14553_v15 }
  0x79   : > { %732 = vmatmul.mubr.f32.gmra.mrb[44].mxu1 %v14511_v10  ;;  %1786 = vmatmul.mubr.f32.gmra.mrb[46].mxu0 %v14497_v2  ;;  %v14541_v10 = vand.u32 4294901760, %v401_v59  ;;  %v763_v2 = vsub.f32 %v14517_v30, %v14533_v57  ;;  %20192 = vst [vmem:[#allocation74_spill] sm:$0xff] %v14550_v34  ;;  %v774_v25 = vsub.f32 %v14536_v37, %v14550_v34  ;;  %20196 = vst [vmem:[#allocation78_spill] sm:$0xff] %v14570_v5 }
  0x7a   : > { %737 = vmatprep.mubr.f32.mxu1 %v20140_v27  ;;  %1791 = vmatprep.mubr.f32.mxu0 %v20140_v27  ;;  %v785_v63 = vsub.f32 %v14553_v15, %v14570_v5 }
  0x7b   : > { %v14564_v30 = vand.u32 4294901760, %v763_v2  ;;  %v14580_v2 = vand.u32 4294901760, %v774_v25 }
  0x7d   : > { %743 = vmatmul.mubr.f32.gmra.mrb[46].mxu1 %v14527_v50  ;;  %1795 = vmatmul.mubr.f32.gmra.mrb[48].mxu0 %v14506_v60  ;;  %v14560_v50 = vsub.f32 %v401_v59, %v14541_v10  ;;  %v407_v60 = vsel %vm315_vm0, %v284_v14, 0  ;;  %20195 = vst [vmem:[#allocation77_spill] sm:$0xff] %v14564_v30  ;;  %v285_v59 = vld [vmem:[%s14000_s20 + $0xf8] sm:$0xff] }
  0x7e   : > { %748 = vmatprep.mubr.f32.mxu1 %v20140_v27  ;;  %1800 = vmatprep.mubr.f32.mxu0 %v20140_v27  ;;  %v14577_v14 = vand.u32 4294901760, %v407_v60  ;;  %v410_v37 = vsel %vm315_vm0, %v285_v59, 0 }
  0x7f   : > { %20194 = vst [vmem:[#allocation76_spill] sm:$0xff] %v14560_v50  ;;  %v14606_v15 = vand.u32 4294901760, %v410_v37 }
  0x80   : > { %v14595_v25 = vsub.f32 %v407_v60, %v14577_v14 }
  0x81   : > { %754 = vmatmul.mubr.f32.gmra.mrb[48].mxu1 %v14544_v9  ;;  %1804 = vmatmul.mubr.f32.gmra.mrb[50].mxu0 %v14533_v57  ;;  %v14586_v57 = vand.u32 4294901760, %v14560_v50  ;;  %v14589_v9 = vsub.f32 %v404_v29, %v14572_v46 }
  0x82   : > { %759 = vmatprep.mubr.f32.mxu1 %v20140_v27  ;;  %1809 = vmatprep.mubr.f32.mxu0 %v20140_v27  ;;  %20199 = vst [vmem:[#allocation81_spill] sm:$0xff] %v14595_v25 }
  0x83   : > { %20197 = vst [vmem:[#allocation79_spill] sm:$0xff] %v14586_v57  ;;  %20198 = vst [vmem:[#allocation80_spill] sm:$0xff] %v14589_v9  ;;  %v14604_v29 = vand.u32 4294901760, %v14589_v9 }
  0x85   : > { %765 = vmatmul.mubr.f32.gmra.mrb[50].mxu1 %v14564_v30  ;;  %1813 = vmatmul.mubr.f32.gmra.mrb[52].mxu0 %v14550_v34  ;;  %v14598_v34 = vand.u32 4294901760, %v785_v63  ;;  %v796_v30 = vsub.f32 %v14560_v50, %v14586_v57  ;;  %20201 = vst [vmem:[#allocation83_spill] sm:$0xff] %v14604_v29  ;;  %v807_v59 = vsub.f32 %v14589_v9, %v14604_v29  ;;  %v14617_v63 = vand.u32 4294901760, %v14595_v25 }
  0x86   : > { %770 = vmatprep.mubr.f32.mxu1 %v20140_v27  ;;  %1818 = vmatprep.mubr.f32.mxu0 %v20140_v27 }
  0x87   : > { %20200 = vst [vmem:[#allocation82_spill] sm:$0xff] %v14598_v34  ;;  %v14611_v60 = vand.u32 4294901760, %v796_v30  ;;  %20202 = vst [vmem:[#allocation84_spill] sm:$0xff] %v14617_v63  ;;  %v818_v30 = vsub.f32 %v14595_v25, %v14617_v63 }
  0x89   : > { %776 = vmatmul.mubr.f32.gmra.mrb[52].mxu1 %v14580_v2  ;;  %1822 = vmatmul.mubr.f32.gmra.mrb[54].mxu0 %v14570_v5  ;;  %v14620_v5 = vsub.f32 %v410_v37, %v14606_v15  ;;  %v14636_v37 = vand.u32 4294901760, %v818_v30  ;;  %v14656_v30 = vld [vmem:[%s19224_s1 + $0x10] sm:$0xff] }
  0x8a   : > { %781 = vmatprep.mubr.f32.mxu1 %v20140_v27  ;;  %1827 = vmatprep.mubr.f32.mxu0 %v20140_v27 }
  0x8b   : > { %20204 = vst [vmem:[#allocation86_spill] sm:$0xff] %v14636_v37 }
  0x8d   : > { %787 = vmatmul.mubr.f32.gmra.mrb[54].mxu1 %v14598_v34  ;;  %1831 = vmatmul.mubr.f32.gmra.mrb[56].mxu0 %v14586_v57  ;;  %v14625_v34 = vand.u32 4294901760, %v807_v59  ;;  %v14631_v57 = vand.u32 4294901760, %v14620_v5 }
  0x8e   : > { %792 = vmatprep.mubr.f32.mxu1 %v20140_v27  ;;  %1836 = vmatprep.mubr.f32.mxu0 %v20140_v27 }
  0x8f   : > { %20203 = vst [vmem:[#allocation85_spill] sm:$0xff] %v14631_v57  ;;  %v829_v59 = vsub.f32 %v14620_v5, %v14631_v57 }
  0x91   : > { %798 = vmatmul.mubr.f32.gmra.mrb[56].mxu1 %v14611_v60  ;;  %1840 = vmatmul.mubr.f32.gmra.mrb[58].mxu0 %v14604_v29  ;;  %v14644_v29 = vand.u32 4294901760, %v829_v59  ;;  %v14661_v59 = vld [vmem:[%s19224_s1 + $0x28] sm:$0xff] }
  0x92   : > { %803 = vmatprep.mubr.f32.mxu1 %v20140_v27  ;;  %1845 = vmatprep.mubr.f32.mxu0 %v20140_v27 }
  0x93   : > { %20205 = vst [vmem:[#allocation87_spill] sm:$0xff] %v14644_v29 }
  0x95   : > { %809 = vmatmul.mubr.f32.gmra.mrb[58].mxu1 %v14625_v34  ;;  %1849 = vmatmul.mubr.f32.gmra.mrb[60].mxu0 %v14617_v63  ;;  %v2475_v63 = vand.u32 4294901760, %v14656_v30 }
  0x96   : > { %814 = vmatprep.mubr.f32.mxu1 %v20140_v27  ;;  %1854 = vmatprep.mubr.f32.mxu0 %v20140_v27 }
  0x99   : > { %820 = vmatmul.mubr.f32.gmra.mrb[60].mxu1 %v14636_v37  ;;  %1858 = vmatmul.mubr.f32.gmra.mrb[62].mxu0 %v14631_v57  ;;  %v12015_v57 = vpack.c.bf16 %v14096_v11, %v14077_v6  ;;  %v20206_v37 = vpack.c.bf16 %v13971_v20, %v13967_v18  ;;  %v20207_v18 = vpack.c.bf16 %v14148_v55, %v14136_v47  ;;  %v14806_v20 = vld [vmem:[%s19224_s1 + $0x40] sm:$0xff] }
  0x9a   : > { %825 = vmatprep.mubr.f32.mxu1 %v20140_v27  ;;  %1952 = vmatprep.mubr.f32.mxu0 %v20140_v27  ;;  %v14826_v11 = vsub.f32 %v14656_v30, %v2475_v63 }
  0x9d   : > { %831 = vmatmul.mubr.f32.gmra.mrb[62].mxu1 %v14644_v29  ;;  %1954 = vmatmul.mubr.f32.vlgmr.msra.gmra.mrb[0].mxu0 %v14024_v43  ;;  %v2478_v29 = vand.u32 4294901760, %v14661_v59 }
  0x9e   : > { %941 = vmatprep.mubr.f32.mxu1 %v20140_v27  ;;  %1959 = vmatprep.mubr.f32.mxu0 %v20140_v27 }
  0x9f   : > { %12038 = vmatpush1.bf16.msra.mxu0 %v13969_v19  ;;  %v14681_v19 = vpack.c.bf16 %v2478_v29, %v2475_v63  ;;  %v14831_v47 = vsub.f32 %v14661_v59, %v2478_v29 }
  0xa0   : > { %12040 = vmatprep.subr.bf16.mxu0 %v13977_v21  ;;  %v14811_v21 = vld [vmem:[%s19224_s1 + $0x58] sm:$0xff] }
  0xa1   : > { %943 = vmatmul.mubr.f32.vlgmr.msra.gmra.mrb[0].mxu1 %v14024_v43  ;;  %1961 = vmatmul.mubr.f32.gmra.mrb[2].mxu0 %v14026_v44  ;;  %v19341_v6 = vand.u32 4294901760, %v14811_v21 }
  0xa2   : > { %12014 = vmatpush1.bf16.msra.mxu1 %v20206_v37  ;;  %948 = vmatprep.mubr.f32.mxu1 %v20140_v27  ;;  %v19339_v37 = vand.u32 4294901760, %v14831_v47 }
  0xa3   : > { %1966 = vmatprep.mubr.f32.mxu0 %v20140_v27  ;;  %12016 = vmatprep.subr.bf16.mxu1 %v12015_v57  ;;  %v19340_v57 = vand.u32 4294901760, %v14826_v11 }
  0xa4   : > { %12042 = vmatpush1.bf16.msra.mxu0 %v13994_v28  ;;  %v19342_v28 = vand.u32 4294901760, %v14806_v20  ;;  %v2874_v63 = vsub.f32 %v14831_v47, %v19339_v37  ;;  %v20212_v37 = vld [vmem:[#allocation32_spill] sm:$0xff] }
  0xa5   : > { %950 = vmatmul.mubr.f32.gmra.mrb[2].mxu1 %v14026_v44  ;;  %1968 = vmatmul.mubr.f32.gmra.mrb[4].mxu0 %v14028_v45  ;;  %v2867_v29 = vsub.f32 %v14826_v11, %v19340_v57  ;;  %v20213_v57 = vld [vmem:[#allocation35_spill] sm:$0xff] }
  0xa6   : > { %955 = vmatprep.mubr.f32.mxu1 %v20140_v27  ;;  %1973 = vmatprep.mubr.f32.mxu0 %v20140_v27  ;;  %v14837_v55 = vpack.c.bf16 %v19341_v6, %v19342_v28  ;;  %v2875_v59 = vand.u32 4294901760, %v2874_v63  ;;  %v20209_v63 = vld [vmem:[#allocation21_spill] sm:$0xff]  ;;  %v14919_v28 = vpack.c.bf16 %v14831_v47, %v14826_v11 }
  0xa7   : > { %12018 = vmatpush1.bf16.msra.mxu1 %v20207_v18  ;;  %v2868_v30 = vand.u32 4294901760, %v2867_v29  ;;  %v20208_v29 = vld [vmem:[#allocation20_spill] sm:$0xff]  ;;  %v20214_v6 = vld [vmem:[#allocation37_spill] sm:$0xff] }
  0xa8   : > { %12044 = vmatprep.subr.bf16.mxu1 %v14681_v19 }
  0xa9   : > { %957 = vmatmul.mubr.f32.gmra.mrb[4].mxu1 %v14028_v45  ;;  %1975 = vmatmul.mubr.f32.gmra.mrb[6].mxu0 %v14034_v49  ;;  %v14857_v18 = vpack.c.bf16 %v2875_v59, %v2868_v30  ;;  %v20210_v30 = vld [vmem:[#allocation27_spill] sm:$0xff]  ;;  %v20211_v59 = vld [vmem:[#allocation28_spill] sm:$0xff] }
  0xaa   : > { %962 = vmatprep.mubr.f32.mxu1 %v20140_v27  ;;  %1980 = vmatprep.mubr.f32.mxu0 %v20140_v27 }
  0xad   : > { %964 = vmatmul.mubr.f32.gmra.mrb[6].mxu1 %v14034_v49  ;;  %1982 = vmatmul.mubr.f32.gmra.mrb[8].mxu0 %v14050_v58 }
  0xae   : > { %969 = vmatprep.mubr.f32.mxu1 %v20140_v27  ;;  %1987 = vmatprep.mubr.f32.mxu0 %v20140_v27 }
  0xb1   : > { %971 = vmatmul.mubr.f32.gmra.mrb[8].mxu1 %v14050_v58  ;;  %1989 = vmatmul.mubr.f32.gmra.mrb[10].mxu0 %v14071_v4 }
  0xb2   : > { %976 = vmatprep.mubr.f32.mxu1 %v20140_v27  ;;  %1994 = vmatprep.mubr.f32.mxu0 %v20140_v27 }
  0xb5   : > { %978 = vmatmul.mubr.f32.gmra.mrb[10].mxu1 %v14071_v4  ;;  %1996 = vmatmul.mubr.f32.gmra.mrb[12].mxu0 %v14091_v7 }
  0xb6   : > { %983 = vmatprep.mubr.f32.mxu1 %v20140_v27  ;;  %2001 = vmatprep.mubr.f32.mxu0 %v20140_v27 }
  0xb9   : > { %985 = vmatmul.mubr.f32.gmra.mrb[12].mxu1 %v14091_v7  ;;  %2003 = vmatmul.mubr.f32.gmra.mrb[14].mxu0 %v14123_v40 }
  0xba   : > { %990 = vmatprep.mubr.f32.mxu1 %v20140_v27  ;;  %2008 = vmatprep.mubr.f32.mxu0 %v20140_v27 }
  0xbd   : > { %992 = vmatmul.mubr.f32.gmra.mrb[14].mxu1 %v14123_v40  ;;  %2010 = vmatmul.mubr.f32.gmra.mrb[16].mxu0 %v14159_v62 }
  0xbe   : > { %997 = vmatprep.mubr.f32.mxu1 %v20140_v27  ;;  %2015 = vmatprep.mubr.f32.mxu0 %v20140_v27 }
  0xc1   : > { %999 = vmatmul.mubr.f32.gmra.mrb[16].mxu1 %v14159_v62  ;;  %2017 = vmatmul.mubr.f32.gmra.mrb[18].mxu0 %v14174_v35 }
  0xc2   : > { %1004 = vmatprep.mubr.f32.mxu1 %v20140_v27  ;;  %2022 = vmatprep.mubr.f32.mxu0 %v20140_v27 }
  0xc5   : > { %1006 = vmatmul.mubr.f32.gmra.mrb[18].mxu1 %v14174_v35  ;;  %2024 = vmatmul.mubr.f32.gmra.mrb[20].mxu0 %v14194_v8 }
  0xc6   : > { %1011 = vmatprep.mubr.f32.mxu1 %v20140_v27  ;;  %2029 = vmatprep.mubr.f32.mxu0 %v20140_v27 }
  0xc9   : > { %1013 = vmatmul.mubr.f32.gmra.mrb[20].mxu1 %v14194_v8  ;;  %2031 = vmatmul.mubr.f32.gmra.mrb[22].mxu0 %v14215_v13 }
  0xca   : > { %1018 = vmatprep.mubr.f32.mxu1 %v20140_v27  ;;  %2036 = vmatprep.mubr.f32.mxu0 %v20140_v27 }
  0xcd   : > { %1020 = vmatmul.mubr.f32.gmra.mrb[22].mxu1 %v14215_v13  ;;  %2038 = vmatmul.mubr.f32.gmra.mrb[24].mxu0 %v14230_v51 }
  0xce   : > { %1025 = vmatprep.mubr.f32.mxu1 %v20140_v27  ;;  %2043 = vmatprep.mubr.f32.mxu0 %v20140_v27 }
  0xd1   : > { %1027 = vmatmul.mubr.f32.gmra.mrb[24].mxu1 %v14230_v51  ;;  %2045 = vmatmul.mubr.f32.gmra.mrb[26].mxu0 %v14251_v31 }
  0xd2   : > { %1032 = vmatprep.mubr.f32.mxu1 %v20140_v27  ;;  %2050 = vmatprep.mubr.f32.mxu0 %v20140_v27 }
  0xd5   : > { %1034 = vmatmul.mubr.f32.gmra.mrb[26].mxu1 %v14251_v31  ;;  %2052 = vmatmul.mubr.f32.gmra.mrb[28].mxu0 %v14272_v26 }
  0xd6   : > { %1039 = vmatprep.mubr.f32.mxu1 %v20140_v27  ;;  %2057 = vmatprep.mubr.f32.mxu0 %v20140_v27 }
  0xd9   : > { %1041 = vmatmul.mubr.f32.gmra.mrb[28].mxu1 %v14272_v26  ;;  %2059 = vmatmul.mubr.f32.gmra.mrb[30].mxu0 %v14304_v0 }
  0xda   : > { %1046 = vmatprep.mubr.f32.mxu1 %v20140_v27  ;;  %2064 = vmatprep.mubr.f32.mxu0 %v20140_v27 }
  0xdd   : > { %1048 = vmatmul.mubr.f32.gmra.mrb[30].mxu1 %v14304_v0  ;;  %2066 = vmatmul.mubr.f32.gmra.mrb[32].mxu0 %v14334_v39 }
  0xde   : > { %1053 = vmatprep.mubr.f32.mxu1 %v20140_v27  ;;  %2071 = vmatprep.mubr.f32.mxu0 %v20140_v27 }
  0xe1   : > { %1055 = vmatmul.mubr.f32.gmra.mrb[32].mxu1 %v14334_v39  ;;  %2073 = vmatmul.mubr.f32.gmra.mrb[34].mxu0 %v14353_v1 }
  0xe2   : > { %1060 = vmatprep.mubr.f32.mxu1 %v20140_v27  ;;  %2078 = vmatprep.mubr.f32.mxu0 %v20140_v27 }
  0xe5   : > { %1062 = vmatmul.mubr.f32.gmra.mrb[34].mxu1 %v14353_v1  ;;  %2080 = vmatmul.mubr.f32.gmra.mrb[36].mxu0 %v14371_v17 }
  0xe6   : > { %1067 = vmatprep.mubr.f32.mxu1 %v20140_v27  ;;  %2085 = vmatprep.mubr.f32.mxu0 %v20140_v27 }
  0xe9   : > { %1069 = vmatmul.mubr.f32.gmra.mrb[36].mxu1 %v14371_v17  ;;  %2087 = vmatmul.mubr.f32.gmra.mrb[38].mxu0 %v14390_v41 }
  0xea   : > { %1074 = vmatprep.mubr.f32.mxu1 %v20140_v27  ;;  %2092 = vmatprep.mubr.f32.mxu0 %v20140_v27 }
  0xed   : > { %1076 = vmatmul.mubr.f32.gmra.mrb[38].mxu1 %v14390_v41  ;;  %2094 = vmatmul.mubr.f32.gmra.mrb[40].mxu0 %v14395_v38 }
  0xee   : > { %1081 = vmatprep.mubr.f32.mxu1 %v20140_v27  ;;  %2099 = vmatprep.mubr.f32.mxu0 %v20140_v27 }
  0xf1   : > { %1083 = vmatmul.mubr.f32.gmra.mrb[40].mxu1 %v14395_v38  ;;  %2101 = vmatmul.mubr.f32.gmra.mrb[42].mxu0 %v14416_v36 }
  0xf2   : > { %1088 = vmatprep.mubr.f32.mxu1 %v20140_v27  ;;  %2106 = vmatprep.mubr.f32.mxu0 %v20140_v27 }
  0xf5   : > { %1090 = vmatmul.mubr.f32.gmra.mrb[42].mxu1 %v14416_v36  ;;  %2108 = vmatmul.mubr.f32.gmra.mrb[44].mxu0 %v14445_v52 }
  0xf6   : > { %1095 = vmatprep.mubr.f32.mxu1 %v20140_v27  ;;  %2113 = vmatprep.mubr.f32.mxu0 %v20140_v27 }
  0xf9   : > { %1097 = vmatmul.mubr.f32.gmra.mrb[44].mxu1 %v14445_v52  ;;  %2115 = vmatmul.mubr.f32.gmra.mrb[46].mxu0 %v14464_v16 }
  0xfa   : > { %1102 = vmatprep.mubr.f32.mxu1 %v20140_v27  ;;  %2120 = vmatprep.mubr.f32.mxu0 %v20140_v27 }
  0xfd   : > { %1104 = vmatmul.mubr.f32.gmra.mrb[46].mxu1 %v14464_v16  ;;  %2122 = vmatmul.mubr.f32.gmra.mrb[48].mxu0 %v14471_v32 }
  0xfe   : > { %1109 = vmatprep.mubr.f32.mxu1 %v20140_v27  ;;  %2127 = vmatprep.mubr.f32.mxu0 %v20140_v27 }
 0x101   : > { %1111 = vmatmul.mubr.f32.gmra.mrb[48].mxu1 %v14471_v32  ;;  %2129 = vmatmul.mubr.f32.gmra.mrb[50].mxu0 %v14499_v23 }
 0x102   : > { %1116 = vmatprep.mubr.f32.mxu1 %v20140_v27  ;;  %2134 = vmatprep.mubr.f32.mxu0 %v20140_v27 }
 0x105   : > { %1118 = vmatmul.mubr.f32.gmra.mrb[50].mxu1 %v14499_v23  ;;  %2136 = vmatmul.mubr.f32.gmra.mrb[52].mxu0 %v14508_v56 }
 0x106   : > { %1123 = vmatprep.mubr.f32.mxu1 %v20140_v27  ;;  %2141 = vmatprep.mubr.f32.mxu0 %v20140_v27 }
 0x109   : > { %1125 = vmatmul.mubr.f32.gmra.mrb[52].mxu1 %v14508_v56  ;;  %2143 = vmatmul.mubr.f32.gmra.mrb[54].mxu0 %v14523_v24 }
 0x10a   : > { %1130 = vmatprep.mubr.f32.mxu1 %v20140_v27  ;;  %2148 = vmatprep.mubr.f32.mxu0 %v20140_v27 }
 0x10d   : > { %1132 = vmatmul.mubr.f32.gmra.mrb[54].mxu1 %v14523_v24  ;;  %2150 = vmatmul.mubr.f32.gmra.mrb[56].mxu0 %v14541_v10 }
 0x10e   : > { %1137 = vmatprep.mubr.f32.mxu1 %v20140_v27  ;;  %2155 = vmatprep.mubr.f32.mxu0 %v20140_v27 }
 0x111   : > { %1139 = vmatmul.mubr.f32.gmra.mrb[56].mxu1 %v14541_v10  ;;  %2157 = vmatmul.mubr.f32.gmra.mrb[58].mxu0 %v14572_v46 }
 0x112   : > { %1144 = vmatprep.mubr.f32.mxu1 %v20140_v27  ;;  %2162 = vmatprep.mubr.f32.mxu0 %v20140_v27 }
 0x115   : > { %1146 = vmatmul.mubr.f32.gmra.mrb[58].mxu1 %v14572_v46  ;;  %2164 = vmatmul.mubr.f32.gmra.mrb[60].mxu0 %v14577_v14 }
 0x116   : > { %1151 = vmatprep.mubr.f32.mxu1 %v20140_v27  ;;  %2169 = vmatprep.mubr.f32.mxu0 %v20140_v27 }
 0x119   : > { %1153 = vmatmul.mubr.f32.gmra.mrb[60].mxu1 %v14577_v14  ;;  %2171 = vmatmul.mubr.f32.gmra.mrb[62].mxu0 %v14606_v15 }
 0x11a   : > { %1158 = vmatprep.mubr.f32.mxu1 %v20140_v27  ;;  %2249 = vmatprep.mubr.f32.mxu0 %v20140_v27 }
 0x11d   : > { %1160 = vmatmul.mubr.f32.gmra.mrb[62].mxu1 %v14606_v15  ;;  %2251 = vmatmul.mubr.f32.vlgmr.msra.gmra.mrb[0].mxu0 %v14024_v43 }
 0x11e   : > { %1246 = vmatprep.mubr.f32.mxu1 %v20140_v27  ;;  %2256 = vmatprep.mubr.f32.mxu0 %v20140_v27 }
 0x121   : > { %1249 = vmatmul.mubr.f32.vlgmr.msra.gmra.mrb[0].mxu1 %v14032_v48  ;;  %2258 = vmatmul.mubr.f32.gmra.mrb[2].mxu0 %v14026_v44 }
 0x122   : > { %12046 = vmatpush3.bf16.msra.mxu1 %v14681_v19  ;;  %1254 = vmatprep.mubr.f32.mxu1 %v20140_v27 }
 0x123   : > { %2263 = vmatprep.mubr.f32.mxu0 %v20140_v27  ;;  %12048 = vmatprep.subr.bf16.mxu1 %v14837_v55 }
 0x125   : > { %1257 = vmatmul.mubr.f32.gmra.mrb[2].mxu1 %v14038_v53  ;;  %2265 = vmatmul.mubr.f32.gmra.mrb[4].mxu0 %v14028_v45 }
 0x126   : > { %1262 = vmatprep.mubr.f32.mxu1 %v20140_v27  ;;  %2270 = vmatprep.mubr.f32.mxu0 %v20140_v27 }
 0x127   : > { %12050 = vmatpush3.bf16.msra.mxu1 %v14837_v55 }
 0x128   : > { %12052 = vmatprep.subr.bf16.mxu1 %v14857_v18 }
 0x129   : > { %1265 = vmatmul.mubr.f32.gmra.mrb[4].mxu1 %v14041_v54  ;;  %2272 = vmatmul.mubr.f32.gmra.mrb[6].mxu0 %v14034_v49 }
 0x12a   : > { %1270 = vmatprep.mubr.f32.mxu1 %v20140_v27  ;;  %2277 = vmatprep.mubr.f32.mxu0 %v20140_v27 }
 0x12d   : > { %1273 = vmatmul.mubr.f32.gmra.mrb[6].mxu1 %v14059_v61  ;;  %2279 = vmatmul.mubr.f32.gmra.mrb[8].mxu0 %v14050_v58 }
 0x12e   : > { %1278 = vmatprep.mubr.f32.mxu1 %v20140_v27  ;;  %2284 = vmatprep.mubr.f32.mxu0 %v20140_v27 }
 0x131   : > { %1281 = vmatmul.mubr.f32.gmra.mrb[8].mxu1 %v14069_v3  ;;  %2286 = vmatmul.mubr.f32.gmra.mrb[10].mxu0 %v14071_v4 }
 0x132   : > { %1286 = vmatprep.mubr.f32.mxu1 %v20140_v27  ;;  %2291 = vmatprep.mubr.f32.mxu0 %v20140_v27 }
 0x135   : > { %1289 = vmatmul.mubr.f32.gmra.mrb[10].mxu1 %v14102_v33  ;;  %2293 = vmatmul.mubr.f32.gmra.mrb[12].mxu0 %v14091_v7 }
 0x136   : > { %1294 = vmatprep.mubr.f32.mxu1 %v20140_v27  ;;  %2298 = vmatprep.mubr.f32.mxu0 %v20140_v27 }
 0x139   : > { %1297 = vmatmul.mubr.f32.gmra.mrb[12].mxu1 %v14115_v12  ;;  %2300 = vmatmul.mubr.f32.gmra.mrb[14].mxu0 %v14123_v40 }
 0x13a   : > { %1302 = vmatprep.mubr.f32.mxu1 %v20140_v27  ;;  %2305 = vmatprep.mubr.f32.mxu0 %v20140_v27 }
 0x13d   : > { %1305 = vmatmul.mubr.f32.gmra.mrb[14].mxu1 %v14155_v22  ;;  %2307 = vmatmul.mubr.f32.gmra.mrb[16].mxu0 %v14159_v62 }
 0x13e   : > { %1310 = vmatprep.mubr.f32.mxu1 %v20140_v27  ;;  %2312 = vmatprep.mubr.f32.mxu0 %v20140_v27 }
 0x141   : > { %1313 = vmatmul.mubr.f32.gmra.mrb[16].mxu1 %v14185_v42  ;;  %2314 = vmatmul.mubr.f32.gmra.mrb[18].mxu0 %v14174_v35 }
 0x142   : > { %1318 = vmatprep.mubr.f32.mxu1 %v20140_v27  ;;  %2319 = vmatprep.mubr.f32.mxu0 %v20140_v27 }
 0x145   : > { %1321 = vmatmul.mubr.f32.gmra.mrb[18].mxu1 %v20208_v29  ;;  %2321 = vmatmul.mubr.f32.gmra.mrb[20].mxu0 %v14194_v8  ;;  %v20230_v29 = vld [vmem:[#allocation7_spill] sm:$0xff] }
 0x146   : > { %1326 = vmatprep.mubr.f32.mxu1 %v20140_v27  ;;  %2326 = vmatprep.mubr.f32.mxu0 %v20140_v27 }
 0x149   : > { %1329 = vmatmul.mubr.f32.gmra.mrb[20].mxu1 %v20209_v63  ;;  %2328 = vmatmul.mubr.f32.gmra.mrb[22].mxu0 %v14215_v13 }
 0x14a   : > { %1334 = vmatprep.mubr.f32.mxu1 %v20140_v27  ;;  %2333 = vmatprep.mubr.f32.mxu0 %v20140_v27 }
 0x14d   : > { %1337 = vmatmul.mubr.f32.gmra.mrb[22].mxu1 %v20210_v30  ;;  %2335 = vmatmul.mubr.f32.gmra.mrb[24].mxu0 %v14230_v51 }
 0x14e   : > { %1342 = vmatprep.mubr.f32.mxu1 %v20140_v27  ;;  %2340 = vmatprep.mubr.f32.mxu0 %v20140_v27 }
 0x151   : > { %1345 = vmatmul.mubr.f32.gmra.mrb[24].mxu1 %v20211_v59  ;;  %2342 = vmatmul.mubr.f32.gmra.mrb[26].mxu0 %v14251_v31 }
 0x152   : > { %1350 = vmatprep.mubr.f32.mxu1 %v20140_v27  ;;  %2347 = vmatprep.mubr.f32.mxu0 %v20140_v27 }
 0x155   : > { %1353 = vmatmul.mubr.f32.gmra.mrb[26].mxu1 %v20212_v37  ;;  %2349 = vmatmul.mubr.f32.gmra.mrb[28].mxu0 %v14272_v26  ;;  %v20215_v37 = vld [vmem:[#allocation42_spill] sm:$0xff] }
 0x156   : > { %1358 = vmatprep.mubr.f32.mxu1 %v20140_v27  ;;  %2354 = vmatprep.mubr.f32.mxu0 %v20140_v27 }
 0x159   : > { %1361 = vmatmul.mubr.f32.gmra.mrb[28].mxu1 %v20213_v57  ;;  %2356 = vmatmul.mubr.f32.gmra.mrb[30].mxu0 %v14304_v0  ;;  %v20216_v57 = vld [vmem:[#allocation45_spill] sm:$0xff] }
 0x15a   : > { %1366 = vmatprep.mubr.f32.mxu1 %v20140_v27  ;;  %2361 = vmatprep.mubr.f32.mxu0 %v20140_v27 }
 0x15d   : > { %1369 = vmatmul.mubr.f32.gmra.mrb[30].mxu1 %v20214_v6  ;;  %2363 = vmatmul.mubr.f32.gmra.mrb[32].mxu0 %v14334_v39  ;;  %v20217_v6 = vld [vmem:[#allocation48_spill] sm:$0xff] }
 0x15e   : > { %1374 = vmatprep.mubr.f32.mxu1 %v20140_v27  ;;  %2368 = vmatprep.mubr.f32.mxu0 %v20140_v27 }
 0x161   : > { %1377 = vmatmul.mubr.f32.gmra.mrb[32].mxu1 %v20215_v37  ;;  %2370 = vmatmul.mubr.f32.gmra.mrb[34].mxu0 %v14353_v1  ;;  %v20218_v37 = vld [vmem:[#allocation51_spill] sm:$0xff] }
 0x162   : > { %1382 = vmatprep.mubr.f32.mxu1 %v20140_v27  ;;  %2375 = vmatprep.mubr.f32.mxu0 %v20140_v27 }
 0x165   : > { %1385 = vmatmul.mubr.f32.gmra.mrb[34].mxu1 %v20216_v57  ;;  %2377 = vmatmul.mubr.f32.gmra.mrb[36].mxu0 %v14371_v17  ;;  %v20219_v57 = vld [vmem:[#allocation52_spill] sm:$0xff] }
 0x166   : > { %1390 = vmatprep.mubr.f32.mxu1 %v20140_v27  ;;  %2382 = vmatprep.mubr.f32.mxu0 %v20140_v27 }
 0x169   : > { %1393 = vmatmul.mubr.f32.gmra.mrb[36].mxu1 %v20217_v6  ;;  %2384 = vmatmul.mubr.f32.gmra.mrb[38].mxu0 %v14390_v41  ;;  %v20220_v6 = vld [vmem:[#allocation55_spill] sm:$0xff] }
 0x16a   : > { %1398 = vmatprep.mubr.f32.mxu1 %v20140_v27  ;;  %2389 = vmatprep.mubr.f32.mxu0 %v20140_v27 }
 0x16d   : > { %1401 = vmatmul.mubr.f32.gmra.mrb[38].mxu1 %v20218_v37  ;;  %2391 = vmatmul.mubr.f32.gmra.mrb[40].mxu0 %v14395_v38  ;;  %v20221_v37 = vld [vmem:[#allocation60_spill] sm:$0xff] }
 0x16e   : > { %1406 = vmatprep.mubr.f32.mxu1 %v20140_v27  ;;  %2396 = vmatprep.mubr.f32.mxu0 %v20140_v27 }
 0x171   : > { %1409 = vmatmul.mubr.f32.gmra.mrb[40].mxu1 %v20219_v57  ;;  %2398 = vmatmul.mubr.f32.gmra.mrb[42].mxu0 %v14416_v36  ;;  %v20222_v57 = vld [vmem:[#allocation63_spill] sm:$0xff] }
 0x172   : > { %1414 = vmatprep.mubr.f32.mxu1 %v20140_v27  ;;  %2403 = vmatprep.mubr.f32.mxu0 %v20140_v27 }
 0x175   : > { %1417 = vmatmul.mubr.f32.gmra.mrb[42].mxu1 %v20220_v6  ;;  %2405 = vmatmul.mubr.f32.gmra.mrb[44].mxu0 %v14445_v52  ;;  %v20223_v6 = vld [vmem:[#allocation65_spill] sm:$0xff] }
 0x176   : > { %1422 = vmatprep.mubr.f32.mxu1 %v20140_v27  ;;  %2410 = vmatprep.mubr.f32.mxu0 %v20140_v27 }
 0x179   : > { %1425 = vmatmul.mubr.f32.gmra.mrb[44].mxu1 %v20221_v37  ;;  %2412 = vmatmul.mubr.f32.gmra.mrb[46].mxu0 %v14464_v16  ;;  %v20224_v37 = vld [vmem:[#allocation69_spill] sm:$0xff] }
 0x17a   : > { %1430 = vmatprep.mubr.f32.mxu1 %v20140_v27  ;;  %2417 = vmatprep.mubr.f32.mxu0 %v20140_v27 }
 0x17d   : > { %1433 = vmatmul.mubr.f32.gmra.mrb[46].mxu1 %v20222_v57  ;;  %2419 = vmatmul.mubr.f32.gmra.mrb[48].mxu0 %v14471_v32  ;;  %v20225_v57 = vld [vmem:[#allocation72_spill] sm:$0xff] }
 0x17e   : > { %1438 = vmatprep.mubr.f32.mxu1 %v20140_v27  ;;  %2424 = vmatprep.mubr.f32.mxu0 %v20140_v27 }
 0x181   : > { %1441 = vmatmul.mubr.f32.gmra.mrb[48].mxu1 %v20223_v6  ;;  %2426 = vmatmul.mubr.f32.gmra.mrb[50].mxu0 %v14499_v23  ;;  %v20226_v6 = vld [vmem:[#allocation75_spill] sm:$0xff] }
 0x182   : > { %1446 = vmatprep.mubr.f32.mxu1 %v20140_v27  ;;  %2431 = vmatprep.mubr.f32.mxu0 %v20140_v27 }
 0x185   : > { %1449 = vmatmul.mubr.f32.gmra.mrb[50].mxu1 %v20224_v37  ;;  %2433 = vmatmul.mubr.f32.gmra.mrb[52].mxu0 %v14508_v56  ;;  %v20227_v37 = vand.u32 4294901760, %v14806_v20 }
 0x186   : > { %1454 = vmatprep.mubr.f32.mxu1 %v20140_v27  ;;  %2438 = vmatprep.mubr.f32.mxu0 %v20140_v27 }
 0x187   : > { %v14972_v59 = vsub.f32 %v14806_v20, %v20227_v37 }
 0x189   : > { %1457 = vmatmul.mubr.f32.gmra.mrb[52].mxu1 %v20225_v57  ;;  %2440 = vmatmul.mubr.f32.gmra.mrb[54].mxu0 %v14523_v24  ;;  %v20228_v57 = vand.u32 4294901760, %v14811_v21 }
 0x18a   : > { %1462 = vmatprep.mubr.f32.mxu1 %v20140_v27  ;;  %2445 = vmatprep.mubr.f32.mxu0 %v20140_v27 }
 0x18b   : > { %v14977_v30 = vsub.f32 %v14811_v21, %v20228_v57 }
 0x18d   : > { %1465 = vmatmul.mubr.f32.gmra.mrb[54].mxu1 %v20226_v6  ;;  %2447 = vmatmul.mubr.f32.gmra.mrb[56].mxu0 %v14541_v10  ;;  %v19345_v6 = vand.u32 4294901760, %v14972_v59  ;;  %v19346_v63 = vand.u32 4294901760, %v14977_v30 }
 0x18e   : > { %1470 = vmatprep.mubr.f32.mxu1 %v20140_v27  ;;  %2452 = vmatprep.mubr.f32.mxu0 %v20140_v27 }
 0x18f   : > { %v2881_v20 = vsub.f32 %v14972_v59, %v19345_v6  ;;  %v2888_v21 = vsub.f32 %v14977_v30, %v19346_v63  ;;  %v20231_v6 = vld [vmem:[#allocation10_spill] sm:$0xff]  ;;  %v20232_v63 = vld [vmem:[#allocation12_spill] sm:$0xff] }
 0x191   : > { %1473 = vmatmul.mubr.f32.gmra.mrb[56].mxu1 %v14560_v50  ;;  %2454 = vmatmul.mubr.f32.gmra.mrb[58].mxu0 %v14572_v46  ;;  %v2882_v57 = vand.u32 4294901760, %v2881_v20  ;;  %v2889_v37 = vand.u32 4294901760, %v2888_v21  ;;  %v20235_v20 = vld [vmem:[#allocation18_spill] sm:$0xff]  ;;  %v20237_v21 = vld [vmem:[#allocation25_spill] sm:$0xff] }
 0x192   : > { %1478 = vmatprep.mubr.f32.mxu1 %v20140_v27  ;;  %2459 = vmatprep.mubr.f32.mxu0 %v20140_v27 }
 0x193   : > { %v12055_v50 = vpack.c.bf16 %v2889_v37, %v2882_v57  ;;  %v20244_v57 = vld [vmem:[#allocation46_spill] sm:$0xff]  ;;  %v20245_v37 = vld [vmem:[#allocation49_spill] sm:$0xff] }
 0x195   : > { %1481 = vmatmul.mubr.f32.gmra.mrb[58].mxu1 %v14589_v9  ;;  %2461 = vmatmul.mubr.f32.gmra.mrb[60].mxu0 %v14577_v14  ;;  %v20229_v9 = vld [vmem:[#allocation6_spill] sm:$0xff] }
 0x196   : > { %1486 = vmatprep.mubr.f32.mxu1 %v20140_v27  ;;  %2466 = vmatprep.mubr.f32.mxu0 %v20140_v27 }
 0x199   : > { %1489 = vmatmul.mubr.f32.gmra.mrb[60].mxu1 %v14595_v25  ;;  %2468 = vmatmul.mubr.f32.gmra.mrb[62].mxu0 %v14606_v15  ;;  %v20233_v25 = vld [vmem:[#allocation14_spill] sm:$0xff] }
 0x19a   : > { %1494 = vmatprep.mubr.f32.mxu1 %v20140_v27  ;;  %v20234_v27 = vld [vmem:[#allocation16_spill] sm:$0xff] }
 0x19d   : > { %1497 = vmatmul.mubr.f32.gmra.mrb[62].mxu1 %v14620_v5 }
 0x19e   : > { %11187 = vmatprep.mubr.f32.mxu1 %v20229_v9  ;;  %v20236_v9 = vld [vmem:[#allocation23_spill] sm:$0xff] }
 0x1a1   : > { %11188 = vmatmul.mubr.f32.vlgmr.msra.gmra.mrb[64].mxu1 %v20230_v29  ;;  %v20238_v29 = vld [vmem:[#allocation29_spill] sm:$0xff] }
 0x1a2   : > { %12054 = vmatpush3.bf16.msra.mxu1 %v14857_v18  ;;  %11190 = vmatprep.mubr.f32.mxu1 %v20231_v6  ;;  %v20239_v18 = vld [vmem:[#allocation33_spill] sm:$0xff]  ;;  %v20240_v6 = vld [vmem:[#allocation36_spill] sm:$0xff] }
 0x1a3   : > { %12056 = vmatprep.subr.bf16.mxu1 %v12055_v50 }
 0x1a5   : > { %11191 = vmatmul.mubr.f32.gmra.mrb[66].mxu1 %v20232_v63  ;;  %v20241_v63 = vld [vmem:[#allocation38_spill] sm:$0xff] }
 0x1a6   : > { %11193 = vmatprep.mubr.f32.mxu1 %v20233_v25  ;;  %12058 = vmatpush3.bf16.msra.mxu1 %v12055_v50  ;;  %v20242_v25 = vld [vmem:[#allocation41_spill] sm:$0xff]  ;;  %v20243_v50 = vld [vmem:[#allocation43_spill] sm:$0xff] }
 0x1a7   : > { %12060 = vmatprep.subr.bf16.mxu1 %v14919_v28 }
 0x1a9   : > { %11194 = vmatmul.mubr.f32.gmra.mrb[68].mxu1 %v20234_v27  ;;  %v20246_v27 = vld [vmem:[#allocation53_spill] sm:$0xff] }
 0x1aa   : > { %11196 = vmatprep.mubr.f32.mxu1 %v20235_v20  ;;  %v20247_v20 = vld [vmem:[#allocation56_spill] sm:$0xff] }
 0x1ad   : > { %11197 = vmatmul.mubr.f32.gmra.mrb[70].mxu1 %v20236_v9  ;;  %v20248_v9 = vld [vmem:[#allocation59_spill] sm:$0xff] }
 0x1ae   : > { %11199 = vmatprep.mubr.f32.mxu1 %v20237_v21  ;;  %v20249_v21 = vld [vmem:[#allocation61_spill] sm:$0xff] }
 0x1b1   : > { %11200 = vmatmul.mubr.f32.gmra.mrb[72].mxu1 %v20238_v29  ;;  %v20250_v29 = vld [vmem:[#allocation64_spill] sm:$0xff] }
 0x1b2   : > { %11202 = vmatprep.mubr.f32.mxu1 %v20239_v18  ;;  %v20251_v18 = vld [vmem:[#allocation68_spill] sm:$0xff] }
 0x1b5   : > { %11203 = vmatmul.mubr.f32.gmra.mrb[74].mxu1 %v20240_v6  ;;  %v20252_v6 = vld [vmem:[#allocation70_spill] sm:$0xff] }
 0x1b6   : > { %11205 = vmatprep.mubr.f32.mxu1 %v20241_v63  ;;  %v20253_v63 = vld [vmem:[#allocation73_spill] sm:$0xff] }
 0x1b9   : > { %11206 = vmatmul.mubr.f32.gmra.mrb[76].mxu1 %v20242_v25  ;;  %v20254_v25 = vld [vmem:[#allocation77_spill] sm:$0xff] }
 0x1ba   : > { %11208 = vmatprep.mubr.f32.mxu1 %v20243_v50  ;;  %v20255_v50 = vld [vmem:[#allocation82_spill] sm:$0xff] }
 0x1bd   : > { %11209 = vmatmul.mubr.f32.gmra.mrb[78].mxu1 %v20244_v57  ;;  %v20256_v57 = vld [vmem:[#allocation86_spill] sm:$0xff] }
 0x1be   : > { %11211 = vmatprep.mubr.f32.mxu1 %v20245_v37  ;;  %v20257_v37 = vld [vmem:[#allocation87_spill] sm:$0xff] }
 0x1c1   : > { %11212 = vmatmul.mubr.f32.gmra.mrb[80].mxu1 %v20246_v27  ;;  %v12063_v27 = vpack.c.bf16 %v14977_v30, %v14972_v59 }
 0x1c2   : > { %11214 = vmatprep.mubr.f32.mxu1 %v20247_v20 }
 0x1c5   : > { %11215 = vmatmul.mubr.f32.gmra.mrb[82].mxu1 %v20248_v9 }
 0x1c6   : > { %11217 = vmatprep.mubr.f32.mxu1 %v20249_v21 }
 0x1c9   : > { %11218 = vmatmul.mubr.f32.gmra.mrb[84].mxu1 %v20250_v29 }
 0x1ca   : > { %11220 = vmatprep.mubr.f32.mxu1 %v20251_v18 }
 0x1cd   : > { %11221 = vmatmul.mubr.f32.gmra.mrb[86].mxu1 %v20252_v6 }
 0x1ce   : > { %11223 = vmatprep.mubr.f32.mxu1 %v20253_v63 }
 0x1d1   : > { %11224 = vmatmul.mubr.f32.gmra.mrb[88].mxu1 %v20254_v25 }
 0x1d2   : > { %11226 = vmatprep.mubr.f32.mxu1 %v14580_v2  ;;  %v19348_v2 = vlaneseq }
 0x1d5   : > { %11227 = vmatmul.mubr.f32.gmra.mrb[90].mxu1 %v20255_v50 }
 0x1d6   : > { %11229 = vmatprep.mubr.f32.mxu1 %v14611_v60 }
 0x1d9   : > { %11230 = vmatmul.mubr.f32.gmra.mrb[92].mxu1 %v14625_v34  ;;  %v15044_v34 = vshrl.u32 %v19348_v2, 7 }
 0x1da   : > { %11232 = vmatprep.mubr.f32.mxu1 %v20256_v57 }
 0x1db   : > { %20258 = vst [vmem:[#allocation6_spill] sm:$0xff] %v15044_v34  ;;  %v302_v60 = vsub.s32 0, %v15044_v34  ;;  %v306_v20 = vsub.s32 1, %v15044_v34 }
 0x1dd   : > { %11233 = vmatmul.mubr.f32.gmra.mrb[94].mxu1 %v20257_v37 }
 0x1de   : > { %11243 = vmatprep.mubr.f32.mxu1 %v14024_v43 }
 0x1e1   : > { %11244 = vmatmul.mubr.f32.vlgmr.msra.gmra.mrb[64].mxu1 %v14026_v44 }
 0x1e2   : > { %12062 = vmatpush3.bf16.msra.mxu1 %v14919_v28  ;;  %11246 = vmatprep.mubr.f32.mxu1 %v14028_v45  ;;  %v15053_v28 = vld [vmem:[%s19225_s2] sm:$0x7] }
 0x1e3   : > { %12064 = vmatprep.subr.bf16.mxu1 %v12063_v27  ;;  %20259 = vst [vmem:[#allocation7_spill] sm:$0xff] %v15053_v28  ;;  %v15058_v21 = vrot.slane %v15053_v28, %v302_v60  ;;  %v15062_v18 = vrot.slane %v15053_v28, %v306_v20 }
 0x1e5   : > { %11247 = vmatmul.mubr.f32.gmra.mrb[66].mxu1 %v14034_v49 }
 0x1e6   : > { %11249 = vmatprep.mubr.f32.mxu1 %v14050_v58  ;;  %12066 = vmatpush3.bf16.msra.mxu1 %v12063_v27 }
 0x1e7   : > { %12068 = vmatprep.subr.bf16.mxu1 %v14681_v19 }
 0x1e9   : > { %11250 = vmatmul.mubr.f32.gmra.mrb[68].mxu1 %v14071_v4 }
 0x1ea   : > { %11252 = vmatprep.mubr.f32.mxu1 %v14091_v7 }
 0x1ed   : > { %11253 = vmatmul.mubr.f32.gmra.mrb[70].mxu1 %v14123_v40 }
 0x1ee   : > { %11255 = vmatprep.mubr.f32.mxu1 %v14159_v62 }
 0x1f0   : > { %v2252_v9 = vpop.f32.mrb[0].mxu0 }
 0x1f1   : > { %11256 = vmatmul.mubr.f32.gmra.mrb[72].mxu1 %v14174_v35  ;;  %v2254_v29 = vpop.f32.mrb[1].mxu0 }
 0x1f2   : > { %11258 = vmatprep.mubr.f32.mxu1 %v14194_v8 }
 0x1f4   : > { %v1250_v6 = vpop.f32.mrb[0].mxu1  ;;  %v2259_v63 = vpop.f32.mrb[2].mxu0 }
 0x1f5   : > { %v12667_v25 = vadd.f32 %v1250_v6, %v15058_v21  ;;  %v1252_v50 = vpop.f32.mrb[1].mxu1  ;;  %11259 = vmatmul.mubr.f32.gmra.mrb[74].mxu1 %v14215_v13  ;;  %v2261_v57 = vpop.f32.mrb[3].mxu0 }
 0x1f6   : > { %v12669_v37 = vadd.f32 %v1252_v50, %v15062_v18  ;;  %11261 = vmatprep.mubr.f32.mxu1 %v14230_v51 }
 0x1f7   : > { %v15068_v27 = vadd.f32 %v12667_v25, %v2252_v9 }
 0x1f8   : > { %v15070_v60 = vadd.f32 %v12669_v37, %v2254_v29  ;;  %v1258_v2 = vpop.f32.mrb[2].mxu1  ;;  %v2266_v34 = vpop.f32.mrb[4].mxu0 }
 0x1f9   : > { %20260 = vst [vmem:[#allocation10_spill] sm:$0xff] %v15068_v27  ;;  %v12671_v20 = vadd.f32 %v1258_v2, %v15058_v21  ;;  %v1260_v28 = vpop.f32.mrb[3].mxu1  ;;  %11262 = vmatmul.mubr.f32.gmra.mrb[76].mxu1 %v14251_v31  ;;  %v2268_v6 = vpop.f32.mrb[5].mxu0 }
 0x1fa   : > { %20261 = vst [vmem:[#allocation12_spill] sm:$0xff] %v15070_v60  ;;  %v12673_v8 = vadd.f32 %v1260_v28, %v15062_v18  ;;  %11264 = vmatprep.mubr.f32.mxu1 %v14272_v26 }
 0x1fb   : > { %v15076_v13 = vadd.f32 %v12671_v20, %v2259_v63 }
 0x1fc   : > { %v15078_v50 = vadd.f32 %v12673_v8, %v2261_v57  ;;  %v1266_v9 = vpop.f32.mrb[4].mxu1  ;;  %v2273_v25 = vpop.f32.mrb[6].mxu0 }
 0x1fd   : > { %20262 = vst [vmem:[#allocation14_spill] sm:$0xff] %v15076_v13  ;;  %v12675_v29 = vadd.f32 %v1266_v9, %v15058_v21  ;;  %v1268_v37 = vpop.f32.mrb[5].mxu1  ;;  %11265 = vmatmul.mubr.f32.gmra.mrb[78].mxu1 %v14304_v0  ;;  %v2275_v2 = vpop.f32.mrb[7].mxu0 }
 0x1fe   : > { %20263 = vst [vmem:[#allocation16_spill] sm:$0xff] %v15078_v50  ;;  %v12677_v60 = vadd.f32 %v1268_v37, %v15062_v18  ;;  %11267 = vmatprep.mubr.f32.mxu1 %v14334_v39 }
 0x1ff   : > { %v15084_v27 = vadd.f32 %v12675_v29, %v2266_v34 }
 0x200   : > { %v15086_v28 = vadd.f32 %v12677_v60, %v2268_v6  ;;  %v1274_v63 = vpop.f32.mrb[6].mxu1  ;;  %v2280_v20 = vpop.f32.mrb[8].mxu0 }
 0x201   : > { %20264 = vst [vmem:[#allocation18_spill] sm:$0xff] %v15084_v27  ;;  %v12679_v8 = vadd.f32 %v1274_v63, %v15058_v21  ;;  %v1276_v57 = vpop.f32.mrb[7].mxu1  ;;  %11268 = vmatmul.mubr.f32.gmra.mrb[80].mxu1 %v14353_v1  ;;  %v2282_v9 = vpop.f32.mrb[9].mxu0 }
 0x202   : > { %20265 = vst [vmem:[#allocation23_spill] sm:$0xff] %v15086_v28  ;;  %v12681_v50 = vadd.f32 %v1276_v57, %v15062_v18  ;;  %11270 = vmatprep.mubr.f32.mxu1 %v14371_v17 }
 0x203   : > { %v15092_v13 = vadd.f32 %v12679_v8, %v2273_v25 }
 0x204   : > { %v15094_v37 = vadd.f32 %v12681_v50, %v2275_v2  ;;  %v1282_v34 = vpop.f32.mrb[8].mxu1  ;;  %v2287_v29 = vpop.f32.mrb[10].mxu0 }
 0x205   : > { %20266 = vst [vmem:[#allocation25_spill] sm:$0xff] %v15092_v13  ;;  %v12683_v60 = vadd.f32 %v1282_v34, %v15058_v21  ;;  %v1284_v6 = vpop.f32.mrb[9].mxu1  ;;  %11271 = vmatmul.mubr.f32.gmra.mrb[82].mxu1 %v14390_v41  ;;  %v2289_v63 = vpop.f32.mrb[11].mxu0 }
 0x206   : > { %20267 = vst [vmem:[#allocation29_spill] sm:$0xff] %v15094_v37  ;;  %v12685_v28 = vadd.f32 %v1284_v6, %v15062_v18  ;;  %11273 = vmatprep.mubr.f32.mxu1 %v14395_v38 }
 0x207   : > { %v15100_v27 = vadd.f32 %v12683_v60, %v2280_v20 }
 0x208   : > { %v15102_v57 = vadd.f32 %v12685_v28, %v2282_v9  ;;  %v1290_v25 = vpop.f32.mrb[10].mxu1  ;;  %v2294_v8 = vpop.f32.mrb[12].mxu0 }
 0x209   : > { %20268 = vst [vmem:[#allocation33_spill] sm:$0xff] %v15100_v27  ;;  %v12687_v50 = vadd.f32 %v1290_v25, %v15058_v21  ;;  %v1292_v2 = vpop.f32.mrb[11].mxu1  ;;  %11274 = vmatmul.mubr.f32.gmra.mrb[84].mxu1 %v14416_v36  ;;  %v2296_v34 = vpop.f32.mrb[13].mxu0 }
 0x20a   : > { %20269 = vst [vmem:[#allocation36_spill] sm:$0xff] %v15102_v57  ;;  %v12689_v37 = vadd.f32 %v1292_v2, %v15062_v18  ;;  %11276 = vmatprep.mubr.f32.mxu1 %v14445_v52 }
 0x20b   : > { %v15108_v13 = vadd.f32 %v12687_v50, %v2287_v29 }
 0x20c   : > { %v15110_v6 = vadd.f32 %v12689_v37, %v2289_v63  ;;  %v1298_v20 = vpop.f32.mrb[12].mxu1  ;;  %v2301_v60 = vpop.f32.mrb[14].mxu0 }
 0x20d   : > { %20270 = vst [vmem:[#allocation38_spill] sm:$0xff] %v15108_v13  ;;  %v12691_v28 = vadd.f32 %v1298_v20, %v15058_v21  ;;  %v1300_v9 = vpop.f32.mrb[13].mxu1  ;;  %11277 = vmatmul.mubr.f32.gmra.mrb[86].mxu1 %v14464_v16  ;;  %v2303_v25 = vpop.f32.mrb[15].mxu0 }
 0x20e   : > { %20271 = vst [vmem:[#allocation41_spill] sm:$0xff] %v15110_v6  ;;  %v12693_v57 = vadd.f32 %v1300_v9, %v15062_v18  ;;  %11279 = vmatprep.mubr.f32.mxu1 %v14471_v32 }
 0x20f   : > { %v15116_v27 = vadd.f32 %v12691_v28, %v2294_v8 }
 0x210   : > { %v15118_v2 = vadd.f32 %v12693_v57, %v2296_v34  ;;  %v1306_v29 = vpop.f32.mrb[14].mxu1  ;;  %v2308_v50 = vpop.f32.mrb[16].mxu0 }
 0x211   : > { %20272 = vst [vmem:[#allocation43_spill] sm:$0xff] %v15116_v27  ;;  %v12695_v37 = vadd.f32 %v1306_v29, %v15058_v21  ;;  %v1308_v63 = vpop.f32.mrb[15].mxu1  ;;  %11280 = vmatmul.mubr.f32.gmra.mrb[88].mxu1 %v14499_v23  ;;  %v2310_v20 = vpop.f32.mrb[17].mxu0 }
 0x212   : > { %20273 = vst [vmem:[#allocation46_spill] sm:$0xff] %v15118_v2  ;;  %v12697_v6 = vadd.f32 %v1308_v63, %v15062_v18  ;;  %11282 = vmatprep.mubr.f32.mxu1 %v14508_v56 }
 0x213   : > { %v15124_v13 = vadd.f32 %v12695_v37, %v2301_v60 }
 0x214   : > { %v15126_v9 = vadd.f32 %v12697_v6, %v2303_v25  ;;  %v1314_v8 = vpop.f32.mrb[16].mxu1  ;;  %v2315_v28 = vpop.f32.mrb[18].mxu0 }
 0x215   : > { %20274 = vst [vmem:[#allocation49_spill] sm:$0xff] %v15124_v13  ;;  %v12699_v57 = vadd.f32 %v1314_v8, %v15058_v21  ;;  %v1316_v34 = vpop.f32.mrb[17].mxu1  ;;  %11283 = vmatmul.mubr.f32.gmra.mrb[90].mxu1 %v14523_v24  ;;  %v2317_v29 = vpop.f32.mrb[19].mxu0 }
 0x216   : > { %20275 = vst [vmem:[#allocation53_spill] sm:$0xff] %v15126_v9  ;;  %v12701_v2 = vadd.f32 %v1316_v34, %v15062_v18  ;;  %11285 = vmatprep.mubr.f32.mxu1 %v14541_v10 }
 0x217   : > { %v15132_v27 = vadd.f32 %v12699_v57, %v2308_v50 }
 0x218   : > { %v15134_v63 = vadd.f32 %v12701_v2, %v2310_v20  ;;  %v1322_v60 = vpop.f32.mrb[18].mxu1  ;;  %v2322_v37 = vpop.f32.mrb[20].mxu0 }
 0x219   : > { %20276 = vst [vmem:[#allocation56_spill] sm:$0xff] %v15132_v27  ;;  %v12703_v6 = vadd.f32 %v1322_v60, %v15058_v21  ;;  %v1324_v25 = vpop.f32.mrb[19].mxu1  ;;  %11286 = vmatmul.mubr.f32.gmra.mrb[92].mxu1 %v14572_v46  ;;  %v2324_v8 = vpop.f32.mrb[21].mxu0 }
 0x21a   : > { %20277 = vst [vmem:[#allocation59_spill] sm:$0xff] %v15134_v63  ;;  %v12705_v9 = vadd.f32 %v1324_v25, %v15062_v18  ;;  %11288 = vmatprep.mubr.f32.mxu1 %v14577_v14 }
 0x21b   : > { %v15140_v13 = vadd.f32 %v12703_v6, %v2315_v28 }
 0x21c   : > { %v15142_v34 = vadd.f32 %v12705_v9, %v2317_v29  ;;  %v1330_v50 = vpop.f32.mrb[20].mxu1  ;;  %v2329_v57 = vpop.f32.mrb[22].mxu0 }
 0x21d   : > { %v12707_v2 = vadd.f32 %v1330_v50, %v15058_v21  ;;  %v1332_v20 = vpop.f32.mrb[21].mxu1  ;;  %11289 = vmatmul.mubr.f32.gmra.mrb[94].mxu1 %v14606_v15  ;;  %v2331_v60 = vpop.f32.mrb[23].mxu0 }
 0x21e   : > { %20278 = vst [vmem:[#allocation61_spill] sm:$0xff] %v15142_v34  ;;  %v12709_v63 = vadd.f32 %v1332_v20, %v15062_v18  ;;  %11299 = vmatprep.mubr.f32.mxu1 %v14032_v48  ;;  %v20280_v48 = vand.u32 4294901760, %v14826_v11 }
 0x21f   : > { %v15148_v27 = vadd.f32 %v12707_v2, %v2322_v37 }
 0x220   : > { %v15150_v25 = vadd.f32 %v12709_v63, %v2324_v8  ;;  %v1338_v28 = vpop.f32.mrb[22].mxu1  ;;  %v2336_v6 = vpop.f32.mrb[24].mxu0  ;;  %v20281_v63 = vand.u32 4294901760, %v14831_v47 }
 0x221   : > { %v12711_v9 = vadd.f32 %v1338_v28, %v15058_v21  ;;  %v1340_v29 = vpop.f32.mrb[23].mxu1  ;;  %11300 = vmatmul.mubr.f32.vlgmr.msra.gmra.mrb[64].mxu1 %v14038_v53  ;;  %v2338_v50 = vpop.f32.mrb[25].mxu0 }
 0x222   : > { %20279 = vst [vmem:[#allocation64_spill] sm:$0xff] %v15150_v25  ;;  %v12713_v34 = vadd.f32 %v1340_v29, %v15062_v18  ;;  %12070 = vmatpush3.bf16.msra.mxu1 %v14681_v19  ;;  %11302 = vmatprep.mubr.f32.mxu1 %v14041_v54  ;;  %v15164_v37 = vpack.c.bf16 %v20281_v63, %v20280_v48 }
 0x223   : > { %v15157_v20 = vadd.f32 %v12711_v9, %v2329_v57  ;;  %12072 = vmatprep.subr.bf16.mxu1 %v14837_v55 }
 0x224   : > { %v15166_v8 = vadd.f32 %v12713_v34, %v2331_v60  ;;  %v1346_v53 = vpop.f32.mrb[24].mxu1  ;;  %v2343_v2 = vpop.f32.mrb[26].mxu0 }
 0x225   : > { %v12715_v28 = vadd.f32 %v1346_v53, %v15058_v21  ;;  %v1348_v29 = vpop.f32.mrb[25].mxu1  ;;  %11303 = vmatmul.mubr.f32.gmra.mrb[66].mxu1 %v14059_v61  ;;  %v2345_v54 = vpop.f32.mrb[27].mxu0 }
 0x226   : > { %20282 = vst [vmem:[#allocation68_spill] sm:$0xff] %v15166_v8  ;;  %v12717_v57 = vadd.f32 %v1348_v29, %v15062_v18  ;;  %11305 = vmatprep.mubr.f32.mxu1 %v14069_v3  ;;  %12074 = vmatpush3.bf16.msra.mxu1 %v14837_v55 }
 0x227   : > { %v15173_v11 = vadd.f32 %v12715_v28, %v2336_v6  ;;  %12076 = vmatprep.subr.bf16.mxu1 %v15164_v37 }
 0x228   : > { %v15176_v47 = vadd.f32 %v12717_v57, %v2338_v50  ;;  %v1354_v34 = vpop.f32.mrb[26].mxu1  ;;  %v2350_v60 = vpop.f32.mrb[28].mxu0 }
 0x229   : > { %v12719_v9 = vadd.f32 %v1354_v34, %v15058_v21  ;;  %v1356_v48 = vpop.f32.mrb[27].mxu1  ;;  %11306 = vmatmul.mubr.f32.gmra.mrb[68].mxu1 %v14102_v33  ;;  %v2352_v61 = vpop.f32.mrb[29].mxu0 }
 0x22a   : > { %20283 = vst [vmem:[#allocation70_spill] sm:$0xff] %v15176_v47  ;;  %v12721_v63 = vadd.f32 %v1356_v48, %v15062_v18  ;;  %11308 = vmatprep.mubr.f32.mxu1 %v14115_v12 }
 0x22b   : > { %v15182_v3 = vadd.f32 %v12719_v9, %v2343_v2 }
 0x22c   : > { %v15184_v6 = vadd.f32 %v12721_v63, %v2345_v54  ;;  %v1362_v53 = vpop.f32.mrb[28].mxu1  ;;  %v2357_v28 = vpop.f32.mrb[30].mxu0  ;;  %v20286_v63 = vld [vmem:[#allocation20_spill] sm:$0xff] }
 0x22d   : > { %v12723_v50 = vadd.f32 %v1362_v53, %v15058_v21  ;;  %v1364_v29 = vpop.f32.mrb[29].mxu1  ;;  %11309 = vmatmul.mubr.f32.gmra.mrb[70].mxu1 %v14155_v22  ;;  %v2359_v57 = vpop.f32.mrb[31].mxu0  ;;  %v20287_v22 = vld [vmem:[#allocation21_spill] sm:$0xff] }
 0x22e   : > { %20284 = vst [vmem:[#allocation73_spill] sm:$0xff] %v15184_v6  ;;  %v12725_v34 = vadd.f32 %v1364_v29, %v15062_v18  ;;  %11311 = vmatprep.mubr.f32.mxu1 %v14185_v42 }
 0x22f   : > { %v15190_v33 = vadd.f32 %v12723_v50, %v2350_v60 }
 0x230   : > { %v15192_v48 = vadd.f32 %v12725_v34, %v2352_v61  ;;  %v1370_v12 = vpop.f32.mrb[30].mxu1  ;;  %v2364_v2 = vpop.f32.mrb[32].mxu0  ;;  %v20289_v34 = vld [vmem:[#allocation27_spill] sm:$0xff] }
 0x231   : > { %v12727_v54 = vadd.f32 %v1370_v12, %v15058_v21  ;;  %v1372_v9 = vpop.f32.mrb[31].mxu1  ;;  %11312 = vmatmul.mubr.f32.gmra.mrb[72].mxu1 %v20286_v63  ;;  %v2366_v53 = vpop.f32.mrb[33].mxu0  ;;  %v20290_v63 = vld [vmem:[#allocation28_spill] sm:$0xff] }
 0x232   : > { %20285 = vst [vmem:[#allocation77_spill] sm:$0xff] %v15192_v48  ;;  %v12729_v6 = vadd.f32 %v1372_v9, %v15062_v18  ;;  %11314 = vmatprep.mubr.f32.mxu1 %v20287_v22  ;;  %v20293_v22 = vld [vmem:[#allocation32_spill] sm:$0xff] }
 0x233   : > { %v15198_v47 = vadd.f32 %v12727_v54, %v2357_v28 }
 0x234   : > { %v15200_v29 = vadd.f32 %v12729_v6, %v2359_v57  ;;  %v1378_v42 = vpop.f32.mrb[32].mxu1  ;;  %v2371_v60 = vpop.f32.mrb[34].mxu0 }
 0x235   : > { %v12731_v61 = vadd.f32 %v1378_v42, %v15058_v21  ;;  %v1380_v50 = vpop.f32.mrb[33].mxu1  ;;  %11315 = vmatmul.mubr.f32.gmra.mrb[74].mxu1 %v20289_v34  ;;  %v2373_v12 = vpop.f32.mrb[35].mxu0  ;;  %v20294_v34 = vld [vmem:[#allocation35_spill] sm:$0xff] }
 0x236   : > { %20288 = vst [vmem:[#allocation82_spill] sm:$0xff] %v15200_v29  ;;  %v12733_v48 = vadd.f32 %v1380_v50, %v15062_v18  ;;  %11317 = vmatprep.mubr.f32.mxu1 %v20290_v63  ;;  %v20297_v63 = vld [vmem:[#allocation37_spill] sm:$0xff] }
 0x237   : > { %v15206_v8 = vadd.f32 %v12731_v61, %v2364_v2 }
 0x238   : > { %v15208_v9 = vadd.f32 %v12733_v48, %v2366_v53  ;;  %v1386_v28 = vpop.f32.mrb[34].mxu1  ;;  %v2378_v54 = vpop.f32.mrb[36].mxu0 }
 0x239   : > { %20291 = vst [vmem:[#allocation86_spill] sm:$0xff] %v15206_v8  ;;  %v12735_v6 = vadd.f32 %v1386_v28, %v15058_v21  ;;  %v1388_v57 = vpop.f32.mrb[35].mxu1  ;;  %11318 = vmatmul.mubr.f32.gmra.mrb[76].mxu1 %v20293_v22  ;;  %v2380_v42 = vpop.f32.mrb[37].mxu0  ;;  %v20298_v22 = vld [vmem:[#allocation42_spill] sm:$0xff] }
 0x23a   : > { %20292 = vst [vmem:[#allocation87_spill] sm:$0xff] %v15208_v9  ;;  %v12737_v29 = vadd.f32 %v1388_v57, %v15062_v18  ;;  %11320 = vmatprep.mubr.f32.mxu1 %v20294_v34  ;;  %v20301_v34 = vld [vmem:[#allocation45_spill] sm:$0xff] }
 0x23b   : > { %v15214_v25 = vadd.f32 %v12735_v6, %v2371_v60 }
 0x23c   : > { %v15216_v50 = vadd.f32 %v12737_v29, %v2373_v12  ;;  %v1394_v2 = vpop.f32.mrb[36].mxu1  ;;  %v2385_v61 = vpop.f32.mrb[38].mxu0 }
 0x23d   : > { %20295 = vst [vmem:[#allocation20_spill] sm:$0xff] %v15214_v25  ;;  %v12739_v48 = vadd.f32 %v1394_v2, %v15058_v21  ;;  %v1396_v53 = vpop.f32.mrb[37].mxu1  ;;  %11321 = vmatmul.mubr.f32.gmra.mrb[78].mxu1 %v20297_v63  ;;  %v2387_v28 = vpop.f32.mrb[39].mxu0  ;;  %v20302_v63 = vld [vmem:[#allocation48_spill] sm:$0xff] }
 0x23e   : > { %20296 = vst [vmem:[#allocation21_spill] sm:$0xff] %v15216_v50  ;;  %v12741_v9 = vadd.f32 %v1396_v53, %v15062_v18  ;;  %11323 = vmatprep.mubr.f32.mxu1 %v20298_v22  ;;  %v20305_v22 = vld [vmem:[#allocation51_spill] sm:$0xff] }
 0x23f   : > { %v15222_v8 = vadd.f32 %v12739_v48, %v2378_v54 }
 0x240   : > { %v15224_v57 = vadd.f32 %v12741_v9, %v2380_v42  ;;  %v1402_v60 = vpop.f32.mrb[38].mxu1  ;;  %v2392_v6 = vpop.f32.mrb[40].mxu0 }
 0x241   : > { %20299 = vst [vmem:[#allocation27_spill] sm:$0xff] %v15222_v8  ;;  %v12743_v29 = vadd.f32 %v1402_v60, %v15058_v21  ;;  %v1404_v12 = vpop.f32.mrb[39].mxu1  ;;  %11324 = vmatmul.mubr.f32.gmra.mrb[80].mxu1 %v20301_v34  ;;  %v2394_v2 = vpop.f32.mrb[41].mxu0  ;;  %v20306_v34 = vld [vmem:[#allocation52_spill] sm:$0xff] }
 0x242   : > { %20300 = vst [vmem:[#allocation28_spill] sm:$0xff] %v15224_v57  ;;  %v12745_v50 = vadd.f32 %v1404_v12, %v15062_v18  ;;  %11326 = vmatprep.mubr.f32.mxu1 %v20302_v63  ;;  %v20309_v63 = vld [vmem:[#allocation55_spill] sm:$0xff] }
 0x243   : > { %v15230_v25 = vadd.f32 %v12743_v29, %v2385_v61 }
 0x244   : > { %v15232_v53 = vadd.f32 %v12745_v50, %v2387_v28  ;;  %v1410_v54 = vpop.f32.mrb[40].mxu1  ;;  %v2399_v48 = vpop.f32.mrb[42].mxu0 }
 0x245   : > { %20303 = vst [vmem:[#allocation32_spill] sm:$0xff] %v15230_v25  ;;  %v12747_v9 = vadd.f32 %v1410_v54, %v15058_v21  ;;  %v1412_v42 = vpop.f32.mrb[41].mxu1  ;;  %11327 = vmatmul.mubr.f32.gmra.mrb[82].mxu1 %v20305_v22  ;;  %v2401_v60 = vpop.f32.mrb[43].mxu0  ;;  %v20310_v22 = vld [vmem:[#allocation60_spill] sm:$0xff] }
 0x246   : > { %20304 = vst [vmem:[#allocation35_spill] sm:$0xff] %v15232_v53  ;;  %v12749_v57 = vadd.f32 %v1412_v42, %v15062_v18  ;;  %11329 = vmatprep.mubr.f32.mxu1 %v20306_v34  ;;  %v20313_v34 = vld [vmem:[#allocation63_spill] sm:$0xff] }
 0x247   : > { %v15238_v8 = vadd.f32 %v12747_v9, %v2392_v6 }
 0x248   : > { %v15240_v12 = vadd.f32 %v12749_v57, %v2394_v2  ;;  %v1418_v61 = vpop.f32.mrb[42].mxu1  ;;  %v2406_v29 = vpop.f32.mrb[44].mxu0 }
 0x249   : > { %20307 = vst [vmem:[#allocation37_spill] sm:$0xff] %v15238_v8  ;;  %v12751_v50 = vadd.f32 %v1418_v61, %v15058_v21  ;;  %v1420_v28 = vpop.f32.mrb[43].mxu1  ;;  %11330 = vmatmul.mubr.f32.gmra.mrb[84].mxu1 %v20309_v63  ;;  %v2408_v54 = vpop.f32.mrb[45].mxu0  ;;  %v20314_v63 = vld [vmem:[#allocation65_spill] sm:$0xff] }
 0x24a   : > { %20308 = vst [vmem:[#allocation42_spill] sm:$0xff] %v15240_v12  ;;  %v12753_v53 = vadd.f32 %v1420_v28, %v15062_v18  ;;  %11332 = vmatprep.mubr.f32.mxu1 %v20310_v22  ;;  %v20317_v22 = vld [vmem:[#allocation69_spill] sm:$0xff] }
 0x24b   : > { %v15246_v25 = vadd.f32 %v12751_v50, %v2399_v48 }
 0x24c   : > { %v15248_v42 = vadd.f32 %v12753_v53, %v2401_v60  ;;  %v1426_v6 = vpop.f32.mrb[44].mxu1  ;;  %v2413_v9 = vpop.f32.mrb[46].mxu0 }
 0x24d   : > { %20311 = vst [vmem:[#allocation45_spill] sm:$0xff] %v15246_v25  ;;  %v12755_v57 = vadd.f32 %v1426_v6, %v15058_v21  ;;  %v1428_v2 = vpop.f32.mrb[45].mxu1  ;;  %11333 = vmatmul.mubr.f32.gmra.mrb[86].mxu1 %v20313_v34  ;;  %v2415_v61 = vpop.f32.mrb[47].mxu0  ;;  %v20318_v34 = vld [vmem:[#allocation72_spill] sm:$0xff] }
 0x24e   : > { %20312 = vst [vmem:[#allocation48_spill] sm:$0xff] %v15248_v42  ;;  %v12757_v12 = vadd.f32 %v1428_v2, %v15062_v18  ;;  %11335 = vmatprep.mubr.f32.mxu1 %v20314_v63  ;;  %v20321_v63 = vld [vmem:[#allocation75_spill] sm:$0xff] }
 0x24f   : > { %v15254_v8 = vadd.f32 %v12755_v57, %v2406_v29 }
 0x250   : > { %v15256_v28 = vadd.f32 %v12757_v12, %v2408_v54  ;;  %v1434_v48 = vpop.f32.mrb[46].mxu1  ;;  %v2420_v50 = vpop.f32.mrb[48].mxu0 }
 0x251   : > { %20315 = vst [vmem:[#allocation51_spill] sm:$0xff] %v15254_v8  ;;  %v12759_v53 = vadd.f32 %v1434_v48, %v15058_v21  ;;  %v1436_v60 = vpop.f32.mrb[47].mxu1  ;;  %11336 = vmatmul.mubr.f32.gmra.mrb[88].mxu1 %v20317_v22  ;;  %v2422_v6 = vpop.f32.mrb[49].mxu0  ;;  %v20322_v22 = vld [vmem:[#allocation76_spill] sm:$0xff] }
 0x252   : > { %20316 = vst [vmem:[#allocation52_spill] sm:$0xff] %v15256_v28  ;;  %v12761_v42 = vadd.f32 %v1436_v60, %v15062_v18  ;;  %11338 = vmatprep.mubr.f32.mxu1 %v20318_v34  ;;  %v20325_v34 = vld [vmem:[#allocation80_spill] sm:$0xff] }
 0x253   : > { %v15262_v25 = vadd.f32 %v12759_v53, %v2413_v9 }
 0x254   : > { %v15264_v2 = vadd.f32 %v12761_v42, %v2415_v61  ;;  %v1442_v29 = vpop.f32.mrb[48].mxu1  ;;  %v2427_v57 = vpop.f32.mrb[50].mxu0 }
 0x255   : > { %20319 = vst [vmem:[#allocation55_spill] sm:$0xff] %v15262_v25  ;;  %v12763_v12 = vadd.f32 %v1442_v29, %v15058_v21  ;;  %v1444_v54 = vpop.f32.mrb[49].mxu1  ;;  %11339 = vmatmul.mubr.f32.gmra.mrb[90].mxu1 %v20321_v63  ;;  %v2429_v48 = vpop.f32.mrb[51].mxu0  ;;  %v20326_v63 = vld [vmem:[#allocation81_spill] sm:$0xff] }
 0x256   : > { %20320 = vst [vmem:[#allocation60_spill] sm:$0xff] %v15264_v2  ;;  %v12765_v28 = vadd.f32 %v1444_v54, %v15062_v18  ;;  %11341 = vmatprep.mubr.f32.mxu1 %v20322_v22 }
 0x257   : > { %v15270_v8 = vadd.f32 %v12763_v12, %v2420_v50 }
 0x258   : > { %v15272_v60 = vadd.f32 %v12765_v28, %v2422_v6  ;;  %v1450_v9 = vpop.f32.mrb[50].mxu1  ;;  %v2434_v53 = vpop.f32.mrb[52].mxu0 }
 0x259   : > { %20323 = vst [vmem:[#allocation63_spill] sm:$0xff] %v15270_v8  ;;  %v12767_v42 = vadd.f32 %v1450_v9, %v15058_v21  ;;  %v1452_v61 = vpop.f32.mrb[51].mxu1  ;;  %11342 = vmatmul.mubr.f32.gmra.mrb[92].mxu1 %v20325_v34  ;;  %v2436_v29 = vpop.f32.mrb[53].mxu0  ;;  %v20329_v34 = vld [vmem:[#allocation3_spill] sm:$0xff] }
 0x25a   : > { %20324 = vst [vmem:[#allocation65_spill] sm:$0xff] %v15272_v60  ;;  %v12769_v2 = vadd.f32 %v1452_v61, %v15062_v18  ;;  %11344 = vmatprep.mubr.f32.mxu1 %v20326_v63  ;;  %v20331_v61 = vand.u32 4294901760, %v14972_v59 }
 0x25b   : > { %v15278_v25 = vadd.f32 %v12767_v42, %v2427_v57  ;;  %v20332_v57 = vand.u32 4294901760, %v14977_v30 }
 0x25c   : > { %v15280_v54 = vadd.f32 %v12769_v2, %v2429_v48  ;;  %v1458_v50 = vpop.f32.mrb[52].mxu1  ;;  %v2441_v12 = vpop.f32.mrb[54].mxu0 }
 0x25d   : > { %20327 = vst [vmem:[#allocation69_spill] sm:$0xff] %v15278_v25  ;;  %v12771_v28 = vadd.f32 %v1458_v50, %v15058_v21  ;;  %v1460_v6 = vpop.f32.mrb[53].mxu1  ;;  %11345 = vmatmul.mubr.f32.gmra.mrb[94].mxu1 %v14620_v5  ;;  %v2443_v22 = vpop.f32.mrb[55].mxu0  ;;  %v12079_v2 = vpack.c.bf16 %v20332_v57, %v20331_v61  ;;  %v20334_v5 = vld [vmem:[#allocation4_spill] sm:$0xff] }
 0x25e   : > { %20328 = vst [vmem:[#allocation72_spill] sm:$0xff] %v15280_v54  ;;  %v12773_v9 = vadd.f32 %v1460_v6, %v15062_v18  ;;  %11355 = vmatprep.mubr.f32.mxu1 %v20329_v34  ;;  %v20338_v61 = vld [vmem:[#allocation8_spill] sm:$0xff] }
 0x25f   : > { %v15286_v60 = vadd.f32 %v12771_v28, %v2434_v53  ;;  %v20335_v53 = vld [vmem:[#allocation5_spill] sm:$0xff] }
 0x260   : > { %v15292_v48 = vadd.f32 %v12773_v9, %v2436_v29  ;;  %v1466_v42 = vpop.f32.mrb[54].mxu1  ;;  %v2448_v63 = vpop.f32.mrb[56].mxu0 }
 0x261   : > { %20330 = vst [vmem:[#allocation75_spill] sm:$0xff] %v15286_v60  ;;  %v12775_v50 = vadd.f32 %v1466_v42, %v15058_v21  ;;  %v1468_v54 = vpop.f32.mrb[55].mxu1  ;;  %11356 = vmatmul.mubr.f32.vlgmr.msra.gmra.mrb[64].mxu1 %v20334_v5  ;;  %v2450_v8 = vpop.f32.mrb[57].mxu0 }
 0x262   : > { %20333 = vst [vmem:[#allocation76_spill] sm:$0xff] %v15292_v48  ;;  %v12777_v6 = vadd.f32 %v1468_v54, %v15062_v18  ;;  %12078 = vmatpush3.bf16.msra.mxu1 %v15164_v37  ;;  %11358 = vmatprep.mubr.f32.mxu1 %v20335_v53  ;;  %v20339_v54 = vld [vmem:[#allocation9_spill] sm:$0xff]  ;;  %v20342_v53 = vld [vmem:[#allocation11_spill] sm:$0xff] }
 0x263   : > { %v15299_v59 = vadd.f32 %v12775_v50, %v2441_v12  ;;  %12080 = vmatprep.subr.bf16.mxu1 %v12079_v2 }
 0x264   : > { %v15301_v30 = vadd.f32 %v12777_v6, %v2443_v22  ;;  %v1474_v29 = vpop.f32.mrb[56].mxu1  ;;  %v2455_v28 = vpop.f32.mrb[58].mxu0 }
 0x265   : > { %20336 = vst [vmem:[#allocation80_spill] sm:$0xff] %v15299_v59  ;;  %v12779_v9 = vadd.f32 %v1474_v29, %v15058_v21  ;;  %v1476_v34 = vpop.f32.mrb[57].mxu1  ;;  %11359 = vmatmul.mubr.f32.gmra.mrb[66].mxu1 %v20338_v61  ;;  %v2457_v57 = vpop.f32.mrb[59].mxu0  ;;  %v20393_v59 = vld [vmem:[#allocation14_spill] sm:$0xff] }
 0x266   : > { %20337 = vst [vmem:[#allocation81_spill] sm:$0xff] %v15301_v30  ;;  %v12781_v42 = vadd.f32 %v1476_v34, %v15062_v18  ;;  %11361 = vmatprep.mubr.f32.mxu1 %v20339_v54  ;;  %12082 = vmatpush3.bf16.msra.mxu1 %v12079_v2  ;;  %v20343_v34 = vld [vmem:[#allocation13_spill] sm:$0xff] }
 0x267   : > { %v15307_v37 = vadd.f32 %v12779_v9, %v2448_v63  ;;  %12084 = vmatprep.subr.bf16.mxu1 %v14681_v19 }
 0x268   : > { %v15310_v12 = vadd.f32 %v12781_v42, %v2450_v8  ;;  %v1482_v22 = vpop.f32.mrb[58].mxu1  ;;  %v2462_v50 = vpop.f32.mrb[60].mxu0 }
 0x269   : > { %20340 = vst [vmem:[#allocation3_spill] sm:$0xff] %v15307_v37  ;;  %v12783_v5 = vadd.f32 %v1482_v22, %v15058_v21  ;;  %v1484_v6 = vpop.f32.mrb[59].mxu1  ;;  %11362 = vmatmul.mubr.f32.gmra.mrb[68].mxu1 %v20342_v53  ;;  %v2464_v29 = vpop.f32.mrb[61].mxu0  ;;  %v20347_v53 = vld [vmem:[#allocation19_spill] sm:$0xff] }
 0x26a   : > { %20341 = vst [vmem:[#allocation4_spill] sm:$0xff] %v15310_v12  ;;  %v12785_v61 = vadd.f32 %v1484_v6, %v15062_v18  ;;  %11364 = vmatprep.mubr.f32.mxu1 %v20343_v34  ;;  %v20346_v12 = vld [vmem:[#allocation15_spill] sm:$0xff] }
 0x26b   : > { %v15316_v54 = vadd.f32 %v12783_v5, %v2455_v28 }
 0x26c   : > { %v15318_v2 = vadd.f32 %v12785_v61, %v2457_v57  ;;  %v1490_v63 = vpop.f32.mrb[60].mxu1  ;;  %v2469_v9 = vpop.f32.mrb[62].mxu0  ;;  %v20350_v61 = vld [vmem:[#allocation24_spill] sm:$0xff] }
 0x26d   : > { %20344 = vst [vmem:[#allocation5_spill] sm:$0xff] %v15316_v54  ;;  %v12787_v8 = vadd.f32 %v1490_v63, %v15058_v21  ;;  %v1492_v42 = vpop.f32.mrb[61].mxu1  ;;  %11365 = vmatmul.mubr.f32.gmra.mrb[70].mxu1 %v20346_v12  ;;  %v2471_v22 = vpop.f32.mrb[63].mxu0  ;;  %v20351_v63 = vld [vmem:[#allocation26_spill] sm:$0xff] }
 0x26e   : > { %20345 = vst [vmem:[#allocation8_spill] sm:$0xff] %v15318_v2  ;;  %v12789_v30 = vadd.f32 %v1492_v42, %v15062_v18  ;;  %11367 = vmatprep.mubr.f32.mxu1 %v20347_v53  ;;  %v20354_v42 = vld [vmem:[#allocation30_spill] sm:$0xff]  ;;  %v20360_v53 = vld [vmem:[#allocation47_spill] sm:$0xff] }
 0x26f   : > { %v15324_v48 = vadd.f32 %v12787_v8, %v2462_v50  ;;  %v20355_v50 = vld [vmem:[#allocation31_spill] sm:$0xff]  ;;  %v20359_v8 = vld [vmem:[#allocation44_spill] sm:$0xff] }
 0x270   : > { %v15326_v6 = vadd.f32 %v12789_v30, %v2464_v29  ;;  %v1498_v28 = vpop.f32.mrb[62].mxu1  ;;  %v20356_v30 = vld [vmem:[#allocation34_spill] sm:$0xff]  ;;  %v20357_v29 = vld [vmem:[#allocation39_spill] sm:$0xff] }
 0x271   : > { %20348 = vst [vmem:[#allocation9_spill] sm:$0xff] %v15324_v48  ;;  %v12791_v57 = vadd.f32 %v1498_v28, %v15058_v21  ;;  %v1500_v5 = vpop.f32.mrb[63].mxu1  ;;  %11368 = vmatmul.mubr.f32.gmra.mrb[72].mxu1 %v20350_v61  ;;  %v20358_v21 = vld [vmem:[#allocation40_spill] sm:$0xff]  ;;  %v20364_v28 = vld [vmem:[#allocation58_spill] sm:$0xff]  ;;  %v20367_v61 = vld [vmem:[#allocation67_spill] sm:$0xff] }
 0x272   : > { %20349 = vst [vmem:[#allocation11_spill] sm:$0xff] %v15326_v6  ;;  %v12793_v34 = vadd.f32 %v1500_v5, %v15062_v18  ;;  %11370 = vmatprep.mubr.f32.mxu1 %v20351_v63  ;;  %v20361_v18 = vld [vmem:[#allocation50_spill] sm:$0xff] }
 0x273   : > { %v15332_v12 = vadd.f32 %v12791_v57, %v2469_v9  ;;  %v20362_v9 = vld [vmem:[#allocation54_spill] sm:$0xff] }
 0x274   : > { %v15334_v2 = vadd.f32 %v12793_v34, %v2471_v22  ;;  %v20363_v22 = vld [vmem:[#allocation57_spill] sm:$0xff]  ;;  %v20365_v57 = vld [vmem:[#allocation62_spill] sm:$0xff]  ;;  %v20368_v34 = vld [vmem:[#allocation71_spill] sm:$0xff] }
 0x275   : > { %20352 = vst [vmem:[#allocation13_spill] sm:$0xff] %v15332_v12  ;;  %11371 = vmatmul.mubr.f32.gmra.mrb[74].mxu1 %v20354_v42  ;;  %v20366_v5 = vld [vmem:[#allocation66_spill] sm:$0xff] }
 0x276   : > { %20353 = vst [vmem:[#allocation15_spill] sm:$0xff] %v15334_v2  ;;  %11373 = vmatprep.mubr.f32.mxu1 %v20355_v50  ;;  %v20369_v63 = vld [vmem:[#allocation74_spill] sm:$0xff]  ;;  %v20371_v50 = vld [vmem:[#allocation79_spill] sm:$0xff] }
 0x277   : > { %v20370_v42 = vld [vmem:[#allocation78_spill] sm:$0xff] }
 0x279   : > { %11374 = vmatmul.mubr.f32.gmra.mrb[76].mxu1 %v20356_v30  ;;  %v20372_v30 = vld [vmem:[#allocation83_spill] sm:$0xff] }
 0x27a   : > { %11376 = vmatprep.mubr.f32.mxu1 %v20357_v29  ;;  %v20373_v29 = vld [vmem:[#allocation84_spill] sm:$0xff] }
 0x27d   : > { %11377 = vmatmul.mubr.f32.gmra.mrb[78].mxu1 %v20358_v21  ;;  %v20374_v21 = vld [vmem:[#allocation85_spill] sm:$0xff] }
 0x27e   : > { %11379 = vmatprep.mubr.f32.mxu1 %v20359_v8  ;;  %v20376_v8 = vld [vmem:[#allocation22_spill] sm:$0xff] }
 0x281   : > { %11380 = vmatmul.mubr.f32.gmra.mrb[80].mxu1 %v20360_v53 }
 0x282   : > { %11382 = vmatprep.mubr.f32.mxu1 %v20361_v18 }
 0x285   : > { %11383 = vmatmul.mubr.f32.gmra.mrb[82].mxu1 %v20362_v9 }
 0x286   : > { %11385 = vmatprep.mubr.f32.mxu1 %v20363_v22 }
 0x289   : > { %11386 = vmatmul.mubr.f32.gmra.mrb[84].mxu1 %v20364_v28  ;;  %v15549_v28 = vld [vmem:[%s19226_s3 + $0x60] sm:$0xff] }
 0x28a   : > { %11388 = vmatprep.mubr.f32.mxu1 %v20365_v57  ;;  %v15554_v57 = vld [vmem:[%s19226_s3 + $0x68] sm:$0xff] }
 0x28d   : > { %11389 = vmatmul.mubr.f32.gmra.mrb[86].mxu1 %v20366_v5 }
 0x28e   : > { %11391 = vmatprep.mubr.f32.mxu1 %v20367_v61 }
 0x291   : > { %11392 = vmatmul.mubr.f32.gmra.mrb[88].mxu1 %v20368_v34  ;;  %v19357_v34 = vand.u32 4294901760, %v15549_v28 }
 0x292   : > { %11394 = vmatprep.mubr.f32.mxu1 %v20369_v63  ;;  %v19356_v63 = vand.u32 4294901760, %v15554_v57 }
 0x295   : > { %11395 = vmatmul.mubr.f32.gmra.mrb[90].mxu1 %v20370_v42  ;;  %v15571_v42 = vpack.c.bf16 %v19356_v63, %v19357_v34 }
 0x296   : > { %11397 = vmatprep.mubr.f32.mxu1 %v20371_v50 }
 0x297   : > { %20385 = vst [vmem:[#allocation39_spill] sm:$0xff] %v15571_v42 }
 0x299   : > { %11398 = vmatmul.mubr.f32.gmra.mrb[92].mxu1 %v20372_v30  ;;  %v15576_v30 = vld [vmem:[%s19226_s3 + $0x70] sm:$0xff] }
 0x29a   : > { %11400 = vmatprep.mubr.f32.mxu1 %v20373_v29  ;;  %v15581_v29 = vld [vmem:[%s19226_s3 + $0x78] sm:$0xff] }
 0x29d   : > { %11401 = vmatmul.mubr.f32.gmra.mrb[94].mxu1 %v20374_v21 }
 0x29e   : > { %11411 = vmatprep.mubr.f32.mxu1 %v14024_v43 }
 0x2a1   : > { %11412 = vmatmul.mubr.f32.vlgmr.msra.gmra.mrb[64].mxu1 %v14026_v44 }
 0x2a2   : > { %12086 = vmatpush3.bf16.msra.mxu1 %v14681_v19  ;;  %11414 = vmatprep.mubr.f32.mxu1 %v14028_v45  ;;  %v20375_v19 = vld [vmem:[#allocation17_spill] sm:$0xff] }
 0x2a3   : > { %12088 = vmatprep.subr.bf16.mxu1 %v14837_v55 }
 0x2a5   : > { %11415 = vmatmul.mubr.f32.gmra.mrb[66].mxu1 %v14034_v49 }
 0x2a6   : > { %11417 = vmatprep.mubr.f32.mxu1 %v14050_v58  ;;  %12090 = vmatpush3.bf16.msra.mxu1 %v14837_v55 }
 0x2a9   : > { %11418 = vmatmul.mubr.f32.gmra.mrb[68].mxu1 %v14071_v4 }
 0x2aa   : > { %11420 = vmatprep.mubr.f32.mxu1 %v14091_v7 }
 0x2ad   : > { %11421 = vmatmul.mubr.f32.gmra.mrb[70].mxu1 %v14123_v40 }
 0x2ae   : > { %11423 = vmatprep.mubr.f32.mxu1 %v14159_v62 }
 0x2b1   : > { %11424 = vmatmul.mubr.f32.gmra.mrb[72].mxu1 %v14174_v35 }
 0x2b2   : > { %11426 = vmatprep.mubr.f32.mxu1 %v20375_v19 }
 0x2b5   : > { %11427 = vmatmul.mubr.f32.gmra.mrb[74].mxu1 %v20376_v8 }
 0x2b6   : > { %11429 = vmatprep.mubr.f32.mxu1 %v14230_v51 }
 0x2b9   : > { %11430 = vmatmul.mubr.f32.gmra.mrb[76].mxu1 %v14251_v31 }
 0x2ba   : > { %11432 = vmatprep.mubr.f32.mxu1 %v14272_v26 }
 0x2bd   : > { %11433 = vmatmul.mubr.f32.gmra.mrb[78].mxu1 %v14304_v0 }
 0x2be   : > { %11435 = vmatprep.mubr.f32.mxu1 %v14334_v39 }
 0x2c1   : > { %11436 = vmatmul.mubr.f32.gmra.mrb[80].mxu1 %v14353_v1 }
 0x2c2   : > { %11438 = vmatprep.mubr.f32.mxu1 %v14371_v17 }
 0x2c5   : > { %11439 = vmatmul.mubr.f32.gmra.mrb[82].mxu1 %v14390_v41 }
 0x2c6   : > { %11441 = vmatprep.mubr.f32.mxu1 %v14395_v38 }
 0x2c9   : > { %11442 = vmatmul.mubr.f32.gmra.mrb[84].mxu1 %v14416_v36 }
 0x2ca   : > { %11444 = vmatprep.mubr.f32.mxu1 %v14445_v52 }
 0x2cd   : > { %11445 = vmatmul.mubr.f32.gmra.mrb[86].mxu1 %v14464_v16 }
 0x2ce   : > { %11447 = vmatprep.mubr.f32.mxu1 %v14471_v32 }
 0x2d1   : > { %11448 = vmatmul.mubr.f32.gmra.mrb[88].mxu1 %v14499_v23 }
 0x2d2   : > { %11450 = vmatprep.mubr.f32.mxu1 %v14508_v56 }
 0x2d5   : > { %11451 = vmatmul.mubr.f32.gmra.mrb[90].mxu1 %v14523_v24 }
 0x2d6   : > { %11453 = vmatprep.mubr.f32.mxu1 %v14541_v10 }
 0x2d9   : > { %11454 = vmatmul.mubr.f32.gmra.mrb[92].mxu1 %v14572_v46 }
 0x2da   : > { %11456 = vmatprep.mubr.f32.mxu1 %v14577_v14 }
 0x2dd   : > { %11457 = vmatmul.mubr.f32.gmra.mrb[94].mxu1 %v14606_v15 }
 0x2de   : > { %11467 = vmatprep.mubr.f32.mxu1 %v14024_v43  ;;  %v15432_v43 = vld [vmem:[%s19226_s3 + $0x8] sm:$0xff] }
 0x2e1   : > { %11468 = vmatmul.mubr.f32.vlgmr.msra.gmra.mrb[64].mxu1 %v14026_v44  ;;  %v19370_v44 = vand.u32 4294901760, %v15432_v43 }
 0x2e2   : > { %11470 = vmatprep.mubr.f32.mxu1 %v14028_v45 }
 0x2e5   : > { %11471 = vmatmul.mubr.f32.gmra.mrb[66].mxu1 %v14034_v49  ;;  %v15445_v49 = vld [vmem:[%s19226_s3 + $0x10] sm:$0xff] }
 0x2e6   : > { %11473 = vmatprep.mubr.f32.mxu1 %v14050_v58  ;;  %v15450_v58 = vld [vmem:[%s19226_s3 + $0x18] sm:$0xff] }
 0x2e9   : > { %11474 = vmatmul.mubr.f32.gmra.mrb[68].mxu1 %v14071_v4  ;;  %v19369_v4 = vand.u32 4294901760, %v15445_v49 }
 0x2ea   : > { %11476 = vmatprep.mubr.f32.mxu1 %v14091_v7 }
 0x2ed   : > { %11477 = vmatmul.mubr.f32.gmra.mrb[70].mxu1 %v14123_v40  ;;  %v15465_v40 = vld [vmem:[%s19226_s3 + $0x20] sm:$0xff] }
 0x2ee   : > { %11479 = vmatprep.mubr.f32.mxu1 %v14159_v62 }
 0x2f1   : > { %11480 = vmatmul.mubr.f32.gmra.mrb[72].mxu1 %v14174_v35  ;;  %v15485_v35 = vld [vmem:[%s19226_s3 + $0x30] sm:$0xff] }
 0x2f2   : > { %11482 = vmatprep.mubr.f32.mxu1 %v20375_v19 }
 0x2f5   : > { %11483 = vmatmul.mubr.f32.gmra.mrb[74].mxu1 %v20376_v8  ;;  %v19360_v8 = vand.u32 4294901760, %v15576_v30 }
 0x2f6   : > { %11485 = vmatprep.mubr.f32.mxu1 %v14230_v51  ;;  %v19365_v51 = vand.u32 4294901760, %v15485_v35 }
 0x2f9   : > { %11486 = vmatmul.mubr.f32.gmra.mrb[76].mxu1 %v14251_v31 }
 0x2fa   : > { %11488 = vmatprep.mubr.f32.mxu1 %v14272_v26  ;;  %v15427_v26 = vld [vmem:[%s19226_s3] sm:$0xff] }
 0x2fd   : > { %11489 = vmatmul.mubr.f32.gmra.mrb[78].mxu1 %v14304_v0 }
 0x2fe   : > { %11491 = vmatprep.mubr.f32.mxu1 %v14334_v39  ;;  %v15510_v39 = vld [vmem:[%s19226_s3 + $0x48] sm:$0xff] }
 0x301   : > { %11492 = vmatmul.mubr.f32.gmra.mrb[80].mxu1 %v14353_v1  ;;  %v20381_v1 = vld [vmem:[#allocation6_spill] sm:$0xff] }
 0x302   : > { %11494 = vmatprep.mubr.f32.mxu1 %v14371_v17  ;;  %v15505_v17 = vld [vmem:[%s19226_s3 + $0x40] sm:$0xff] }
 0x305   : > { %11495 = vmatmul.mubr.f32.gmra.mrb[82].mxu1 %v14390_v41  ;;  %v15470_v41 = vld [vmem:[%s19226_s3 + $0x28] sm:$0xff] }
 0x306   : > { %11497 = vmatprep.mubr.f32.mxu1 %v14395_v38  ;;  %v19366_v62 = vand.u32 4294901760, %v15470_v41  ;;  %v19362_v38 = vand.u32 4294901760, %v15510_v39 }
 0x309   : > { %11498 = vmatmul.mubr.f32.gmra.mrb[84].mxu1 %v14416_v36  ;;  %v19363_v36 = vand.u32 4294901760, %v15505_v17 }
 0x30a   : > { %11500 = vmatprep.mubr.f32.mxu1 %v14445_v52  ;;  %v19367_v52 = vand.u32 4294901760, %v15465_v40 }
 0x30c   : > { %v15480_v31 = vpack.c.bf16 %v19366_v62, %v19367_v52 }
 0x30d   : > { %11501 = vmatmul.mubr.f32.gmra.mrb[86].mxu1 %v14464_v16 }
 0x30e   : > { %11503 = vmatprep.mubr.f32.mxu1 %v14471_v32  ;;  %20379 = vst [vmem:[#allocation26_spill] sm:$0xff] %v15480_v31  ;;  %v15526_v32 = vld [vmem:[%s19226_s3 + $0x50] sm:$0xff] }
 0x30f   : > { %v19361_v53 = vand.u32 4294901760, %v15526_v32 }
 0x311   : > { %11504 = vmatmul.mubr.f32.gmra.mrb[88].mxu1 %v14499_v23  ;;  %v310_v23 = vsub.s32 2, %v20381_v1 }
 0x312   : > { %11506 = vmatprep.mubr.f32.mxu1 %v14508_v56  ;;  %v15521_v56 = vpack.c.bf16 %v19362_v38, %v19363_v36 }
 0x314   : > { %20382 = vst [vmem:[#allocation31_spill] sm:$0xff] %v15521_v56 }
 0x315   : > { %11507 = vmatmul.mubr.f32.gmra.mrb[90].mxu1 %v14523_v24  ;;  %v19371_v24 = vand.u32 4294901760, %v15427_v26 }
 0x316   : > { %11509 = vmatprep.mubr.f32.mxu1 %v14541_v10  ;;  %v19368_v10 = vand.u32 4294901760, %v15450_v58 }
 0x317   : > { %v15440_v45 = vpack.c.bf16 %v19370_v44, %v19371_v24 }
 0x318   : > { %v15460_v7 = vpack.c.bf16 %v19368_v10, %v19369_v4 }
 0x319   : > { %11510 = vmatmul.mubr.f32.gmra.mrb[92].mxu1 %v14572_v46  ;;  %20377 = vst [vmem:[#allocation19_spill] sm:$0xff] %v15440_v45  ;;  %12092 = vmatprep.subr.bf16.mxu1 %v15440_v45  ;;  %v15490_v46 = vld [vmem:[%s19226_s3 + $0x38] sm:$0xff] }
 0x31a   : > { %11512 = vmatprep.mubr.f32.mxu1 %v14577_v14  ;;  %12094 = vmatpush3.bf16.msra.mxu1 %v15440_v45  ;;  %20378 = vst [vmem:[#allocation24_spill] sm:$0xff] %v15460_v7  ;;  %v19364_v0 = vand.u32 4294901760, %v15490_v46  ;;  %v20383_v14 = vld [vmem:[#allocation7_spill] sm:$0xff] }
 0x31b   : > { %12096 = vmatprep.subr.bf16.mxu1 %v15460_v7  ;;  %v15534_v55 = vrot.slane %v20383_v14, %v310_v23  ;;  %v19359_v23 = vand.u32 4294901760, %v15581_v29 }
 0x31c   : > { %v15500_v16 = vpack.c.bf16 %v19364_v0, %v19365_v51 }
 0x31d   : > { %11513 = vmatmul.mubr.f32.gmra.mrb[94].mxu1 %v14606_v15  ;;  %v15531_v15 = vld [vmem:[%s19226_s3 + $0x58] sm:$0xff]  ;;  %v15598_v14 = vpack.c.bf16 %v19359_v23, %v19360_v8 }
 0x31e   : > { %12098 = vmatpush3.bf16.msra.mxu1 %v15460_v7  ;;  %20380 = vst [vmem:[#allocation30_spill] sm:$0xff] %v15500_v16  ;;  %v19358_v18 = vand.u32 4294901760, %v15531_v15 }
 0x31f   : > { %12100 = vmatprep.subr.bf16.mxu1 %v15480_v31  ;;  %20386 = vst [vmem:[#allocation40_spill] sm:$0xff] %v15598_v14 }
 0x320   : > { %v15544_v9 = vpack.c.bf16 %v19358_v18, %v19361_v53 }
 0x322   : > { %12102 = vmatpush3.bf16.msra.mxu1 %v15480_v31  ;;  %20384 = vst [vmem:[#allocation34_spill] sm:$0xff] %v15544_v9 }
 0x323   : > { %12104 = vmatprep.subr.bf16.mxu1 %v15500_v16 }
 0x326   : > { %12106 = vmatpush3.bf16.msra.mxu1 %v15500_v16 }
 0x327   : > { %12108 = vmatprep.subr.bf16.mxu1 %v15521_v56 }
 0x32a   : > { %12110 = vmatpush3.bf16.msra.mxu1 %v15521_v56 }
 0x32b   : > { %12112 = vmatprep.subr.bf16.mxu1 %v15544_v9 }
 0x32e   : > { %12114 = vmatpush3.bf16.msra.mxu1 %v15544_v9 }
 0x32f   : > { %12116 = vmatprep.subr.bf16.mxu1 %v15571_v42 }
 0x332   : > { %12118 = vmatpush3.bf16.msra.mxu1 %v15571_v42 }
 0x333   : > { %12120 = vmatprep.subr.bf16.mxu1 %v15598_v14 }
 0x336   : > { %12122 = vmatpush3.bf16.msra.mxu1 %v15598_v14 }
 0x3b4   : > { %v11469_v22 = vpop.f32.mrb[64].mxu1 }
 0x3b5   : > { %v15557_v5 = vadd.f32 %v11469_v22, %v15534_v55  ;;  %v4102_v61 = vpop.f32.mrb[65].mxu1 }
 0x3b6   : > { %v15584_v21 = vadd.f32 %v4102_v61, %v15534_v55 }
 0x3b7   : > { %4422 = vrot.lane.b32.xlu1 %v15557_v5, %s13873_s13  ;;  %4326 = vrot.lane.b32.xlu0 %v15557_v5, %s13874_s14 }
 0x3b8   : > { %v11472_v50 = vpop.f32.mrb[66].mxu1 }
 0x3b9   : > { %v4114_v19 = vpop.f32.mrb[67].mxu1  ;;  %v15607_v34 = vadd.f32 %v11472_v50, %v15534_v55 }
 0x3ba   : > { %v15610_v18 = vadd.f32 %v4114_v19, %v15534_v55 }
 0x3bb   : > { %4518 = vrot.lane.b32.xlu1 %v15557_v5, %s13875_s19  ;;  %4324 = vrot.lane.b32.xlu0 %v15584_v21, %s13874_s14 }
 0x3bc   : > { %v11475_v22 = vpop.f32.mrb[68].mxu1 }
 0x3bd   : > { %v4126_v61 = vpop.f32.mrb[69].mxu1  ;;  %v15629_v36 = vadd.f32 %v11475_v22, %v15534_v55 }
 0x3be   : > { %v15632_v0 = vadd.f32 %v4126_v61, %v15534_v55 }
 0x3bf   : > { %4420 = vrot.lane.b32.xlu1 %v15584_v21, %s13873_s13  ;;  %4516 = vrot.lane.b32.xlu0 %v15584_v21, %s13875_s19 }
 0x3c0   : > { %v11478_v63 = vpop.f32.mrb[70].mxu1 }
 0x3c1   : > { %v4138_v23 = vpop.f32.mrb[71].mxu1 }
 0x3c2   : > { %v15668_v1 = vadd.f32 %v4138_v23, %v15534_v55 }
 0x3c3   : > { %4330 = vrot.lane.b32.xlu1 %v15607_v34, %s13874_s14  ;;  %4328 = vrot.lane.b32.xlu0 %v15610_v18, %s13874_s14 }
 0x3c4   : > { %v11481_v8 = vpop.f32.mrb[72].mxu1 }
 0x3c5   : > { %v4150_v53 = vpop.f32.mrb[73].mxu1 }
 0x3c6   : > { %v15704_v56 = vadd.f32 %v4150_v53, %v15534_v55 }
 0x3c7   : > { %4426 = vrot.lane.b32.xlu1 %v15607_v34, %s13873_s13  ;;  %4424 = vrot.lane.b32.xlu0 %v15610_v18, %s13873_s13 }
 0x3c8   : > { %v15620_v50 = vpop.f32.mrb[74].mxu1 }
 0x3c9   : > { %v15622_v38 = vpop.f32.mrb[75].mxu1 }
 0x3ca   : > { %v15742_v12 = vadd.f32 %v15622_v38, %v15534_v55 }
 0x3cb   : > { %4522 = vrot.lane.b32.xlu1 %v15607_v34, %s13875_s19  ;;  %4520 = vrot.lane.b32.xlu0 %v15610_v18, %s13875_s19 }
 0x3cc   : > { %v11487_v19 = vpop.f32.mrb[76].mxu1 }
 0x3cd   : > { %v15635_v51 = vadd.f32 %v11487_v19, %v15534_v55  ;;  %v4174_v62 = vpop.f32.mrb[77].mxu1 }
 0x3ce   : > { %v15638_v52 = vadd.f32 %v4174_v62, %v15534_v55 }
 0x3cf   : > { %4334 = vrot.lane.b32.xlu1 %v15629_v36, %s13874_s14  ;;  %4332 = vrot.lane.b32.xlu0 %v15632_v0, %s13874_s14 }
 0x3d0   : > { %v11490_v10 = vpop.f32.mrb[78].mxu1 }
 0x3d1   : > { %v15645_v22 = vadd.f32 %v11490_v10, %v15534_v55  ;;  %v4186_v4 = vpop.f32.mrb[79].mxu1  ;;  %v15665_v10 = vadd.f32 %v11478_v63, %v15534_v55 }
 0x3d2   : > { %v15648_v61 = vadd.f32 %v4186_v4, %v15534_v55 }
 0x3d3   : > { %4430 = vrot.lane.b32.xlu1 %v15629_v36, %s13873_s13  ;;  %4428 = vrot.lane.b32.xlu0 %v15632_v0, %s13873_s13 }
 0x3d4   : > { %v11493_v62 = vpop.f32.mrb[80].mxu1 }
 0x3d5   : > { %v15655_v19 = vadd.f32 %v11493_v62, %v15534_v55  ;;  %v4198_v44 = vpop.f32.mrb[81].mxu1 }
 0x3d6   : > { %v15658_v24 = vadd.f32 %v4198_v44, %v15534_v55 }
 0x3d7   : > { %20387 = vst [vmem:[#allocation44_spill] sm:$0xff] %v15655_v19  ;;  %4526 = vrot.lane.b32.xlu1 %v15629_v36, %s13875_s19  ;;  %4524 = vrot.lane.b32.xlu0 %v15632_v0, %s13875_s19 }
 0x3d8   : > { %20388 = vst [vmem:[#allocation47_spill] sm:$0xff] %v15658_v24  ;;  %v11496_v4 = vpop.f32.mrb[82].mxu1 }
 0x3d9   : > { %v15671_v62 = vadd.f32 %v11496_v4, %v15534_v55  ;;  %v4210_v2 = vpop.f32.mrb[83].mxu1 }
 0x3da   : > { %v15674_v44 = vadd.f32 %v4210_v2, %v15534_v55 }
 0x3db   : > { %20389 = vst [vmem:[#allocation50_spill] sm:$0xff] %v15671_v62  ;;  %4338 = vrot.lane.b32.xlu1 %v15665_v10, %s13874_s14  ;;  %4336 = vrot.lane.b32.xlu0 %v15668_v1, %s13874_s14 }
 0x3dc   : > { %20390 = vst [vmem:[#allocation54_spill] sm:$0xff] %v15674_v44  ;;  %v11499_v6 = vpop.f32.mrb[84].mxu1 }
 0x3dd   : > { %v15681_v63 = vadd.f32 %v11499_v6, %v15534_v55  ;;  %v4222_v14 = vpop.f32.mrb[85].mxu1 }
 0x3de   : > { %v15684_v23 = vadd.f32 %v4222_v14, %v15534_v55  ;;  %v15701_v14 = vadd.f32 %v11481_v8, %v15534_v55 }
 0x3df   : > { %20391 = vst [vmem:[#allocation57_spill] sm:$0xff] %v15681_v63  ;;  %4434 = vrot.lane.b32.xlu1 %v15665_v10, %s13873_s13  ;;  %4432 = vrot.lane.b32.xlu0 %v15668_v1, %s13873_s13 }
 0x3e0   : > { %20392 = vst [vmem:[#allocation58_spill] sm:$0xff] %v15684_v23  ;;  %v11502_v2 = vpop.f32.mrb[86].mxu1 }
 0x3e1   : > { %v15691_v4 = vadd.f32 %v11502_v2, %v15534_v55  ;;  %v4234_v42 = vpop.f32.mrb[87].mxu1 }
 0x3e2   : > { %v15694_v9 = vadd.f32 %v4234_v42, %v15534_v55 }
 0x3e3   : > { %4530 = vrot.lane.b32.xlu1 %v15665_v10, %s13875_s19  ;;  %4528 = vrot.lane.b32.xlu0 %v15668_v1, %s13875_s19 }
 0x3e4   : > { %v11505_v6 = vpop.f32.mrb[88].mxu1 }
 0x3e5   : > { %v15707_v2 = vadd.f32 %v11505_v6, %v15534_v55  ;;  %v4246_v16 = vpop.f32.mrb[89].mxu1 }
 0x3e6   : > { %v15710_v42 = vadd.f32 %v4246_v16, %v15534_v55 }
 0x3e7   : > { %4342 = vrot.lane.b32.xlu1 %v15701_v14, %s13874_s14  ;;  %4340 = vrot.lane.b32.xlu0 %v15704_v56, %s13874_s14 }
 0x3e8   : > { %v11508_v31 = vpop.f32.mrb[90].mxu1 }
 0x3e9   : > { %v15717_v8 = vadd.f32 %v11508_v31, %v15534_v55  ;;  %v4258_v7 = vpop.f32.mrb[91].mxu1  ;;  %v15738_v31 = vadd.f32 %v15620_v50, %v15534_v55 }
 0x3ea   : > { %v15720_v53 = vadd.f32 %v4258_v7, %v15534_v55 }
 0x3eb   : > { %4438 = vrot.lane.b32.xlu1 %v15701_v14, %s13873_s13  ;;  %4436 = vrot.lane.b32.xlu0 %v15704_v56, %s13873_s13 }
 0x3ec   : > { %v11511_v16 = vpop.f32.mrb[92].mxu1 }
 0x3ed   : > { %v15727_v6 = vadd.f32 %v11511_v16, %v15534_v55  ;;  %v4270_v45 = vpop.f32.mrb[93].mxu1 }
 0x3ee   : > { %v15730_v48 = vadd.f32 %v4270_v45, %v15534_v55 }
 0x3ef   : > { %4534 = vrot.lane.b32.xlu1 %v15701_v14, %s13875_s19  ;;  %4532 = vrot.lane.b32.xlu0 %v15704_v56, %s13875_s19 }
 0x3f0   : > { %v11514_v7 = vpop.f32.mrb[94].mxu1 }
 0x3f1   : > { %v15745_v16 = vadd.f32 %v11514_v7, %v15534_v55  ;;  %v4282_v45 = vpop.f32.mrb[95].mxu1 }
 0x3f2   : > { %v15748_v37 = vadd.f32 %v4282_v45, %v15534_v55 }
 0x3f3   : > { %4346 = vrot.lane.b32.xlu1 %v15738_v31, %s13874_s14  ;;  %4344 = vrot.lane.b32.xlu0 %v15742_v12, %s13874_s14 }
 0x3f7   : > { %4442 = vrot.lane.b32.xlu1 %v15738_v31, %s13873_s13  ;;  %4440 = vrot.lane.b32.xlu0 %v15742_v12, %s13873_s13 }
 0x3fb   : > { %4538 = vrot.lane.b32.xlu1 %v15738_v31, %s13875_s19  ;;  %4536 = vrot.lane.b32.xlu0 %v15742_v12, %s13875_s19 }
 0x3ff   : > { %4350 = vrot.lane.b32.xlu1 %v15635_v51, %s13874_s14  ;;  %4348 = vrot.lane.b32.xlu0 %v15638_v52, %s13874_s14 }
 0x403   : > { %4446 = vrot.lane.b32.xlu1 %v15635_v51, %s13873_s13  ;;  %4444 = vrot.lane.b32.xlu0 %v15638_v52, %s13873_s13 }
 0x407   : > { %4542 = vrot.lane.b32.xlu1 %v15635_v51, %s13875_s19  ;;  %4540 = vrot.lane.b32.xlu0 %v15638_v52, %s13875_s19 }
 0x40b   : > { %4354 = vrot.lane.b32.xlu1 %v15645_v22, %s13874_s14  ;;  %4352 = vrot.lane.b32.xlu0 %v15648_v61, %s13874_s14 }
 0x40f   : > { %4450 = vrot.lane.b32.xlu1 %v15645_v22, %s13873_s13  ;;  %4448 = vrot.lane.b32.xlu0 %v15648_v61, %s13873_s13 }
 0x413   : > { %4546 = vrot.lane.b32.xlu1 %v15645_v22, %s13875_s19  ;;  %4544 = vrot.lane.b32.xlu0 %v15648_v61, %s13875_s19 }
 0x417   : > { %4358 = vrot.lane.b32.xlu1 %v15655_v19, %s13874_s14  ;;  %4356 = vrot.lane.b32.xlu0 %v15658_v24, %s13874_s14 }
 0x41b   : > { %4454 = vrot.lane.b32.xlu1 %v15655_v19, %s13873_s13  ;;  %4452 = vrot.lane.b32.xlu0 %v15658_v24, %s13873_s13 }
 0x41f   : > { %4550 = vrot.lane.b32.xlu1 %v15655_v19, %s13875_s19  ;;  %4548 = vrot.lane.b32.xlu0 %v15658_v24, %s13875_s19 }
 0x423   : > { %4362 = vrot.lane.b32.xlu1 %v15671_v62, %s13874_s14  ;;  %4360 = vrot.lane.b32.xlu0 %v15674_v44, %s13874_s14 }
 0x427   : > { %4458 = vrot.lane.b32.xlu1 %v15671_v62, %s13873_s13  ;;  %4456 = vrot.lane.b32.xlu0 %v15674_v44, %s13873_s13 }
 0x429   : > { %v4423_v38 = vpop.permute.xlu1 %4422  ;;  %v4327_v55 = vpop.permute.xlu0 %4326 }
 0x42a   : > { %v4613_v50 = vsel %vm315_vm0, %v15557_v5, %v4327_v55 }
 0x42b   : > { %4554 = vrot.lane.b32.xlu1 %v15671_v62, %s13875_s19  ;;  %4552 = vrot.lane.b32.xlu0 %v15674_v44, %s13875_s19  ;;  %v4646_v45 = vsel %vm4644_vm1, %v4613_v50, %v4423_v38 }
 0x42d   : > { %v4519_v7 = vpop.permute.xlu1 %4518  ;;  %v4325_v54 = vpop.permute.xlu0 %4324 }
 0x42e   : > { %v4679_v60 = vsel %vm4677_vm2, %v4646_v45, %v4519_v7  ;;  %v4612_v55 = vsel %vm315_vm0, %v15584_v21, %v4325_v54 }
 0x42f   : > { %v4711_v25 = vmul.f32 %v20393_v59, %v4679_v60  ;;  %4366 = vrot.lane.b32.xlu1 %v15681_v63, %s13874_s14  ;;  %4364 = vrot.lane.b32.xlu0 %v15684_v23, %s13874_s14  ;;  %v20396_v59 = vld [vmem:[#allocation10_spill] sm:$0xff] }
 0x431   : > { %v15819_v5 = vand.u32 4294901760, %v4711_v25  ;;  %v4421_v44 = vpop.permute.xlu1 %4420  ;;  %v4517_v62 = vpop.permute.xlu0 %4516 }
 0x432   : > { %v4645_v38 = vsel %vm4644_vm1, %v4612_v55, %v4421_v44 }
 0x433   : > { %20394 = vst [vmem:[#allocation62_spill] sm:$0xff] %v15819_v5  ;;  %v15825_v50 = vsub.f32 %v4711_v25, %v15819_v5  ;;  %v4678_v60 = vsel %vm4677_vm2, %v4645_v38, %v4517_v62  ;;  %4462 = vrot.lane.b32.xlu1 %v15681_v63, %s13873_s13  ;;  %4460 = vrot.lane.b32.xlu0 %v15684_v23, %s13873_s13 }
 0x434   : > { %v4710_v7 = vmul.f32 %v20396_v59, %v4678_v60  ;;  %v20399_v60 = vand.u32 4294901760, %v15427_v26 }
 0x435   : > { %20395 = vst [vmem:[#allocation66_spill] sm:$0xff] %v15825_v50  ;;  %v4331_v45 = vpop.permute.xlu1 %4330  ;;  %v4329_v24 = vpop.permute.xlu0 %4328  ;;  %v19393_v21 = vand.u32 4294901760, %v15825_v50 }
 0x436   : > { %v15833_v54 = vand.u32 4294901760, %v4710_v7  ;;  %v15854_v59 = vsub.f32 %v15427_v26, %v20399_v60  ;;  %v4615_v55 = vsel %vm315_vm0, %v15607_v34, %v4331_v45 }
 0x437   : > { %4558 = vrot.lane.b32.xlu1 %v15681_v63, %s13875_s19  ;;  %4556 = vrot.lane.b32.xlu0 %v15684_v23, %s13875_s19  ;;  %v4852_v38 = vsub.f32 %v15825_v50, %v19393_v21  ;;  %v4614_v21 = vsel %vm315_vm0, %v15610_v18, %v4329_v24  ;;  %v20403_v24 = vand.u32 4294901760, %v15445_v49 }
 0x438   : > { %20397 = vst [vmem:[#allocation67_spill] sm:$0xff] %v15833_v54  ;;  %v15841_v25 = vsub.f32 %v4710_v7, %v15833_v54  ;;  %v20400_v7 = vand.u32 4294901760, %v15432_v43  ;;  %v19403_v19 = vand.u32 4294901760, %v15854_v59 }
 0x439   : > { %v4427_v62 = vpop.permute.xlu1 %4426  ;;  %v4425_v44 = vpop.permute.xlu0 %4424  ;;  %v15877_v18 = vsub.f32 %v15445_v49, %v20403_v24 }
 0x43a   : > { %20398 = vst [vmem:[#allocation71_spill] sm:$0xff] %v15841_v25  ;;  %v15859_v5 = vsub.f32 %v15432_v43, %v20400_v7  ;;  %v20402_v50 = vand.u32 4294901760, %v15841_v25  ;;  %v4648_v23 = vsel %vm4644_vm1, %v4615_v55, %v4427_v62  ;;  %v4647_v26 = vsel %vm4644_vm1, %v4614_v21, %v4425_v44  ;;  %v20405_v62 = vld [vmem:[#allocation25_spill] sm:$0xff]  ;;  %v20406_v21 = vld [vmem:[#allocation18_spill] sm:$0xff] }
 0x43b   : > { %4370 = vrot.lane.b32.xlu1 %v15691_v4, %s13874_s14  ;;  %4368 = vrot.lane.b32.xlu0 %v15694_v9, %s13874_s14  ;;  %20404 = vst [vmem:[#allocation78_spill] sm:$0xff] %v15877_v18 }
 0x43c   : > { %20401 = vst [vmem:[#allocation74_spill] sm:$0xff] %v15859_v5  ;;  %v4842_v54 = vsub.f32 %v15841_v25, %v20402_v50  ;;  %v19401_v43 = vand.u32 4294901760, %v15859_v5  ;;  %v4853_v50 = vand.u32 4294901760, %v4852_v38 }
 0x43d   : > { %v4523_v60 = vpop.permute.xlu1 %4522  ;;  %v4521_v63 = vpop.permute.xlu0 %4520 }
 0x43e   : > { %v4681_v7 = vsel %vm4677_vm2, %v4648_v23, %v4523_v60  ;;  %v4680_v34 = vsel %vm4677_vm2, %v4647_v26, %v4521_v63  ;;  %v4843_v45 = vand.u32 4294901760, %v4842_v54  ;;  %v5163_v63 = vsub.f32 %v15854_v59, %v19403_v19 }
 0x43f   : > { %v4713_v55 = vmul.f32 %v20405_v62, %v4681_v7  ;;  %v4712_v44 = vmul.f32 %v20406_v21, %v4680_v34  ;;  %4466 = vrot.lane.b32.xlu1 %v15691_v4, %s13873_s13  ;;  %4464 = vrot.lane.b32.xlu0 %v15694_v9, %s13873_s13  ;;  %v5170_v49 = vsub.f32 %v15859_v5, %v19401_v43  ;;  %v19402_v23 = vand.u32 4294901760, %v15877_v18 }
 0x440   : > { %11547 = vmatprep.mubr.f32.mxu1 %v4843_v45  ;;  %v20407_v54 = vand.u32 4294901760, %v15450_v58  ;;  %v5164_v24 = vand.u32 4294901760, %v5163_v63 }
 0x441   : > { %v15897_v26 = vand.u32 4294901760, %v4713_v55  ;;  %v15899_v60 = vand.u32 4294901760, %v4712_v44  ;;  %v4335_v7 = vpop.permute.xlu1 %4334  ;;  %11548 = vmatmul.mubr.f32.vlgmr.msra.gmra.mrb[96].mxu1 %v4853_v50  ;;  %v4333_v34 = vpop.permute.xlu0 %4332  ;;  %v5171_v45 = vand.u32 4294901760, %v5170_v49  ;;  %v5177_v62 = vsub.f32 %v15877_v18, %v19402_v23 }
 0x442   : > { %v15895_v38 = vsub.f32 %v15450_v58, %v20407_v54  ;;  %v4617_v19 = vsel %vm315_vm0, %v15629_v36, %v4335_v7  ;;  %v4616_v25 = vsel %vm315_vm0, %v15632_v0, %v4333_v34  ;;  %v20413_v36 = vand.u32 4294901760, %v15465_v40 }
 0x443   : > { %20409 = vst [vmem:[#allocation83_spill] sm:$0xff] %v15897_v26  ;;  %20410 = vst [vmem:[#allocation84_spill] sm:$0xff] %v15899_v60  ;;  %v15905_v21 = vsub.f32 %v4713_v55, %v15897_v26  ;;  %v15908_v43 = vsub.f32 %v4712_v44, %v15899_v60  ;;  %4562 = vrot.lane.b32.xlu1 %v15691_v4, %s13875_s19  ;;  %4560 = vrot.lane.b32.xlu0 %v15694_v9, %s13875_s19  ;;  %v5178_v55 = vand.u32 4294901760, %v5177_v62 }
 0x444   : > { %20408 = vst [vmem:[#allocation79_spill] sm:$0xff] %v15895_v38  ;;  %v19406_v58 = vand.u32 4294901760, %v15895_v38  ;;  %v12123_v50 = vpack.c.bf16 %v5171_v45, %v5164_v24  ;;  %v15937_v0 = vsub.f32 %v15465_v40, %v20413_v36 }
 0x445   : > { %20411 = vst [vmem:[#allocation85_spill] sm:$0xff] %v15905_v21  ;;  %20412 = vst [vmem:[#allocation17_spill] sm:$0xff] %v15908_v43  ;;  %v4431_v63 = vpop.permute.xlu1 %4430  ;;  %v4429_v49 = vpop.permute.xlu0 %4428  ;;  %v19409_v54 = vand.u32 4294901760, %v15908_v43  ;;  %v19414_v23 = vand.u32 4294901760, %v15905_v21 }
 0x446   : > { %v5184_v44 = vsub.f32 %v15895_v38, %v19406_v58  ;;  %12124 = vmatprep.subr.bf16.mxu1 %v12123_v50  ;;  %20414 = vst [vmem:[#allocation22_spill] sm:$0xff] %v15937_v0  ;;  %v4650_v7 = vsel %vm4644_vm1, %v4617_v19, %v4431_v63  ;;  %v4649_v34 = vsel %vm4644_vm1, %v4616_v25, %v4429_v49  ;;  %v20415_v58 = vand.u32 4294901760, %v15470_v41  ;;  %v20417_v25 = vld [vmem:[#allocation38_spill] sm:$0xff]  ;;  %v20418_v63 = vld [vmem:[#allocation33_spill] sm:$0xff] }
 0x447   : > { %4374 = vrot.lane.b32.xlu1 %v15707_v2, %s13874_s14  ;;  %4372 = vrot.lane.b32.xlu0 %v15710_v42, %s13874_s14  ;;  %v4862_v24 = vsub.f32 %v15908_v43, %v19409_v54  ;;  %v4872_v45 = vsub.f32 %v15905_v21, %v19414_v23  ;;  %v19420_v21 = vand.u32 4294901760, %v15937_v0 }
 0x448   : > { %v5185_v62 = vand.u32 4294901760, %v5184_v44  ;;  %12126 = vmatpush3.bf16.msra.mxu1 %v12123_v50  ;;  %v15944_v26 = vsub.f32 %v15470_v41, %v20415_v58 }
 0x449   : > { %v4527_v54 = vpop.permute.xlu1 %4526  ;;  %v4525_v43 = vpop.permute.xlu0 %4524  ;;  %v4863_v60 = vand.u32 4294901760, %v4862_v24  ;;  %v4873_v23 = vand.u32 4294901760, %v4872_v45  ;;  %v5191_v41 = vsub.f32 %v15937_v0, %v19420_v21 }
 0x44a   : > { %20416 = vst [vmem:[#allocation7_spill] sm:$0xff] %v15944_v26  ;;  %v12127_v44 = vpack.c.bf16 %v5185_v62, %v5178_v55  ;;  %v4683_v40 = vsel %vm4677_vm2, %v4650_v7, %v4527_v54  ;;  %v4682_v36 = vsel %vm4677_vm2, %v4649_v34, %v4525_v43  ;;  %v19419_v19 = vand.u32 4294901760, %v15944_v26 }
 0x44b   : > { %v4715_v50 = vmul.f32 %v20417_v25, %v4683_v40  ;;  %v4714_v49 = vmul.f32 %v20418_v63, %v4682_v36  ;;  %4470 = vrot.lane.b32.xlu1 %v15707_v2, %s13873_s13  ;;  %4468 = vrot.lane.b32.xlu0 %v15710_v42, %s13873_s13  ;;  %v5192_v45 = vand.u32 4294901760, %v5191_v41 }
 0x44c   : > { %11550 = vmatprep.mubr.f32.mxu1 %v4863_v60  ;;  %12128 = vmatprep.subr.bf16.mxu1 %v12127_v44  ;;  %v5198_v43 = vsub.f32 %v15944_v26, %v19419_v19 }
 0x44d   : > { %v15962_v58 = vand.u32 4294901760, %v4715_v50  ;;  %v15964_v54 = vand.u32 4294901760, %v4714_v49  ;;  %11551 = vmatmul.mubr.f32.gmra.mrb[98].mxu1 %v4873_v23  ;;  %v4339_v55 = vpop.permute.xlu1 %4338  ;;  %v4337_v24 = vpop.permute.xlu0 %4336 }
 0x44e   : > { %12130 = vmatpush3.bf16.msra.mxu1 %v12127_v44  ;;  %v5199_v62 = vand.u32 4294901760, %v5198_v43  ;;  %v4619_v25 = vsel %vm315_vm0, %v15665_v10, %v4339_v55  ;;  %v4618_v10 = vsel %vm315_vm0, %v15668_v1, %v4337_v24  ;;  %v20423_v55 = vand.u32 4294901760, %v15490_v46 }
 0x44f   : > { %v15967_v7 = vsub.f32 %v4715_v50, %v15962_v58  ;;  %v15970_v60 = vsub.f32 %v4714_v49, %v15964_v54  ;;  %4566 = vrot.lane.b32.xlu1 %v15707_v2, %s13875_s19  ;;  %4564 = vrot.lane.b32.xlu0 %v15710_v42, %s13875_s19  ;;  %v20421_v49 = vand.u32 4294901760, %v15485_v35 }
 0x450   : > { %v12131_v34 = vpack.c.bf16 %v5199_v62, %v5192_v45  ;;  %v16001_v45 = vsub.f32 %v15490_v46, %v20423_v55  ;;  %v20427_v46 = vld [vmem:[#allocation49_spill] sm:$0xff] }
 0x451   : > { %20419 = vst [vmem:[#allocation14_spill] sm:$0xff] %v15967_v7  ;;  %20420 = vst [vmem:[#allocation10_spill] sm:$0xff] %v15970_v60  ;;  %v4435_v40 = vpop.permute.xlu1 %4434  ;;  %v4433_v23 = vpop.permute.xlu0 %4432  ;;  %v19417_v36 = vand.u32 4294901760, %v15970_v60  ;;  %v19418_v44 = vand.u32 4294901760, %v15967_v7  ;;  %v15993_v41 = vsub.f32 %v15485_v35, %v20421_v49 }
 0x452   : > { %12132 = vmatprep.subr.bf16.mxu1 %v12131_v34  ;;  %v4652_v43 = vsel %vm4644_vm1, %v4619_v25, %v4435_v40  ;;  %20424 = vst [vmem:[#allocation18_spill] sm:$0xff] %v16001_v45  ;;  %v4651_v62 = vsel %vm4644_vm1, %v4618_v10, %v4433_v23  ;;  %v19422_v24 = vand.u32 4294901760, %v16001_v45  ;;  %v20428_v23 = vld [vmem:[#allocation43_spill] sm:$0xff] }
 0x453   : > { %4378 = vrot.lane.b32.xlu1 %v15717_v8, %s13874_s14  ;;  %4376 = vrot.lane.b32.xlu0 %v15720_v53, %s13874_s14  ;;  %v4882_v50 = vsub.f32 %v15970_v60, %v19417_v36  ;;  %v4892_v63 = vsub.f32 %v15967_v7, %v19418_v44  ;;  %20422 = vst [vmem:[#allocation25_spill] sm:$0xff] %v15993_v41  ;;  %v19423_v35 = vand.u32 4294901760, %v15993_v41 }
 0x454   : > { %12134 = vmatpush3.bf16.msra.mxu1 %v12131_v34  ;;  %v20425_v34 = vand.u32 4294901760, %v15505_v17 }
 0x455   : > { %v4531_v36 = vpop.permute.xlu1 %4530  ;;  %v4529_v44 = vpop.permute.xlu0 %4528  ;;  %v4883_v19 = vand.u32 4294901760, %v4882_v50  ;;  %v4893_v21 = vand.u32 4294901760, %v4892_v63  ;;  %v20429_v50 = vand.u32 4294901760, %v15510_v39 }
 0x456   : > { %v4685_v49 = vsel %vm4677_vm2, %v4652_v43, %v4531_v36  ;;  %v4684_v1 = vsel %vm4677_vm2, %v4651_v62, %v4529_v44  ;;  %v16011_v40 = vsub.f32 %v15505_v17, %v20425_v34  ;;  %v5205_v36 = vsub.f32 %v15993_v41, %v19423_v35 }
 0x457   : > { %v4717_v25 = vmul.f32 %v20427_v46, %v4685_v49  ;;  %v4716_v10 = vmul.f32 %v20428_v23, %v4684_v1  ;;  %4474 = vrot.lane.b32.xlu1 %v15717_v8, %s13873_s13  ;;  %4472 = vrot.lane.b32.xlu0 %v15720_v53, %s13873_s13  ;;  %v5212_v17 = vsub.f32 %v16001_v45, %v19422_v24 }
 0x458   : > { %20426 = vst [vmem:[#allocation38_spill] sm:$0xff] %v16011_v40  ;;  %11553 = vmatprep.mubr.f32.mxu1 %v4883_v19  ;;  %v19421_v44 = vand.u32 4294901760, %v16011_v40  ;;  %v16029_v63 = vsub.f32 %v15510_v39, %v20429_v50  ;;  %v5206_v1 = vand.u32 4294901760, %v5205_v36 }
 0x459   : > { %v16031_v43 = vand.u32 4294901760, %v4717_v25  ;;  %v16033_v55 = vand.u32 4294901760, %v4716_v10  ;;  %11554 = vmatmul.mubr.f32.gmra.mrb[100].mxu1 %v4893_v21  ;;  %v4343_v62 = vpop.permute.xlu1 %4342  ;;  %v4341_v49 = vpop.permute.xlu0 %4340  ;;  %v5213_v19 = vand.u32 4294901760, %v5212_v17 }
 0x45a   : > { %20430 = vst [vmem:[#allocation33_spill] sm:$0xff] %v16029_v63  ;;  %v5219_v34 = vsub.f32 %v16011_v40, %v19421_v44  ;;  %v19424_v39 = vand.u32 4294901760, %v16029_v63  ;;  %v4621_v24 = vsel %vm315_vm0, %v15701_v14, %v4343_v62  ;;  %v4620_v35 = vsel %vm315_vm0, %v15704_v56, %v4341_v49 }
 0x45b   : > { %v16039_v46 = vsub.f32 %v4717_v25, %v16031_v43  ;;  %v16042_v23 = vsub.f32 %v4716_v10, %v16033_v55  ;;  %4570 = vrot.lane.b32.xlu1 %v15717_v8, %s13875_s19  ;;  %4568 = vrot.lane.b32.xlu0 %v15720_v53, %s13875_s19  ;;  %v12135_v21 = vpack.c.bf16 %v5213_v19, %v5206_v1  ;;  %v20433_v14 = vand.u32 4294901760, %v15526_v32 }
 0x45c   : > { %v5220_v25 = vand.u32 4294901760, %v5219_v34  ;;  %v5226_v10 = vsub.f32 %v16029_v63, %v19424_v39  ;;  %v20435_v39 = vand.u32 4294901760, %v15531_v15 }
 0x45d   : > { %20431 = vst [vmem:[#allocation49_spill] sm:$0xff] %v16039_v46  ;;  %20432 = vst [vmem:[#allocation43_spill] sm:$0xff] %v16042_v23  ;;  %v4439_v36 = vpop.permute.xlu1 %4438  ;;  %v4437_v17 = vpop.permute.xlu0 %4436  ;;  %v19427_v50 = vand.u32 4294901760, %v16042_v23  ;;  %v19432_v44 = vand.u32 4294901760, %v16039_v46  ;;  %12136 = vmatprep.subr.bf16.mxu1 %v12135_v21  ;;  %v16071_v56 = vsub.f32 %v15526_v32, %v20433_v14 }
 0x45e   : > { %v5227_v34 = vand.u32 4294901760, %v5226_v10  ;;  %v4654_v62 = vsel %vm4644_vm1, %v4621_v24, %v4439_v36  ;;  %v4653_v49 = vsel %vm4644_vm1, %v4620_v35, %v4437_v17  ;;  %12138 = vmatpush3.bf16.msra.mxu1 %v12135_v21  ;;  %v16078_v7 = vsub.f32 %v15531_v15, %v20435_v39  ;;  %v20437_v21 = vld [vmem:[#allocation56_spill] sm:$0xff] }
 0x45f   : > { %4382 = vrot.lane.b32.xlu1 %v15727_v6, %s13874_s14  ;;  %4380 = vrot.lane.b32.xlu0 %v15730_v48, %s13874_s14  ;;  %v4902_v1 = vsub.f32 %v16042_v23, %v19427_v50  ;;  %v4912_v19 = vsub.f32 %v16039_v46, %v19432_v44  ;;  %20434 = vst [vmem:[#allocation88_spill] sm:$0xff] %v16071_v56  ;;  %v19438_v46 = vand.u32 4294901760, %v16071_v56 }
 0x460   : > { %20436 = vst [vmem:[#allocation89_spill] sm:$0xff] %v16078_v7  ;;  %v12139_v10 = vpack.c.bf16 %v5227_v34, %v5220_v25  ;;  %v19437_v24 = vand.u32 4294901760, %v16078_v7  ;;  %v20439_v34 = vand.u32 4294901760, %v15549_v28 }
 0x461   : > { %v4535_v50 = vpop.permute.xlu1 %4534  ;;  %v4533_v23 = vpop.permute.xlu0 %4532  ;;  %v4903_v60 = vand.u32 4294901760, %v4902_v1  ;;  %v4913_v44 = vand.u32 4294901760, %v4912_v19  ;;  %v5233_v15 = vsub.f32 %v16071_v56, %v19438_v46 }
 0x462   : > { %v4687_v32 = vsel %vm4677_vm2, %v4654_v62, %v4535_v50  ;;  %v4686_v14 = vsel %vm4677_vm2, %v4653_v49, %v4533_v23  ;;  %12140 = vmatprep.subr.bf16.mxu1 %v12139_v10  ;;  %v5240_v23 = vsub.f32 %v16078_v7, %v19437_v24  ;;  %v20441_v49 = vand.u32 4294901760, %v15554_v57 }
 0x463   : > { %v4719_v35 = vmul.f32 %v15140_v13, %v4687_v32  ;;  %v4718_v36 = vmul.f32 %v20437_v21, %v4686_v14  ;;  %4478 = vrot.lane.b32.xlu1 %v15727_v6, %s13873_s13  ;;  %4476 = vrot.lane.b32.xlu0 %v15730_v48, %s13873_s13  ;;  %v5234_v25 = vand.u32 4294901760, %v5233_v15 }
 0x464   : > { %11556 = vmatprep.mubr.f32.mxu1 %v4903_v60  ;;  %12142 = vmatpush3.bf16.msra.mxu1 %v12139_v10  ;;  %v5241_v1 = vand.u32 4294901760, %v5240_v23  ;;  %v16118_v10 = vsub.f32 %v15554_v57, %v20441_v49 }
 0x465   : > { %v16096_v39 = vand.u32 4294901760, %v4719_v35  ;;  %v16098_v13 = vand.u32 4294901760, %v4718_v36  ;;  %11557 = vmatmul.mubr.f32.gmra.mrb[102].mxu1 %v4913_v44  ;;  %v4347_v17 = vpop.permute.xlu1 %4346  ;;  %v4345_v50 = vpop.permute.xlu0 %4344  ;;  %v16113_v44 = vsub.f32 %v15549_v28, %v20439_v34  ;;  %v20445_v34 = vand.u32 4294901760, %v15581_v29 }
 0x466   : > { %v12143_v62 = vpack.c.bf16 %v5241_v1, %v5234_v25  ;;  %20442 = vst [vmem:[#allocation91_spill] sm:$0xff] %v16118_v10  ;;  %v4623_v15 = vsel %vm315_vm0, %v15738_v31, %v4347_v17  ;;  %v4622_v28 = vsel %vm315_vm0, %v15742_v12, %v4345_v50  ;;  %v19439_v23 = vand.u32 4294901760, %v16118_v10 }
 0x467   : > { %v16101_v19 = vsub.f32 %v4719_v35, %v16096_v39  ;;  %v16104_v60 = vsub.f32 %v4718_v36, %v16098_v13  ;;  %4574 = vrot.lane.b32.xlu1 %v15727_v6, %s13875_s19  ;;  %4572 = vrot.lane.b32.xlu0 %v15730_v48, %s13875_s19  ;;  %20440 = vst [vmem:[#allocation90_spill] sm:$0xff] %v16113_v44  ;;  %v19436_v36 = vand.u32 4294901760, %v16113_v44  ;;  %v20443_v25 = vand.u32 4294901760, %v15576_v30 }
 0x468   : > { %12144 = vmatprep.subr.bf16.mxu1 %v12143_v62  ;;  %v5254_v50 = vsub.f32 %v16118_v10, %v19439_v23  ;;  %v16153_v49 = vsub.f32 %v15581_v29, %v20445_v34 }
 0x469   : > { %20438 = vst [vmem:[#allocation56_spill] sm:$0xff] %v16101_v19  ;;  %v4443_v32 = vpop.permute.xlu1 %4442  ;;  %v4441_v14 = vpop.permute.xlu0 %4440  ;;  %v19440_v35 = vand.u32 4294901760, %v16104_v60  ;;  %v19435_v21 = vand.u32 4294901760, %v16101_v19  ;;  %v5247_v12 = vsub.f32 %v16113_v44, %v19436_v36  ;;  %12146 = vmatpush3.bf16.msra.mxu1 %v12143_v62  ;;  %v16148_v1 = vsub.f32 %v15576_v30, %v20443_v25 }
 0x46a   : > { %v4656_v17 = vsel %vm4644_vm1, %v4623_v15, %v4443_v32  ;;  %20446 = vst [vmem:[#allocation93_spill] sm:$0xff] %v16153_v49  ;;  %v19443_v29 = vand.u32 4294901760, %v16153_v49 }
 0x46b   : > { %4386 = vrot.lane.b32.xlu1 %v15745_v16, %s13874_s14  ;;  %4384 = vrot.lane.b32.xlu0 %v15748_v37, %s13874_s14  ;;  %v4922_v57 = vsub.f32 %v16104_v60, %v19440_v35  ;;  %v4932_v31 = vsub.f32 %v16101_v19, %v19435_v21  ;;  %20444 = vst [vmem:[#allocation92_spill] sm:$0xff] %v16148_v1  ;;  %v5248_v15 = vand.u32 4294901760, %v5247_v12  ;;  %v5255_v35 = vand.u32 4294901760, %v5254_v50 }
 0x46c   : > { %v4655_v21 = vsel %vm4644_vm1, %v4622_v28, %v4441_v14  ;;  %v19444_v30 = vand.u32 4294901760, %v16148_v1 }
 0x46d   : > { %v4539_v36 = vpop.permute.xlu1 %4538  ;;  %v4537_v24 = vpop.permute.xlu0 %4536  ;;  %v4923_v32 = vand.u32 4294901760, %v4922_v57  ;;  %v4933_v62 = vand.u32 4294901760, %v4932_v31  ;;  %v12147_v14 = vpack.c.bf16 %v5255_v35, %v5248_v15 }
 0x46e   : > { %v4689_v46 = vsel %vm4677_vm2, %v4656_v17, %v4539_v36  ;;  %v4688_v23 = vsel %vm4677_vm2, %v4655_v21, %v4537_v24  ;;  %v5261_v24 = vsub.f32 %v16148_v1, %v19444_v30 }
 0x46f   : > { %v4721_v25 = vmul.f32 %v15157_v20, %v4689_v46  ;;  %v4720_v19 = vmul.f32 %v15148_v27, %v4688_v23  ;;  %4482 = vrot.lane.b32.xlu1 %v15745_v16, %s13873_s13  ;;  %4480 = vrot.lane.b32.xlu0 %v15748_v37, %s13873_s13  ;;  %v5268_v46 = vsub.f32 %v16153_v49, %v19443_v29 }
 0x470   : > { %11559 = vmatprep.mubr.f32.mxu1 %v4923_v32  ;;  %12148 = vmatprep.subr.bf16.mxu1 %v12147_v14  ;;  %v5262_v28 = vand.u32 4294901760, %v5261_v24  ;;  %v16190_v32 = vpack.c.bf16 %v15859_v5, %v15854_v59 }
 0x471   : > { %v16169_v21 = vand.u32 4294901760, %v4721_v25  ;;  %v16171_v36 = vand.u32 4294901760, %v4720_v19  ;;  %11560 = vmatmul.mubr.f32.gmra.mrb[104].mxu1 %v4933_v62  ;;  %v4351_v27 = vpop.permute.xlu1 %4350  ;;  %v4349_v20 = vpop.permute.xlu0 %4348  ;;  %v5269_v57 = vand.u32 4294901760, %v5268_v46 }
 0x472   : > { %12150 = vmatpush3.bf16.msra.mxu1 %v12147_v14  ;;  %v4625_v15 = vsel %vm315_vm0, %v15635_v51, %v4351_v27 }
 0x473   : > { %v16177_v23 = vsub.f32 %v4721_v25, %v16169_v21  ;;  %v16180_v35 = vsub.f32 %v4720_v19, %v16171_v36  ;;  %4578 = vrot.lane.b32.xlu1 %v15745_v16, %s13875_s19  ;;  %4576 = vrot.lane.b32.xlu0 %v15748_v37, %s13875_s19  ;;  %v12151_v34 = vpack.c.bf16 %v5269_v57, %v5262_v28 }
 0x474   : > { %v4624_v25 = vsel %vm315_vm0, %v15638_v52, %v4349_v20 }
 0x475   : > { %v4447_v31 = vpop.permute.xlu1 %4446  ;;  %v4445_v12 = vpop.permute.xlu0 %4444  ;;  %v19448_v17 = vand.u32 4294901760, %v16180_v35  ;;  %v19445_v50 = vand.u32 4294901760, %v16177_v23  ;;  %12152 = vmatprep.subr.bf16.mxu1 %v12151_v34 }
 0x476   : > { %12154 = vmatpush3.bf16.msra.mxu1 %v12151_v34  ;;  %v4658_v14 = vsel %vm4644_vm1, %v4625_v15, %v4447_v31  ;;  %v4657_v24 = vsel %vm4644_vm1, %v4624_v25, %v4445_v12  ;;  %v16215_v34 = vpack.c.bf16 %v15895_v38, %v15877_v18  ;;  %v20454_v38 = vld [vmem:[#allocation20_spill] sm:$0xff]  ;;  %v20455_v18 = vld [vmem:[#allocation86_spill] sm:$0xff] }
 0x477   : > { %v4942_v19 = vsub.f32 %v16180_v35, %v19448_v17  ;;  %v4952_v62 = vsub.f32 %v16177_v23, %v19445_v50  ;;  %12156 = vmatprep.subr.bf16.mxu1 %v16190_v32 }
 0x479   : > { %v4543_v46 = vpop.permute.xlu1 %4542  ;;  %v4541_v28 = vpop.permute.xlu0 %4540  ;;  %v4943_v57 = vand.u32 4294901760, %v4942_v19  ;;  %v4953_v29 = vand.u32 4294901760, %v4952_v62 }
 0x47a   : > { %v4691_v30 = vsel %vm4677_vm2, %v4658_v14, %v4543_v46  ;;  %v4690_v50 = vsel %vm4677_vm2, %v4657_v24, %v4541_v28 }
 0x47b   : > { %v4723_v51 = vmul.f32 %v15182_v3, %v4691_v30  ;;  %v4722_v27 = vmul.f32 %v15173_v11, %v4690_v50  ;;  %11562 = vmatprep.mubr.f32.mxu1 %v4943_v57 }
 0x47c   : > { %11563 = vmatmul.mubr.f32.gmra.mrb[106].mxu1 %v4953_v29 }
 0x47d   : > { %v16209_v52 = vand.u32 4294901760, %v4723_v51  ;;  %v16211_v20 = vand.u32 4294901760, %v4722_v27  ;;  %v4355_v31 = vpop.permute.xlu1 %4354  ;;  %v4353_v12 = vpop.permute.xlu0 %4352 }
 0x47e   : > { %v4627_v50 = vsel %vm315_vm0, %v15645_v22, %v4355_v31  ;;  %v4626_v14 = vsel %vm315_vm0, %v15648_v61, %v4353_v12  ;;  %v16239_v22 = vpack.c.bf16 %v15944_v26, %v15937_v0 }
 0x47f   : > { %20447 = vst [vmem:[#allocation94_spill] sm:$0xff] %v16209_v52  ;;  %20448 = vst [vmem:[#allocation95_spill] sm:$0xff] %v16211_v20  ;;  %v16218_v19 = vsub.f32 %v4723_v51, %v16209_v52  ;;  %v16221_v62 = vsub.f32 %v4722_v27, %v16211_v20 }
 0x481   : > { %v4451_v3 = vpop.permute.xlu1 %4450  ;;  %v4449_v11 = vpop.permute.xlu0 %4448  ;;  %v19446_v30 = vand.u32 4294901760, %v16221_v62  ;;  %v19447_v29 = vand.u32 4294901760, %v16218_v19 }
 0x482   : > { %v4660_v24 = vsel %vm4644_vm1, %v4627_v50, %v4451_v3  ;;  %v4659_v46 = vsel %vm4644_vm1, %v4626_v14, %v4449_v11 }
 0x483   : > { %v4962_v15 = vsub.f32 %v16221_v62, %v19446_v30  ;;  %v4972_v25 = vsub.f32 %v16218_v19, %v19447_v29 }
 0x485   : > { %v4547_v28 = vpop.permute.xlu1 %4546  ;;  %v4545_v57 = vpop.permute.xlu0 %4544  ;;  %v4963_v51 = vand.u32 4294901760, %v4962_v15  ;;  %v4973_v27 = vand.u32 4294901760, %v4972_v25 }
 0x486   : > { %v4693_v31 = vsel %vm4677_vm2, %v4660_v24, %v4547_v28  ;;  %v4692_v30 = vsel %vm4677_vm2, %v4659_v46, %v4545_v57  ;;  %v20452_v28 = vld [vmem:[#allocation44_spill] sm:$0xff] }
 0x487   : > { %v4725_v29 = vmul.f32 %v15198_v47, %v4693_v31  ;;  %v4724_v61 = vmul.f32 %v15190_v33, %v4692_v30  ;;  %11565 = vmatprep.mubr.f32.mxu1 %v4963_v51  ;;  %v16259_v30 = vpack.c.bf16 %v16001_v45, %v15993_v41  ;;  %v20453_v51 = vld [vmem:[#allocation47_spill] sm:$0xff] }
 0x488   : > { %11566 = vmatmul.mubr.f32.gmra.mrb[108].mxu1 %v4973_v27 }
 0x489   : > { %v16245_v12 = vand.u32 4294901760, %v4725_v29  ;;  %v16247_v3 = vand.u32 4294901760, %v4724_v61  ;;  %v4359_v11 = vpop.permute.xlu1 %4358  ;;  %v4357_v50 = vpop.permute.xlu0 %4356 }
 0x48a   : > { %v4629_v57 = vsel %vm315_vm0, %v20452_v28, %v4359_v11  ;;  %v4628_v27 = vsel %vm315_vm0, %v20453_v51, %v4357_v50  ;;  %v20461_v28 = vld [vmem:[#allocation54_spill] sm:$0xff] }
 0x48b   : > { %20449 = vst [vmem:[#allocation96_spill] sm:$0xff] %v16245_v12  ;;  %20450 = vst [vmem:[#allocation97_spill] sm:$0xff] %v16247_v3  ;;  %v16250_v15 = vsub.f32 %v4725_v29, %v16245_v12  ;;  %v16253_v25 = vsub.f32 %v4724_v61, %v16247_v3 }
 0x48d   : > { %20451 = vst [vmem:[#allocation98_spill] sm:$0xff] %v16250_v15  ;;  %v4455_v14 = vpop.permute.xlu1 %4454  ;;  %v4453_v24 = vpop.permute.xlu0 %4452  ;;  %v19452_v47 = vand.u32 4294901760, %v16253_v25  ;;  %v19455_v33 = vand.u32 4294901760, %v16250_v15 }
 0x48e   : > { %v4662_v31 = vsel %vm4644_vm1, %v4629_v57, %v4455_v14  ;;  %v4661_v61 = vsel %vm4644_vm1, %v4628_v27, %v4453_v24 }
 0x48f   : > { %v4982_v46 = vsub.f32 %v16253_v25, %v19452_v47  ;;  %v4992_v29 = vsub.f32 %v16250_v15, %v19455_v33 }
 0x491   : > { %v4551_v17 = vpop.permute.xlu1 %4550  ;;  %v4549_v45 = vpop.permute.xlu0 %4548  ;;  %v4983_v41 = vand.u32 4294901760, %v4982_v46  ;;  %v4993_v26 = vand.u32 4294901760, %v4992_v29  ;;  %v16283_v46 = vpack.c.bf16 %v16029_v63, %v16011_v40 }
 0x492   : > { %v4695_v47 = vsel %vm4677_vm2, %v4662_v31, %v4551_v17  ;;  %v4694_v0 = vsel %vm4677_vm2, %v4661_v61, %v4549_v45 }
 0x493   : > { %v4727_v33 = vmul.f32 %v20454_v38, %v4695_v47  ;;  %v4726_v15 = vmul.f32 %v20455_v18, %v4694_v0  ;;  %11568 = vmatprep.mubr.f32.mxu1 %v4983_v41  ;;  %v20460_v41 = vld [vmem:[#allocation50_spill] sm:$0xff] }
 0x494   : > { %11569 = vmatmul.mubr.f32.gmra.mrb[110].mxu1 %v4993_v26 }
 0x495   : > { %v16277_v11 = vand.u32 4294901760, %v4727_v33  ;;  %v16279_v50 = vand.u32 4294901760, %v4726_v15  ;;  %v4363_v14 = vpop.permute.xlu1 %4362  ;;  %v4361_v24 = vpop.permute.xlu0 %4360 }
 0x496   : > { %v4631_v47 = vsel %vm315_vm0, %v20460_v41, %v4363_v14  ;;  %v16307_v14 = vpack.c.bf16 %v16078_v7, %v16071_v56 }
 0x497   : > { %20456 = vst [vmem:[#allocation44_spill] sm:$0xff] %v16277_v11  ;;  %20457 = vst [vmem:[#allocation47_spill] sm:$0xff] %v16279_v50  ;;  %v16286_v17 = vsub.f32 %v4727_v33, %v16277_v11  ;;  %v16289_v45 = vsub.f32 %v4726_v15, %v16279_v50  ;;  %v4630_v15 = vsel %vm315_vm0, %v20461_v28, %v4361_v24 }
 0x499   : > { %20458 = vst [vmem:[#allocation20_spill] sm:$0xff] %v16286_v17  ;;  %20459 = vst [vmem:[#allocation86_spill] sm:$0xff] %v16289_v45  ;;  %v4459_v38 = vpop.permute.xlu1 %4458  ;;  %v4457_v18 = vpop.permute.xlu0 %4456  ;;  %v19460_v26 = vand.u32 4294901760, %v16289_v45  ;;  %v19461_v0 = vand.u32 4294901760, %v16286_v17 }
 0x49a   : > { %v4664_v57 = vsel %vm4644_vm1, %v4631_v47, %v4459_v38  ;;  %v4663_v51 = vsel %vm4644_vm1, %v4630_v15, %v4457_v18 }
 0x49b   : > { %v5002_v29 = vsub.f32 %v16289_v45, %v19460_v26  ;;  %v5012_v33 = vsub.f32 %v16286_v17, %v19461_v0  ;;  %v20462_v0 = vld [vmem:[#allocation32_spill] sm:$0xff]  ;;  %v20463_v17 = vld [vmem:[#allocation27_spill] sm:$0xff]  ;;  %v20470_v45 = vld [vmem:[#allocation45_spill] sm:$0xff] }
 0x49d   : > { %v4555_v27 = vpop.permute.xlu1 %4554  ;;  %v4553_v31 = vpop.permute.xlu0 %4552  ;;  %v5003_v61 = vand.u32 4294901760, %v5002_v29  ;;  %v5013_v63 = vand.u32 4294901760, %v5012_v33 }
 0x49e   : > { %v4697_v41 = vsel %vm4677_vm2, %v4664_v57, %v4555_v27  ;;  %v4696_v26 = vsel %vm4677_vm2, %v4663_v51, %v4553_v31  ;;  %v20468_v51 = vld [vmem:[#allocation57_spill] sm:$0xff]  ;;  %v20469_v31 = vld [vmem:[#allocation58_spill] sm:$0xff] }
 0x49f   : > { %v4729_v40 = vmul.f32 %v20462_v0, %v4697_v41  ;;  %v4728_v24 = vmul.f32 %v20463_v17, %v4696_v26  ;;  %11571 = vmatprep.mubr.f32.mxu1 %v5003_v61 }
 0x4a0   : > { %11572 = vmatmul.mubr.f32.gmra.mrb[112].mxu1 %v5013_v63  ;;  %v16327_v63 = vpack.c.bf16 %v16118_v10, %v16113_v44 }
 0x4a1   : > { %v16313_v38 = vand.u32 4294901760, %v4729_v40  ;;  %v16315_v18 = vand.u32 4294901760, %v4728_v24  ;;  %v4367_v47 = vpop.permute.xlu1 %4366  ;;  %v4365_v29 = vpop.permute.xlu0 %4364 }
 0x4a2   : > { %v4633_v27 = vsel %vm315_vm0, %v20468_v51, %v4367_v47  ;;  %v4632_v61 = vsel %vm315_vm0, %v20469_v31, %v4365_v29 }
 0x4a3   : > { %20464 = vst [vmem:[#allocation50_spill] sm:$0xff] %v16313_v38  ;;  %20465 = vst [vmem:[#allocation54_spill] sm:$0xff] %v16315_v18  ;;  %v16318_v33 = vsub.f32 %v4729_v40, %v16313_v38  ;;  %v16321_v28 = vsub.f32 %v4728_v24, %v16315_v18 }
 0x4a5   : > { %20466 = vst [vmem:[#allocation32_spill] sm:$0xff] %v16318_v33  ;;  %20467 = vst [vmem:[#allocation27_spill] sm:$0xff] %v16321_v28  ;;  %v4463_v15 = vpop.permute.xlu1 %4462  ;;  %v4461_v57 = vpop.permute.xlu0 %4460  ;;  %v19469_v0 = vand.u32 4294901760, %v16321_v28  ;;  %v19474_v17 = vand.u32 4294901760, %v16318_v33 }
 0x4a6   : > { %v4666_v41 = vsel %vm4644_vm1, %v4633_v27, %v4463_v15  ;;  %v4665_v24 = vsel %vm4644_vm1, %v4632_v61, %v4461_v57 }
 0x4a7   : > { %v5022_v26 = vsub.f32 %v16321_v28, %v19469_v0  ;;  %v5032_v40 = vsub.f32 %v16318_v33, %v19474_v17  ;;  %v20471_v33 = vld [vmem:[#allocation37_spill] sm:$0xff] }
 0x4a9   : > { %v4559_v10 = vpop.permute.xlu1 %4558  ;;  %v4557_v44 = vpop.permute.xlu0 %4556  ;;  %v5023_v7 = vand.u32 4294901760, %v5022_v26  ;;  %v5033_v56 = vand.u32 4294901760, %v5032_v40  ;;  %v16351_v26 = vpack.c.bf16 %v16153_v49, %v16148_v1  ;;  %v20475_v49 = vld [vmem:[#allocation55_spill] sm:$0xff] }
 0x4aa   : > { %v4699_v0 = vsel %vm4677_vm2, %v4666_v41, %v4559_v10  ;;  %v4698_v28 = vsel %vm4677_vm2, %v4665_v24, %v4557_v44  ;;  %v20476_v1 = vld [vmem:[#allocation51_spill] sm:$0xff] }
 0x4ab   : > { %v4731_v17 = vmul.f32 %v20470_v45, %v4699_v0  ;;  %v4730_v5 = vmul.f32 %v20471_v33, %v4698_v28  ;;  %11574 = vmatprep.mubr.f32.mxu1 %v5023_v7 }
 0x4ac   : > { %11575 = vmatmul.mubr.f32.gmra.mrb[114].mxu1 %v5033_v56 }
 0x4ad   : > { %v16345_v47 = vand.u32 4294901760, %v4731_v17  ;;  %v16347_v29 = vand.u32 4294901760, %v4730_v5  ;;  %v4371_v15 = vpop.permute.xlu1 %4370  ;;  %v4369_v57 = vpop.permute.xlu0 %4368 }
 0x4af   : > { %20472 = vst [vmem:[#allocation57_spill] sm:$0xff] %v16345_v47  ;;  %20473 = vst [vmem:[#allocation58_spill] sm:$0xff] %v16347_v29  ;;  %v16354_v10 = vsub.f32 %v4731_v17, %v16345_v47  ;;  %v16357_v44 = vsub.f32 %v4730_v5, %v16347_v29  ;;  %v4635_v17 = vsel %vm315_vm0, %v15691_v4, %v4371_v15 }
 0x4b0   : > { %v4634_v5 = vsel %vm315_vm0, %v15694_v9, %v4369_v57 }
 0x4b1   : > { %20474 = vst [vmem:[#allocation45_spill] sm:$0xff] %v16354_v10  ;;  %v4467_v45 = vpop.permute.xlu1 %4466  ;;  %v4465_v33 = vpop.permute.xlu0 %4464  ;;  %v19478_v7 = vand.u32 4294901760, %v16357_v44  ;;  %v19480_v56 = vand.u32 4294901760, %v16354_v10 }
 0x4b2   : > { %v4668_v40 = vsel %vm4644_vm1, %v4635_v17, %v4467_v45  ;;  %v4667_v51 = vsel %vm4644_vm1, %v4634_v5, %v4465_v33 }
 0x4b3   : > { %v5042_v28 = vsub.f32 %v16357_v44, %v19478_v7  ;;  %v5052_v0 = vsub.f32 %v16354_v10, %v19480_v56 }
 0x4b5   : > { %v4563_v27 = vpop.permute.xlu1 %4562  ;;  %v4561_v31 = vpop.permute.xlu0 %4560  ;;  %v5043_v61 = vand.u32 4294901760, %v5042_v28  ;;  %v5053_v41 = vand.u32 4294901760, %v5052_v0 }
 0x4b6   : > { %v4701_v24 = vsel %vm4677_vm2, %v4668_v40, %v4563_v27  ;;  %v4700_v7 = vsel %vm4677_vm2, %v4667_v51, %v4561_v31 }
 0x4b7   : > { %v4733_v56 = vmul.f32 %v20475_v49, %v4701_v24  ;;  %v4732_v10 = vmul.f32 %v20476_v1, %v4700_v7  ;;  %11577 = vmatprep.mubr.f32.mxu1 %v5043_v61 }
 0x4b8   : > { %11578 = vmatmul.mubr.f32.gmra.mrb[116].mxu1 %v5053_v41 }
 0x4b9   : > { %v16377_v4 = vand.u32 4294901760, %v4733_v56  ;;  %v16379_v9 = vand.u32 4294901760, %v4732_v10  ;;  %v4375_v15 = vpop.permute.xlu1 %4374  ;;  %v4373_v57 = vpop.permute.xlu0 %4372 }
 0x4bb   : > { %20477 = vst [vmem:[#allocation37_spill] sm:$0xff] %v16377_v4  ;;  %20478 = vst [vmem:[#allocation55_spill] sm:$0xff] %v16379_v9  ;;  %v16382_v45 = vsub.f32 %v4733_v56, %v16377_v4  ;;  %v16385_v33 = vsub.f32 %v4732_v10, %v16379_v9  ;;  %v4637_v56 = vsel %vm315_vm0, %v15707_v2, %v4375_v15 }
 0x4bc   : > { %v4636_v10 = vsel %vm315_vm0, %v15710_v42, %v4373_v57 }
 0x4bd   : > { %20479 = vst [vmem:[#allocation51_spill] sm:$0xff] %v16382_v45  ;;  %20480 = vst [vmem:[#allocation99_spill] sm:$0xff] %v16385_v33  ;;  %v4471_v28 = vpop.permute.xlu1 %4470  ;;  %v4469_v0 = vpop.permute.xlu0 %4468  ;;  %v19484_v49 = vand.u32 4294901760, %v16385_v33  ;;  %v19485_v1 = vand.u32 4294901760, %v16382_v45 }
 0x4be   : > { %v4670_v5 = vsel %vm4644_vm1, %v4637_v56, %v4471_v28  ;;  %v4669_v40 = vsel %vm4644_vm1, %v4636_v10, %v4469_v0 }
 0x4bf   : > { %v5062_v7 = vsub.f32 %v16385_v33, %v19484_v49  ;;  %v5072_v17 = vsub.f32 %v16382_v45, %v19485_v1  ;;  %v20481_v49 = vld [vmem:[#allocation69_spill] sm:$0xff]  ;;  %v20482_v45 = vld [vmem:[#allocation63_spill] sm:$0xff] }
 0x4c1   : > { %v4567_v51 = vpop.permute.xlu1 %4566  ;;  %v4565_v27 = vpop.permute.xlu0 %4564  ;;  %v5063_v31 = vand.u32 4294901760, %v5062_v7  ;;  %v5073_v61 = vand.u32 4294901760, %v5072_v17 }
 0x4c2   : > { %v4703_v41 = vsel %vm4677_vm2, %v4670_v5, %v4567_v51  ;;  %v4702_v24 = vsel %vm4677_vm2, %v4669_v40, %v4565_v27 }
 0x4c3   : > { %v4735_v1 = vmul.f32 %v20481_v49, %v4703_v41  ;;  %v4734_v33 = vmul.f32 %v20482_v45, %v4702_v24  ;;  %11580 = vmatprep.mubr.f32.mxu1 %v5063_v31 }
 0x4c4   : > { %11581 = vmatmul.mubr.f32.gmra.mrb[118].mxu1 %v5073_v61 }
 0x4c5   : > { %v16405_v2 = vand.u32 4294901760, %v4735_v1  ;;  %v16407_v42 = vand.u32 4294901760, %v4734_v33  ;;  %v4379_v15 = vpop.permute.xlu1 %4378  ;;  %v4377_v57 = vpop.permute.xlu0 %4376 }
 0x4c7   : > { %20483 = vst [vmem:[#allocation69_spill] sm:$0xff] %v16405_v2  ;;  %20484 = vst [vmem:[#allocation63_spill] sm:$0xff] %v16407_v42  ;;  %v16410_v28 = vsub.f32 %v4735_v1, %v16405_v2  ;;  %v16413_v0 = vsub.f32 %v4734_v33, %v16407_v42  ;;  %v4639_v1 = vsel %vm315_vm0, %v15717_v8, %v4379_v15 }
 0x4c8   : > { %v4638_v33 = vsel %vm315_vm0, %v15720_v53, %v4377_v57 }
 0x4c9   : > { %20485 = vst [vmem:[#allocation100_spill] sm:$0xff] %v16410_v28  ;;  %20486 = vst [vmem:[#allocation101_spill] sm:$0xff] %v16413_v0  ;;  %v4475_v7 = vpop.permute.xlu1 %4474  ;;  %v4473_v17 = vpop.permute.xlu0 %4472  ;;  %v19490_v49 = vand.u32 4294901760, %v16413_v0  ;;  %v19491_v45 = vand.u32 4294901760, %v16410_v28 }
 0x4ca   : > { %v4672_v5 = vsel %vm4644_vm1, %v4639_v1, %v4475_v7  ;;  %v4671_v40 = vsel %vm4644_vm1, %v4638_v33, %v4473_v17 }
 0x4cb   : > { %v5082_v56 = vsub.f32 %v16413_v0, %v19490_v49  ;;  %v5092_v10 = vsub.f32 %v16410_v28, %v19491_v45  ;;  %v20487_v49 = vld [vmem:[#allocation80_spill] sm:$0xff]  ;;  %v20488_v28 = vld [vmem:[#allocation75_spill] sm:$0xff] }
 0x4cd   : > { %v4571_v51 = vpop.permute.xlu1 %4570  ;;  %v4569_v27 = vpop.permute.xlu0 %4568  ;;  %v5083_v31 = vand.u32 4294901760, %v5082_v56  ;;  %v5093_v61 = vand.u32 4294901760, %v5092_v10 }
 0x4ce   : > { %v4705_v41 = vsel %vm4677_vm2, %v4672_v5, %v4571_v51  ;;  %v4704_v24 = vsel %vm4677_vm2, %v4671_v40, %v4569_v27 }
 0x4cf   : > { %v4737_v45 = vmul.f32 %v20487_v49, %v4705_v41  ;;  %v4736_v0 = vmul.f32 %v20488_v28, %v4704_v24  ;;  %11583 = vmatprep.mubr.f32.mxu1 %v5083_v31 }
 0x4d0   : > { %11584 = vmatmul.mubr.f32.gmra.mrb[120].mxu1 %v5093_v61 }
 0x4d1   : > { %v16433_v8 = vand.u32 4294901760, %v4737_v45  ;;  %v16435_v53 = vand.u32 4294901760, %v4736_v0  ;;  %v4383_v15 = vpop.permute.xlu1 %4382  ;;  %v4381_v57 = vpop.permute.xlu0 %4380 }
 0x4d3   : > { %20489 = vst [vmem:[#allocation80_spill] sm:$0xff] %v16433_v8  ;;  %20490 = vst [vmem:[#allocation75_spill] sm:$0xff] %v16435_v53  ;;  %v16438_v7 = vsub.f32 %v4737_v45, %v16433_v8  ;;  %v16441_v17 = vsub.f32 %v4736_v0, %v16435_v53  ;;  %v4641_v45 = vsel %vm315_vm0, %v15727_v6, %v4383_v15 }
 0x4d4   : > { %v4640_v0 = vsel %vm315_vm0, %v15730_v48, %v4381_v57 }
 0x4d5   : > { %20491 = vst [vmem:[#allocation102_spill] sm:$0xff] %v16438_v7  ;;  %20492 = vst [vmem:[#allocation103_spill] sm:$0xff] %v16441_v17  ;;  %v4479_v56 = vpop.permute.xlu1 %4478  ;;  %v4477_v10 = vpop.permute.xlu0 %4476  ;;  %v19496_v49 = vand.u32 4294901760, %v16441_v17  ;;  %v19497_v28 = vand.u32 4294901760, %v16438_v7 }
 0x4d6   : > { %v4674_v5 = vsel %vm4644_vm1, %v4641_v45, %v4479_v56  ;;  %v4673_v40 = vsel %vm4644_vm1, %v4640_v0, %v4477_v10 }
 0x4d7   : > { %v5102_v1 = vsub.f32 %v16441_v17, %v19496_v49  ;;  %v5112_v33 = vsub.f32 %v16438_v7, %v19497_v28  ;;  %v20493_v49 = vld [vmem:[#allocation5_spill] sm:$0xff]  ;;  %v20494_v7 = vld [vmem:[#allocation3_spill] sm:$0xff] }
 0x4d9   : > { %v4575_v51 = vpop.permute.xlu1 %4574  ;;  %v4573_v27 = vpop.permute.xlu0 %4572  ;;  %v5103_v31 = vand.u32 4294901760, %v5102_v1  ;;  %v5113_v61 = vand.u32 4294901760, %v5112_v33 }
 0x4da   : > { %v4707_v41 = vsel %vm4677_vm2, %v4674_v5, %v4575_v51  ;;  %v4706_v24 = vsel %vm4677_vm2, %v4673_v40, %v4573_v27 }
 0x4db   : > { %v4739_v28 = vmul.f32 %v20493_v49, %v4707_v41  ;;  %v4738_v17 = vmul.f32 %v20494_v7, %v4706_v24  ;;  %11586 = vmatprep.mubr.f32.mxu1 %v5103_v31 }
 0x4dc   : > { %11587 = vmatmul.mubr.f32.gmra.mrb[122].mxu1 %v5113_v61 }
 0x4dd   : > { %v16461_v6 = vand.u32 4294901760, %v4739_v28  ;;  %v16463_v48 = vand.u32 4294901760, %v4738_v17  ;;  %v4387_v15 = vpop.permute.xlu1 %4386  ;;  %v4385_v57 = vpop.permute.xlu0 %4384 }
 0x4df   : > { %20495 = vst [vmem:[#allocation5_spill] sm:$0xff] %v16461_v6  ;;  %20496 = vst [vmem:[#allocation3_spill] sm:$0xff] %v16463_v48  ;;  %v16466_v56 = vsub.f32 %v4739_v28, %v16461_v6  ;;  %v16469_v10 = vsub.f32 %v4738_v17, %v16463_v48  ;;  %v4643_v28 = vsel %vm315_vm0, %v15745_v16, %v4387_v15 }
 0x4e0   : > { %v4642_v17 = vsel %vm315_vm0, %v15748_v37, %v4385_v57 }
 0x4e1   : > { %20497 = vst [vmem:[#allocation104_spill] sm:$0xff] %v16466_v56  ;;  %20498 = vst [vmem:[#allocation105_spill] sm:$0xff] %v16469_v10  ;;  %v4483_v1 = vpop.permute.xlu1 %4482  ;;  %v4481_v33 = vpop.permute.xlu0 %4480  ;;  %v19502_v49 = vand.u32 4294901760, %v16469_v10  ;;  %v19503_v7 = vand.u32 4294901760, %v16466_v56 }
 0x4e2   : > { %v4676_v5 = vsel %vm4644_vm1, %v4643_v28, %v4483_v1  ;;  %v4675_v40 = vsel %vm4644_vm1, %v4642_v17, %v4481_v33  ;;  %v20505_v28 = vld [vmem:[#allocation84_spill] sm:$0xff]  ;;  %v20506_v17 = vld [vmem:[#allocation83_spill] sm:$0xff] }
 0x4e3   : > { %v5122_v45 = vsub.f32 %v16469_v10, %v19502_v49  ;;  %v5132_v0 = vsub.f32 %v16466_v56, %v19503_v7  ;;  %v20499_v49 = vld [vmem:[#allocation13_spill] sm:$0xff] }
 0x4e4   : > { %v20500_v56 = vld [vmem:[#allocation9_spill] sm:$0xff] }
 0x4e5   : > { %v4579_v51 = vpop.permute.xlu1 %4578  ;;  %v4577_v27 = vpop.permute.xlu0 %4576  ;;  %v5123_v31 = vand.u32 4294901760, %v5122_v45  ;;  %v5133_v61 = vand.u32 4294901760, %v5132_v0 }
 0x4e6   : > { %v4709_v41 = vsel %vm4677_vm2, %v4676_v5, %v4579_v51  ;;  %v4708_v24 = vsel %vm4677_vm2, %v4675_v40, %v4577_v27  ;;  %v20515_v5 = vld [vmem:[#allocation14_spill] sm:$0xff]  ;;  %v20516_v40 = vld [vmem:[#allocation43_spill] sm:$0xff]  ;;  %v20518_v27 = vld [vmem:[#allocation49_spill] sm:$0xff] }
 0x4e7   : > { %v4741_v7 = vmul.f32 %v20499_v49, %v4709_v41  ;;  %v4740_v10 = vmul.f32 %v20500_v56, %v4708_v24  ;;  %11589 = vmatprep.mubr.f32.mxu1 %v5123_v31  ;;  %v20517_v51 = vld [vmem:[#allocation30_spill] sm:$0xff]  ;;  %v20519_v31 = vld [vmem:[#allocation31_spill] sm:$0xff] }
 0x4e8   : > { %11590 = vmatmul.mubr.f32.gmra.mrb[124].mxu1 %v5133_v61  ;;  %v20520_v61 = vld [vmem:[#allocation56_spill] sm:$0xff]  ;;  %v20521_v41 = vld [vmem:[#allocation34_spill] sm:$0xff]  ;;  %v20522_v24 = vld [vmem:[#allocation39_spill] sm:$0xff] }
 0x4e9   : > { %v16489_v16 = vand.u32 4294901760, %v4741_v7  ;;  %v16491_v37 = vand.u32 4294901760, %v4740_v10 }
 0x4eb   : > { %20501 = vst [vmem:[#allocation13_spill] sm:$0xff] %v16489_v16  ;;  %20502 = vst [vmem:[#allocation9_spill] sm:$0xff] %v16491_v37  ;;  %v16494_v15 = vsub.f32 %v4741_v7, %v16489_v16  ;;  %v16497_v57 = vsub.f32 %v4740_v10, %v16491_v37  ;;  %v20503_v7 = vld [vmem:[#allocation67_spill] sm:$0xff]  ;;  %v20504_v10 = vld [vmem:[#allocation62_spill] sm:$0xff] }
 0x4ed   : > { %v19509_v1 = vand.u32 4294901760, %v16497_v57  ;;  %v19508_v33 = vand.u32 4294901760, %v16494_v15 }
 0x4ef   : > { %v5142_v56 = vsub.f32 %v16497_v57, %v19509_v1  ;;  %v5152_v49 = vsub.f32 %v16494_v15, %v19508_v33  ;;  %v20527_v1 = vld [vmem:[#allocation98_spill] sm:$0xff] }
 0x4f1   : > { %v5143_v45 = vand.u32 4294901760, %v5142_v56  ;;  %v5153_v0 = vand.u32 4294901760, %v5152_v49  ;;  %v20523_v56 = vld [vmem:[#allocation40_spill] sm:$0xff]  ;;  %v20524_v49 = vand.u32 4294901760, %v15854_v59  ;;  %v20533_v59 = vld [vmem:[#allocation99_spill] sm:$0xff] }
 0x4f3   : > { %11592 = vmatprep.mubr.f32.mxu1 %v5143_v45  ;;  %v20525_v45 = vld [vmem:[#allocation74_spill] sm:$0xff] }
 0x4f4   : > { %11593 = vmatmul.mubr.f32.gmra.mrb[126].mxu1 %v5153_v0  ;;  %v20526_v0 = vand.u32 4294901760, %v20525_v45  ;;  %v20535_v45 = vld [vmem:[#allocation101_spill] sm:$0xff] }
 0x4f5   : > { %11627 = vmatprep.mubr.f32.mxu1 %v20503_v7 }
 0x4f6   : > { %v12219_v33 = vpack.c.bf16 %v20526_v0, %v20524_v49  ;;  %v20534_v49 = vld [vmem:[#allocation51_spill] sm:$0xff]  ;;  %v20536_v0 = vld [vmem:[#allocation100_spill] sm:$0xff] }
 0x4f8   : > { %11628 = vmatmul.mubr.f32.vlgmr.msra.gmra.mrb[96].mxu1 %v20504_v10 }
 0x4f9   : > { %12158 = vmatpush3.bf16.msra.mxu1 %v16190_v32  ;;  %11630 = vmatprep.mubr.f32.mxu1 %v20505_v28  ;;  %v20507_v32 = vld [vmem:[#allocation19_spill] sm:$0xff] }
 0x4fa   : > { %12160 = vmatprep.subr.bf16.mxu1 %v16215_v34 }
 0x4fc   : > { %11631 = vmatmul.mubr.f32.gmra.mrb[98].mxu1 %v20506_v17 }
 0x4fd   : > { %11633 = vmatprep.mubr.f32.mxu1 %v15964_v54  ;;  %12162 = vmatpush3.bf16.msra.mxu1 %v16215_v34  ;;  %v20508_v34 = vld [vmem:[#allocation71_spill] sm:$0xff] }
 0x4fe   : > { %12164 = vmatprep.subr.bf16.mxu1 %v16239_v22 }
 0x500   : > { %11634 = vmatmul.mubr.f32.gmra.mrb[100].mxu1 %v15962_v58 }
 0x501   : > { %11636 = vmatprep.mubr.f32.mxu1 %v16033_v55  ;;  %12166 = vmatpush3.bf16.msra.mxu1 %v16239_v22  ;;  %v20509_v22 = vld [vmem:[#allocation66_spill] sm:$0xff] }
 0x502   : > { %12168 = vmatprep.subr.bf16.mxu1 %v16259_v30 }
 0x504   : > { %11637 = vmatmul.mubr.f32.gmra.mrb[102].mxu1 %v16031_v43 }
 0x505   : > { %11639 = vmatprep.mubr.f32.mxu1 %v16098_v13  ;;  %12170 = vmatpush3.bf16.msra.mxu1 %v16259_v30  ;;  %v20510_v30 = vld [vmem:[#allocation17_spill] sm:$0xff] }
 0x506   : > { %12172 = vmatprep.subr.bf16.mxu1 %v16283_v46 }
 0x508   : > { %11640 = vmatmul.mubr.f32.gmra.mrb[104].mxu1 %v16096_v39 }
 0x509   : > { %11642 = vmatprep.mubr.f32.mxu1 %v16171_v36  ;;  %12174 = vmatpush3.bf16.msra.mxu1 %v16283_v46  ;;  %v20511_v46 = vld [vmem:[#allocation24_spill] sm:$0xff] }
 0x50a   : > { %12176 = vmatprep.subr.bf16.mxu1 %v16307_v14 }
 0x50c   : > { %11643 = vmatmul.mubr.f32.gmra.mrb[106].mxu1 %v16169_v21 }
 0x50d   : > { %11645 = vmatprep.mubr.f32.mxu1 %v16211_v20  ;;  %12178 = vmatpush3.bf16.msra.mxu1 %v16307_v14  ;;  %v20512_v14 = vld [vmem:[#allocation85_spill] sm:$0xff] }
 0x50e   : > { %12180 = vmatprep.subr.bf16.mxu1 %v16327_v63 }
 0x510   : > { %11646 = vmatmul.mubr.f32.gmra.mrb[108].mxu1 %v16209_v52  ;;  %v20550_v52 = vld [vmem:[#allocation7_spill] sm:$0xff] }
 0x511   : > { %11648 = vmatprep.mubr.f32.mxu1 %v16247_v3  ;;  %12182 = vmatpush3.bf16.msra.mxu1 %v16327_v63  ;;  %v20513_v63 = vld [vmem:[#allocation10_spill] sm:$0xff] }
 0x512   : > { %12184 = vmatprep.subr.bf16.mxu1 %v16351_v26 }
 0x514   : > { %11649 = vmatmul.mubr.f32.gmra.mrb[110].mxu1 %v16245_v12  ;;  %v20547_v12 = vand.u32 4294901760, %v20510_v30 }
 0x515   : > { %11651 = vmatprep.mubr.f32.mxu1 %v16279_v50  ;;  %12186 = vmatpush3.bf16.msra.mxu1 %v16351_v26  ;;  %v20514_v26 = vld [vmem:[#allocation26_spill] sm:$0xff]  ;;  %v20546_v50 = vand.u32 4294901760, %v20509_v22 }
 0x516   : > { %12188 = vmatprep.subr.bf16.mxu1 %v20507_v32 }
 0x518   : > { %11652 = vmatmul.mubr.f32.gmra.mrb[112].mxu1 %v16277_v11 }
 0x519   : > { %11654 = vmatprep.mubr.f32.mxu1 %v16315_v18 }
 0x51c   : > { %11655 = vmatmul.mubr.f32.gmra.mrb[114].mxu1 %v16313_v38  ;;  %v20544_v38 = vld [vmem:[#allocation79_spill] sm:$0xff] }
 0x51d   : > { %11657 = vmatprep.mubr.f32.mxu1 %v16347_v29  ;;  %v20545_v18 = vand.u32 4294901760, %v20544_v38  ;;  %v20554_v38 = vld [vmem:[#allocation25_spill] sm:$0xff] }
 0x520   : > { %11658 = vmatmul.mubr.f32.gmra.mrb[116].mxu1 %v16345_v47  ;;  %v20542_v47 = vld [vmem:[#allocation78_spill] sm:$0xff] }
 0x521   : > { %11660 = vmatprep.mubr.f32.mxu1 %v16379_v9  ;;  %v20541_v9 = vand.u32 4294901760, %v20508_v34  ;;  %v20543_v29 = vand.u32 4294901760, %v20542_v47  ;;  %v20553_v47 = vand.u32 4294901760, %v20513_v63 }
 0x523   : > { %v12223_v11 = vpack.c.bf16 %v20545_v18, %v20543_v29  ;;  %v20556_v18 = vld [vmem:[#allocation18_spill] sm:$0xff] }
 0x524   : > { %11661 = vmatmul.mubr.f32.gmra.mrb[118].mxu1 %v16377_v4  ;;  %v20540_v4 = vld [vmem:[#allocation104_spill] sm:$0xff]  ;;  %v20557_v29 = vand.u32 4294901760, %v20556_v18 }
 0x525   : > { %11663 = vmatprep.mubr.f32.mxu1 %v16407_v42  ;;  %v20539_v42 = vld [vmem:[#allocation105_spill] sm:$0xff] }
 0x528   : > { %11664 = vmatmul.mubr.f32.gmra.mrb[120].mxu1 %v16405_v2  ;;  %v20538_v2 = vld [vmem:[#allocation102_spill] sm:$0xff] }
 0x529   : > { %11666 = vmatprep.mubr.f32.mxu1 %v16435_v53  ;;  %v20537_v53 = vld [vmem:[#allocation103_spill] sm:$0xff] }
 0x52c   : > { %11667 = vmatmul.mubr.f32.gmra.mrb[122].mxu1 %v16433_v8  ;;  %v20532_v8 = vld [vmem:[#allocation45_spill] sm:$0xff] }
 0x52d   : > { %11669 = vmatprep.mubr.f32.mxu1 %v16463_v48  ;;  %v20531_v48 = vld [vmem:[#allocation32_spill] sm:$0xff] }
 0x530   : > { %11670 = vmatmul.mubr.f32.gmra.mrb[124].mxu1 %v16461_v6  ;;  %v20530_v6 = vld [vmem:[#allocation27_spill] sm:$0xff] }
 0x531   : > { %11672 = vmatprep.mubr.f32.mxu1 %v16491_v37  ;;  %v20529_v37 = vld [vmem:[#allocation20_spill] sm:$0xff] }
 0x534   : > { %11673 = vmatmul.mubr.f32.gmra.mrb[126].mxu1 %v16489_v16  ;;  %v20528_v16 = vld [vmem:[#allocation86_spill] sm:$0xff] }
 0x535   : > { %11707 = vmatprep.mubr.f32.mxu1 %v20508_v34  ;;  %v20559_v34 = vand.u32 4294901760, %v20516_v40 }
 0x538   : > { %11708 = vmatmul.mubr.f32.vlgmr.msra.gmra.mrb[96].mxu1 %v20509_v22  ;;  %v20562_v22 = vld [vmem:[#allocation33_spill] sm:$0xff] }
 0x539   : > { %12190 = vmatpush3.bf16.msra.mxu1 %v20507_v32  ;;  %11710 = vmatprep.mubr.f32.mxu1 %v20510_v30  ;;  %v20563_v30 = vand.u32 4294901760, %v20562_v22  ;;  %v20583_v22 = vand.u32 4294901760, %v16253_v25 }
 0x53a   : > { %12192 = vmatprep.subr.bf16.mxu1 %v20511_v46 }
 0x53c   : > { %11711 = vmatmul.mubr.f32.gmra.mrb[98].mxu1 %v20512_v14 }
 0x53d   : > { %11713 = vmatprep.mubr.f32.mxu1 %v20513_v63  ;;  %12194 = vmatpush3.bf16.msra.mxu1 %v20511_v46  ;;  %v20565_v63 = vand.u32 4294901760, %v16104_v60 }
 0x53e   : > { %12196 = vmatprep.subr.bf16.mxu1 %v20514_v26 }
 0x540   : > { %11714 = vmatmul.mubr.f32.gmra.mrb[100].mxu1 %v20515_v5 }
 0x541   : > { %11716 = vmatprep.mubr.f32.mxu1 %v20516_v40  ;;  %12198 = vmatpush3.bf16.msra.mxu1 %v20514_v26 }
 0x542   : > { %12200 = vmatprep.subr.bf16.mxu1 %v20517_v51 }
 0x544   : > { %11717 = vmatmul.mubr.f32.gmra.mrb[102].mxu1 %v20518_v27 }
 0x545   : > { %11719 = vmatprep.mubr.f32.mxu1 %v16104_v60  ;;  %12202 = vmatpush3.bf16.msra.mxu1 %v20517_v51 }
 0x546   : > { %12204 = vmatprep.subr.bf16.mxu1 %v20519_v31 }
 0x548   : > { %11720 = vmatmul.mubr.f32.gmra.mrb[104].mxu1 %v20520_v61 }
 0x549   : > { %11722 = vmatprep.mubr.f32.mxu1 %v16180_v35  ;;  %12206 = vmatpush3.bf16.msra.mxu1 %v20519_v31 }
 0x54a   : > { %12208 = vmatprep.subr.bf16.mxu1 %v20521_v41 }
 0x54c   : > { %11723 = vmatmul.mubr.f32.gmra.mrb[106].mxu1 %v16177_v23 }
 0x54d   : > { %11725 = vmatprep.mubr.f32.mxu1 %v16221_v62  ;;  %12210 = vmatpush3.bf16.msra.mxu1 %v20521_v41 }
 0x54e   : > { %12212 = vmatprep.subr.bf16.mxu1 %v20522_v24 }
 0x550   : > { %11726 = vmatmul.mubr.f32.gmra.mrb[108].mxu1 %v16218_v19 }
 0x551   : > { %11728 = vmatprep.mubr.f32.mxu1 %v16253_v25  ;;  %12214 = vmatpush3.bf16.msra.mxu1 %v20522_v24  ;;  %v20551_v24 = vand.u32 4294901760, %v20550_v52  ;;  %v20560_v52 = vld [vmem:[#allocation38_spill] sm:$0xff]  ;;  %v20588_v25 = vand.u32 4294901760, %v20531_v48 }
 0x552   : > { %12216 = vmatprep.subr.bf16.mxu1 %v20523_v56 }
 0x554   : > { %11729 = vmatmul.mubr.f32.gmra.mrb[110].mxu1 %v20527_v1 }
 0x555   : > { %11731 = vmatprep.mubr.f32.mxu1 %v20528_v16  ;;  %12218 = vmatpush3.bf16.msra.mxu1 %v20523_v56  ;;  %v20548_v56 = vld [vmem:[#allocation22_spill] sm:$0xff] }
 0x556   : > { %12220 = vmatprep.subr.bf16.mxu1 %v12219_v33  ;;  %v20549_v3 = vand.u32 4294901760, %v20548_v56  ;;  %v20568_v56 = vld [vmem:[#allocation89_spill] sm:$0xff] }
 0x557   : > { %v20569_v40 = vand.u32 4294901760, %v20568_v56  ;;  %v20617_v56 = vld [vmem:[#allocation75_spill] sm:$0xff] }
 0x558   : > { %11732 = vmatmul.mubr.f32.gmra.mrb[112].mxu1 %v20529_v37  ;;  %v12227_v20 = vpack.c.bf16 %v20551_v24, %v20549_v3  ;;  %v20561_v3 = vand.u32 4294901760, %v20560_v52 }
 0x559   : > { %11734 = vmatprep.mubr.f32.mxu1 %v20530_v6 }
 0x55c   : > { %11735 = vmatmul.mubr.f32.gmra.mrb[114].mxu1 %v20531_v48  ;;  %v20595_v48 = vand.u32 4294901760, %v20537_v53 }
 0x55d   : > { %11737 = vmatprep.mubr.f32.mxu1 %v16357_v44 }
 0x560   : > { %11738 = vmatmul.mubr.f32.gmra.mrb[116].mxu1 %v20532_v8 }
 0x561   : > { %11740 = vmatprep.mubr.f32.mxu1 %v20533_v59 }
 0x564   : > { %11741 = vmatmul.mubr.f32.gmra.mrb[118].mxu1 %v20534_v49 }
 0x565   : > { %11743 = vmatprep.mubr.f32.mxu1 %v20535_v45 }
 0x568   : > { %11744 = vmatmul.mubr.f32.gmra.mrb[120].mxu1 %v20536_v0 }
 0x569   : > { %11746 = vmatprep.mubr.f32.mxu1 %v20537_v53  ;;  %v20604_v53 = vld [vmem:[#allocation97_spill] sm:$0xff] }
 0x56c   : > { %11747 = vmatmul.mubr.f32.gmra.mrb[122].mxu1 %v20538_v2 }
 0x56d   : > { %11749 = vmatprep.mubr.f32.mxu1 %v20539_v42 }
 0x570   : > { %11750 = vmatmul.mubr.f32.gmra.mrb[124].mxu1 %v20540_v4 }
 0x571   : > { %11752 = vmatprep.mubr.f32.mxu1 %v16497_v57 }
 0x574   : > { %11753 = vmatmul.mubr.f32.gmra.mrb[126].mxu1 %v16494_v15 }
 0x575   : > { %11787 = vmatprep.mubr.f32.mxu1 %v20541_v9  ;;  %v20552_v9 = vand.u32 4294901760, %v20512_v14  ;;  %v12235_v14 = vpack.c.bf16 %v20563_v30, %v20561_v3  ;;  %v20582_v3 = vand.u32 4294901760, %v16218_v19  ;;  %v20586_v30 = vand.u32 4294901760, %v20529_v37 }
 0x576   : > { %v20587_v19 = vand.u32 4294901760, %v20530_v6  ;;  %v20593_v37 = vand.u32 4294901760, %v20535_v45  ;;  %v20594_v6 = vand.u32 4294901760, %v20536_v0  ;;  %v20600_v45 = vand.u32 4294901760, %v16494_v15  ;;  %v20605_v15 = vld [vmem:[#allocation40_spill] sm:$0xff]  ;;  %v20613_v0 = vld [vmem:[#allocation55_spill] sm:$0xff] }
 0x578   : > { %11788 = vmatmul.mubr.f32.vlgmr.msra.gmra.mrb[96].mxu1 %v20546_v50  ;;  %v20555_v50 = vand.u32 4294901760, %v20554_v38 }
 0x579   : > { %12222 = vmatpush3.bf16.msra.mxu1 %v12219_v33  ;;  %11790 = vmatprep.mubr.f32.mxu1 %v20547_v12  ;;  %v20558_v12 = vand.u32 4294901760, %v20515_v5  ;;  %v20566_v5 = vld [vmem:[#allocation88_spill] sm:$0xff] }
 0x57a   : > { %12224 = vmatprep.subr.bf16.mxu1 %v12223_v11  ;;  %v12231_v33 = vpack.c.bf16 %v20557_v29, %v20555_v50  ;;  %v20567_v24 = vand.u32 4294901760, %v20566_v5  ;;  %v20574_v50 = vld [vmem:[#allocation91_spill] sm:$0xff]  ;;  %v20576_v29 = vand.u32 4294901760, %v16177_v23  ;;  %v20584_v23 = vand.u32 4294901760, %v20527_v1 }
 0x57b   : > { %v20575_v60 = vand.u32 4294901760, %v20574_v50  ;;  %v20590_v1 = vand.u32 4294901760, %v20532_v8  ;;  %v20597_v8 = vand.u32 4294901760, %v20539_v42  ;;  %v20603_v42 = vld [vmem:[#allocation94_spill] sm:$0xff]  ;;  %v20615_v5 = vld [vmem:[#allocation63_spill] sm:$0xff]  ;;  %v7054_v50 = vld [vmem:[%s19227_s4 + $0x10] sm:$0xff] }
 0x57c   : > { %11791 = vmatmul.mubr.f32.gmra.mrb[98].mxu1 %v20552_v9  ;;  %v12239_v9 = vpack.c.bf16 %v20569_v40, %v20567_v24  ;;  %v20616_v24 = vld [vmem:[#allocation69_spill] sm:$0xff]  ;;  %v20618_v40 = vld [vmem:[#allocation80_spill] sm:$0xff] }
 0x57d   : > { %11793 = vmatprep.mubr.f32.mxu1 %v20553_v47  ;;  %12226 = vmatpush3.bf16.msra.mxu1 %v12223_v11  ;;  %v20564_v11 = vand.u32 4294901760, %v20518_v27  ;;  %v20571_v47 = vand.u32 4294901760, %v16180_v35  ;;  %v20572_v27 = vld [vmem:[#allocation90_spill] sm:$0xff] }
 0x57e   : > { %12228 = vmatprep.subr.bf16.mxu1 %v12227_v20  ;;  %v20573_v38 = vand.u32 4294901760, %v20572_v27  ;;  %v20622_v27 = vld [vmem:[#allocation13_spill] sm:$0xff] }
 0x580   : > { %11794 = vmatmul.mubr.f32.gmra.mrb[100].mxu1 %v20558_v12  ;;  %v12243_v18 = vpack.c.bf16 %v20575_v60, %v20573_v38  ;;  %v7052_v38 = vld [vmem:[%s19227_s4] sm:$0xff] }
 0x581   : > { %11796 = vmatprep.mubr.f32.mxu1 %v20559_v34  ;;  %12230 = vmatpush3.bf16.msra.mxu1 %v12227_v20  ;;  %v20570_v20 = vand.u32 4294901760, %v20520_v61  ;;  %v20578_v61 = vld [vmem:[#allocation92_spill] sm:$0xff]  ;;  %v20580_v34 = vld [vmem:[#allocation93_spill] sm:$0xff] }
 0x582   : > { %12232 = vmatprep.subr.bf16.mxu1 %v12231_v33  ;;  %v20579_v12 = vand.u32 4294901760, %v20578_v61  ;;  %v20581_v35 = vand.u32 4294901760, %v20580_v34 }
 0x584   : > { %11797 = vmatmul.mubr.f32.gmra.mrb[102].mxu1 %v20564_v11  ;;  %v12247_v52 = vpack.c.bf16 %v20581_v35, %v20579_v12  ;;  %v20592_v11 = vand.u32 4294901760, %v20534_v49  ;;  %v20599_v49 = vand.u32 4294901760, %v16497_v57  ;;  %v20606_v57 = vld [vmem:[#allocation96_spill] sm:$0xff] }
 0x585   : > { %11799 = vmatprep.mubr.f32.mxu1 %v20565_v63  ;;  %12234 = vmatpush3.bf16.msra.mxu1 %v12231_v33  ;;  %v20577_v33 = vand.u32 4294901760, %v16221_v62  ;;  %v20585_v62 = vand.u32 4294901760, %v20528_v16  ;;  %v20591_v16 = vand.u32 4294901760, %v20533_v59  ;;  %v20598_v59 = vand.u32 4294901760, %v20540_v4  ;;  %v20601_v4 = vld [vmem:[#allocation95_spill] sm:$0xff]  ;;  %v20614_v63 = vld [vmem:[#allocation37_spill] sm:$0xff] }
 0x586   : > { %12236 = vmatprep.subr.bf16.mxu1 %v12235_v14 }
 0x588   : > { %11800 = vmatmul.mubr.f32.gmra.mrb[104].mxu1 %v20570_v20  ;;  %v20620_v20 = vld [vmem:[#allocation5_spill] sm:$0xff] }
 0x589   : > { %11802 = vmatprep.mubr.f32.mxu1 %v20571_v47  ;;  %12238 = vmatpush3.bf16.msra.mxu1 %v12235_v14  ;;  %v20589_v14 = vand.u32 4294901760, %v16357_v44  ;;  %v20596_v44 = vand.u32 4294901760, %v20538_v2  ;;  %v20602_v2 = vld [vmem:[#allocation39_spill] sm:$0xff]  ;;  %v20621_v47 = vld [vmem:[#allocation9_spill] sm:$0xff] }
 0x58a   : > { %12240 = vmatprep.subr.bf16.mxu1 %v12239_v9 }
 0x58c   : > { %11803 = vmatmul.mubr.f32.gmra.mrb[106].mxu1 %v20576_v29  ;;  %v7122_v29 = vand.u32 4294901760, %v7054_v50 }
 0x58d   : > { %11805 = vmatprep.mubr.f32.mxu1 %v20577_v33  ;;  %12242 = vmatpush3.bf16.msra.mxu1 %v12239_v9  ;;  %v20619_v9 = vld [vmem:[#allocation3_spill] sm:$0xff] }
 0x58e   : > { %12244 = vmatprep.subr.bf16.mxu1 %v12243_v18  ;;  %v16825_v12 = vsub.f32 %v7054_v50, %v7122_v29 }
 0x590   : > { %11806 = vmatmul.mubr.f32.gmra.mrb[108].mxu1 %v20582_v3  ;;  %20631 = vst [vmem:[#allocation24_spill] sm:$0xff] %v16825_v12  ;;  %v7059_v3 = vld [vmem:[%s19227_s4 + $0x38] sm:$0xff] }
 0x591   : > { %11808 = vmatprep.mubr.f32.mxu1 %v20583_v22  ;;  %12246 = vmatpush3.bf16.msra.mxu1 %v12243_v18  ;;  %v7118_v18 = vand.u32 4294901760, %v7052_v38 }
 0x592   : > { %12248 = vmatprep.subr.bf16.mxu1 %v12247_v52 }
 0x593   : > { %v16821_v33 = vpack.c.bf16 %v7122_v29, %v7118_v18  ;;  %v16823_v61 = vsub.f32 %v7052_v38, %v7118_v18 }
 0x594   : > { %11809 = vmatmul.mubr.f32.gmra.mrb[110].mxu1 %v20584_v23  ;;  %v7128_v23 = vand.u32 4294901760, %v7059_v3 }
 0x595   : > { %11811 = vmatprep.mubr.f32.mxu1 %v20585_v62  ;;  %12250 = vmatpush3.bf16.msra.mxu1 %v12247_v52  ;;  %20629 = vst [vmem:[#allocation66_spill] sm:$0xff] %v16821_v33  ;;  %20630 = vst [vmem:[#allocation17_spill] sm:$0xff] %v16823_v61  ;;  %v7057_v52 = vld [vmem:[%s19227_s4 + $0x28] sm:$0xff] }
 0x596   : > { %12252 = vmatprep.subr.bf16.mxu1 %v20507_v32  ;;  %v7124_v22 = vand.u32 4294901760, %v7057_v52 }
 0x598   : > { %11812 = vmatmul.mubr.f32.gmra.mrb[112].mxu1 %v20586_v30  ;;  %v16844_v30 = vpack.c.bf16 %v7128_v23, %v7124_v22 }
 0x599   : > { %11814 = vmatprep.mubr.f32.mxu1 %v20587_v19  ;;  %v16846_v19 = vsub.f32 %v7057_v52, %v7124_v22 }
 0x59a   : > { %20632 = vst [vmem:[#allocation85_spill] sm:$0xff] %v16844_v30 }
 0x59b   : > { %20633 = vst [vmem:[#allocation10_spill] sm:$0xff] %v16846_v19 }
 0x59c   : > { %11815 = vmatmul.mubr.f32.gmra.mrb[114].mxu1 %v20588_v25  ;;  %v16848_v25 = vsub.f32 %v7059_v3, %v7128_v23 }
 0x59d   : > { %11817 = vmatprep.mubr.f32.mxu1 %v20589_v14  ;;  %v7056_v14 = vld [vmem:[%s19227_s4 + $0x20] sm:$0xff] }
 0x59e   : > { %20634 = vst [vmem:[#allocation26_spill] sm:$0xff] %v16848_v25 }
 0x5a0   : > { %11818 = vmatmul.mubr.f32.gmra.mrb[116].mxu1 %v20590_v1  ;;  %v7058_v1 = vld [vmem:[%s19227_s4 + $0x30] sm:$0xff] }
 0x5a1   : > { %11820 = vmatprep.mubr.f32.mxu1 %v20591_v16 }
 0x5a4   : > { %11821 = vmatmul.mubr.f32.gmra.mrb[118].mxu1 %v20592_v11  ;;  %v7126_v11 = vand.u32 4294901760, %v7056_v14 }
 0x5a5   : > { %11823 = vmatprep.mubr.f32.mxu1 %v20593_v37  ;;  %v7130_v37 = vand.u32 4294901760, %v7058_v1 }
 0x5a8   : > { %11824 = vmatmul.mubr.f32.gmra.mrb[120].mxu1 %v20594_v6  ;;  %v16863_v6 = vpack.c.bf16 %v7130_v37, %v7126_v11 }
 0x5a9   : > { %11826 = vmatprep.mubr.f32.mxu1 %v20595_v48  ;;  %v16865_v48 = vsub.f32 %v7056_v14, %v7126_v11  ;;  %v7069_v14 = vld [vmem:[%s19227_s4 + $0x88] sm:$0xff] }
 0x5aa   : > { %20635 = vst [vmem:[#allocation14_spill] sm:$0xff] %v16863_v6  ;;  %v7148_v11 = vand.u32 4294901760, %v7069_v14 }
 0x5ab   : > { %20636 = vst [vmem:[#allocation43_spill] sm:$0xff] %v16865_v48 }
 0x5ac   : > { %11827 = vmatmul.mubr.f32.gmra.mrb[122].mxu1 %v20596_v44  ;;  %v16867_v44 = vsub.f32 %v7058_v1, %v7130_v37  ;;  %v7071_v1 = vld [vmem:[%s19227_s4 + $0x98] sm:$0xff] }
 0x5ad   : > { %11829 = vmatprep.mubr.f32.mxu1 %v20597_v8  ;;  %v7152_v37 = vand.u32 4294901760, %v7071_v1 }
 0x5ae   : > { %20637 = vst [vmem:[#allocation30_spill] sm:$0xff] %v16867_v44 }
 0x5b0   : > { %11830 = vmatmul.mubr.f32.gmra.mrb[124].mxu1 %v20598_v59 }
 0x5b1   : > { %11832 = vmatprep.mubr.f32.mxu1 %v20599_v49  ;;  %v7061_v49 = vld [vmem:[%s19227_s4 + $0x48] sm:$0xff] }
 0x5b4   : > { %11833 = vmatmul.mubr.f32.gmra.mrb[126].mxu1 %v20600_v45  ;;  %v7063_v45 = vld [vmem:[%s19227_s4 + $0x58] sm:$0xff] }
 0x5b5   : > { %11867 = vmatprep.mubr.f32.mxu1 %v20503_v7 }
 0x5b8   : > { %11868 = vmatmul.mubr.f32.vlgmr.msra.gmra.mrb[96].mxu1 %v20504_v10 }
 0x5b9   : > { %12254 = vmatpush3.bf16.msra.mxu1 %v20507_v32  ;;  %11870 = vmatprep.mubr.f32.mxu1 %v20505_v28  ;;  %v20607_v32 = vld [vmem:[#allocation47_spill] sm:$0xff] }
 0x5ba   : > { %12256 = vmatprep.subr.bf16.mxu1 %v20511_v46 }
 0x5bc   : > { %11871 = vmatmul.mubr.f32.gmra.mrb[98].mxu1 %v20506_v17 }
 0x5bd   : > { %11873 = vmatprep.mubr.f32.mxu1 %v15964_v54  ;;  %12258 = vmatpush3.bf16.msra.mxu1 %v20511_v46  ;;  %v20608_v46 = vld [vmem:[#allocation44_spill] sm:$0xff] }
 0x5be   : > { %12260 = vmatprep.subr.bf16.mxu1 %v20514_v26 }
 0x5c0   : > { %11874 = vmatmul.mubr.f32.gmra.mrb[100].mxu1 %v15962_v58 }
 0x5c1   : > { %11876 = vmatprep.mubr.f32.mxu1 %v16033_v55  ;;  %12262 = vmatpush3.bf16.msra.mxu1 %v20514_v26  ;;  %v20609_v26 = vld [vmem:[#allocation54_spill] sm:$0xff] }
 0x5c2   : > { %12264 = vmatprep.subr.bf16.mxu1 %v20517_v51 }
 0x5c4   : > { %11877 = vmatmul.mubr.f32.gmra.mrb[102].mxu1 %v16031_v43 }
 0x5c5   : > { %11879 = vmatprep.mubr.f32.mxu1 %v16098_v13  ;;  %12266 = vmatpush3.bf16.msra.mxu1 %v20517_v51  ;;  %v20610_v51 = vld [vmem:[#allocation50_spill] sm:$0xff] }
 0x5c6   : > { %12268 = vmatprep.subr.bf16.mxu1 %v20519_v31 }
 0x5c8   : > { %11880 = vmatmul.mubr.f32.gmra.mrb[104].mxu1 %v16096_v39 }
 0x5c9   : > { %11882 = vmatprep.mubr.f32.mxu1 %v16171_v36  ;;  %12270 = vmatpush3.bf16.msra.mxu1 %v20519_v31  ;;  %v20611_v31 = vld [vmem:[#allocation58_spill] sm:$0xff] }
 0x5ca   : > { %12272 = vmatprep.subr.bf16.mxu1 %v20521_v41 }
 0x5cc   : > { %11883 = vmatmul.mubr.f32.gmra.mrb[106].mxu1 %v16169_v21 }
 0x5cd   : > { %11885 = vmatprep.mubr.f32.mxu1 %v20601_v4  ;;  %12274 = vmatpush3.bf16.msra.mxu1 %v20521_v41  ;;  %v20612_v41 = vld [vmem:[#allocation57_spill] sm:$0xff] }
 0x5ce   : > { %12276 = vmatprep.subr.bf16.mxu1 %v20602_v2 }
 0x5d0   : > { %11886 = vmatmul.mubr.f32.gmra.mrb[108].mxu1 %v20603_v42 }
 0x5d1   : > { %11888 = vmatprep.mubr.f32.mxu1 %v20604_v53  ;;  %12278 = vmatpush3.bf16.msra.mxu1 %v20602_v2  ;;  %v7136_v2 = vand.u32 4294901760, %v7063_v45 }
 0x5d2   : > { %12280 = vmatprep.subr.bf16.mxu1 %v20605_v15 }
 0x5d4   : > { %11889 = vmatmul.mubr.f32.gmra.mrb[110].mxu1 %v20606_v57 }
 0x5d5   : > { %11891 = vmatprep.mubr.f32.mxu1 %v20607_v32  ;;  %12282 = vmatpush3.bf16.msra.mxu1 %v20605_v15 }
 0x5d8   : > { %11892 = vmatmul.mubr.f32.gmra.mrb[112].mxu1 %v20608_v46 }
 0x5d9   : > { %11894 = vmatprep.mubr.f32.mxu1 %v20609_v26 }
 0x5dc   : > { %11895 = vmatmul.mubr.f32.gmra.mrb[114].mxu1 %v20610_v51 }
 0x5dd   : > { %11897 = vmatprep.mubr.f32.mxu1 %v20611_v31 }
 0x5e0   : > { %11898 = vmatmul.mubr.f32.gmra.mrb[116].mxu1 %v20612_v41 }
 0x5e1   : > { %11900 = vmatprep.mubr.f32.mxu1 %v20613_v0 }
 0x5e4   : > { %11901 = vmatmul.mubr.f32.gmra.mrb[118].mxu1 %v20614_v63 }
 0x5e5   : > { %11903 = vmatprep.mubr.f32.mxu1 %v20615_v5 }
 0x5e8   : > { %11904 = vmatmul.mubr.f32.gmra.mrb[120].mxu1 %v20616_v24 }
 0x5e9   : > { %11906 = vmatprep.mubr.f32.mxu1 %v20617_v56 }
 0x5ec   : > { %11907 = vmatmul.mubr.f32.gmra.mrb[122].mxu1 %v20618_v40 }
 0x5ed   : > { %11909 = vmatprep.mubr.f32.mxu1 %v20619_v9 }
 0x5f0   : > { %11910 = vmatmul.mubr.f32.gmra.mrb[124].mxu1 %v20620_v20 }
 0x5f1   : > { %11912 = vmatprep.mubr.f32.mxu1 %v20621_v47 }
 0x5f4   : > { %11913 = vmatmul.mubr.f32.gmra.mrb[126].mxu1 %v20622_v27 }
 0x5f5   : > { %11947 = vmatprep.mubr.f32.mxu1 %v20503_v7 }
 0x5f8   : > { %11948 = vmatmul.mubr.f32.vlgmr.msra.gmra.mrb[96].mxu1 %v20504_v10 }
 0x5f9   : > { %11950 = vmatprep.mubr.f32.mxu1 %v20505_v28 }
 0x5fc   : > { %11951 = vmatmul.mubr.f32.gmra.mrb[98].mxu1 %v20506_v17 }
 0x5fd   : > { %11953 = vmatprep.mubr.f32.mxu1 %v15964_v54 }
 0x600   : > { %11954 = vmatmul.mubr.f32.gmra.mrb[100].mxu1 %v15962_v58 }
 0x601   : > { %11956 = vmatprep.mubr.f32.mxu1 %v16033_v55 }
 0x604   : > { %11957 = vmatmul.mubr.f32.gmra.mrb[102].mxu1 %v16031_v43 }
 0x605   : > { %11959 = vmatprep.mubr.f32.mxu1 %v16098_v13  ;;  %v7055_v13 = vld [vmem:[%s19227_s4 + $0x18] sm:$0xff] }
 0x608   : > { %11960 = vmatmul.mubr.f32.gmra.mrb[104].mxu1 %v16096_v39  ;;  %v7053_v39 = vld [vmem:[%s19227_s4 + $0x8] sm:$0xff] }
 0x609   : > { %11962 = vmatprep.mubr.f32.mxu1 %v16171_v36  ;;  %v7120_v36 = vand.u32 4294901760, %v7055_v13 }
 0x60b   : > { %v16806_v17 = vsub.f32 %v7055_v13, %v7120_v36 }
 0x60c   : > { %11963 = vmatmul.mubr.f32.gmra.mrb[106].mxu1 %v16169_v21  ;;  %v7116_v21 = vand.u32 4294901760, %v7053_v39 }
 0x60d   : > { %11965 = vmatprep.mubr.f32.mxu1 %v20601_v4  ;;  %20628 = vst [vmem:[#allocation71_spill] sm:$0xff] %v16806_v17  ;;  %v7132_v4 = vand.u32 4294901760, %v7061_v49 }
 0x60e   : > { %v16802_v10 = vpack.c.bf16 %v7120_v36, %v7116_v21  ;;  %v16804_v28 = vsub.f32 %v7053_v39, %v7116_v21 }
 0x610   : > { %11966 = vmatmul.mubr.f32.gmra.mrb[108].mxu1 %v20603_v42  ;;  %20626 = vst [vmem:[#allocation83_spill] sm:$0xff] %v16802_v10  ;;  %20627 = vst [vmem:[#allocation19_spill] sm:$0xff] %v16804_v28  ;;  %12284 = vmatprep.subr.bf16.mxu0 %v16802_v10  ;;  %v7060_v42 = vld [vmem:[%s19227_s4 + $0x40] sm:$0xff] }
 0x611   : > { %11968 = vmatprep.mubr.f32.mxu1 %v20604_v53  ;;  %12286 = vmatpush1.bf16.msra.mxu0 %v16821_v33  ;;  %v7062_v53 = vld [vmem:[%s19227_s4 + $0x50] sm:$0xff] }
 0x612   : > { %12288 = vmatprep.subr.bf16.mxu0 %v16844_v30 }
 0x614   : > { %11969 = vmatmul.mubr.f32.gmra.mrb[110].mxu1 %v20606_v57  ;;  %v16892_v57 = vpack.c.bf16 %v7136_v2, %v7132_v4 }
 0x615   : > { %11971 = vmatprep.mubr.f32.mxu1 %v20607_v32  ;;  %12290 = vmatpush1.bf16.msra.mxu0 %v16863_v6  ;;  %v16894_v32 = vsub.f32 %v7061_v49, %v7132_v4  ;;  %v7068_v49 = vld [vmem:[%s19227_s4 + $0x80] sm:$0xff] }
 0x616   : > { %20641 = vst [vmem:[#allocation34_spill] sm:$0xff] %v16892_v57  ;;  %12292 = vmatprep.subr.bf16.mxu0 %v16892_v57 }
 0x617   : > { %20642 = vst [vmem:[#allocation74_spill] sm:$0xff] %v16894_v32 }
 0x618   : > { %11972 = vmatmul.mubr.f32.gmra.mrb[112].mxu1 %v20608_v46  ;;  %v16896_v46 = vsub.f32 %v7063_v45, %v7136_v2  ;;  %v7070_v45 = vld [vmem:[%s19227_s4 + $0x90] sm:$0xff]  ;;  %v16972_v2 = vpack.c.bf16 %v7152_v37, %v7148_v11 }
 0x619   : > { %11974 = vmatprep.mubr.f32.mxu1 %v20609_v26  ;;  %v7134_v26 = vand.u32 4294901760, %v7060_v42 }
 0x61a   : > { %20643 = vst [vmem:[#allocation98_spill] sm:$0xff] %v16896_v46  ;;  %20661 = vst [vmem:[#allocation25_spill] sm:$0xff] %v16972_v2 }
 0x61c   : > { %11975 = vmatmul.mubr.f32.gmra.mrb[114].mxu1 %v20610_v51 }
 0x61d   : > { %11977 = vmatprep.mubr.f32.mxu1 %v20611_v31  ;;  %v7138_v31 = vand.u32 4294901760, %v7062_v53 }
 0x620   : > { %11978 = vmatmul.mubr.f32.gmra.mrb[116].mxu1 %v20612_v41  ;;  %v16905_v41 = vsub.f32 %v7060_v42, %v7134_v26  ;;  %v16974_v42 = vsub.f32 %v7069_v14, %v7148_v11  ;;  %v7072_v11 = vld [vmem:[%s19227_s4 + $0xa0] sm:$0xff] }
 0x621   : > { %11980 = vmatprep.mubr.f32.mxu1 %v20613_v0  ;;  %v16907_v0 = vpack.c.bf16 %v7138_v31, %v7134_v26  ;;  %v7150_v26 = vand.u32 4294901760, %v7068_v49 }
 0x622   : > { %20645 = vst [vmem:[#allocation20_spill] sm:$0xff] %v16905_v41  ;;  %20662 = vst [vmem:[#allocation18_spill] sm:$0xff] %v16974_v42  ;;  %v7101_v42 = vld [vmem:[%s19227_s4 + $0x188] sm:$0xff] }
 0x623   : > { %20646 = vst [vmem:[#allocation27_spill] sm:$0xff] %v16907_v0  ;;  %12294 = vmatpush1.bf16.msra.mxu0 %v16907_v0 }
 0x624   : > { %11981 = vmatmul.mubr.f32.gmra.mrb[118].mxu1 %v20614_v63  ;;  %v16909_v63 = vsub.f32 %v7062_v53, %v7138_v31  ;;  %v16976_v53 = vsub.f32 %v7071_v1, %v7152_v37  ;;  %v7074_v37 = vld [vmem:[%s19227_s4 + $0xb0] sm:$0xff] }
 0x625   : > { %11983 = vmatprep.mubr.f32.mxu1 %v20615_v5 }
 0x626   : > { %20647 = vst [vmem:[#allocation32_spill] sm:$0xff] %v16909_v63  ;;  %20663 = vst [vmem:[#allocation38_spill] sm:$0xff] %v16976_v53  ;;  %v7098_v53 = vld [vmem:[%s19227_s4 + $0x170] sm:$0xff]  ;;  %v7100_v63 = vld [vmem:[%s19227_s4 + $0x180] sm:$0xff] }
 0x627   : > { %v7214_v46 = vand.u32 4294901760, %v7100_v63 }
 0x628   : > { %11984 = vmatmul.mubr.f32.gmra.mrb[120].mxu1 %v20616_v24 }
 0x629   : > { %11986 = vmatprep.mubr.f32.mxu1 %v20617_v56  ;;  %v7065_v56 = vld [vmem:[%s19227_s4 + $0x68] sm:$0xff] }
 0x62c   : > { %11987 = vmatmul.mubr.f32.gmra.mrb[122].mxu1 %v20618_v40  ;;  %v7067_v40 = vld [vmem:[%s19227_s4 + $0x78] sm:$0xff] }
 0x62d   : > { %11989 = vmatprep.mubr.f32.mxu1 %v20619_v9  ;;  %v7140_v9 = vand.u32 4294901760, %v7065_v56 }
 0x62f   : > { %v16936_v21 = vsub.f32 %v7065_v56, %v7140_v9  ;;  %v7154_v56 = vand.u32 4294901760, %v7070_v45 }
 0x630   : > { %11990 = vmatmul.mubr.f32.gmra.mrb[124].mxu1 %v20620_v20  ;;  %v7144_v20 = vand.u32 4294901760, %v7067_v40 }
 0x631   : > { %11992 = vmatprep.mubr.f32.mxu1 %v20621_v47  ;;  %v7064_v47 = vld [vmem:[%s19227_s4 + $0x60] sm:$0xff]  ;;  %20652 = vst [vmem:[#allocation100_spill] sm:$0xff] %v16936_v21  ;;  %v7103_v21 = vld [vmem:[%s19227_s4 + $0x198] sm:$0xff] }
 0x632   : > { %v16934_v13 = vpack.c.bf16 %v7144_v20, %v7140_v9  ;;  %v16938_v36 = vsub.f32 %v7067_v40, %v7144_v20  ;;  %v7142_v38 = vand.u32 4294901760, %v7064_v47  ;;  %v16983_v40 = vsub.f32 %v7068_v49, %v7150_v26 }
 0x633   : > { %v16985_v9 = vpack.c.bf16 %v7154_v56, %v7150_v26  ;;  %v16987_v20 = vsub.f32 %v7070_v45, %v7154_v56 }
 0x634   : > { %11993 = vmatmul.mubr.f32.gmra.mrb[126].mxu1 %v20622_v27  ;;  %v7066_v27 = vld [vmem:[%s19227_s4 + $0x70] sm:$0xff]  ;;  %20651 = vst [vmem:[#allocation101_spill] sm:$0xff] %v16934_v13  ;;  %20653 = vst [vmem:[#allocation103_spill] sm:$0xff] %v16938_v36  ;;  %12296 = vmatprep.subr.bf16.mxu0 %v16934_v13  ;;  %v16945_v29 = vsub.f32 %v7064_v47, %v7142_v38 }
 0x635   : > { %v7146_v18 = vand.u32 4294901760, %v7066_v27  ;;  %20665 = vst [vmem:[#allocation88_spill] sm:$0xff] %v16983_v40  ;;  %20666 = vst [vmem:[#allocation89_spill] sm:$0xff] %v16985_v9 }
 0x636   : > { %20655 = vst [vmem:[#allocation105_spill] sm:$0xff] %v16945_v29  ;;  %20667 = vst [vmem:[#allocation90_spill] sm:$0xff] %v16987_v20 }
 0x637   : > { %v16947_v52 = vpack.c.bf16 %v7146_v18, %v7142_v38  ;;  %v16949_v3 = vsub.f32 %v7066_v27, %v7146_v18  ;;  %v7073_v38 = vld [vmem:[%s19227_s4 + $0xa8] sm:$0xff]  ;;  %v7075_v18 = vld [vmem:[%s19227_s4 + $0xb8] sm:$0xff] }
 0x638   : > { %v7156_v14 = vand.u32 4294901760, %v7073_v38  ;;  %v7160_v1 = vand.u32 4294901760, %v7075_v18 }
 0x639   : > { %20656 = vst [vmem:[#allocation104_spill] sm:$0xff] %v16947_v52  ;;  %20657 = vst [vmem:[#allocation78_spill] sm:$0xff] %v16949_v3  ;;  %12298 = vmatpush1.bf16.msra.mxu0 %v16947_v52  ;;  %v7162_v52 = vand.u32 4294901760, %v7074_v37 }
 0x63a   : > { %12300 = vmatprep.subr.bf16.mxu0 %v16972_v2  ;;  %v17010_v45 = vpack.c.bf16 %v7160_v1, %v7156_v14  ;;  %v17012_v26 = vsub.f32 %v7073_v38, %v7156_v14  ;;  %v17014_v56 = vsub.f32 %v7075_v18, %v7160_v1  ;;  %v7077_v18 = vld [vmem:[%s19227_s4 + $0xc8] sm:$0xff]  ;;  %v7079_v14 = vld [vmem:[%s19227_s4 + $0xd8] sm:$0xff]  ;;  %v7076_v1 = vld [vmem:[%s19227_s4 + $0xc0] sm:$0xff] }
 0x63b   : > { %v17025_v57 = vsub.f32 %v7074_v37, %v7162_v52  ;;  %v7166_v33 = vand.u32 4294901760, %v7076_v1 }
 0x63c   : > { %20671 = vst [vmem:[#allocation95_spill] sm:$0xff] %v17010_v45  ;;  %20672 = vst [vmem:[#allocation39_spill] sm:$0xff] %v17012_v26 }
 0x63d   : > { %12302 = vmatpush1.bf16.msra.mxu0 %v16985_v9  ;;  %20673 = vst [vmem:[#allocation94_spill] sm:$0xff] %v17014_v56  ;;  %v7158_v9 = vand.u32 4294901760, %v7072_v11  ;;  %20677 = vst [vmem:[#allocation47_spill] sm:$0xff] %v17025_v57 }
 0x63e   : > { %12304 = vmatprep.subr.bf16.mxu0 %v17010_v45 }
 0x63f   : > { %v17021_v13 = vsub.f32 %v7072_v11, %v7158_v9  ;;  %v17023_v0 = vpack.c.bf16 %v7162_v52, %v7158_v9  ;;  %v7164_v9 = vand.u32 4294901760, %v7077_v18  ;;  %v7168_v52 = vand.u32 4294901760, %v7079_v14  ;;  %v7078_v11 = vld [vmem:[%s19227_s4 + $0xd0] sm:$0xff] }
 0x640   : > { %v7170_v57 = vand.u32 4294901760, %v7078_v11 }
 0x641   : > { %20675 = vst [vmem:[#allocation40_spill] sm:$0xff] %v17021_v13  ;;  %20676 = vst [vmem:[#allocation96_spill] sm:$0xff] %v17023_v0  ;;  %12306 = vmatpush1.bf16.msra.mxu0 %v17023_v0  ;;  %v17048_v0 = vpack.c.bf16 %v7168_v52, %v7164_v9  ;;  %v17050_v45 = vsub.f32 %v7077_v18, %v7164_v9  ;;  %v17052_v30 = vsub.f32 %v7079_v14, %v7168_v52  ;;  %v7081_v14 = vld [vmem:[%s19227_s4 + $0xe8] sm:$0xff]  ;;  %v7083_v9 = vld [vmem:[%s19227_s4 + $0xf8] sm:$0xff] }
 0x642   : > { %v17059_v13 = vsub.f32 %v7076_v1, %v7166_v33  ;;  %v17061_v56 = vpack.c.bf16 %v7170_v57, %v7166_v33  ;;  %v17063_v26 = vsub.f32 %v7078_v11, %v7170_v57  ;;  %v7172_v33 = vand.u32 4294901760, %v7081_v14  ;;  %v7080_v52 = vld [vmem:[%s19227_s4 + $0xe0] sm:$0xff]  ;;  %v7082_v1 = vld [vmem:[%s19227_s4 + $0xf0] sm:$0xff] }
 0x643   : > { %20681 = vst [vmem:[#allocation58_spill] sm:$0xff] %v17048_v0  ;;  %20682 = vst [vmem:[#allocation57_spill] sm:$0xff] %v17050_v45  ;;  %12308 = vmatprep.subr.bf16.mxu0 %v17048_v0  ;;  %v7176_v57 = vand.u32 4294901760, %v7083_v9 }
 0x644   : > { %20683 = vst [vmem:[#allocation55_spill] sm:$0xff] %v17052_v30  ;;  %20685 = vst [vmem:[#allocation63_spill] sm:$0xff] %v17059_v13  ;;  %v7178_v13 = vand.u32 4294901760, %v7082_v1 }
 0x645   : > { %20686 = vst [vmem:[#allocation69_spill] sm:$0xff] %v17061_v56  ;;  %20687 = vst [vmem:[#allocation75_spill] sm:$0xff] %v17063_v26  ;;  %12310 = vmatpush1.bf16.msra.mxu0 %v17061_v56  ;;  %v17084_v11 = vpack.c.bf16 %v7176_v57, %v7172_v33  ;;  %v17086_v56 = vsub.f32 %v7081_v14, %v7172_v33  ;;  %v17088_v0 = vsub.f32 %v7083_v9, %v7176_v57  ;;  %v7085_v14 = vld [vmem:[%s19227_s4 + $0x108] sm:$0xff]  ;;  %v7087_v9 = vld [vmem:[%s19227_s4 + $0x118] sm:$0xff] }
 0x646   : > { %v7174_v26 = vand.u32 4294901760, %v7080_v52  ;;  %v17097_v40 = vsub.f32 %v7082_v1, %v7178_v13  ;;  %v7180_v33 = vand.u32 4294901760, %v7085_v14  ;;  %v7184_v57 = vand.u32 4294901760, %v7087_v9 }
 0x647   : > { %20690 = vst [vmem:[#allocation5_spill] sm:$0xff] %v17084_v11  ;;  %20691 = vst [vmem:[#allocation9_spill] sm:$0xff] %v17086_v56  ;;  %12312 = vmatprep.subr.bf16.mxu0 %v17084_v11 }
 0x648   : > { %20692 = vst [vmem:[#allocation13_spill] sm:$0xff] %v17088_v0  ;;  %v17093_v30 = vsub.f32 %v7080_v52, %v7174_v26  ;;  %v17095_v45 = vpack.c.bf16 %v7178_v13, %v7174_v26  ;;  %20695 = vst [vmem:[#allocation108_spill] sm:$0xff] %v17097_v40  ;;  %v7084_v13 = vld [vmem:[%s19227_s4 + $0x100] sm:$0xff]  ;;  %v7086_v26 = vld [vmem:[%s19227_s4 + $0x110] sm:$0xff]  ;;  %v17114_v52 = vpack.c.bf16 %v7184_v57, %v7180_v33 }
 0x649   : > { %v17116_v1 = vsub.f32 %v7085_v14, %v7180_v33  ;;  %v7182_v11 = vand.u32 4294901760, %v7084_v13  ;;  %v7186_v40 = vand.u32 4294901760, %v7086_v26  ;;  %v7089_v14 = vld [vmem:[%s19227_s4 + $0x128] sm:$0xff] }
 0x64a   : > { %20693 = vst [vmem:[#allocation106_spill] sm:$0xff] %v17093_v30  ;;  %20694 = vst [vmem:[#allocation107_spill] sm:$0xff] %v17095_v45  ;;  %12314 = vmatpush1.bf16.msra.mxu0 %v17095_v45  ;;  %v17118_v45 = vsub.f32 %v7087_v9, %v7184_v57  ;;  %v7091_v9 = vld [vmem:[%s19227_s4 + $0x138] sm:$0xff]  ;;  %v7188_v33 = vand.u32 4294901760, %v7089_v14 }
 0x64b   : > { %20696 = vst [vmem:[#allocation109_spill] sm:$0xff] %v17114_v52  ;;  %20697 = vst [vmem:[#allocation110_spill] sm:$0xff] %v17116_v1  ;;  %12316 = vmatprep.subr.bf16.mxu0 %v17114_v52  ;;  %v17123_v30 = vsub.f32 %v7084_v13, %v7182_v11  ;;  %v17125_v0 = vpack.c.bf16 %v7186_v40, %v7182_v11  ;;  %v17127_v56 = vsub.f32 %v7086_v26, %v7186_v40  ;;  %v7088_v40 = vld [vmem:[%s19227_s4 + $0x120] sm:$0xff]  ;;  %v7090_v11 = vld [vmem:[%s19227_s4 + $0x130] sm:$0xff] }
 0x64c   : > { %20698 = vst [vmem:[#allocation111_spill] sm:$0xff] %v17118_v45  ;;  %v7192_v57 = vand.u32 4294901760, %v7091_v9  ;;  %v17146_v26 = vsub.f32 %v7089_v14, %v7188_v33  ;;  %v7190_v52 = vand.u32 4294901760, %v7088_v40  ;;  %v7093_v14 = vld [vmem:[%s19227_s4 + $0x148] sm:$0xff] }
 0x64d   : > { %20699 = vst [vmem:[#allocation112_spill] sm:$0xff] %v17123_v30  ;;  %20700 = vst [vmem:[#allocation113_spill] sm:$0xff] %v17125_v0 }
 0x64e   : > { %20701 = vst [vmem:[#allocation114_spill] sm:$0xff] %v17127_v56  ;;  %12318 = vmatpush1.bf16.msra.mxu0 %v17125_v0  ;;  %v17144_v13 = vpack.c.bf16 %v7192_v57, %v7188_v33  ;;  %20703 = vst [vmem:[#allocation116_spill] sm:$0xff] %v17146_v26  ;;  %v17148_v0 = vsub.f32 %v7091_v9, %v7192_v57  ;;  %v7194_v56 = vand.u32 4294901760, %v7090_v11  ;;  %v7095_v9 = vld [vmem:[%s19227_s4 + $0x158] sm:$0xff]  ;;  %v7092_v33 = vld [vmem:[%s19227_s4 + $0x140] sm:$0xff]  ;;  %v7196_v57 = vand.u32 4294901760, %v7093_v14 }
 0x64f   : > { %v17153_v30 = vsub.f32 %v7088_v40, %v7190_v52  ;;  %v7097_v40 = vld [vmem:[%s19227_s4 + $0x168] sm:$0xff]  ;;  %v7096_v26 = vld [vmem:[%s19227_s4 + $0x160] sm:$0xff] }
 0x650   : > { %20702 = vst [vmem:[#allocation115_spill] sm:$0xff] %v17144_v13  ;;  %20704 = vst [vmem:[#allocation117_spill] sm:$0xff] %v17148_v0  ;;  %12320 = vmatprep.subr.bf16.mxu0 %v17144_v13  ;;  %v17155_v45 = vpack.c.bf16 %v7194_v56, %v7190_v52  ;;  %v17157_v1 = vsub.f32 %v7090_v11, %v7194_v56  ;;  %v7200_v13 = vand.u32 4294901760, %v7095_v9  ;;  %v7094_v52 = vld [vmem:[%s19227_s4 + $0x150] sm:$0xff]  ;;  %v7198_v56 = vand.u32 4294901760, %v7092_v33  ;;  %v7099_v11 = vld [vmem:[%s19227_s4 + $0x178] sm:$0xff] }
 0x651   : > { %20705 = vst [vmem:[#allocation118_spill] sm:$0xff] %v17153_v30  ;;  %v7204_v30 = vand.u32 4294901760, %v7097_v40  ;;  %v7208_v0 = vand.u32 4294901760, %v7099_v11 }
 0x652   : > { %20706 = vst [vmem:[#allocation119_spill] sm:$0xff] %v17155_v45  ;;  %20707 = vst [vmem:[#allocation120_spill] sm:$0xff] %v17157_v1  ;;  %12322 = vmatpush1.bf16.msra.mxu0 %v17155_v45  ;;  %v7202_v1 = vand.u32 4294901760, %v7094_v52  ;;  %v17189_v3 = vpack.c.bf16 %v7200_v13, %v7196_v57  ;;  %v17191_v45 = vsub.f32 %v7093_v14, %v7196_v57  ;;  %v7206_v57 = vand.u32 4294901760, %v7096_v26 }
 0x653   : > { %v17193_v29 = vsub.f32 %v7095_v9, %v7200_v13  ;;  %v17195_v36 = vsub.f32 %v7092_v33, %v7198_v56  ;;  %v17210_v13 = vpack.c.bf16 %v7208_v0, %v7204_v30  ;;  %v17212_v9 = vsub.f32 %v7097_v40, %v7204_v30 }
 0x654   : > { %20708 = vst [vmem:[#allocation121_spill] sm:$0xff] %v17189_v3  ;;  %20709 = vst [vmem:[#allocation122_spill] sm:$0xff] %v17191_v45  ;;  %v17206_v41 = vpack.c.bf16 %v7202_v1, %v7198_v56  ;;  %v17208_v14 = vsub.f32 %v7094_v52, %v7202_v1  ;;  %12324 = vmatprep.subr.bf16.mxu0 %v17189_v3  ;;  %v17215_v33 = vsub.f32 %v7099_v11, %v7208_v0 }
 0x655   : > { %20710 = vst [vmem:[#allocation123_spill] sm:$0xff] %v17193_v29  ;;  %20711 = vst [vmem:[#allocation124_spill] sm:$0xff] %v17195_v36  ;;  %v7210_v36 = vand.u32 4294901760, %v7098_v53  ;;  %v7212_v29 = vand.u32 4294901760, %v7101_v42  ;;  %v7216_v45 = vand.u32 4294901760, %v7103_v21  ;;  %v17223_v30 = vsub.f32 %v7096_v26, %v7206_v57 }
 0x656   : > { %20712 = vst [vmem:[#allocation125_spill] sm:$0xff] %v17206_v41  ;;  %20713 = vst [vmem:[#allocation126_spill] sm:$0xff] %v17208_v14  ;;  %12326 = vmatpush1.bf16.msra.mxu0 %v17206_v41  ;;  %v17233_v11 = vsub.f32 %v7100_v63, %v7214_v46  ;;  %v7105_v63 = vld [vmem:[%s19227_s4 + $0x1a8] sm:$0xff] }
 0x657   : > { %20714 = vst [vmem:[#allocation127_spill] sm:$0xff] %v17210_v13  ;;  %20715 = vst [vmem:[#allocation128_spill] sm:$0xff] %v17212_v9  ;;  %12328 = vmatprep.subr.bf16.mxu0 %v17210_v13  ;;  %v17221_v1 = vpack.c.bf16 %v7210_v36, %v7206_v57  ;;  %v17225_v52 = vsub.f32 %v7098_v53, %v7210_v36  ;;  %v17227_v0 = vpack.c.bf16 %v7216_v45, %v7212_v29  ;;  %v7106_v53 = vld [vmem:[%s19227_s4 + $0x1b0] sm:$0xff] }
 0x658   : > { %20716 = vst [vmem:[#allocation129_spill] sm:$0xff] %v17215_v33  ;;  %20718 = vst [vmem:[#allocation131_spill] sm:$0xff] %v17223_v30  ;;  %v17229_v56 = vsub.f32 %v7101_v42, %v7212_v29  ;;  %v17231_v40 = vsub.f32 %v7103_v21, %v7216_v45  ;;  %v7220_v21 = vand.u32 4294901760, %v7105_v63  ;;  %v7226_v26 = vand.u32 4294901760, %v7106_v53 }
 0x659   : > { %20717 = vst [vmem:[#allocation130_spill] sm:$0xff] %v17221_v1  ;;  %20719 = vst [vmem:[#allocation132_spill] sm:$0xff] %v17225_v52 }
 0x65a   : > { %20720 = vst [vmem:[#allocation133_spill] sm:$0xff] %v17227_v0  ;;  %20721 = vst [vmem:[#allocation134_spill] sm:$0xff] %v17229_v56  ;;  %12330 = vmatpush1.bf16.msra.mxu0 %v17221_v1 }
 0x65b   : > { %20722 = vst [vmem:[#allocation135_spill] sm:$0xff] %v17231_v40  ;;  %20723 = vst [vmem:[#allocation136_spill] sm:$0xff] %v17233_v11  ;;  %12332 = vmatprep.subr.bf16.mxu0 %v17227_v0  ;;  %v17263_v0 = vsub.f32 %v7105_v63, %v7220_v21  ;;  %v7109_v63 = vld [vmem:[%s19227_s4 + $0x1c8] sm:$0xff] }
 0x65d   : > { %20727 = vst [vmem:[#allocation140_spill] sm:$0xff] %v17263_v0  ;;  %v7113_v0 = vld [vmem:[%s19227_s4 + $0x1e8] sm:$0xff] }
 0x6cb   : > { %v16778_v58 = vpop.f32.mrb[96].mxu1 }
 0x6cc   : > { %20623 = vst [vmem:[#allocation67_spill] sm:$0xff] %v16778_v58  ;;  %6734 = vrot.lane.b32.xlu1 %v16778_v58, %s13874_s14  ;;  %v16782_v54 = vpop.f32.mrb[97].mxu1 }
 0x6cd   : > { %6732 = vrot.lane.b32.xlu0 %v16782_v54, %s13874_s14 }
 0x6cf   : > { %v16786_v43 = vpop.f32.mrb[98].mxu1 }
 0x6d0   : > { %20624 = vst [vmem:[#allocation62_spill] sm:$0xff] %v16786_v43  ;;  %6738 = vrot.lane.b32.xlu1 %v16786_v43, %s13874_s14  ;;  %v16790_v55 = vpop.f32.mrb[99].mxu1 }
 0x6d1   : > { %20625 = vst [vmem:[#allocation84_spill] sm:$0xff] %v16790_v55  ;;  %6736 = vrot.lane.b32.xlu0 %v16790_v55, %s13874_s14 }
 0x6d3   : > { %v16800_v7 = vpop.f32.mrb[100].mxu1 }
 0x6d4   : > { %6742 = vrot.lane.b32.xlu1 %v16800_v7, %s13874_s14  ;;  %v16816_v60 = vpop.f32.mrb[101].mxu1 }
 0x6d5   : > { %6740 = vrot.lane.b32.xlu0 %v16816_v60, %s13874_s14 }
 0x6d7   : > { %v16827_v34 = vpop.f32.mrb[102].mxu1 }
 0x6d8   : > { %6746 = vrot.lane.b32.xlu1 %v16827_v34, %s13874_s14  ;;  %v16831_v35 = vpop.f32.mrb[103].mxu1 }
 0x6d9   : > { %6744 = vrot.lane.b32.xlu0 %v16831_v35, %s13874_s14 }
 0x6db   : > { %v16842_v62 = vpop.f32.mrb[104].mxu1 }
 0x6dc   : > { %6750 = vrot.lane.b32.xlu1 %v16842_v62, %s13874_s14  ;;  %v16858_v16 = vpop.f32.mrb[105].mxu1 }
 0x6dd   : > { %6748 = vrot.lane.b32.xlu0 %v16858_v16, %s13874_s14 }
 0x6df   : > { %v16869_v8 = vpop.f32.mrb[106].mxu1 }
 0x6e0   : > { %20638 = vst [vmem:[#allocation49_spill] sm:$0xff] %v16869_v8  ;;  %6754 = vrot.lane.b32.xlu1 %v16869_v8, %s13874_s14  ;;  %v16873_v59 = vpop.f32.mrb[107].mxu1 }
 0x6e1   : > { %20639 = vst [vmem:[#allocation31_spill] sm:$0xff] %v16873_v59  ;;  %6752 = vrot.lane.b32.xlu0 %v16873_v59, %s13874_s14 }
 0x6e3   : > { %v16890_v15 = vpop.f32.mrb[108].mxu1 }
 0x6e4   : > { %20640 = vst [vmem:[#allocation56_spill] sm:$0xff] %v16890_v15  ;;  %6758 = vrot.lane.b32.xlu1 %v16890_v15, %s13874_s14  ;;  %v16900_v51 = vpop.f32.mrb[109].mxu1 }
 0x6e5   : > { %20644 = vst [vmem:[#allocation86_spill] sm:$0xff] %v16900_v51  ;;  %6756 = vrot.lane.b32.xlu0 %v16900_v51, %s13874_s14 }
 0x6e7   : > { %v16911_v5 = vpop.f32.mrb[110].mxu1 }
 0x6e8   : > { %20648 = vst [vmem:[#allocation45_spill] sm:$0xff] %v16911_v5  ;;  %6762 = vrot.lane.b32.xlu1 %v16911_v5, %s13874_s14  ;;  %v16915_v24 = vpop.f32.mrb[111].mxu1 }
 0x6e9   : > { %20649 = vst [vmem:[#allocation99_spill] sm:$0xff] %v16915_v24  ;;  %6760 = vrot.lane.b32.xlu0 %v16915_v24, %s13874_s14 }
 0x6eb   : > { %v16932_v39 = vpop.f32.mrb[112].mxu1 }
 0x6ec   : > { %20650 = vst [vmem:[#allocation51_spill] sm:$0xff] %v16932_v39  ;;  %v16940_v50 = vpop.f32.mrb[113].mxu1 }
 0x6ed   : > { %20654 = vst [vmem:[#allocation102_spill] sm:$0xff] %v16940_v50  ;;  %6764 = vrot.lane.b32.xlu1 %v16940_v50, %s13874_s14 }
 0x6ef   : > { %v16951_v22 = vpop.f32.mrb[114].mxu1 }
 0x6f0   : > { %20658 = vst [vmem:[#allocation79_spill] sm:$0xff] %v16951_v22  ;;  %v16953_v23 = vpop.f32.mrb[115].mxu1 }
 0x6f1   : > { %20659 = vst [vmem:[#allocation22_spill] sm:$0xff] %v16953_v23  ;;  %6766 = vrot.lane.b32.xlu1 %v16932_v39, %s13874_s14 }
 0x6f3   : > { %v16970_v4 = vpop.f32.mrb[116].mxu1 }
 0x6f4   : > { %20660 = vst [vmem:[#allocation7_spill] sm:$0xff] %v16970_v4  ;;  %v16978_v31 = vpop.f32.mrb[117].mxu1 }
 0x6f5   : > { %20664 = vst [vmem:[#allocation33_spill] sm:$0xff] %v16978_v31  ;;  %6768 = vrot.lane.b32.xlu1 %v16953_v23, %s13874_s14 }
 0x6f7   : > { %v16989_v47 = vpop.f32.mrb[118].mxu1 }
 0x6f8   : > { %20668 = vst [vmem:[#allocation91_spill] sm:$0xff] %v16989_v47  ;;  %v16991_v27 = vpop.f32.mrb[119].mxu1 }
 0x6f9   : > { %20669 = vst [vmem:[#allocation92_spill] sm:$0xff] %v16991_v27  ;;  %6770 = vrot.lane.b32.xlu1 %v16951_v22, %s13874_s14 }
 0x6fb   : > { %v17008_v49 = vpop.f32.mrb[120].mxu1 }
 0x6fc   : > { %20670 = vst [vmem:[#allocation93_spill] sm:$0xff] %v17008_v49  ;;  %v17016_v2 = vpop.f32.mrb[121].mxu1 }
 0x6fd   : > { %20674 = vst [vmem:[#allocation97_spill] sm:$0xff] %v17016_v2  ;;  %6772 = vrot.lane.b32.xlu1 %v16978_v31, %s13874_s14 }
 0x6ff   : > { %v17027_v6 = vpop.f32.mrb[122].mxu1 }
 0x700   : > { %20678 = vst [vmem:[#allocation44_spill] sm:$0xff] %v17027_v6  ;;  %v17029_v38 = vpop.f32.mrb[123].mxu1 }
 0x701   : > { %20679 = vst [vmem:[#allocation54_spill] sm:$0xff] %v17029_v38  ;;  %6774 = vrot.lane.b32.xlu1 %v16970_v4, %s13874_s14 }
 0x703   : > { %v17046_v37 = vpop.f32.mrb[124].mxu1 }
 0x704   : > { %20680 = vst [vmem:[#allocation50_spill] sm:$0xff] %v17046_v37  ;;  %v17054_v10 = vpop.f32.mrb[125].mxu1 }
 0x705   : > { %20684 = vst [vmem:[#allocation37_spill] sm:$0xff] %v17054_v10  ;;  %6776 = vrot.lane.b32.xlu1 %v16991_v27, %s13874_s14 }
 0x707   : > { %v17065_v20 = vpop.f32.mrb[126].mxu1 }
 0x708   : > { %20688 = vst [vmem:[#allocation80_spill] sm:$0xff] %v17065_v20  ;;  %v17067_v18 = vpop.f32.mrb[127].mxu1 }
 0x709   : > { %20689 = vst [vmem:[#allocation3_spill] sm:$0xff] %v17067_v18  ;;  %6778 = vrot.lane.b32.xlu1 %v16989_v47, %s13874_s14 }
 0x70d   : > { %6780 = vrot.lane.b32.xlu1 %v17016_v2, %s13874_s14 }
 0x711   : > { %6782 = vrot.lane.b32.xlu1 %v17008_v49, %s13874_s14 }
 0x715   : > { %6784 = vrot.lane.b32.xlu1 %v17029_v38, %s13874_s14 }
 0x719   : > { %6786 = vrot.lane.b32.xlu1 %v17027_v6, %s13874_s14 }
 0x71d   : > { %6788 = vrot.lane.b32.xlu1 %v17054_v10, %s13874_s14  ;;  %v7102_v10 = vld [vmem:[%s19227_s4 + $0x190] sm:$0xff] }
 0x71e   : > { %v7218_v32 = vand.u32 4294901760, %v7102_v10 }
 0x720   : > { %v17235_v41 = vsub.f32 %v7102_v10, %v7218_v32  ;;  %v17238_v3 = vpack.c.bf16 %v7218_v32, %v7214_v46  ;;  %v7107_v10 = vld [vmem:[%s19227_s4 + $0x1b8] sm:$0xff]  ;;  %v7104_v32 = vld [vmem:[%s19227_s4 + $0x1a0] sm:$0xff] }
 0x721   : > { %6790 = vrot.lane.b32.xlu1 %v17046_v37, %s13874_s14  ;;  %v7224_v42 = vand.u32 4294901760, %v7107_v10  ;;  %v7222_v45 = vand.u32 4294901760, %v7104_v32 }
 0x722   : > { %20724 = vst [vmem:[#allocation137_spill] sm:$0xff] %v17235_v41  ;;  %20725 = vst [vmem:[#allocation138_spill] sm:$0xff] %v17238_v3  ;;  %12334 = vmatpush1.bf16.msra.mxu0 %v17238_v3  ;;  %v17271_v41 = vsub.f32 %v7106_v53, %v7226_v26  ;;  %v7110_v53 = vld [vmem:[%s19227_s4 + $0x1d0] sm:$0xff] }
 0x723   : > { %v17261_v3 = vpack.c.bf16 %v7224_v42, %v7220_v21  ;;  %v17265_v1 = vsub.f32 %v7107_v10, %v7224_v42  ;;  %v17269_v13 = vpack.c.bf16 %v7226_v26, %v7222_v45  ;;  %v7111_v10 = vld [vmem:[%s19227_s4 + $0x1d8] sm:$0xff]  ;;  %v7228_v21 = vand.u32 4294901760, %v7109_v63 }
 0x724   : > { %20731 = vst [vmem:[#allocation144_spill] sm:$0xff] %v17271_v41  ;;  %v7232_v42 = vand.u32 4294901760, %v7111_v10  ;;  %v7234_v26 = vand.u32 4294901760, %v7110_v53 }
 0x725   : > { %6792 = vrot.lane.b32.xlu1 %v17067_v18, %s13874_s14  ;;  %20726 = vst [vmem:[#allocation139_spill] sm:$0xff] %v17261_v3  ;;  %20728 = vst [vmem:[#allocation141_spill] sm:$0xff] %v17265_v1  ;;  %12336 = vmatprep.subr.bf16.mxu0 %v17261_v3  ;;  %v17299_v41 = vsub.f32 %v7109_v63, %v7228_v21  ;;  %v7236_v63 = vand.u32 4294901760, %v7113_v0 }
 0x726   : > { %20730 = vst [vmem:[#allocation143_spill] sm:$0xff] %v17269_v13  ;;  %12338 = vmatpush1.bf16.msra.mxu0 %v17269_v13  ;;  %v17297_v3 = vpack.c.bf16 %v7232_v42, %v7228_v21  ;;  %v17307_v1 = vsub.f32 %v7110_v53, %v7234_v26  ;;  %v7114_v21 = vld [vmem:[%s19227_s4 + $0x1f0] sm:$0xff] }
 0x727   : > { %20734 = vst [vmem:[#allocation147_spill] sm:$0xff] %v17299_v41 }
 0x728   : > { %20733 = vst [vmem:[#allocation146_spill] sm:$0xff] %v17297_v3  ;;  %20738 = vst [vmem:[#allocation151_spill] sm:$0xff] %v17307_v1  ;;  %12340 = vmatprep.subr.bf16.mxu0 %v17297_v3  ;;  %v17330_v3 = vsub.f32 %v7113_v0, %v7236_v63 }
 0x729   : > { %6794 = vrot.lane.b32.xlu1 %v17065_v20, %s13874_s14 }
 0x72a   : > { %20740 = vst [vmem:[#allocation153_spill] sm:$0xff] %v17330_v3 }
 0x73e   : > { %v6735_v36 = vpop.permute.xlu1 %6734 }
 0x73f   : > { %v6733_v29 = vpop.permute.xlu0 %6732  ;;  %v17274_v11 = vmax.f32 %v16778_v58, %v6735_v36  ;;  %v7108_v36 = vld [vmem:[%s19227_s4 + $0x1c0] sm:$0xff] }
 0x740   : > { %v17254_v46 = vmax.f32 %v16782_v54, %v6733_v29  ;;  %v17267_v29 = vsub.f32 %v7104_v32, %v7222_v45  ;;  %v7230_v45 = vand.u32 4294901760, %v7108_v36 }
 0x742   : > { %v6739_v57 = vpop.permute.xlu1 %6738  ;;  %6828 = vrot.lane.b32.xlu0 %v17254_v46, %s13873_s13  ;;  %20729 = vst [vmem:[#allocation142_spill] sm:$0xff] %v17267_v29  ;;  %v17301_v29 = vsub.f32 %v7111_v10, %v7232_v42 }
 0x743   : > { %v6737_v40 = vpop.permute.xlu0 %6736  ;;  %v17316_v58 = vmax.f32 %v16786_v43, %v6739_v57 }
 0x744   : > { %v17290_v32 = vmax.f32 %v16790_v55, %v6737_v40  ;;  %20735 = vst [vmem:[#allocation148_spill] sm:$0xff] %v17301_v29  ;;  %v17303_v40 = vsub.f32 %v7108_v36, %v7230_v45  ;;  %v17305_v55 = vpack.c.bf16 %v7234_v26, %v7230_v45  ;;  %v7112_v36 = vld [vmem:[%s19227_s4 + $0x1e0] sm:$0xff]  ;;  %v7242_v45 = vand.u32 4294901760, %v7114_v21 }
 0x745   : > { %v7238_v53 = vand.u32 4294901760, %v7112_v36 }
 0x746   : > { %v6743_v56 = vpop.permute.xlu1 %6742  ;;  %6830 = vrot.lane.b32.xlu0 %v17274_v11, %s13873_s13  ;;  %20732 = vst [vmem:[#allocation145_spill] sm:$0xff] %v17290_v32  ;;  %20736 = vst [vmem:[#allocation149_spill] sm:$0xff] %v17303_v40  ;;  %12342 = vmatpush1.bf16.msra.mxu0 %v17305_v55  ;;  %v17342_v41 = vsub.f32 %v7114_v21, %v7242_v45 }
 0x747   : > { %20737 = vst [vmem:[#allocation150_spill] sm:$0xff] %v17305_v55  ;;  %v6741_v42 = vpop.permute.xlu0 %6740  ;;  %v17334_v40 = vpack.c.bf16 %v7242_v45, %v7238_v53  ;;  %v17340_v55 = vsub.f32 %v7112_v36, %v7238_v53  ;;  %v17348_v0 = vmax.f32 %v16800_v7, %v6743_v56  ;;  %v19672_v36 = vand.u32 4294901760, %v16806_v17 }
 0x748   : > { %v17337_v29 = vmax.f32 %v16816_v60, %v6741_v42  ;;  %20744 = vst [vmem:[#allocation157_spill] sm:$0xff] %v17342_v41 }
 0x749   : > { %20742 = vst [vmem:[#allocation155_spill] sm:$0xff] %v17334_v40  ;;  %20743 = vst [vmem:[#allocation156_spill] sm:$0xff] %v17340_v55  ;;  %v7772_v56 = vsub.f32 %v16806_v17, %v19672_v36 }
 0x74a   : > { %v6747_v13 = vpop.permute.xlu1 %6746  ;;  %6832 = vrot.lane.b32.xlu0 %v17290_v32, %s13873_s13  ;;  %v7115_v32 = vld [vmem:[%s19227_s4 + $0x1f8] sm:$0xff] }
 0x74b   : > { %v7240_v10 = vand.u32 4294901760, %v7115_v32 }
 0x74d   : > { %v17328_v57 = vpack.c.bf16 %v7240_v10, %v7236_v63  ;;  %v17332_v1 = vsub.f32 %v7115_v32, %v7240_v10  ;;  %v6745_v32 = vpop.permute.xlu0 %6744  ;;  %v19671_v10 = vand.u32 4294901760, %v16804_v28 }
 0x74e   : > { %v6751_v26 = vpop.permute.xlu1 %6750  ;;  %6834 = vrot.lane.b32.xlu0 %v17316_v58, %s13873_s13  ;;  %v17355_v21 = vmax.f32 %v16831_v35, %v6745_v32 }
 0x74f   : > { %20739 = vst [vmem:[#allocation152_spill] sm:$0xff] %v17328_v57  ;;  %20741 = vst [vmem:[#allocation154_spill] sm:$0xff] %v17332_v1  ;;  %12344 = vmatprep.subr.bf16.mxu0 %v17328_v57  ;;  %v7760_v42 = vsub.f32 %v16804_v28, %v19671_v10  ;;  %v17366_v57 = vmax.f32 %v16827_v34, %v6747_v13 }
 0x750   : > { %12346 = vmatpush1.bf16.msra.mxu0 %v17334_v40  ;;  %v7773_v40 = vand.u32 4294901760, %v7772_v56 }
 0x751   : > { %v7761_v45 = vand.u32 4294901760, %v7760_v42  ;;  %v6749_v41 = vpop.permute.xlu0 %6748  ;;  %v17376_v42 = vmax.f32 %v16842_v62, %v6751_v26 }
 0x752   : > { %v6755_v43 = vpop.permute.xlu1 %6754  ;;  %6836 = vrot.lane.b32.xlu0 %v17337_v29, %s13873_s13  ;;  %v17371_v10 = vmax.f32 %v16858_v16, %v6749_v41 }
 0x753   : > { %v12347_v32 = vpack.c.bf16 %v7773_v40, %v7761_v45  ;;  %v17391_v26 = vmax.f32 %v16869_v8, %v6755_v43 }
 0x755   : > { %12348 = vmatprep.subr.bf16.mxu0 %v12347_v32  ;;  %v6753_v56 = vpop.permute.xlu0 %6752  ;;  %20746 = vst [vmem:[#allocation159_spill] sm:$0xff] %v17391_v26 }
 0x756   : > { %v6759_v63 = vpop.permute.xlu1 %6758  ;;  %6838 = vrot.lane.b32.xlu0 %v17348_v0, %s13873_s13  ;;  %v17386_v41 = vmax.f32 %v16873_v59, %v6753_v56 }
 0x757   : > { %v17406_v43 = vmax.f32 %v16890_v15, %v6759_v63  ;;  %v20789_v15 = vld [vmem:[#allocation40_spill] sm:$0xff] }
 0x758   : > { %20745 = vst [vmem:[#allocation158_spill] sm:$0xff] %v17386_v41 }
 0x759   : > { %v6757_v32 = vpop.permute.xlu0 %6756  ;;  %20749 = vst [vmem:[#allocation162_spill] sm:$0xff] %v17406_v43 }
 0x75a   : > { %v6763_v53 = vpop.permute.xlu1 %6762  ;;  %6840 = vrot.lane.b32.xlu0 %v17355_v21, %s13873_s13  ;;  %v17401_v56 = vmax.f32 %v16900_v51, %v6757_v32 }
 0x75b   : > { %v17421_v63 = vmax.f32 %v16911_v5, %v6763_v53  ;;  %v20781_v5 = vld [vmem:[#allocation88_spill] sm:$0xff] }
 0x75c   : > { %20748 = vst [vmem:[#allocation161_spill] sm:$0xff] %v17401_v56 }
 0x75d   : > { %v6761_v1 = vpop.permute.xlu0 %6760  ;;  %20752 = vst [vmem:[#allocation165_spill] sm:$0xff] %v17421_v63 }
 0x75e   : > { %6842 = vrot.lane.b32.xlu0 %v17366_v57, %s13873_s13  ;;  %v17416_v32 = vmax.f32 %v16915_v24, %v6761_v1 }
 0x75f   : > { %v6765_v55 = vpop.permute.xlu1 %6764 }
 0x760   : > { %20751 = vst [vmem:[#allocation164_spill] sm:$0xff] %v17416_v32  ;;  %v17431_v1 = vmax.f32 %v16940_v50, %v6765_v55 }
 0x762   : > { %6844 = vrot.lane.b32.xlu0 %v17371_v10, %s13873_s13  ;;  %20754 = vst [vmem:[#allocation167_spill] sm:$0xff] %v17431_v1 }
 0x763   : > { %v6767_v36 = vpop.permute.xlu1 %6766 }
 0x764   : > { %v17379_v13 = vmax.f32 %v16932_v39, %v6767_v36  ;;  %v20805_v39 = vld [vmem:[#allocation75_spill] sm:$0xff] }
 0x766   : > { %6846 = vrot.lane.b32.xlu0 %v17376_v42, %s13873_s13  ;;  %6862 = vrot.lane.b32.xlu1 %v17379_v13, %s13873_s13 }
 0x767   : > { %v6769_v40 = vpop.permute.xlu1 %6768 }
 0x768   : > { %v17436_v53 = vmax.f32 %v16953_v23, %v6769_v40  ;;  %v19693_v40 = vand.u32 4294901760, %v16823_v61  ;;  %v19694_v23 = vand.u32 4294901760, %v16825_v12 }
 0x76a   : > { %6848 = vrot.lane.b32.xlu0 %v17386_v41, %s13873_s13  ;;  %20755 = vst [vmem:[#allocation168_spill] sm:$0xff] %v17436_v53 }
 0x76b   : > { %v6771_v45 = vpop.permute.xlu1 %6770 }
 0x76c   : > { %v17394_v36 = vmax.f32 %v16951_v22, %v6771_v45 }
 0x76e   : > { %20747 = vst [vmem:[#allocation160_spill] sm:$0xff] %v17394_v36  ;;  %6850 = vrot.lane.b32.xlu0 %v17391_v26, %s13873_s13  ;;  %6866 = vrot.lane.b32.xlu1 %v17394_v36, %s13873_s13 }
 0x76f   : > { %v6773_v17 = vpop.permute.xlu1 %6772 }
 0x770   : > { %v17446_v55 = vmax.f32 %v16978_v31, %v6773_v17  ;;  %v7766_v31 = vsub.f32 %v16823_v61, %v19693_v40  ;;  %v20766_v61 = vld [vmem:[#allocation98_spill] sm:$0xff] }
 0x772   : > { %6852 = vrot.lane.b32.xlu0 %v17401_v56, %s13873_s13  ;;  %20757 = vst [vmem:[#allocation170_spill] sm:$0xff] %v17446_v55 }
 0x773   : > { %v6775_v28 = vpop.permute.xlu1 %6774 }
 0x774   : > { %v17409_v45 = vmax.f32 %v16970_v4, %v6775_v28 }
 0x776   : > { %20750 = vst [vmem:[#allocation163_spill] sm:$0xff] %v17409_v45  ;;  %6854 = vrot.lane.b32.xlu0 %v17406_v43, %s13873_s13  ;;  %6870 = vrot.lane.b32.xlu1 %v17409_v45, %s13873_s13  ;;  %v20790_v43 = vld [vmem:[#allocation47_spill] sm:$0xff] }
 0x777   : > { %v6777_v3 = vpop.permute.xlu1 %6776 }
 0x77a   : > { %6856 = vrot.lane.b32.xlu0 %v17416_v32, %s13873_s13 }
 0x77b   : > { %v6779_v51 = vpop.permute.xlu1 %6778 }
 0x77c   : > { %v17424_v28 = vmax.f32 %v16989_v47, %v6779_v51 }
 0x77e   : > { %20753 = vst [vmem:[#allocation166_spill] sm:$0xff] %v17424_v28  ;;  %6858 = vrot.lane.b32.xlu0 %v17421_v63, %s13873_s13  ;;  %6874 = vrot.lane.b32.xlu1 %v17424_v28, %s13873_s13  ;;  %v20779_v28 = vld [vmem:[#allocation18_spill] sm:$0xff] }
 0x77f   : > { %v6781_v4 = vpop.permute.xlu1 %6780  ;;  %v20782_v63 = vld [vmem:[#allocation90_spill] sm:$0xff] }
 0x782   : > { %6860 = vrot.lane.b32.xlu0 %v17431_v1, %s13873_s13 }
 0x783   : > { %v6783_v24 = vpop.permute.xlu1 %6782 }
 0x784   : > { %v17439_v51 = vmax.f32 %v17008_v49, %v6783_v24  ;;  %v17453_v24 = vmax.f32 %v16991_v27, %v6777_v3  ;;  %v19697_v3 = vand.u32 4294901760, %v16846_v19  ;;  %v20763_v27 = vand.u32 4294901760, %v16848_v25 }
 0x786   : > { %20756 = vst [vmem:[#allocation169_spill] sm:$0xff] %v17439_v51  ;;  %6864 = vrot.lane.b32.xlu0 %v17436_v53, %s13873_s13  ;;  %6878 = vrot.lane.b32.xlu1 %v17439_v51, %s13873_s13  ;;  %20758 = vst [vmem:[#allocation171_spill] sm:$0xff] %v17453_v24  ;;  %v17479_v40 = vsub.f32 %v16846_v19, %v19697_v3  ;;  %v20765_v3 = vld [vmem:[#allocation74_spill] sm:$0xff] }
 0x787   : > { %v6785_v47 = vpop.permute.xlu1 %6784  ;;  %v20786_v53 = vld [vmem:[#allocation94_spill] sm:$0xff] }
 0x78a   : > { %6868 = vrot.lane.b32.xlu0 %v17446_v55, %s13873_s13  ;;  %v7778_v55 = vsub.f32 %v16825_v12, %v19694_v23  ;;  %v17491_v12 = vsub.f32 %v16848_v25, %v20763_v27  ;;  %v20768_v25 = vand.u32 4294901760, %v16867_v44  ;;  %v7785_v23 = vand.u32 4294901760, %v17479_v40 }
 0x78b   : > { %v6787_v50 = vpop.permute.xlu1 %6786 }
 0x78c   : > { %v17456_v49 = vmax.f32 %v17027_v6, %v6787_v50  ;;  %v17470_v50 = vmax.f32 %v17016_v2, %v6781_v4  ;;  %v7779_v51 = vand.u32 4294901760, %v7778_v55  ;;  %v17483_v4 = vmax.f32 %v17029_v38, %v6785_v47  ;;  %v20767_v47 = vld [vmem:[#allocation20_spill] sm:$0xff] }
 0x78d   : > { %v7797_v38 = vand.u32 4294901760, %v17491_v12  ;;  %v20773_v2 = vld [vmem:[#allocation32_spill] sm:$0xff]  ;;  %v20775_v40 = vand.u32 4294901760, %v20767_v47 }
 0x78e   : > { %20759 = vst [vmem:[#allocation172_spill] sm:$0xff] %v17456_v49  ;;  %6872 = vrot.lane.b32.xlu0 %v17453_v24, %s13873_s13  ;;  %6882 = vrot.lane.b32.xlu1 %v17456_v49, %s13873_s13  ;;  %20760 = vst [vmem:[#allocation173_spill] sm:$0xff] %v17470_v50  ;;  %v7767_v24 = vand.u32 4294901760, %v7766_v31  ;;  %v20764_v31 = vand.u32 4294901760, %v16865_v48 }
 0x78f   : > { %v6789_v17 = vpop.permute.xlu1 %6788  ;;  %20761 = vst [vmem:[#allocation174_spill] sm:$0xff] %v17483_v4  ;;  %v7814_v12 = vsub.f32 %v20767_v47, %v20775_v40 }
 0x790   : > { %v17496_v55 = vsub.f32 %v16865_v48, %v20764_v31  ;;  %v17505_v27 = vpack.c.bf16 %v7779_v51, %v7767_v24  ;;  %v17510_v31 = vsub.f32 %v16867_v44, %v20768_v25  ;;  %v20769_v48 = vld [vmem:[#allocation37_spill] sm:$0xff]  ;;  %v20772_v51 = vand.u32 4294901760, %v20766_v61  ;;  %v20774_v44 = vld [vmem:[#allocation100_spill] sm:$0xff] }
 0x791   : > { %v17513_v19 = vmax.f32 %v20769_v48, %v6789_v17  ;;  %v20776_v17 = vld [vmem:[#allocation103_spill] sm:$0xff]  ;;  %v20777_v48 = vld [vmem:[#allocation105_spill] sm:$0xff]  ;;  %v20788_v25 = vand.u32 4294901760, %v20774_v44 }
 0x792   : > { %6876 = vrot.lane.b32.xlu0 %v17470_v50, %s13873_s13  ;;  %v7820_v24 = vsub.f32 %v20766_v61, %v20772_v51  ;;  %v20780_v61 = vld [vmem:[#allocation38_spill] sm:$0xff]  ;;  %v20791_v45 = vand.u32 4294901760, %v20776_v17  ;;  %v20792_v47 = vand.u32 4294901760, %v20777_v48 }
 0x793   : > { %v6791_v49 = vpop.permute.xlu1 %6790  ;;  %20770 = vst [vmem:[#allocation176_spill] sm:$0xff] %v17513_v19  ;;  %v7832_v50 = vsub.f32 %v20774_v44, %v20788_v25  ;;  %v20794_v44 = vand.u32 4294901760, %v20779_v28 }
 0x794   : > { %v17486_v6 = vmax.f32 %v17046_v37, %v6791_v49  ;;  %v7838_v25 = vsub.f32 %v20777_v48, %v20792_v47 }
 0x796   : > { %20762 = vst [vmem:[#allocation175_spill] sm:$0xff] %v17486_v6  ;;  %6880 = vrot.lane.b32.xlu0 %v17483_v4, %s13873_s13  ;;  %6886 = vrot.lane.b32.xlu1 %v17486_v6, %s13873_s13  ;;  %v7791_v4 = vand.u32 4294901760, %v17496_v55  ;;  %v20771_v6 = vand.u32 4294901760, %v20765_v3  ;;  %v20785_v55 = vld [vmem:[#allocation39_spill] sm:$0xff] }
 0x797   : > { %v6793_v37 = vpop.permute.xlu1 %6792 }
 0x798   : > { %v7808_v49 = vsub.f32 %v20765_v3, %v20771_v6  ;;  %v20778_v6 = vld [vmem:[#allocation78_spill] sm:$0xff]  ;;  %v20787_v3 = vand.u32 4294901760, %v20773_v2 }
 0x799   : > { %v20793_v32 = vand.u32 4294901760, %v20778_v6 }
 0x79a   : > { %6884 = vrot.lane.b32.xlu0 %v17513_v19, %s13873_s13  ;;  %v17539_v19 = vmax.f32 %v17067_v18, %v6793_v37  ;;  %v7826_v51 = vsub.f32 %v20773_v2, %v20787_v3  ;;  %v7844_v3 = vsub.f32 %v20776_v17, %v20791_v45  ;;  %v7856_v2 = vsub.f32 %v20779_v28, %v20794_v44 }
 0x79b   : > { %v6795_v1 = vpop.permute.xlu1 %6794  ;;  %v7850_v37 = vsub.f32 %v20778_v6, %v20793_v32  ;;  %v20797_v17 = vand.u32 4294901760, %v20782_v63  ;;  %v7809_v48 = vand.u32 4294901760, %v7808_v49  ;;  %v7821_v18 = vand.u32 4294901760, %v7820_v24 }
 0x79c   : > { %20783 = vst [vmem:[#allocation177_spill] sm:$0xff] %v17539_v19  ;;  %v17542_v40 = vmax.f32 %v17065_v20, %v6795_v1  ;;  %v7803_v1 = vand.u32 4294901760, %v17510_v31  ;;  %v20795_v20 = vand.u32 4294901760, %v20780_v61  ;;  %v20798_v32 = vand.u32 4294901760, %v20785_v55 }
 0x79d   : > { %v7874_v47 = vsub.f32 %v20782_v63, %v20797_v17  ;;  %v20799_v44 = vand.u32 4294901760, %v20786_v53  ;;  %v7833_v49 = vand.u32 4294901760, %v7832_v50  ;;  %v7845_v24 = vand.u32 4294901760, %v7844_v3 }
 0x79e   : > { %20784 = vst [vmem:[#allocation178_spill] sm:$0xff] %v17542_v40  ;;  %6888 = vrot.lane.b32.xlu0 %v17539_v19, %s13873_s13  ;;  %6890 = vrot.lane.b32.xlu1 %v17542_v40, %s13873_s13  ;;  %v7868_v31 = vsub.f32 %v20780_v61, %v20795_v20  ;;  %v20796_v40 = vand.u32 4294901760, %v20781_v5  ;;  %v7880_v6 = vsub.f32 %v20785_v55, %v20798_v32  ;;  %v7815_v19 = vand.u32 4294901760, %v7814_v12  ;;  %v20802_v12 = vld [vmem:[#allocation57_spill] sm:$0xff]  ;;  %s10588_s13 = sld [smem:[#allocation2]] }
 0x79f   : > { %v7892_v28 = vsub.f32 %v20786_v53, %v20799_v44  ;;  %v7827_v20 = vand.u32 4294901760, %v7826_v51  ;;  %v20800_v61 = vand.u32 4294901760, %v20789_v15  ;;  %v7839_v63 = vand.u32 4294901760, %v7838_v25  ;;  %v20803_v53 = vld [vmem:[#allocation55_spill] sm:$0xff] }
 0x7a0   : > { %v7862_v45 = vsub.f32 %v20781_v5, %v20796_v40  ;;  %v20801_v5 = vand.u32 4294901760, %v20790_v43  ;;  %v7851_v56 = vand.u32 4294901760, %v7850_v37  ;;  %v7857_v22 = vand.u32 4294901760, %v7856_v2 }
 0x7a1   : > { %v7886_v40 = vsub.f32 %v20789_v15, %v20800_v61  ;;  %v7869_v32 = vand.u32 4294901760, %v7868_v31  ;;  %v7875_v8 = vand.u32 4294901760, %v7874_v47  ;;  %v7881_v36 = vand.u32 4294901760, %v7880_v6  ;;  %v20804_v15 = vld [vmem:[#allocation63_spill] sm:$0xff]  ;;  %v20815_v47 = vld [vmem:[#allocation110_spill] sm:$0xff] }
 0x7a2   : > { %v7898_v17 = vsub.f32 %v20790_v43, %v20801_v5  ;;  %v7863_v55 = vand.u32 4294901760, %v7862_v45  ;;  %v7893_v44 = vand.u32 4294901760, %v7892_v28  ;;  %v19753_v51 = vand.u32 4294901760, %v20802_v12 }
 0x7a3   : > { %v19752_v26 = vand.u32 4294901760, %v20803_v53  ;;  %v7887_v59 = vand.u32 4294901760, %v7886_v40  ;;  %v19751_v41 = vand.u32 4294901760, %v20804_v15  ;;  %v19754_v5 = vand.u32 4294901760, %v20805_v39  ;;  %v20816_v40 = vld [vmem:[#allocation111_spill] sm:$0xff] }
 0x7a4   : > { %v7899_v61 = vand.u32 4294901760, %v7898_v17  ;;  %v17596_v50 = vpack.c.bf16 %v7797_v38, %v7785_v23  ;;  %v17598_v3 = vpack.c.bf16 %v7803_v1, %v7791_v4  ;;  %v17600_v2 = vpack.c.bf16 %v7821_v18, %v7809_v48 }
 0x7a5   : > { %v17602_v37 = vpack.c.bf16 %v7827_v20, %v7815_v19  ;;  %v17604_v6 = vpack.c.bf16 %v7845_v24, %v7833_v49  ;;  %v17606_v28 = vpack.c.bf16 %v7851_v56, %v7839_v63  ;;  %v17608_v25 = vpack.c.bf16 %v7869_v32, %v7857_v22  ;;  %v20810_v19 = vld [vmem:[#allocation9_spill] sm:$0xff]  ;;  %v20813_v63 = vld [vmem:[#allocation106_spill] sm:$0xff] }
 0x7a6   : > { %v17610_v31 = vpack.c.bf16 %v7875_v8, %v7863_v55  ;;  %v17612_v45 = vpack.c.bf16 %v7893_v44, %v7881_v36  ;;  %v7904_v23 = vsub.f32 %v20802_v12, %v19753_v51  ;;  %v7916_v48 = vsub.f32 %v20803_v53, %v19752_v26  ;;  %v20812_v36 = vld [vmem:[#allocation13_spill] sm:$0xff]  ;;  %v20814_v55 = vld [vmem:[#allocation108_spill] sm:$0xff]  ;;  %v20818_v24 = vld [vmem:[#allocation114_spill] sm:$0xff] }
 0x7a7   : > { %20806 = vst [vmem:[#allocation179_spill] sm:$0xff] %v17606_v28  ;;  %20807 = vst [vmem:[#allocation180_spill] sm:$0xff] %v17608_v25  ;;  %v19758_v38 = vand.u32 4294901760, %v20810_v19  ;;  %v17621_v18 = vpack.c.bf16 %v7899_v61, %v7887_v59  ;;  %v7910_v22 = vsub.f32 %v20804_v15, %v19751_v41  ;;  %v7922_v8 = vsub.f32 %v20805_v39, %v19754_v5  ;;  %v20817_v59 = vld [vmem:[#allocation112_spill] sm:$0xff]  ;;  %v20820_v41 = vld [vmem:[#allocation117_spill] sm:$0xff] }
 0x7a8   : > { %20808 = vst [vmem:[#allocation181_spill] sm:$0xff] %v17610_v31  ;;  %20809 = vst [vmem:[#allocation182_spill] sm:$0xff] %v17612_v45  ;;  %v20819_v44 = vld [vmem:[#allocation116_spill] sm:$0xff]  ;;  %v7905_v51 = vand.u32 4294901760, %v7904_v23  ;;  %v7917_v5 = vand.u32 4294901760, %v7916_v48  ;;  %v20821_v56 = vld [vmem:[#allocation118_spill] sm:$0xff] }
 0x7a9   : > { %20811 = vst [vmem:[#allocation183_spill] sm:$0xff] %v17621_v18  ;;  %v7928_v4 = vsub.f32 %v20810_v19, %v19758_v38  ;;  %v20822_v20 = vand.u32 4294901760, %v20812_v36  ;;  %v20823_v39 = vld [vmem:[#allocation120_spill] sm:$0xff]  ;;  %v20824_v15 = vld [vmem:[#allocation122_spill] sm:$0xff]  ;;  %v20825_v53 = vld [vmem:[#allocation123_spill] sm:$0xff]  ;;  %v20826_v26 = vand.u32 4294901760, %v20813_v63 }
 0x7aa   : > { %v20827_v48 = vand.u32 4294901760, %v20814_v55  ;;  %v20828_v1 = vand.u32 4294901760, %v20815_v47  ;;  %v20830_v32 = vand.u32 4294901760, %v20817_v59  ;;  %v7923_v12 = vand.u32 4294901760, %v7922_v8  ;;  %v20838_v25 = vld [vmem:[#allocation124_spill] sm:$0xff] }
 0x7ab   : > { %v7940_v17 = vsub.f32 %v20812_v36, %v20822_v20  ;;  %v7934_v23 = vsub.f32 %v20813_v63, %v20826_v26  ;;  %v20829_v20 = vand.u32 4294901760, %v20816_v40  ;;  %v20831_v36 = vand.u32 4294901760, %v20818_v24 }
 0x7ac   : > { %v7946_v38 = vsub.f32 %v20814_v55, %v20827_v48  ;;  %v7952_v19 = vsub.f32 %v20815_v47, %v20828_v1  ;;  %v7958_v61 = vsub.f32 %v20817_v59, %v20830_v32  ;;  %v20832_v63 = vand.u32 4294901760, %v20819_v44 }
 0x7ad   : > { %v7964_v49 = vsub.f32 %v20816_v40, %v20829_v20  ;;  %v7970_v26 = vsub.f32 %v20818_v24, %v20831_v36  ;;  %v20833_v55 = vand.u32 4294901760, %v20820_v41  ;;  %v7911_v47 = vand.u32 4294901760, %v7910_v22 }
 0x7ae   : > { %v7976_v48 = vsub.f32 %v20819_v44, %v20832_v63  ;;  %v7929_v43 = vand.u32 4294901760, %v7928_v4  ;;  %v20834_v20 = vand.u32 4294901760, %v20821_v56  ;;  %v7941_v32 = vand.u32 4294901760, %v7940_v17 }
 0x7af   : > { %v7988_v1 = vsub.f32 %v20820_v41, %v20833_v55  ;;  %v20835_v59 = vand.u32 4294901760, %v20823_v39  ;;  %v20836_v24 = vand.u32 4294901760, %v20824_v15  ;;  %v20837_v44 = vand.u32 4294901760, %v20825_v53 }
 0x7b0   : > { %v7982_v40 = vsub.f32 %v20821_v56, %v20834_v20  ;;  %v7935_v22 = vand.u32 4294901760, %v7934_v23  ;;  %v7947_v8 = vand.u32 4294901760, %v7946_v38  ;;  %v7953_v4 = vand.u32 4294901760, %v7952_v19 }
 0x7b1   : > { %v7994_v36 = vsub.f32 %v20823_v39, %v20835_v59  ;;  %v8000_v63 = vsub.f32 %v20824_v15, %v20836_v24  ;;  %v8012_v55 = vsub.f32 %v20825_v53, %v20837_v44  ;;  %v7965_v41 = vand.u32 4294901760, %v7964_v49 }
 0x7b2   : > { %v7959_v18 = vand.u32 4294901760, %v7958_v61  ;;  %v7971_v45 = vand.u32 4294901760, %v7970_v26  ;;  %v7977_v20 = vand.u32 4294901760, %v7976_v48  ;;  %v7989_v17 = vand.u32 4294901760, %v7988_v1 }
 0x7b3   : > { %v7983_v31 = vand.u32 4294901760, %v7982_v40  ;;  %v19777_v59 = vand.u32 4294901760, %v20838_v25  ;;  %v19776_v39 = vand.u32 4294901760, %v17208_v14  ;;  %v19775_v24 = vand.u32 4294901760, %v17212_v9 }
 0x7b4   : > { %v6829_v56 = vpop.permute.xlu0 %6828  ;;  %v7995_v28 = vand.u32 4294901760, %v7994_v36  ;;  %v8001_v44 = vand.u32 4294901760, %v8000_v63  ;;  %v8013_v23 = vand.u32 4294901760, %v8012_v55  ;;  %v17688_v38 = vpack.c.bf16 %v7917_v5, %v7905_v51  ;;  %v20840_v63 = vld [vmem:[#allocation67_spill] sm:$0xff] }
 0x7b5   : > { %v6892_v15 = vmax.f32 %v17254_v46, %v6829_v56  ;;  %v17690_v19 = vpack.c.bf16 %v7923_v12, %v7911_v47  ;;  %v17692_v49 = vpack.c.bf16 %v7941_v32, %v7929_v43  ;;  %v19774_v61 = vand.u32 4294901760, %v17215_v33  ;;  %v20839_v32 = vld [vmem:[#allocation134_spill] sm:$0xff] }
 0x7b6   : > { %v17696_v26 = vpack.c.bf16 %v7947_v8, %v7935_v22  ;;  %v17698_v48 = vpack.c.bf16 %v7965_v41, %v7953_v4  ;;  %v17700_v1 = vpack.c.bf16 %v7971_v45, %v7959_v18  ;;  %v17702_v56 = vpack.c.bf16 %v7989_v17, %v7977_v20  ;;  %v20841_v22 = vld [vmem:[#allocation135_spill] sm:$0xff] }
 0x7b7   : > { %v6924_v40 = vsub.f32 %v16782_v54, %v6892_v15  ;;  %v8006_v12 = vsub.f32 %v20838_v25, %v19777_v59  ;;  %v8018_v43 = vsub.f32 %v17208_v14, %v19776_v39  ;;  %v8024_v54 = vsub.f32 %v17212_v9, %v19775_v24  ;;  %v20845_v24 = vld [vmem:[#allocation140_spill] sm:$0xff]  ;;  %v20846_v59 = vld [vmem:[#allocation141_spill] sm:$0xff] }
 0x7b8   : > { %v6831_v46 = vpop.permute.xlu0 %6830  ;;  %v17714_v51 = vpack.c.bf16 %v7995_v28, %v7983_v31  ;;  %v17716_v5 = vpack.c.bf16 %v8013_v23, %v8001_v44  ;;  %v8036_v45 = vsub.f32 %v17215_v33, %v19774_v61  ;;  %v19779_v18 = vand.u32 4294901760, %v17223_v30  ;;  %v20843_v44 = vld [vmem:[#allocation137_spill] sm:$0xff]  ;;  %v20922_v33 = vld [vmem:[#allocation163_spill] sm:$0xff] }
 0x7b9   : > { %v6956_v15 = vmul.f32 1.442695, %v6924_v40  ;;  %v6893_v41 = vmax.f32 %v17274_v11, %v6831_v46  ;;  %v19778_v47 = vand.u32 4294901760, %v17225_v52  ;;  %v19780_v8 = vand.u32 4294901760, %v20841_v22  ;;  %v20842_v11 = vld [vmem:[#allocation136_spill] sm:$0xff]  ;;  %v20844_v46 = vld [vmem:[#allocation145_spill] sm:$0xff] }
 0x7ba   : > { %v19782_v28 = vand.u32 4294901760, %v20842_v11  ;;  %v8007_v4 = vand.u32 4294901760, %v8006_v12  ;;  %v8019_v20 = vand.u32 4294901760, %v8018_v43  ;;  %v8025_v17 = vand.u32 4294901760, %v8024_v54 }
 0x7bb   : > { %13736 = vpow2.f32 %v6956_v15  ;;  %v6925_v55 = vsub.f32 %v20840_v63, %v6893_v41  ;;  %v19785_v23 = vand.u32 4294901760, %v20843_v44  ;;  %v19787_v39 = vand.u32 4294901760, %v20845_v24  ;;  %v20848_v63 = vld [vmem:[#allocation84_spill] sm:$0xff] }
 0x7bc   : > { %v6833_v31 = vpop.permute.xlu0 %6832  ;;  %v8037_v15 = vand.u32 4294901760, %v8036_v45  ;;  %v8030_v41 = vsub.f32 %v17223_v30, %v19779_v18  ;;  %v8042_v12 = vsub.f32 %v17225_v52, %v19778_v47  ;;  %v20847_v43 = vand.u32 4294901760, %v20839_v32  ;;  %v20854_v30 = vld [vmem:[#allocation147_spill] sm:$0xff] }
 0x7bd   : > { %v6958_v40 = vmul.f32 1.442695, %v6925_v55  ;;  %v6894_v61 = vmax.f32 %v20844_v46, %v6833_v31  ;;  %v8060_v31 = vsub.f32 %v20841_v22, %v19780_v8  ;;  %v8054_v45 = vsub.f32 %v20842_v11, %v19782_v28 }
 0x7be   : > { %v8048_v54 = vsub.f32 %v20839_v32, %v20847_v43  ;;  %v8066_v47 = vsub.f32 %v20843_v44, %v19785_v23  ;;  %v8072_v43 = vsub.f32 %v20845_v24, %v19787_v39  ;;  %v17756_v22 = vpack.c.bf16 %v8019_v20, %v8007_v4  ;;  %v20852_v24 = vld [vmem:[#allocation62_spill] sm:$0xff] }
 0x7bf   : > { %13738 = vpow2.f32 %v6958_v40  ;;  %v6926_v55 = vsub.f32 %v20848_v63, %v6894_v61  ;;  %v20849_v40 = vld [vmem:[#allocation142_spill] sm:$0xff]  ;;  %v20850_v61 = vld [vmem:[#allocation144_spill] sm:$0xff]  ;;  %v20851_v28 = vand.u32 4294901760, %v20846_v59  ;;  %v17761_v32 = vpack.c.bf16 %v8037_v15, %v8025_v17 }
 0x7c0   : > { %v6835_v46 = vpop.permute.xlu0 %6834  ;;  %v19794_v18 = vand.u32 4294901760, %v20849_v40  ;;  %v8031_v23 = vand.u32 4294901760, %v8030_v41  ;;  %v8043_v44 = vand.u32 4294901760, %v8042_v12  ;;  %v8055_v52 = vand.u32 4294901760, %v8054_v45 }
 0x7c1   : > { %v6960_v36 = vmul.f32 1.442695, %v6926_v55  ;;  %v6895_v8 = vmax.f32 %v17316_v58, %v6835_v46  ;;  %v8084_v11 = vsub.f32 %v20846_v59, %v20851_v28  ;;  %v8049_v55 = vand.u32 4294901760, %v8048_v54 }
 0x7c2   : > { %v8078_v39 = vsub.f32 %v20849_v40, %v19794_v18  ;;  %v20853_v58 = vand.u32 4294901760, %v20850_v61  ;;  %v8061_v46 = vand.u32 4294901760, %v8060_v31  ;;  %v8067_v28 = vand.u32 4294901760, %v8066_v47  ;;  %v20857_v47 = vld [vmem:[#allocation148_spill] sm:$0xff] }
 0x7c3   : > { %13740 = vpow2.f32 %v6960_v36  ;;  %v6927_v63 = vsub.f32 %v20852_v24, %v6895_v8  ;;  %v8073_v17 = vand.u32 4294901760, %v8072_v43  ;;  %v8085_v59 = vand.u32 4294901760, %v8084_v11  ;;  %v20855_v36 = vld [vmem:[#allocation12_spill] sm:$0xff] }
 0x7c4   : > { %v8090_v4 = vsub.f32 %v20850_v61, %v20853_v58  ;;  %v6837_v20 = vpop.permute.xlu0 %6836  ;;  %v19797_v18 = vand.u32 4294901760, %v20854_v30  ;;  %v17775_v8 = vpack.c.bf16 %v8043_v44, %v8031_v23  ;;  %v8079_v54 = vand.u32 4294901760, %v8078_v39 }
 0x7c5   : > { %v13737_v15 = vpop.eup %13736  ;;  %v6962_v41 = vmul.f32 1.442695, %v6927_v63  ;;  %v6896_v12 = vmax.f32 %v17337_v29, %v6837_v20  ;;  %v19796_v43 = vand.u32 4294901760, %v20857_v47  ;;  %v17784_v11 = vpack.c.bf16 %v8061_v46, %v8049_v55  ;;  %v20861_v55 = vld [vmem:[#allocation16_spill] sm:$0xff] }
 0x7c6   : > { %v7020_v40 = vmul.f32 %v13737_v15, %v20855_v36  ;;  %v17773_v24 = vand.u32 4294901760, %v13737_v15  ;;  %v8091_v45 = vand.u32 4294901760, %v8090_v4  ;;  %v17786_v20 = vpack.c.bf16 %v8067_v28, %v8055_v52 }
 0x7c7   : > { %13742 = vpow2.f32 %v6962_v41  ;;  %v6928_v31 = vsub.f32 %v16816_v60, %v6896_v12  ;;  %v17789_v23 = vpack.c.bf16 %v8085_v59, %v8073_v17  ;;  %v17794_v60 = vsub.f32 %v20854_v30, %v19797_v18 }
 0x7c8   : > { %20856 = vst [vmem:[#allocation67_spill] sm:$0xff] %v17773_v24  ;;  %v6839_v58 = vpop.permute.xlu0 %6838  ;;  %v17779_v63 = vand.u32 4294901760, %v7020_v40  ;;  %v17782_v29 = vsub.f32 %v13737_v15, %v17773_v24  ;;  %v8108_v59 = vsub.f32 %v20857_v47, %v19796_v43 }
 0x7c9   : > { %v13739_v36 = vpop.eup %13738  ;;  %v6964_v44 = vmul.f32 1.442695, %v6928_v31  ;;  %v6897_v39 = vmax.f32 %v17348_v0, %v6839_v58  ;;  %v17804_v0 = vpack.c.bf16 %v8091_v45, %v8079_v54  ;;  %v20865_v45 = vld [vmem:[#allocation149_spill] sm:$0xff] }
 0x7ca   : > { %20858 = vst [vmem:[#allocation145_spill] sm:$0xff] %v17779_v63  ;;  %20859 = vst [vmem:[#allocation84_spill] sm:$0xff] %v17782_v29  ;;  %v17797_v4 = vsub.f32 %v7020_v40, %v17779_v63  ;;  %v19798_v15 = vand.u32 4294901760, %v17782_v29  ;;  %v7021_v46 = vmul.f32 %v13739_v36, %v20861_v55  ;;  %v17801_v52 = vand.u32 4294901760, %v13739_v36 }
 0x7cb   : > { %13744 = vpow2.f32 %v6964_v44  ;;  %v6929_v28 = vsub.f32 %v16800_v7, %v6897_v39  ;;  %v20866_v39 = vld [vmem:[#allocation151_spill] sm:$0xff]  ;;  %v8109_v61 = vand.u32 4294901760, %v8108_v59 }
 0x7cc   : > { %20860 = vst [vmem:[#allocation62_spill] sm:$0xff] %v17797_v4  ;;  %20862 = vst [vmem:[#allocation12_spill] sm:$0xff] %v17801_v52  ;;  %v6841_v17 = vpop.permute.xlu0 %6840  ;;  %v19803_v41 = vand.u32 4294901760, %v17797_v4  ;;  %v7253_v40 = vsub.f32 %v17782_v29, %v19798_v15  ;;  %v17813_v12 = vand.u32 4294901760, %v7021_v46  ;;  %v17816_v31 = vsub.f32 %v13739_v36, %v17801_v52  ;;  %v20868_v29 = vld [vmem:[#allocation23_spill] sm:$0xff] }
 0x7cd   : > { %v13741_v58 = vpop.eup %13740  ;;  %v6966_v7 = vmul.f32 1.442695, %v6929_v28  ;;  %v6898_v54 = vmax.f32 %v17355_v21, %v6841_v17  ;;  %v8097_v36 = vand.u32 4294901760, %v17794_v60 }
 0x7ce   : > { %20863 = vst [vmem:[#allocation16_spill] sm:$0xff] %v17813_v12  ;;  %20864 = vst [vmem:[#allocation184_spill] sm:$0xff] %v17816_v31  ;;  %v7247_v43 = vsub.f32 %v17797_v4, %v19803_v41  ;;  %v17825_v18 = vsub.f32 %v7021_v46, %v17813_v12  ;;  %v19807_v15 = vand.u32 4294901760, %v17816_v31  ;;  %v7022_v21 = vmul.f32 %v13741_v58, %v20868_v29  ;;  %v20872_v29 = vld [vmem:[#allocation29_spill] sm:$0xff] }
 0x7cf   : > { %13746 = vpow2.f32 %v6966_v7  ;;  %v6930_v28 = vsub.f32 %v16831_v35, %v6898_v54  ;;  %v17831_v17 = vand.u32 4294901760, %v13741_v58  ;;  %v7254_v47 = vand.u32 4294901760, %v7253_v40 }
 0x7d0   : > { %20867 = vst [vmem:[#allocation185_spill] sm:$0xff] %v17825_v18  ;;  %v6843_v44 = vpop.permute.xlu0 %6842  ;;  %v7248_v55 = vand.u32 4294901760, %v7247_v43  ;;  %v19808_v30 = vand.u32 4294901760, %v17825_v18  ;;  %v7269_v46 = vsub.f32 %v17816_v31, %v19807_v15  ;;  %v17838_v7 = vand.u32 4294901760, %v7022_v21 }
 0x7d1   : > { %20869 = vst [vmem:[#allocation23_spill] sm:$0xff] %v17831_v17  ;;  %v13743_v41 = vpop.eup %13742  ;;  %v6968_v4 = vmul.f32 1.442695, %v6930_v28  ;;  %v6899_v60 = vmax.f32 %v17366_v57, %v6843_v44  ;;  %v17841_v35 = vsub.f32 %v13741_v58, %v17831_v17 }
 0x7d2   : > { %20870 = vst [vmem:[#allocation186_spill] sm:$0xff] %v17838_v7  ;;  %7249 = vmatprep.mubr.f32.mxu0 %v7248_v55  ;;  %v7263_v43 = vsub.f32 %v17825_v18, %v19808_v30  ;;  %v7023_v40 = vmul.f32 %v13743_v41, %v20872_v29  ;;  %v17847_v54 = vand.u32 4294901760, %v13743_v41  ;;  %v17851_v57 = vsub.f32 %v7022_v21, %v17838_v7 }
 0x7d3   : > { %20871 = vst [vmem:[#allocation187_spill] sm:$0xff] %v17841_v35  ;;  %13748 = vpow2.f32 %v6968_v4  ;;  %v6931_v28 = vsub.f32 %v16827_v34, %v6899_v60  ;;  %7255 = vmatmul.mubr.f32.vlgmr.msra.gmra.mrb[64].mxu0 %v7254_v47  ;;  %v19809_v58 = vand.u32 4294901760, %v17841_v35  ;;  %v7270_v15 = vand.u32 4294901760, %v7269_v46 }
 0x7d4   : > { %20873 = vst [vmem:[#allocation29_spill] sm:$0xff] %v17847_v54  ;;  %20874 = vst [vmem:[#allocation188_spill] sm:$0xff] %v17851_v57  ;;  %12350 = vmatpush1.bf16.msra.mxu0 %v17505_v27  ;;  %v6845_v44 = vpop.permute.xlu0 %6844  ;;  %v7264_v55 = vand.u32 4294901760, %v7263_v43  ;;  %v17855_v30 = vand.u32 4294901760, %v7023_v40  ;;  %v17858_v29 = vsub.f32 %v13743_v41, %v17847_v54  ;;  %v19810_v47 = vand.u32 4294901760, %v17851_v57  ;;  %v20878_v41 = vld [vmem:[#allocation36_spill] sm:$0xff] }
 0x7d5   : > { %v13745_v59 = vpop.eup %13744  ;;  %v6970_v4 = vmul.f32 1.442695, %v6931_v28  ;;  %v6900_v34 = vmax.f32 %v17371_v10, %v6845_v44  ;;  %12352 = vmatprep.subr.bf16.mxu0 %v17596_v50  ;;  %v7285_v27 = vsub.f32 %v17841_v35, %v19809_v58  ;;  %v17877_v28 = vpack.c.bf16 %v8109_v61, %v8097_v36  ;;  %v20896_v35 = vld [vmem:[#allocation160_spill] sm:$0xff] }
 0x7d6   : > { %20875 = vst [vmem:[#allocation189_spill] sm:$0xff] %v17855_v30  ;;  %20876 = vst [vmem:[#allocation190_spill] sm:$0xff] %v17858_v29  ;;  %7265 = vmatprep.mubr.f32.mxu0 %v7264_v55  ;;  %v17867_v21 = vsub.f32 %v7023_v40, %v17855_v30  ;;  %v19811_v46 = vand.u32 4294901760, %v17858_v29  ;;  %v7024_v60 = vmul.f32 %v13745_v59, %v20878_v41  ;;  %v17871_v43 = vand.u32 4294901760, %v13745_v59 }
 0x7d7   : > { %13750 = vpow2.f32 %v6970_v4  ;;  %v6932_v10 = vsub.f32 %v16858_v16, %v6900_v34  ;;  %7271 = vmatmul.mubr.f32.gmra.mrb[66].mxu0 %v7270_v15  ;;  %v7279_v50 = vsub.f32 %v17851_v57, %v19810_v47  ;;  %v7286_v40 = vand.u32 4294901760, %v7285_v27 }
 0x7d8   : > { %20877 = vst [vmem:[#allocation191_spill] sm:$0xff] %v17867_v21  ;;  %20879 = vst [vmem:[#allocation36_spill] sm:$0xff] %v17871_v43  ;;  %v6847_v44 = vpop.permute.xlu0 %6846  ;;  %v6863_v55 = vpop.permute.xlu1 %6862  ;;  %12354 = vmatpush1.bf16.msra.mxu0 %v17598_v3  ;;  %v19812_v58 = vand.u32 4294901760, %v17867_v21  ;;  %v17881_v41 = vand.u32 4294901760, %v7024_v60  ;;  %v17884_v4 = vsub.f32 %v13745_v59, %v17871_v43  ;;  %v7301_v36 = vsub.f32 %v17858_v29, %v19811_v46 }
 0x7d9   : > { %v13747_v16 = vpop.eup %13746  ;;  %v6972_v15 = vmul.f32 1.442695, %v6932_v10  ;;  %v6901_v34 = vmax.f32 %v17376_v42, %v6847_v44  ;;  %v6909_v47 = vmax.f32 %v17379_v13, %v6863_v55  ;;  %v7280_v61 = vand.u32 4294901760, %v7279_v50  ;;  %12356 = vmatprep.subr.bf16.mxu0 %v17600_v2  ;;  %v20883_v13 = vld [vmem:[#allocation41_spill] sm:$0xff] }
 0x7da   : > { %20880 = vst [vmem:[#allocation192_spill] sm:$0xff] %v17881_v41  ;;  %20881 = vst [vmem:[#allocation193_spill] sm:$0xff] %v17884_v4  ;;  %v7295_v3 = vsub.f32 %v17867_v21, %v19812_v58  ;;  %v17896_v59 = vsub.f32 %v7024_v60, %v17881_v41  ;;  %v19815_v27 = vand.u32 4294901760, %v17884_v4  ;;  %v7025_v10 = vmul.f32 %v13747_v16, %v20883_v13  ;;  %v20887_v58 = vld [vmem:[#allocation158_spill] sm:$0xff] }
 0x7db   : > { %13752 = vpow2.f32 %v6972_v15  ;;  %v6933_v42 = vsub.f32 %v16842_v62, %v6901_v34  ;;  %7281 = vmatprep.mubr.f32.mxu0 %v7280_v61  ;;  %v20884_v2 = vand.u32 4294901760, %v20865_v45  ;;  %v17910_v15 = vand.u32 4294901760, %v13747_v16  ;;  %v20886_v61 = vld [vmem:[#allocation51_spill] sm:$0xff] }
 0x7dc   : > { %20882 = vst [vmem:[#allocation194_spill] sm:$0xff] %v17896_v59  ;;  %7287 = vmatmul.mubr.f32.gmra.mrb[68].mxu0 %v7286_v40  ;;  %v6849_v44 = vpop.permute.xlu0 %6848  ;;  %v7296_v55 = vand.u32 4294901760, %v7295_v3  ;;  %v19820_v46 = vand.u32 4294901760, %v17896_v59  ;;  %v7317_v60 = vsub.f32 %v17884_v4, %v19815_v27  ;;  %v6941_v13 = vsub.f32 %v20886_v61, %v6909_v47  ;;  %v20890_v4 = vld [vmem:[#allocation46_spill] sm:$0xff]  ;;  %v20891_v47 = vld [vmem:[#allocation31_spill] sm:$0xff] }
 0x7dd   : > { %v17904_v50 = vsub.f32 %v20865_v45, %v20884_v2  ;;  %20885 = vst [vmem:[#allocation41_spill] sm:$0xff] %v17910_v15  ;;  %v13749_v62 = vpop.eup %13748  ;;  %v6974_v34 = vmul.f32 1.442695, %v6933_v42  ;;  %v6902_v29 = vmax.f32 %v20887_v58, %v6849_v44  ;;  %12358 = vmatpush1.bf16.msra.mxu0 %v17602_v37  ;;  %v17915_v2 = vand.u32 4294901760, %v7025_v10  ;;  %v20906_v45 = vld [vmem:[#allocation181_spill] sm:$0xff] }
 0x7de   : > { %7297 = vmatprep.mubr.f32.mxu0 %v7296_v55  ;;  %v7302_v40 = vand.u32 4294901760, %v7301_v36  ;;  %v7311_v3 = vsub.f32 %v17896_v59, %v19820_v46  ;;  %v17921_v27 = vsub.f32 %v13747_v16, %v17910_v15  ;;  %v7026_v21 = vmul.f32 %v13749_v62, %v20890_v4  ;;  %12360 = vmatprep.subr.bf16.mxu0 %v17604_v6  ;;  %v20895_v6 = vld [vmem:[#allocation159_spill] sm:$0xff] }
 0x7df   : > { %20888 = vst [vmem:[#allocation51_spill] sm:$0xff] %v17915_v2  ;;  %13754 = vpow2.f32 %v6974_v34  ;;  %v6934_v58 = vsub.f32 %v20891_v47, %v6902_v29  ;;  %v17927_v37 = vsub.f32 %v7025_v10, %v17915_v2  ;;  %v17929_v42 = vand.u32 4294901760, %v13749_v62  ;;  %v20897_v47 = vld [vmem:[#allocation179_spill] sm:$0xff] }
 0x7e0   : > { %20889 = vst [vmem:[#allocation158_spill] sm:$0xff] %v17921_v27  ;;  %7303 = vmatmul.mubr.f32.gmra.mrb[70].mxu0 %v7302_v40  ;;  %v6851_v36 = vpop.permute.xlu0 %6850  ;;  %v6867_v44 = vpop.permute.xlu1 %6866  ;;  %v7312_v55 = vand.u32 4294901760, %v7311_v3  ;;  %v7318_v61 = vand.u32 4294901760, %v7317_v60  ;;  %v19827_v16 = vand.u32 4294901760, %v17921_v27  ;;  %v17932_v46 = vand.u32 4294901760, %v7026_v21 }
 0x7e1   : > { %20892 = vst [vmem:[#allocation46_spill] sm:$0xff] %v17927_v37  ;;  %20893 = vst [vmem:[#allocation31_spill] sm:$0xff] %v17929_v42  ;;  %v13751_v4 = vpop.eup %13750  ;;  %v6976_v59 = vmul.f32 1.442695, %v6934_v58  ;;  %v6903_v34 = vmax.f32 %v20895_v6, %v6851_v36  ;;  %v6911_v29 = vmax.f32 %v20896_v35, %v6867_v44  ;;  %v19836_v10 = vand.u32 4294901760, %v17927_v37  ;;  %12362 = vmatpush1.bf16.msra.mxu0 %v20897_v47  ;;  %v20900_v58 = vld [vmem:[#allocation53_spill] sm:$0xff] }
 0x7e2   : > { %20894 = vst [vmem:[#allocation195_spill] sm:$0xff] %v17932_v46  ;;  %7313 = vmatprep.mubr.f32.mxu0 %v7312_v55  ;;  %v7333_v40 = vsub.f32 %v17921_v27, %v19827_v16  ;;  %v17942_v60 = vsub.f32 %v7026_v21, %v17932_v46  ;;  %v17945_v3 = vsub.f32 %v13749_v62, %v17929_v42  ;;  %v6990_v36 = vmul.f32 1.442695, %v6941_v13  ;;  %v20901_v35 = vld [vmem:[#allocation49_spill] sm:$0xff]  ;;  %v20902_v6 = vld [vmem:[#allocation180_spill] sm:$0xff]  ;;  %v20903_v47 = vld [vmem:[#allocation79_spill] sm:$0xff] }
 0x7e3   : > { %v7027_v57 = vmul.f32 %v13751_v4, %v20900_v58  ;;  %13756 = vpow2.f32 %v6976_v59  ;;  %v6935_v44 = vsub.f32 %v20901_v35, %v6903_v34  ;;  %v7327_v55 = vsub.f32 %v17927_v37, %v19836_v10  ;;  %12364 = vmatprep.subr.bf16.mxu0 %v20902_v6  ;;  %v20905_v58 = vld [vmem:[#allocation161_spill] sm:$0xff]  ;;  %v20913_v37 = vld [vmem:[#allocation162_spill] sm:$0xff] }
 0x7e4   : > { %20898 = vst [vmem:[#allocation159_spill] sm:$0xff] %v17942_v60  ;;  %20899 = vst [vmem:[#allocation160_spill] sm:$0xff] %v17945_v3  ;;  %v6943_v16 = vsub.f32 %v20903_v47, %v6911_v29  ;;  %7319 = vmatmul.mubr.f32.gmra.mrb[72].mxu0 %v7318_v61  ;;  %v6853_v21 = vpop.permute.xlu0 %6852  ;;  %v19835_v27 = vand.u32 4294901760, %v17942_v60  ;;  %v19837_v62 = vand.u32 4294901760, %v17945_v3  ;;  %v7334_v18 = vand.u32 4294901760, %v7333_v40 }
 0x7e5   : > { %v17956_v31 = vand.u32 4294901760, %v7027_v57  ;;  %v13753_v13 = vpop.eup %13752  ;;  %v6978_v59 = vmul.f32 1.442695, %v6935_v44  ;;  %v6904_v34 = vmax.f32 %v20905_v58, %v6853_v21  ;;  %v7328_v35 = vand.u32 4294901760, %v7327_v55  ;;  %12366 = vmatpush1.bf16.msra.mxu0 %v20906_v45  ;;  %v20909_v44 = vld [vmem:[#allocation182_spill] sm:$0xff]  ;;  %v20911_v45 = vld [vmem:[#allocation59_spill] sm:$0xff] }
 0x7e6   : > { %v7343_v29 = vsub.f32 %v17942_v60, %v19835_v27  ;;  %v7349_v61 = vsub.f32 %v17945_v3, %v19837_v62  ;;  %v17969_v47 = vand.u32 4294901760, %v13751_v4  ;;  %12368 = vmatprep.subr.bf16.mxu0 %v20909_v44  ;;  %v20910_v55 = vld [vmem:[#allocation86_spill] sm:$0xff]  ;;  %v7028_v21 = vmul.f32 %v13753_v13, %v20911_v45 }
 0x7e7   : > { %20904 = vst [vmem:[#allocation179_spill] sm:$0xff] %v17956_v31  ;;  %v17967_v6 = vsub.f32 %v7027_v57, %v17956_v31  ;;  %13758 = vpow2.f32 %v6978_v59  ;;  %v6936_v40 = vsub.f32 %v20910_v55, %v6904_v34  ;;  %7329 = vmatprep.mubr.f32.mxu0 %v7328_v35  ;;  %v17974_v58 = vand.u32 4294901760, %v13753_v13  ;;  %v20915_v35 = vld [vmem:[#allocation183_spill] sm:$0xff] }
 0x7e8   : > { %20908 = vst [vmem:[#allocation49_spill] sm:$0xff] %v17969_v47  ;;  %13760 = vpow2.f32 %v6990_v36  ;;  %7335 = vmatmul.mubr.f32.gmra.mrb[74].mxu0 %v7334_v18  ;;  %v6855_v27 = vpop.permute.xlu0 %6854  ;;  %v7344_v10 = vand.u32 4294901760, %v7343_v29  ;;  %v7350_v59 = vand.u32 4294901760, %v7349_v61  ;;  %v17980_v34 = vsub.f32 %v13751_v4, %v17969_v47  ;;  %v6871_v55 = vpop.permute.xlu1 %6870 }
 0x7e9   : > { %20907 = vst [vmem:[#allocation53_spill] sm:$0xff] %v17967_v6  ;;  %20912 = vst [vmem:[#allocation180_spill] sm:$0xff] %v17974_v58  ;;  %v19844_v62 = vand.u32 4294901760, %v17967_v6  ;;  %v13755_v3 = vpop.eup %13754  ;;  %v6980_v60 = vmul.f32 1.442695, %v6936_v40  ;;  %v6905_v44 = vmax.f32 %v20913_v37, %v6855_v27  ;;  %12370 = vmatpush1.bf16.msra.mxu0 %v20915_v35  ;;  %v17986_v36 = vand.u32 4294901760, %v7028_v21 }
 0x7ea   : > { %20914 = vst [vmem:[#allocation79_spill] sm:$0xff] %v17980_v34  ;;  %7345 = vmatprep.mubr.f32.mxu0 %v7344_v10  ;;  %v17989_v29 = vsub.f32 %v13753_v13, %v17974_v58  ;;  %v20918_v40 = vld [vmem:[#allocation61_spill] sm:$0xff]  ;;  %12372 = vmatprep.subr.bf16.mxu0 %v17688_v38  ;;  %v6994_v27 = vmul.f32 1.442695, %v6943_v16  ;;  %v20919_v37 = vld [vmem:[#allocation56_spill] sm:$0xff]  ;;  %v19850_v61 = vand.u32 4294901760, %v17980_v34  ;;  %v6913_v38 = vmax.f32 %v20922_v33, %v6871_v55 }
 0x7eb   : > { %v7359_v18 = vsub.f32 %v17967_v6, %v19844_v62  ;;  %20916 = vst [vmem:[#allocation161_spill] sm:$0xff] %v17986_v36  ;;  %v7029_v45 = vmul.f32 %v13755_v3, %v20918_v40  ;;  %13762 = vpow2.f32 %v6980_v60  ;;  %v6937_v4 = vsub.f32 %v20919_v37, %v6905_v44  ;;  %v20923_v16 = vld [vmem:[#allocation164_spill] sm:$0xff]  ;;  %v20926_v33 = vld [vmem:[#allocation99_spill] sm:$0xff] }
 0x7ec   : > { %20917 = vst [vmem:[#allocation181_spill] sm:$0xff] %v17989_v29  ;;  %7351 = vmatmul.mubr.f32.gmra.mrb[76].mxu0 %v7350_v59  ;;  %v6857_v10 = vpop.permute.xlu0 %6856  ;;  %v17996_v62 = vsub.f32 %v7028_v21, %v17986_v36  ;;  %v19849_v57 = vand.u32 4294901760, %v17989_v29  ;;  %v7365_v44 = vsub.f32 %v17980_v34, %v19850_v61  ;;  %v18014_v37 = vand.u32 4294901760, %v13755_v3 }
 0x7ed   : > { %v7360_v35 = vand.u32 4294901760, %v7359_v18  ;;  %v17999_v13 = vand.u32 4294901760, %v7029_v45  ;;  %v13757_v6 = vpop.eup %13756  ;;  %v6982_v40 = vmul.f32 1.442695, %v6937_v4  ;;  %v6906_v60 = vmax.f32 %v20923_v16, %v6857_v10  ;;  %12374 = vmatpush1.bf16.msra.mxu0 %v17690_v19  ;;  %v20927_v10 = vld [vmem:[#allocation64_spill] sm:$0xff] }
 0x7ee   : > { %20920 = vst [vmem:[#allocation182_spill] sm:$0xff] %v17996_v62  ;;  %v19855_v21 = vand.u32 4294901760, %v17996_v62  ;;  %v7381_v59 = vsub.f32 %v17989_v29, %v19849_v57  ;;  %20925 = vst [vmem:[#allocation162_spill] sm:$0xff] %v18014_v37  ;;  %12376 = vmatprep.subr.bf16.mxu0 %v17692_v49  ;;  %v7366_v4 = vand.u32 4294901760, %v7365_v44  ;;  %v7030_v19 = vmul.f32 %v13757_v6, %v20927_v10 }
 0x7ef   : > { %20921 = vst [vmem:[#allocation86_spill] sm:$0xff] %v17999_v13  ;;  %7361 = vmatprep.mubr.f32.mxu0 %v7360_v35  ;;  %v18012_v18 = vsub.f32 %v7029_v45, %v17999_v13  ;;  %13764 = vpow2.f32 %v6982_v40  ;;  %v6938_v55 = vsub.f32 %v20926_v33, %v6906_v60  ;;  %v20928_v61 = vand.u32 4294901760, %v20866_v39  ;;  %v20929_v40 = vld [vmem:[#allocation7_spill] sm:$0xff]  ;;  %v20930_v33 = vld [vmem:[#allocation165_spill] sm:$0xff] }
 0x7f0   : > { %13766 = vpow2.f32 %v6994_v27  ;;  %v6859_v35 = vpop.permute.xlu0 %6858  ;;  %v6875_v16 = vpop.permute.xlu1 %6874  ;;  %v7375_v57 = vsub.f32 %v17996_v62, %v19855_v21  ;;  %v6945_v60 = vsub.f32 %v20929_v40, %v6913_v38  ;;  %7367 = vmatmul.mubr.f32.gmra.mrb[78].mxu0 %v7366_v4  ;;  %v18031_v10 = vsub.f32 %v13755_v3, %v18014_v37  ;;  %v20934_v38 = vld [vmem:[#allocation45_spill] sm:$0xff]  ;;  %v20935_v4 = vld [vmem:[#allocation166_spill] sm:$0xff] }
 0x7f1   : > { %20924 = vst [vmem:[#allocation59_spill] sm:$0xff] %v18012_v18  ;;  %v19860_v45 = vand.u32 4294901760, %v18012_v18  ;;  %v18026_v29 = vsub.f32 %v20866_v39, %v20928_v61  ;;  %v13759_v49 = vpop.eup %13758  ;;  %v6984_v44 = vmul.f32 1.442695, %v6938_v55  ;;  %v6907_v27 = vmax.f32 %v20930_v33, %v6859_v35  ;;  %12378 = vmatpush1.bf16.msra.mxu0 %v17696_v26  ;;  %v20938_v39 = vld [vmem:[#allocation68_spill] sm:$0xff] }
 0x7f2   : > { %20931 = vst [vmem:[#allocation183_spill] sm:$0xff] %v18031_v10  ;;  %v18033_v34 = vpop.eup %13760  ;;  %v7376_v21 = vand.u32 4294901760, %v7375_v57  ;;  %v18038_v9 = vand.u32 4294901760, %v7030_v19  ;;  %v18040_v61 = vand.u32 4294901760, %v13757_v6  ;;  %v6915_v35 = vmax.f32 %v20935_v4, %v6875_v16  ;;  %12380 = vmatprep.subr.bf16.mxu0 %v17698_v48 }
 0x7f3   : > { %v7391_v62 = vsub.f32 %v18012_v18, %v19860_v45  ;;  %v6939_v55 = vsub.f32 %v20934_v38, %v6907_v27  ;;  %v7382_v40 = vand.u32 4294901760, %v7381_v59  ;;  %v19866_v3 = vand.u32 4294901760, %v18031_v10  ;;  %v20939_v59 = vld [vmem:[#allocation167_spill] sm:$0xff]  ;;  %v20943_v38 = vld [vmem:[#allocation102_spill] sm:$0xff] }
 0x7f4   : > { %20932 = vst [vmem:[#allocation61_spill] sm:$0xff] %v18038_v9  ;;  %20933 = vst [vmem:[#allocation56_spill] sm:$0xff] %v18040_v61  ;;  %7377 = vmatprep.mubr.f32.mxu0 %v7376_v21  ;;  %v6861_v57 = vpop.permute.xlu0 %6860  ;;  %v18048_v45 = vsub.f32 %v7030_v19, %v18038_v9  ;;  %v18051_v18 = vsub.f32 %v13757_v6, %v18040_v61  ;;  %v7031_v26 = vmul.f32 %v13759_v49, %v20938_v39  ;;  %v20942_v39 = vld [vmem:[#allocation91_spill] sm:$0xff] }
 0x7f5   : > { %v7392_v33 = vand.u32 4294901760, %v7391_v62  ;;  %v13763_v14 = vpop.eup %13762  ;;  %13768 = vpow2.f32 %v6984_v44  ;;  %v6986_v27 = vmul.f32 1.442695, %v6939_v55  ;;  %7383 = vmatmul.mubr.f32.gmra.mrb[80].mxu0 %v7382_v40  ;;  %v6908_v16 = vmax.f32 %v20939_v59, %v6861_v57  ;;  %v20944_v40 = vld [vmem:[#allocation70_spill] sm:$0xff] }
 0x7f6   : > { %20936 = vst [vmem:[#allocation163_spill] sm:$0xff] %v18048_v45  ;;  %20937 = vst [vmem:[#allocation164_spill] sm:$0xff] %v18051_v18  ;;  %v7397_v48 = vsub.f32 %v18031_v10, %v19866_v3  ;;  %v19869_v62 = vand.u32 4294901760, %v18048_v45  ;;  %v19874_v21 = vand.u32 4294901760, %v18051_v18  ;;  %v18060_v19 = vand.u32 4294901760, %v7031_v26  ;;  %12382 = vmatpush1.bf16.msra.mxu0 %v17700_v1 }
 0x7f7   : > { %7393 = vmatprep.mubr.f32.mxu0 %v7392_v33  ;;  %v18062_v6 = vand.u32 4294901760, %v13759_v49  ;;  %v6947_v44 = vsub.f32 %v20942_v39, %v6915_v35  ;;  %v6940_v55 = vsub.f32 %v20943_v38, %v6908_v16  ;;  %v7032_v57 = vmul.f32 %v13763_v14, %v20944_v40  ;;  %12384 = vmatprep.subr.bf16.mxu0 %v17702_v56  ;;  %v20946_v39 = vld [vmem:[#allocation168_spill] sm:$0xff]  ;;  %v20947_v56 = vld [vmem:[#allocation169_spill] sm:$0xff] }
 0x7f8   : > { %20940 = vst [vmem:[#allocation99_spill] sm:$0xff] %v18060_v19  ;;  %v7398_v4 = vand.u32 4294901760, %v7397_v48  ;;  %13770 = vpow2.f32 %v6986_v27  ;;  %v6865_v33 = vpop.permute.xlu0 %6864  ;;  %v6879_v59 = vpop.permute.xlu1 %6878  ;;  %v7407_v3 = vsub.f32 %v18048_v45, %v19869_v62  ;;  %v7413_v1 = vsub.f32 %v18051_v18, %v19874_v21 }
 0x7f9   : > { %20941 = vst [vmem:[#allocation64_spill] sm:$0xff] %v18062_v6  ;;  %v18076_v35 = vsub.f32 %v7031_v26, %v18060_v19  ;;  %v13765_v16 = vpop.eup %13764  ;;  %v6988_v48 = vmul.f32 1.442695, %v6940_v55  ;;  %v6910_v38 = vmax.f32 %v20946_v39, %v6865_v33  ;;  %v6917_v27 = vmax.f32 %v20947_v56, %v6879_v59  ;;  %v20950_v55 = vld [vmem:[#allocation22_spill] sm:$0xff] }
 0x7fa   : > { %7399 = vmatmul.mubr.f32.gmra.mrb[82].mxu0 %v7398_v4  ;;  %v18081_v40 = vsub.f32 %v13759_v49, %v18062_v6  ;;  %v18083_v10 = vpop.eup %13766  ;;  %v6998_v62 = vmul.f32 1.442695, %v6945_v60  ;;  %v7408_v45 = vand.u32 4294901760, %v7407_v3  ;;  %v18086_v21 = vand.u32 4294901760, %v7032_v57 }
 0x7fb   : > { %20945 = vst [vmem:[#allocation7_spill] sm:$0xff] %v18076_v35  ;;  %v19879_v61 = vand.u32 4294901760, %v18076_v35  ;;  %12386 = vmatpush1.bf16.msra.mxu0 %v17714_v51  ;;  %v7002_v26 = vmul.f32 1.442695, %v6947_v44  ;;  %v6942_v4 = vsub.f32 %v20950_v55, %v6910_v38  ;;  %v7414_v18 = vand.u32 4294901760, %v7413_v1  ;;  %v20953_v51 = vld [vmem:[#allocation73_spill] sm:$0xff] }
 0x7fc   : > { %20948 = vst [vmem:[#allocation165_spill] sm:$0xff] %v18081_v40  ;;  %20949 = vst [vmem:[#allocation45_spill] sm:$0xff] %v18086_v21  ;;  %v19877_v33 = vand.u32 4294901760, %v18081_v40  ;;  %12388 = vmatprep.subr.bf16.mxu0 %v17716_v5  ;;  %7409 = vmatprep.mubr.f32.mxu0 %v7408_v45  ;;  %v6869_v49 = vpop.permute.xlu0 %6868  ;;  %v18096_v3 = vsub.f32 %v7032_v57, %v18086_v21  ;;  %v18098_v59 = vand.u32 4294901760, %v13763_v14  ;;  %13772 = vpow2.f32 %v6988_v48  ;;  %v20954_v1 = vld [vmem:[#allocation93_spill] sm:$0xff]  ;;  %v20957_v48 = vld [vmem:[#allocation170_spill] sm:$0xff] }
 0x7fd   : > { %v7423_v60 = vsub.f32 %v18076_v35, %v19879_v61  ;;  %v7033_v44 = vmul.f32 %v13765_v16, %v20953_v51  ;;  %v6992_v39 = vmul.f32 1.442695, %v6942_v4  ;;  %v6949_v38 = vsub.f32 %v20954_v1, %v6917_v27 }
 0x7fe   : > { %20951 = vst [vmem:[#allocation166_spill] sm:$0xff] %v18096_v3  ;;  %20952 = vst [vmem:[#allocation68_spill] sm:$0xff] %v18098_v59  ;;  %7415 = vmatmul.mubr.f32.gmra.mrb[84].mxu0 %v7414_v18  ;;  %v7429_v5 = vsub.f32 %v18081_v40, %v19877_v33  ;;  %v19878_v56 = vand.u32 4294901760, %v18096_v3  ;;  %v18107_v55 = vsub.f32 %v13763_v14, %v18098_v59  ;;  %13774 = vpow2.f32 %v6998_v62 }
 0x7ff   : > { %v7424_v45 = vand.u32 4294901760, %v7423_v60  ;;  %v18109_v57 = vand.u32 4294901760, %v7033_v44  ;;  %12390 = vmatpush1.bf16.msra.mxu0 %v17756_v22  ;;  %v13769_v51 = vpop.eup %13768  ;;  %v6912_v4 = vmax.f32 %v20957_v48, %v6869_v49  ;;  %v18113_v18 = vand.u32 4294901760, %v13765_v16 }
 0x800   : > { %20955 = vst [vmem:[#allocation167_spill] sm:$0xff] %v18107_v55  ;;  %v7430_v27 = vand.u32 4294901760, %v7429_v5  ;;  %12392 = vmatprep.subr.bf16.mxu0 %v17761_v32  ;;  %13776 = vpow2.f32 %v7002_v26  ;;  %v6873_v60 = vpop.permute.xlu0 %6872  ;;  %v6883_v1 = vpop.permute.xlu1 %6882  ;;  %v7439_v14 = vsub.f32 %v18096_v3, %v19878_v56  ;;  %v19884_v33 = vand.u32 4294901760, %v18107_v55  ;;  %v20961_v56 = vld [vmem:[#allocation77_spill] sm:$0xff] }
 0x801   : > { %20956 = vst [vmem:[#allocation91_spill] sm:$0xff] %v18109_v57  ;;  %20958 = vst [vmem:[#allocation102_spill] sm:$0xff] %v18113_v18  ;;  %7425 = vmatprep.mubr.f32.mxu0 %v7424_v45  ;;  %v18121_v22 = vsub.f32 %v7033_v44, %v18109_v57  ;;  %13778 = vpow2.f32 %v6992_v39  ;;  %v7006_v62 = vmul.f32 1.442695, %v6949_v38  ;;  %v18124_v49 = vsub.f32 %v13765_v16, %v18113_v18  ;;  %v20962_v44 = vld [vmem:[#allocation33_spill] sm:$0xff]  ;;  %v20963_v38 = vld [vmem:[#allocation171_spill] sm:$0xff] }
 0x802   : > { %7431 = vmatmul.mubr.f32.gmra.mrb[86].mxu0 %v7430_v27  ;;  %v8115_v32 = vand.u32 4294901760, %v18026_v29  ;;  %v13771_v26 = vpop.eup %13770  ;;  %v7440_v5 = vand.u32 4294901760, %v7439_v14  ;;  %v7445_v45 = vsub.f32 %v18107_v55, %v19884_v33  ;;  %v7034_v61 = vmul.f32 %v13769_v51, %v20961_v56  ;;  %v20964_v16 = vld [vmem:[#allocation172_spill] sm:$0xff] }
 0x803   : > { %20959 = vst [vmem:[#allocation70_spill] sm:$0xff] %v18121_v22  ;;  %20960 = vst [vmem:[#allocation168_spill] sm:$0xff] %v18124_v49  ;;  %v19885_v48 = vand.u32 4294901760, %v18121_v22  ;;  %12394 = vmatpush1.bf16.msra.mxu0 %v17775_v8  ;;  %v6944_v39 = vsub.f32 %v20962_v44, %v6912_v4  ;;  %v6914_v27 = vmax.f32 %v20963_v38, %v6873_v60  ;;  %v19892_v29 = vand.u32 4294901760, %v18124_v49  ;;  %v20967_v4 = vld [vmem:[#allocation173_spill] sm:$0xff]  ;;  %v20973_v55 = vld [vmem:[#allocation44_spill] sm:$0xff] }
 0x804   : > { %v6919_v3 = vmax.f32 %v20964_v16, %v6883_v1  ;;  %12396 = vmatprep.subr.bf16.mxu0 %v17784_v11  ;;  %7441 = vmatprep.mubr.f32.mxu0 %v7440_v5  ;;  %v7446_v14 = vand.u32 4294901760, %v7445_v45  ;;  %v6877_v40 = vpop.permute.xlu0 %6876  ;;  %v18141_v56 = vand.u32 4294901760, %v7034_v61  ;;  %v18143_v8 = vand.u32 4294901760, %v13769_v51  ;;  %v20971_v16 = vld [vmem:[#allocation82_spill] sm:$0xff] }
 0x805   : > { %v7455_v33 = vsub.f32 %v18121_v22, %v19885_v48  ;;  %13780 = vpow2.f32 %v7006_v62  ;;  %v6916_v60 = vmax.f32 %v20967_v4, %v6877_v40  ;;  %v7461_v1 = vsub.f32 %v18124_v49, %v19892_v29  ;;  %v20972_v40 = vld [vmem:[#allocation92_spill] sm:$0xff] }
 0x806   : > { %20965 = vst [vmem:[#allocation169_spill] sm:$0xff] %v18141_v56  ;;  %20966 = vst [vmem:[#allocation22_spill] sm:$0xff] %v18143_v8  ;;  %v20968_v11 = vand.u32 4294901760, %v17904_v50  ;;  %7447 = vmatmul.mubr.f32.gmra.mrb[88].mxu0 %v7446_v14  ;;  %v18152_v44 = vsub.f32 %v7034_v61, %v18141_v56  ;;  %v18155_v38 = vsub.f32 %v13769_v51, %v18143_v8  ;;  %v13773_v62 = vpop.eup %13772  ;;  %v6996_v22 = vmul.f32 1.442695, %v6944_v39 }
 0x807   : > { %v7456_v45 = vand.u32 4294901760, %v7455_v33  ;;  %v7035_v48 = vmul.f32 %v13771_v26, %v20971_v16  ;;  %v6946_v4 = vsub.f32 %v20972_v40, %v6914_v27  ;;  %v6951_v35 = vsub.f32 %v20973_v55, %v6919_v3  ;;  %12398 = vmatpush1.bf16.msra.mxu0 %v17786_v20  ;;  %v20976_v27 = vld [vmem:[#allocation97_spill] sm:$0xff]  ;;  %v20977_v55 = vld [vmem:[#allocation174_spill] sm:$0xff]  ;;  %v20978_v16 = vld [vmem:[#allocation175_spill] sm:$0xff] }
 0x808   : > { %v12405_v5 = vpack.c.bf16 %v8115_v32, %v20968_v11  ;;  %20969 = vst [vmem:[#allocation73_spill] sm:$0xff] %v18152_v44  ;;  %20970 = vst [vmem:[#allocation93_spill] sm:$0xff] %v18155_v38  ;;  %v18160_v29 = vand.u32 4294901760, %v13771_v26  ;;  %v7462_v50 = vand.u32 4294901760, %v7461_v1  ;;  %v6881_v33 = vpop.permute.xlu0 %6880  ;;  %v6887_v61 = vpop.permute.xlu1 %6886  ;;  %v19895_v32 = vand.u32 4294901760, %v18152_v44  ;;  %12400 = vmatprep.subr.bf16.mxu0 %v17789_v23 }
 0x809   : > { %7457 = vmatprep.mubr.f32.mxu0 %v7456_v45  ;;  %v19900_v51 = vand.u32 4294901760, %v18155_v38  ;;  %v18165_v14 = vand.u32 4294901760, %v7035_v48  ;;  %v18168_v39 = vpop.eup %13774  ;;  %v6948_v3 = vsub.f32 %v20976_v27, %v6916_v60  ;;  %v6918_v11 = vmax.f32 %v20977_v55, %v6881_v33  ;;  %v20981_v33 = vld [vmem:[#allocation87_spill] sm:$0xff]  ;;  %v20982_v55 = vld [vmem:[#allocation54_spill] sm:$0xff] }
 0x80a   : > { %20974 = vst [vmem:[#allocation170_spill] sm:$0xff] %v18160_v29  ;;  %v6921_v20 = vmax.f32 %v20978_v16, %v6887_v61  ;;  %v18174_v1 = vsub.f32 %v13771_v26, %v18160_v29  ;;  %v18176_v45 = vpop.eup %13776  ;;  %7463 = vmatmul.mubr.f32.gmra.mrb[90].mxu0 %v7462_v50  ;;  %v7471_v40 = vsub.f32 %v18152_v44, %v19895_v32  ;;  %13782 = vpow2.f32 %v6996_v22 }
 0x80b   : > { %20975 = vst [vmem:[#allocation77_spill] sm:$0xff] %v18165_v14  ;;  %v7477_v23 = vsub.f32 %v18155_v38, %v19900_v51  ;;  %v18185_v60 = vsub.f32 %v7035_v48, %v18165_v14  ;;  %v7036_v27 = vmul.f32 %v13773_v62, %v20981_v33  ;;  %v13779_v61 = vpop.eup %13778  ;;  %v7000_v26 = vmul.f32 1.442695, %v6946_v4  ;;  %12402 = vmatpush1.bf16.msra.mxu0 %v17804_v0  ;;  %v20984_v33 = vld [vmem:[#allocation50_spill] sm:$0xff] }
 0x80c   : > { %20979 = vst [vmem:[#allocation33_spill] sm:$0xff] %v18174_v1  ;;  %v6950_v16 = vsub.f32 %v20982_v55, %v6918_v11  ;;  %v19903_v50 = vand.u32 4294901760, %v18174_v1  ;;  %v7010_v49 = vmul.f32 1.442695, %v6951_v35  ;;  %v7472_v32 = vand.u32 4294901760, %v7471_v40  ;;  %v6885_v44 = vpop.permute.xlu0 %6884  ;;  %12404 = vmatprep.subr.bf16.mxu0 %v17877_v28  ;;  %v20987_v40 = vld [vmem:[#allocation21_spill] sm:$0xff] }
 0x80d   : > { %20980 = vst [vmem:[#allocation171_spill] sm:$0xff] %v18185_v60  ;;  %v19904_v29 = vand.u32 4294901760, %v18185_v60  ;;  %v18192_v51 = vand.u32 4294901760, %v7036_v27  ;;  %v7004_v48 = vmul.f32 1.442695, %v6948_v3  ;;  %v6953_v38 = vsub.f32 %v20984_v33, %v6921_v20 }
 0x80e   : > { %v7478_v22 = vand.u32 4294901760, %v7477_v23  ;;  %v7493_v4 = vsub.f32 %v18174_v1, %v19903_v50  ;;  %7473 = vmatprep.mubr.f32.mxu0 %v7472_v32  ;;  %v18205_v11 = vand.u32 4294901760, %v13773_v62  ;;  %v7037_v28 = vmul.f32 %v18033_v34, %v20987_v40  ;;  %v20988_v23 = vld [vmem:[#allocation176_spill] sm:$0xff] }
 0x80f   : > { %20983 = vst [vmem:[#allocation172_spill] sm:$0xff] %v18192_v51  ;;  %v7487_v0 = vsub.f32 %v18185_v60, %v19904_v29  ;;  %v18203_v35 = vsub.f32 %v7036_v27, %v18192_v51  ;;  %v18209_v3 = vpop.eup %13780  ;;  %13784 = vpow2.f32 %v7000_v26  ;;  %v7008_v20 = vmul.f32 1.442695, %v6950_v16  ;;  %12406 = vmatpush1.bf16.msra.mxu0 %v12405_v5  ;;  %v20993_v16 = vld [vmem:[#allocation28_spill] sm:$0xff]  ;;  %v20994_v5 = vld [vmem:[#allocation37_spill] sm:$0xff] }
 0x810   : > { %20986 = vst [vmem:[#allocation82_spill] sm:$0xff] %v18205_v11  ;;  %7479 = vmatmul.mubr.f32.gmra.mrb[92].mxu0 %v7478_v22  ;;  %v6920_v55 = vmax.f32 %v20988_v23, %v6885_v44  ;;  %v18213_v32 = vand.u32 4294901760, %v18033_v34  ;;  %13786 = vpow2.f32 %v7010_v49  ;;  %v18217_v50 = vsub.f32 %v13773_v62, %v18205_v11 }
 0x811   : > { %20985 = vst [vmem:[#allocation173_spill] sm:$0xff] %v18203_v35  ;;  %v7488_v33 = vand.u32 4294901760, %v7487_v0  ;;  %v19908_v27 = vand.u32 4294901760, %v18203_v35  ;;  %13788 = vpow2.f32 %v7004_v48  ;;  %v7014_v40 = vmul.f32 1.442695, %v6953_v38 }
 0x812   : > { %20989 = vst [vmem:[#allocation92_spill] sm:$0xff] %v18213_v32  ;;  %20990 = vst [vmem:[#allocation44_spill] sm:$0xff] %v18217_v50  ;;  %v7494_v29 = vand.u32 4294901760, %v7493_v4  ;;  %v18219_v1 = vand.u32 4294901760, %v7037_v28  ;;  %v19907_v26 = vand.u32 4294901760, %v18217_v50  ;;  %v18227_v49 = vsub.f32 %v18033_v34, %v18213_v32 }
 0x813   : > { %7489 = vmatprep.mubr.f32.mxu0 %v7488_v33  ;;  %v7503_v44 = vsub.f32 %v18203_v35, %v19908_v27  ;;  %v7038_v62 = vmul.f32 %v13779_v61, %v20993_v16  ;;  %13790 = vpow2.f32 %v7008_v20  ;;  %v6952_v48 = vsub.f32 %v20994_v5, %v6920_v55  ;;  %v6889_v33 = vpop.permute.xlu0 %6888 }
 0x814   : > { %20991 = vst [vmem:[#allocation97_spill] sm:$0xff] %v18219_v1  ;;  %20992 = vst [vmem:[#allocation174_spill] sm:$0xff] %v18227_v49  ;;  %7495 = vmatmul.mubr.f32.gmra.mrb[94].mxu0 %v7494_v29  ;;  %v18232_v38 = vsub.f32 %v7037_v28, %v18219_v1  ;;  %v7509_v4 = vsub.f32 %v18217_v50, %v19907_v26  ;;  %v19911_v0 = vand.u32 4294901760, %v18227_v49  ;;  %v13783_v34 = vpop.eup %13782  ;;  %13792 = vpow2.f32 %v7014_v40 }
 0x815   : > { %v7504_v22 = vand.u32 4294901760, %v7503_v44  ;;  %v18238_v23 = vand.u32 4294901760, %v7038_v62  ;;  %v18241_v16 = vand.u32 4294901760, %v13779_v61  ;;  %v20999_v44 = vld [vmem:[#allocation35_spill] sm:$0xff]  ;;  %v7012_v26 = vmul.f32 1.442695, %v6952_v48 }
 0x816   : > { %20995 = vst [vmem:[#allocation175_spill] sm:$0xff] %v18232_v38  ;;  %v19916_v20 = vand.u32 4294901760, %v18232_v38  ;;  %v7510_v29 = vand.u32 4294901760, %v7509_v4  ;;  %v7525_v28 = vsub.f32 %v18227_v49, %v19911_v0  ;;  %v7039_v5 = vmul.f32 %v18083_v10, %v20999_v44  ;;  %v21002_v4 = vld [vmem:[#allocation177_spill] sm:$0xff] }
 0x817   : > { %20996 = vst [vmem:[#allocation87_spill] sm:$0xff] %v18238_v23  ;;  %20997 = vst [vmem:[#allocation54_spill] sm:$0xff] %v18241_v16  ;;  %7505 = vmatprep.mubr.f32.mxu0 %v7504_v22  ;;  %v18247_v55 = vsub.f32 %v7038_v62, %v18238_v23  ;;  %v18255_v27 = vsub.f32 %v13779_v61, %v18241_v16  ;;  %v18258_v22 = vand.u32 4294901760, %v18083_v10  ;;  %v21005_v61 = vld [vmem:[#allocation42_spill] sm:$0xff]  ;;  %13794 = vpow2.f32 %v7012_v26 }
 0x818   : > { %v7519_v40 = vsub.f32 %v18232_v38, %v19916_v20  ;;  %v6922_v50 = vmax.f32 %v21002_v4, %v6889_v33  ;;  %7511 = vmatmul.mubr.f32.gmra.mrb[96].mxu0 %v7510_v29  ;;  %v7526_v0 = vand.u32 4294901760, %v7525_v28  ;;  %v18262_v49 = vand.u32 4294901760, %v7039_v5 }
 0x819   : > { %20998 = vst [vmem:[#allocation50_spill] sm:$0xff] %v18247_v55  ;;  %21000 = vst [vmem:[#allocation21_spill] sm:$0xff] %v18255_v27  ;;  %v19925_v62 = vand.u32 4294901760, %v18247_v55  ;;  %v13785_v44 = vpop.eup %13784  ;;  %v18267_v20 = vsub.f32 %v18083_v10, %v18258_v22  ;;  %v7040_v38 = vmul.f32 %v13783_v34, %v21005_v61  ;;  %v18278_v28 = vand.u32 4294901760, %v13783_v34 }
 0x81a   : > { %21001 = vst [vmem:[#allocation176_spill] sm:$0xff] %v18258_v22  ;;  %21003 = vst [vmem:[#allocation28_spill] sm:$0xff] %v18262_v49  ;;  %v7520_v48 = vand.u32 4294901760, %v7519_v40  ;;  %v18270_v60 = vpop.eup %13786  ;;  %v18276_v29 = vsub.f32 %v7039_v5, %v18262_v49  ;;  %v21008_v40 = vld [vmem:[#allocation48_spill] sm:$0xff]  ;;  %v21009_v10 = vand.u32 4294901760, %v18255_v27  ;;  %v6891_v5 = vpop.permute.xlu1 %6890 }
 0x81b   : > { %21004 = vst [vmem:[#allocation37_spill] sm:$0xff] %v18267_v20  ;;  %v7535_v33 = vsub.f32 %v18247_v55, %v19925_v62  ;;  %21007 = vst [vmem:[#allocation177_spill] sm:$0xff] %v18278_v28  ;;  %v7041_v4 = vmul.f32 %v18168_v39, %v21008_v40  ;;  %v18282_v35 = vpop.eup %13788  ;;  %v19940_v22 = vand.u32 4294901760, %v18267_v20  ;;  %v18288_v16 = vand.u32 4294901760, %v7040_v38 }
 0x81c   : > { %21006 = vst [vmem:[#allocation35_spill] sm:$0xff] %v18276_v29  ;;  %7521 = vmatprep.mubr.f32.mxu0 %v7520_v48  ;;  %v7541_v61 = vsub.f32 %v18255_v27, %v21009_v10  ;;  %v18291_v62 = vand.u32 4294901760, %v18168_v39  ;;  %v19949_v49 = vand.u32 4294901760, %v18276_v29  ;;  %v18295_v40 = vsub.f32 %v13783_v34, %v18278_v28  ;;  %v21017_v28 = vld [vmem:[#allocation52_spill] sm:$0xff] }
 0x81d   : > { %21010 = vst [vmem:[#allocation42_spill] sm:$0xff] %v18288_v16  ;;  %7527 = vmatmul.mubr.f32.gmra.mrb[98].mxu0 %v7526_v0  ;;  %v7536_v55 = vand.u32 4294901760, %v7535_v33  ;;  %v18297_v48 = vand.u32 4294901760, %v7041_v4  ;;  %v18299_v23 = vpop.eup %13790  ;;  %v7557_v27 = vsub.f32 %v18267_v20, %v19940_v22  ;;  %v18305_v32 = vsub.f32 %v7040_v38, %v18288_v16  ;;  %v21018_v38 = vld [vmem:[#allocation3_spill] sm:$0xff]  ;;  %v21019_v16 = vld [vmem:[#allocation178_spill] sm:$0xff] }
 0x81e   : > { %21011 = vst [vmem:[#allocation48_spill] sm:$0xff] %v18291_v62  ;;  %21012 = vst [vmem:[#allocation196_spill] sm:$0xff] %v18295_v40  ;;  %v7542_v10 = vand.u32 4294901760, %v7541_v61  ;;  %v18309_v0 = vsub.f32 %v18168_v39, %v18291_v62  ;;  %v7551_v34 = vsub.f32 %v18276_v29, %v19949_v49  ;;  %v7042_v1 = vmul.f32 %v13785_v44, %v21017_v28  ;;  %v18319_v22 = vpop.eup %13792 }
 0x81f   : > { %21013 = vst [vmem:[#allocation197_spill] sm:$0xff] %v18297_v48  ;;  %21014 = vst [vmem:[#allocation198_spill] sm:$0xff] %v18305_v32  ;;  %7537 = vmatprep.mubr.f32.mxu0 %v7536_v55  ;;  %v18316_v61 = vsub.f32 %v7041_v4, %v18297_v48  ;;  %v6954_v20 = vsub.f32 %v21018_v38, %v6922_v50  ;;  %v6923_v11 = vmax.f32 %v21019_v16, %v6891_v5  ;;  %v21024_v38 = vld [vmem:[#allocation60_spill] sm:$0xff] }
 0x820   : > { %21015 = vst [vmem:[#allocation199_spill] sm:$0xff] %v18309_v0  ;;  %v19950_v39 = vand.u32 4294901760, %v18305_v32  ;;  %v18324_v55 = vand.u32 4294901760, %v13785_v44  ;;  %v7552_v62 = vand.u32 4294901760, %v7551_v34  ;;  %v18328_v4 = vand.u32 4294901760, %v7042_v1 }
 0x821   : > { %21016 = vst [vmem:[#allocation200_spill] sm:$0xff] %v18316_v61  ;;  %7543 = vmatmul.mubr.f32.gmra.mrb[100].mxu0 %v7542_v10  ;;  %v21022_v50 = vand.u32 4294901760, %v18295_v40  ;;  %v7043_v10 = vmul.f32 %v18176_v45, %v21024_v38  ;;  %v7558_v34 = vand.u32 4294901760, %v7557_v27  ;;  %v18345_v49 = vand.u32 4294901760, %v18176_v45 }
 0x822   : > { %21020 = vst [vmem:[#allocation52_spill] sm:$0xff] %v18324_v55  ;;  %21021 = vst [vmem:[#allocation3_spill] sm:$0xff] %v18328_v4  ;;  %v7567_v28 = vsub.f32 %v18305_v32, %v19950_v39  ;;  %v18337_v5 = vsub.f32 %v13785_v44, %v18324_v55  ;;  %7553 = vmatprep.mubr.f32.mxu0 %v7552_v62  ;;  %v18342_v33 = vsub.f32 %v7042_v1, %v18328_v4  ;;  %v21031_v62 = vld [vmem:[#allocation65_spill] sm:$0xff]  ;;  %v21078_v4 = vld [vmem:[#allocation15_spill] sm:$0xff] }
 0x823   : > { %v7573_v16 = vsub.f32 %v18295_v40, %v21022_v50  ;;  %21026 = vst [vmem:[#allocation201_spill] sm:$0xff] %v18345_v49  ;;  %v7016_v39 = vmul.f32 1.442695, %v6954_v20  ;;  %v21027_v29 = vand.u32 4294901760, %v18316_v61  ;;  %v18350_v44 = vand.u32 4294901760, %v7043_v10  ;;  %v21029_v40 = vld [vmem:[#allocation80_spill] sm:$0xff] }
 0x824   : > { %21023 = vst [vmem:[#allocation178_spill] sm:$0xff] %v18337_v5  ;;  %21025 = vst [vmem:[#allocation60_spill] sm:$0xff] %v18342_v33  ;;  %v7568_v32 = vand.u32 4294901760, %v7567_v28  ;;  %v6955_v55 = vsub.f32 %v21029_v40, %v6923_v11  ;;  %v21030_v26 = vand.u32 4294901760, %v18309_v0  ;;  %v19961_v1 = vand.u32 4294901760, %v18342_v33 }
 0x825   : > { %v7583_v50 = vsub.f32 %v18316_v61, %v21027_v29  ;;  %21028 = vst [vmem:[#allocation202_spill] sm:$0xff] %v18350_v44  ;;  %7559 = vmatmul.mubr.f32.gmra.mrb[102].mxu0 %v7558_v34  ;;  %v7044_v38 = vmul.f32 %v18282_v35, %v21031_v62  ;;  %v7574_v20 = vand.u32 4294901760, %v7573_v16  ;;  %v18361_v29 = vsub.f32 %v7043_v10, %v18350_v44  ;;  %v21033_v61 = vld [vmem:[#allocation72_spill] sm:$0xff]  ;;  %v21048_v10 = vld [vmem:[#allocation81_spill] sm:$0xff] }
 0x826   : > { %v7589_v27 = vsub.f32 %v18309_v0, %v21030_v26  ;;  %7569 = vmatprep.mubr.f32.mxu0 %v7568_v32  ;;  %v7045_v11 = vmul.f32 %v18209_v3, %v21033_v61  ;;  %v7599_v40 = vsub.f32 %v18342_v33, %v19961_v1  ;;  %v18370_v34 = vsub.f32 %v18176_v45, %v18345_v49  ;;  %v21040_v33 = vld [vmem:[#allocation76_spill] sm:$0xff] }
 0x827   : > { %21032 = vst [vmem:[#allocation80_spill] sm:$0xff] %v18361_v29  ;;  %v18372_v26 = vand.u32 4294901760, %v7044_v38  ;;  %v18375_v32 = vand.u32 4294901760, %v18282_v35  ;;  %13796 = vpow2.f32 %v7016_v39  ;;  %v7584_v16 = vand.u32 4294901760, %v7583_v50 }
 0x828   : > { %21034 = vst [vmem:[#allocation65_spill] sm:$0xff] %v18370_v34  ;;  %v18378_v62 = vand.u32 4294901760, %v7045_v11  ;;  %v18384_v1 = vand.u32 4294901760, %v18209_v3  ;;  %v7018_v45 = vmul.f32 1.442695, %v6955_v55  ;;  %v7590_v28 = vand.u32 4294901760, %v7589_v27 }
 0x829   : > { %21035 = vst [vmem:[#allocation72_spill] sm:$0xff] %v18372_v26  ;;  %21036 = vst [vmem:[#allocation203_spill] sm:$0xff] %v18375_v32  ;;  %7575 = vmatmul.mubr.f32.gmra.mrb[104].mxu0 %v7574_v20  ;;  %v18381_v61 = vsub.f32 %v7044_v38, %v18372_v26  ;;  %v7046_v0 = vmul.f32 %v18299_v23, %v21040_v33  ;;  %v7600_v49 = vand.u32 4294901760, %v7599_v40  ;;  %v21041_v39 = vand.u32 4294901760, %v18337_v5  ;;  %v13795_v40 = vpop.eup %13794 }
 0x82a   : > { %21037 = vst [vmem:[#allocation204_spill] sm:$0xff] %v18378_v62  ;;  %21039 = vst [vmem:[#allocation206_spill] sm:$0xff] %v18384_v1  ;;  %7585 = vmatprep.mubr.f32.mxu0 %v7584_v16  ;;  %v18394_v38 = vsub.f32 %v18282_v35, %v18375_v32  ;;  %v21043_v20 = vand.u32 4294901760, %v18361_v29  ;;  %v18401_v16 = vsub.f32 %v7045_v11, %v18378_v62  ;;  %v18410_v35 = vand.u32 4294901760, %v18299_v23 }
 0x82b   : > { %21038 = vst [vmem:[#allocation205_spill] sm:$0xff] %v18381_v61  ;;  %v7605_v50 = vsub.f32 %v18337_v5, %v21041_v39  ;;  %v18403_v33 = vand.u32 4294901760, %v7046_v0  ;;  %v18407_v39 = vsub.f32 %v18209_v3, %v18384_v1  ;;  %v7047_v5 = vmul.f32 %v18270_v60, %v21048_v10 }
 0x82c   : > { %21042 = vst [vmem:[#allocation76_spill] sm:$0xff] %v18394_v38  ;;  %v7615_v55 = vsub.f32 %v18361_v29, %v21043_v20  ;;  %21044 = vst [vmem:[#allocation207_spill] sm:$0xff] %v18401_v16  ;;  %13798 = vpow2.f32 %v7018_v45  ;;  %v21050_v27 = vand.u32 4294901760, %v18370_v34  ;;  %v21052_v62 = vand.u32 4294901760, %v18381_v61  ;;  %v21056_v29 = vld [vmem:[#allocation8_spill] sm:$0xff] }
 0x82d   : > { %21045 = vst [vmem:[#allocation208_spill] sm:$0xff] %v18403_v33  ;;  %7591 = vmatmul.mubr.f32.gmra.mrb[106].mxu0 %v7590_v28  ;;  %21046 = vst [vmem:[#allocation209_spill] sm:$0xff] %v18407_v39  ;;  %v18415_v20 = vsub.f32 %v7046_v0, %v18403_v33  ;;  %v7606_v11 = vand.u32 4294901760, %v7605_v50  ;;  %v18421_v3 = vand.u32 4294901760, %v7047_v5  ;;  %v18431_v50 = vsub.f32 %v18299_v23, %v18410_v35 }
 0x82e   : > { %21047 = vst [vmem:[#allocation210_spill] sm:$0xff] %v18410_v35  ;;  %7601 = vmatprep.mubr.f32.mxu0 %v7600_v49  ;;  %v7621_v28 = vsub.f32 %v18370_v34, %v21050_v27  ;;  %v7616_v1 = vand.u32 4294901760, %v7615_v55  ;;  %v7631_v32 = vsub.f32 %v18381_v61, %v21052_v62  ;;  %v21053_v49 = vld [vmem:[#allocation4_spill] sm:$0xff]  ;;  %v18434_v27 = vand.u32 4294901760, %v18270_v60 }
 0x82f   : > { %21049 = vst [vmem:[#allocation81_spill] sm:$0xff] %v18415_v20  ;;  %21051 = vst [vmem:[#allocation211_spill] sm:$0xff] %v18421_v3  ;;  %v7048_v45 = vmul.f32 %v13795_v40, %v21053_v49  ;;  %v7049_v55 = vmul.f32 %v18319_v22, %v21056_v29  ;;  %v18445_v0 = vsub.f32 %v7047_v5, %v18421_v3  ;;  %v21060_v35 = vand.u32 4294901760, %v18401_v16  ;;  %v21063_v5 = vld [vmem:[#allocation11_spill] sm:$0xff] }
 0x830   : > { %21054 = vst [vmem:[#allocation4_spill] sm:$0xff] %v18431_v50  ;;  %21055 = vst [vmem:[#allocation212_spill] sm:$0xff] %v18434_v27  ;;  %v7622_v10 = vand.u32 4294901760, %v7621_v28  ;;  %v7632_v61 = vand.u32 4294901760, %v7631_v32  ;;  %v21064_v32 = vand.u32 4294901760, %v18415_v20  ;;  %v21070_v26 = vand.u32 4294901760, %v18431_v50 }
 0x831   : > { %7607 = vmatmul.mubr.f32.gmra.mrb[108].mxu0 %v7606_v11  ;;  %v18438_v34 = vpop.eup %13796  ;;  %v21057_v11 = vand.u32 4294901760, %v18394_v38  ;;  %21058 = vst [vmem:[#allocation8_spill] sm:$0xff] %v18445_v0  ;;  %v18447_v23 = vand.u32 4294901760, %v7048_v45  ;;  %v7647_v29 = vsub.f32 %v18401_v16, %v21060_v35  ;;  %v18465_v35 = vand.u32 4294901760, %v13795_v40 }
 0x832   : > { %7617 = vmatprep.mubr.f32.mxu0 %v7616_v1  ;;  %v21061_v1 = vand.u32 4294901760, %v18407_v39  ;;  %v7663_v3 = vsub.f32 %v18415_v20, %v21064_v32 }
 0x833   : > { %v7637_v49 = vsub.f32 %v18394_v38, %v21057_v11  ;;  %21059 = vst [vmem:[#allocation213_spill] sm:$0xff] %v18447_v23  ;;  %v18458_v11 = vsub.f32 %v18270_v60, %v18434_v27  ;;  %v7050_v38 = vmul.f32 %v18438_v34, %v21063_v5  ;;  %21065 = vst [vmem:[#allocation11_spill] sm:$0xff] %v18465_v35  ;;  %v18472_v60 = vand.u32 4294901760, %v7049_v55  ;;  %v21069_v5 = vld [vmem:[#allocation154_spill] sm:$0xff] }
 0x834   : > { %v7653_v62 = vsub.f32 %v18407_v39, %v21061_v1  ;;  %v18470_v28 = vsub.f32 %v7048_v45, %v18447_v23  ;;  %v7648_v27 = vand.u32 4294901760, %v7647_v29  ;;  %v20013_v32 = vand.u32 4294901760, %v21069_v5 }
 0x835   : > { %7623 = vmatmul.mubr.f32.gmra.mrb[110].mxu0 %v7622_v10  ;;  %21062 = vst [vmem:[#allocation214_spill] sm:$0xff] %v18458_v11  ;;  %v21066_v10 = vld [vmem:[#allocation153_spill] sm:$0xff]  ;;  %v7638_v33 = vand.u32 4294901760, %v7637_v49  ;;  %21068 = vst [vmem:[#allocation216_spill] sm:$0xff] %v18472_v60  ;;  %v7669_v49 = vsub.f32 %v18431_v50, %v21070_v26  ;;  %v18483_v45 = vand.u32 4294901760, %v18319_v22  ;;  %v7664_v23 = vand.u32 4294901760, %v7663_v3 }
 0x836   : > { %7633 = vmatprep.mubr.f32.mxu0 %v7632_v61  ;;  %v20004_v16 = vand.u32 4294901760, %v21066_v10  ;;  %21067 = vst [vmem:[#allocation215_spill] sm:$0xff] %v18470_v28  ;;  %v13799_v39 = vpop.eup %13798  ;;  %v7654_v20 = vand.u32 4294901760, %v7653_v62  ;;  %v18486_v29 = vsub.f32 %v13795_v40, %v18465_v35  ;;  %v21073_v62 = vand.u32 4294901760, %v18445_v0  ;;  %v21075_v50 = vld [vmem:[#allocation156_spill] sm:$0xff]  ;;  %v21077_v35 = vld [vmem:[#allocation157_spill] sm:$0xff] }
 0x837   : > { %21071 = vst [vmem:[#allocation217_spill] sm:$0xff] %v18483_v45  ;;  %v18496_v1 = vsub.f32 %v7049_v55, %v18472_v60  ;;  %v18499_v3 = vand.u32 4294901760, %v7050_v38  ;;  %v7051_v48 = vmul.f32 %v13799_v39, %v21078_v4  ;;  %v21079_v51 = vand.u32 4294901760, %v18458_v11 }
 0x838   : > { %v8120_v61 = vsub.f32 %v21066_v10, %v20004_v16  ;;  %21072 = vst [vmem:[#allocation218_spill] sm:$0xff] %v18486_v29  ;;  %v7679_v16 = vsub.f32 %v18445_v0, %v21073_v62  ;;  %v21081_v4 = vand.u32 4294901760, %v21077_v35 }
 0x839   : > { %7639 = vmatmul.mubr.f32.gmra.mrb[112].mxu0 %v7638_v33  ;;  %v8132_v33 = vsub.f32 %v21069_v5, %v20013_v32  ;;  %21074 = vst [vmem:[#allocation219_spill] sm:$0xff] %v18496_v1  ;;  %21076 = vst [vmem:[#allocation220_spill] sm:$0xff] %v18499_v3  ;;  %v7670_v32 = vand.u32 4294901760, %v7669_v49  ;;  %v7685_v62 = vsub.f32 %v18458_v11, %v21079_v51  ;;  %v18519_v51 = vand.u32 4294901760, %v18438_v34 }
 0x83a   : > { %7649 = vmatprep.mubr.f32.mxu0 %v7648_v27  ;;  %v8121_v44 = vand.u32 4294901760, %v8120_v61  ;;  %v20020_v27 = vand.u32 4294901760, %v21075_v50  ;;  %v7680_v49 = vand.u32 4294901760, %v7679_v16  ;;  %v18525_v26 = vsub.f32 %v7050_v38, %v18499_v3  ;;  %v21087_v16 = vld [vmem:[#allocation71_spill] sm:$0xff] }
 0x83b   : > { %v8133_v40 = vand.u32 4294901760, %v8132_v33  ;;  %v18512_v33 = vsub.f32 %v18319_v22, %v18483_v45  ;;  %21082 = vst [vmem:[#allocation221_spill] sm:$0xff] %v18519_v51  ;;  %v7686_v0 = vand.u32 4294901760, %v7685_v62  ;;  %v18537_v38 = vsub.f32 %v18438_v34, %v18519_v51 }
 0x83c   : > { %v8126_v55 = vsub.f32 %v21075_v50, %v20020_v27  ;;  %21084 = vst [vmem:[#allocation222_spill] sm:$0xff] %v18525_v26  ;;  %v20029_v62 = vand.u32 4294901760, %v18525_v26 }
 0x83d   : > { %7655 = vmatmul.mubr.f32.gmra.mrb[114].mxu0 %v7654_v20  ;;  %21080 = vst [vmem:[#allocation15_spill] sm:$0xff] %v18512_v33  ;;  %v12407_v61 = vpack.c.bf16 %v8133_v40, %v8121_v44  ;;  %v8138_v20 = vsub.f32 %v21077_v35, %v21081_v4  ;;  %v18527_v44 = vand.u32 4294901760, %v7051_v48  ;;  %v21086_v40 = vld [vmem:[#allocation19_spill] sm:$0xff] }
 0x83e   : > { %7665 = vmatprep.mubr.f32.mxu0 %v7664_v23  ;;  %v8127_v11 = vand.u32 4294901760, %v8126_v55  ;;  %v21083_v23 = vand.u32 4294901760, %v18470_v28  ;;  %v12411_v4 = vpack.c.bf16 %v21087_v16, %v21086_v40  ;;  %v21088_v55 = vand.u32 4294901760, %v18486_v29 }
 0x83f   : > { %12408 = vmatprep.subr.bf16.mxu0 %v12407_v61  ;;  %v8139_v22 = vand.u32 4294901760, %v8138_v20  ;;  %21085 = vst [vmem:[#allocation223_spill] sm:$0xff] %v18527_v44  ;;  %v18539_v61 = vand.u32 4294901760, %v13799_v39 }
 0x840   : > { %v7695_v27 = vsub.f32 %v18470_v28, %v21083_v23  ;;  %v7701_v60 = vsub.f32 %v18486_v29, %v21088_v55  ;;  %v20031_v23 = vand.u32 4294901760, %v18512_v33 }
 0x841   : > { %7671 = vmatmul.mubr.f32.gmra.mrb[116].mxu0 %v7670_v32  ;;  %v12409_v45 = vpack.c.bf16 %v8139_v22, %v8127_v11  ;;  %21089 = vst [vmem:[#allocation19_spill] sm:$0xff] %v18539_v61  ;;  %v21090_v32 = vand.u32 4294901760, %v18496_v1  ;;  %v18546_v11 = vsub.f32 %v7051_v48, %v18527_v44  ;;  %v18553_v22 = vsub.f32 %v13799_v39, %v18539_v61 }
 0x842   : > { %7681 = vmatprep.mubr.f32.mxu0 %v7680_v49  ;;  %v7696_v20 = vand.u32 4294901760, %v7695_v27  ;;  %v7702_v49 = vand.u32 4294901760, %v7701_v60  ;;  %v7717_v34 = vsub.f32 %v18512_v33, %v20031_v23  ;;  %v20028_v27 = vand.u32 4294901760, %v18537_v38  ;;  %v21101_v23 = vld [vmem:[#allocation20_spill] sm:$0xff] }
 0x843   : > { %v7711_v28 = vsub.f32 %v18496_v1, %v21090_v32  ;;  %12410 = vmatpush1.bf16.msra.mxu0 %v12409_v45  ;;  %21091 = vst [vmem:[#allocation71_spill] sm:$0xff] %v18546_v11  ;;  %21092 = vst [vmem:[#allocation224_spill] sm:$0xff] %v18553_v22  ;;  %v7727_v45 = vsub.f32 %v18525_v26, %v20029_v62  ;;  %v20027_v48 = vand.u32 4294901760, %v18546_v11  ;;  %v21096_v62 = vld [vmem:[#allocation26_spill] sm:$0xff] }
 0x844   : > { %12412 = vmatprep.subr.bf16.mxu0 %v12411_v4  ;;  %v7733_v60 = vsub.f32 %v18537_v38, %v20028_v27  ;;  %v20030_v4 = vand.u32 4294901760, %v18553_v22  ;;  %v21095_v27 = vld [vmem:[#allocation10_spill] sm:$0xff] }
 0x845   : > { %7687 = vmatmul.mubr.f32.gmra.mrb[118].mxu0 %v7686_v0  ;;  %v7712_v55 = vand.u32 4294901760, %v7711_v28  ;;  %v7718_v0 = vand.u32 4294901760, %v7717_v34  ;;  %v7743_v39 = vsub.f32 %v18546_v11, %v20027_v48 }
 0x846   : > { %7697 = vmatprep.mubr.f32.mxu0 %v7696_v20  ;;  %v7728_v20 = vand.u32 4294901760, %v7727_v45  ;;  %v7734_v32 = vand.u32 4294901760, %v7733_v60  ;;  %v12415_v60 = vpack.c.bf16 %v21096_v62, %v21095_v27 }
 0x847   : > { %v7744_v34 = vand.u32 4294901760, %v7743_v39  ;;  %v21097_v39 = vld [vmem:[#allocation43_spill] sm:$0xff] }
 0x849   : > { %7703 = vmatmul.mubr.f32.gmra.mrb[120].mxu0 %v7702_v49  ;;  %v7749_v49 = vsub.f32 %v18553_v22, %v20030_v4 }
 0x84a   : > { %7713 = vmatprep.mubr.f32.mxu0 %v7712_v55  ;;  %v21102_v55 = vld [vmem:[#allocation32_spill] sm:$0xff] }
 0x84b   : > { %v7750_v45 = vand.u32 4294901760, %v7749_v49  ;;  %v21100_v49 = vld [vmem:[#allocation98_spill] sm:$0xff]  ;;  %v12421_v28 = vpack.c.bf16 %v21102_v55, %v21101_v23 }
 0x84d   : > { %7719 = vmatmul.mubr.f32.gmra.mrb[122].mxu0 %v7718_v0  ;;  %v21093_v0 = vld [vmem:[#allocation17_spill] sm:$0xff] }
 0x84e   : > { %7729 = vmatprep.mubr.f32.mxu0 %v7728_v20  ;;  %v21094_v20 = vld [vmem:[#allocation24_spill] sm:$0xff] }
 0x84f   : > { %v12413_v48 = vpack.c.bf16 %v21094_v20, %v21093_v0 }
 0x851   : > { %7735 = vmatmul.mubr.f32.gmra.mrb[124].mxu0 %v7734_v32  ;;  %v21098_v32 = vld [vmem:[#allocation30_spill] sm:$0xff] }
 0x852   : > { %7745 = vmatprep.mubr.f32.mxu0 %v7744_v34  ;;  %v12417_v4 = vpack.c.bf16 %v21098_v32, %v21097_v39  ;;  %v21099_v34 = vld [vmem:[#allocation74_spill] sm:$0xff] }
 0x855   : > { %7751 = vmatmul.mubr.f32.gmra.mrb[126].mxu0 %v7750_v45  ;;  %v12419_v45 = vpack.c.bf16 %v21100_v49, %v21099_v34  ;;  %v21108_v34 = vld [vmem:[#allocation38_spill] sm:$0xff] }
 0x856   : > { %8142 = vmatprep.mubr.f32.mxu0 %v17779_v63 }
 0x859   : > { %8144 = vmatmul.mubr.f32.vlgmr.msra.gmra.mrb[64].mxu0 %v17773_v24  ;;  %v21103_v24 = vld [vmem:[#allocation100_spill] sm:$0xff] }
 0x85a   : > { %12414 = vmatpush1.bf16.msra.mxu0 %v12413_v48  ;;  %8150 = vmatprep.mubr.f32.mxu0 %v17813_v12  ;;  %v21104_v48 = vld [vmem:[#allocation103_spill] sm:$0xff]  ;;  %v21106_v12 = vld [vmem:[#allocation78_spill] sm:$0xff] }
 0x85b   : > { %12416 = vmatprep.subr.bf16.mxu0 %v12415_v60  ;;  %v12423_v63 = vpack.c.bf16 %v21104_v48, %v21103_v24  ;;  %v21105_v60 = vld [vmem:[#allocation105_spill] sm:$0xff]  ;;  %v21112_v24 = vld [vmem:[#allocation94_spill] sm:$0xff] }
 0x85c   : > { %v12425_v49 = vpack.c.bf16 %v21106_v12, %v21105_v60 }
 0x85d   : > { %8152 = vmatmul.mubr.f32.gmra.mrb[66].mxu0 %v17801_v52  ;;  %v21107_v52 = vld [vmem:[#allocation18_spill] sm:$0xff] }
 0x85e   : > { %8158 = vmatprep.mubr.f32.mxu0 %v17838_v7  ;;  %12418 = vmatpush1.bf16.msra.mxu0 %v12417_v4  ;;  %v12427_v7 = vpack.c.bf16 %v21108_v34, %v21107_v52  ;;  %v21109_v4 = vld [vmem:[#allocation88_spill] sm:$0xff]  ;;  %v21116_v52 = vld [vmem:[#allocation55_spill] sm:$0xff] }
 0x85f   : > { %12420 = vmatprep.subr.bf16.mxu0 %v12419_v45  ;;  %v21110_v45 = vld [vmem:[#allocation90_spill] sm:$0xff] }
 0x860   : > { %v12429_v48 = vpack.c.bf16 %v21110_v45, %v21109_v4 }
 0x861   : > { %8160 = vmatmul.mubr.f32.gmra.mrb[68].mxu0 %v17831_v17  ;;  %v21111_v17 = vld [vmem:[#allocation39_spill] sm:$0xff] }
 0x862   : > { %8166 = vmatprep.mubr.f32.mxu0 %v17855_v30  ;;  %12422 = vmatpush1.bf16.msra.mxu0 %v12421_v28  ;;  %v12431_v30 = vpack.c.bf16 %v21112_v24, %v21111_v17  ;;  %v21114_v28 = vld [vmem:[#allocation47_spill] sm:$0xff]  ;;  %v21120_v17 = vld [vmem:[#allocation13_spill] sm:$0xff] }
 0x863   : > { %12424 = vmatprep.subr.bf16.mxu0 %v12423_v63  ;;  %v21113_v63 = vld [vmem:[#allocation40_spill] sm:$0xff] }
 0x864   : > { %v12433_v34 = vpack.c.bf16 %v21114_v28, %v21113_v63 }
 0x865   : > { %8168 = vmatmul.mubr.f32.gmra.mrb[70].mxu0 %v17847_v54  ;;  %v21115_v54 = vld [vmem:[#allocation57_spill] sm:$0xff] }
 0x866   : > { %8174 = vmatprep.mubr.f32.mxu0 %v17881_v41  ;;  %12426 = vmatpush1.bf16.msra.mxu0 %v12425_v49  ;;  %v12435_v41 = vpack.c.bf16 %v21116_v52, %v21115_v54  ;;  %v21118_v49 = vld [vmem:[#allocation75_spill] sm:$0xff] }
 0x867   : > { %12428 = vmatprep.subr.bf16.mxu0 %v12427_v7  ;;  %v21117_v7 = vld [vmem:[#allocation63_spill] sm:$0xff] }
 0x868   : > { %v12437_v24 = vpack.c.bf16 %v21118_v49, %v21117_v7  ;;  %v21124_v54 = vld [vmem:[#allocation111_spill] sm:$0xff] }
 0x869   : > { %8176 = vmatmul.mubr.f32.gmra.mrb[72].mxu0 %v17871_v43  ;;  %v21119_v43 = vld [vmem:[#allocation9_spill] sm:$0xff] }
 0x86a   : > { %8182 = vmatprep.mubr.f32.mxu0 %v17915_v2  ;;  %12430 = vmatpush1.bf16.msra.mxu0 %v12429_v48  ;;  %v12439_v2 = vpack.c.bf16 %v21120_v17, %v21119_v43  ;;  %v21122_v48 = vld [vmem:[#allocation108_spill] sm:$0xff]  ;;  %v21128_v43 = vld [vmem:[#allocation117_spill] sm:$0xff] }
 0x86b   : > { %12432 = vmatprep.subr.bf16.mxu0 %v12431_v30  ;;  %v21121_v30 = vld [vmem:[#allocation106_spill] sm:$0xff] }
 0x86c   : > { %v12441_v52 = vpack.c.bf16 %v21122_v48, %v21121_v30 }
 0x86d   : > { %8184 = vmatmul.mubr.f32.gmra.mrb[74].mxu0 %v17910_v15  ;;  %v21123_v15 = vld [vmem:[#allocation110_spill] sm:$0xff] }
 0x86e   : > { %8190 = vmatprep.mubr.f32.mxu0 %v17932_v46  ;;  %12434 = vmatpush1.bf16.msra.mxu0 %v12433_v34  ;;  %v12443_v46 = vpack.c.bf16 %v21124_v54, %v21123_v15  ;;  %v21126_v34 = vld [vmem:[#allocation114_spill] sm:$0xff] }
 0x86f   : > { %12436 = vmatprep.subr.bf16.mxu0 %v12435_v41  ;;  %v21125_v41 = vld [vmem:[#allocation112_spill] sm:$0xff] }
 0x870   : > { %v12445_v17 = vpack.c.bf16 %v21126_v34, %v21125_v41 }
 0x871   : > { %8192 = vmatmul.mubr.f32.gmra.mrb[76].mxu0 %v17929_v42  ;;  %v21127_v42 = vld [vmem:[#allocation116_spill] sm:$0xff] }
 0x872   : > { %8198 = vmatprep.mubr.f32.mxu0 %v17956_v31  ;;  %12438 = vmatpush1.bf16.msra.mxu0 %v12437_v24  ;;  %v12447_v31 = vpack.c.bf16 %v21128_v43, %v21127_v42  ;;  %v21129_v24 = vld [vmem:[#allocation118_spill] sm:$0xff]  ;;  %v21134_v43 = vld [vmem:[#allocation129_spill] sm:$0xff] }
 0x873   : > { %12440 = vmatprep.subr.bf16.mxu0 %v12439_v2  ;;  %v21130_v2 = vld [vmem:[#allocation120_spill] sm:$0xff] }
 0x874   : > { %v12449_v54 = vpack.c.bf16 %v21130_v2, %v21129_v24  ;;  %v21137_v2 = vld [vmem:[#allocation132_spill] sm:$0xff] }
 0x875   : > { %8200 = vmatmul.mubr.f32.gmra.mrb[78].mxu0 %v17969_v47  ;;  %v21131_v47 = vld [vmem:[#allocation122_spill] sm:$0xff] }
 0x876   : > { %8206 = vmatprep.mubr.f32.mxu0 %v17986_v36  ;;  %12442 = vmatpush1.bf16.msra.mxu0 %v12441_v52  ;;  %v12451_v36 = vpack.c.bf16 %v20825_v53, %v21131_v47  ;;  %v21132_v52 = vld [vmem:[#allocation126_spill] sm:$0xff]  ;;  %v21139_v47 = vld [vmem:[#allocation135_spill] sm:$0xff] }
 0x877   : > { %12444 = vmatprep.subr.bf16.mxu0 %v12443_v46  ;;  %v12453_v46 = vpack.c.bf16 %v21132_v52, %v20838_v25  ;;  %v21230_v52 = vld [vmem:[#allocation133_spill] sm:$0xff]  ;;  %v21231_v25 = vld [vmem:[#allocation167_spill] sm:$0xff] }
 0x879   : > { %8208 = vmatmul.mubr.f32.gmra.mrb[80].mxu0 %v17974_v58  ;;  %v21133_v58 = vld [vmem:[#allocation128_spill] sm:$0xff] }
 0x87a   : > { %8214 = vmatprep.mubr.f32.mxu0 %v17999_v13  ;;  %12446 = vmatpush1.bf16.msra.mxu0 %v12445_v17  ;;  %v12455_v13 = vpack.c.bf16 %v21134_v43, %v21133_v58  ;;  %v21135_v17 = vld [vmem:[#allocation56_spill] sm:$0xff]  ;;  %v21143_v58 = vld [vmem:[#allocation141_spill] sm:$0xff] }
 0x87b   : > { %12448 = vmatprep.subr.bf16.mxu0 %v12447_v31  ;;  %v21136_v31 = vld [vmem:[#allocation131_spill] sm:$0xff] }
 0x87c   : > { %v12457_v53 = vpack.c.bf16 %v21137_v2, %v21136_v31  ;;  %v21226_v2 = vld [vmem:[#allocation127_spill] sm:$0xff]  ;;  %v21227_v31 = vld [vmem:[#allocation165_spill] sm:$0xff] }
 0x87d   : > { %8216 = vmatmul.mubr.f32.gmra.mrb[82].mxu0 %v18014_v37  ;;  %v21138_v37 = vld [vmem:[#allocation134_spill] sm:$0xff] }
 0x87e   : > { %8222 = vmatprep.mubr.f32.mxu0 %v18038_v9  ;;  %12450 = vmatpush1.bf16.msra.mxu0 %v12449_v54  ;;  %v12459_v9 = vpack.c.bf16 %v21139_v47, %v21138_v37  ;;  %v21140_v54 = vld [vmem:[#allocation136_spill] sm:$0xff] }
 0x87f   : > { %12452 = vmatprep.subr.bf16.mxu0 %v12451_v36  ;;  %v21141_v36 = vld [vmem:[#allocation137_spill] sm:$0xff]  ;;  %v21147_v37 = vld [vmem:[#allocation148_spill] sm:$0xff] }
 0x880   : > { %v12461_v43 = vpack.c.bf16 %v21141_v36, %v21140_v54  ;;  %v21222_v36 = vld [vmem:[#allocation121_spill] sm:$0xff]  ;;  %v21223_v54 = vld [vmem:[#allocation164_spill] sm:$0xff] }
 0x881   : > { %8224 = vmatmul.mubr.f32.gmra.mrb[84].mxu0 %v21135_v17  ;;  %v21142_v17 = vld [vmem:[#allocation140_spill] sm:$0xff] }
 0x882   : > { %8230 = vmatprep.mubr.f32.mxu0 %v18060_v19  ;;  %12454 = vmatpush1.bf16.msra.mxu0 %v12453_v46  ;;  %v12463_v19 = vpack.c.bf16 %v21143_v58, %v21142_v17  ;;  %v21145_v46 = vld [vmem:[#allocation144_spill] sm:$0xff]  ;;  %v21219_v17 = vld [vmem:[#allocation183_spill] sm:$0xff] }
 0x883   : > { %12456 = vmatprep.subr.bf16.mxu0 %v12455_v13  ;;  %v21144_v13 = vld [vmem:[#allocation142_spill] sm:$0xff] }
 0x884   : > { %v12465_v47 = vpack.c.bf16 %v21145_v46, %v21144_v13  ;;  %v21215_v46 = vld [vmem:[#allocation181_spill] sm:$0xff]  ;;  %v21218_v13 = vld [vmem:[#allocation115_spill] sm:$0xff] }
 0x885   : > { %8232 = vmatmul.mubr.f32.gmra.mrb[86].mxu0 %v18062_v6  ;;  %v21146_v6 = vld [vmem:[#allocation147_spill] sm:$0xff] }
 0x886   : > { %8238 = vmatprep.mubr.f32.mxu0 %v18086_v21  ;;  %12458 = vmatpush1.bf16.msra.mxu0 %v12457_v53  ;;  %v12467_v21 = vpack.c.bf16 %v21147_v37, %v21146_v6  ;;  %v21149_v53 = vld [vmem:[#allocation151_spill] sm:$0xff]  ;;  %v21214_v6 = vld [vmem:[#allocation109_spill] sm:$0xff] }
 0x887   : > { %12460 = vmatprep.subr.bf16.mxu0 %v12459_v9  ;;  %v21148_v9 = vld [vmem:[#allocation149_spill] sm:$0xff]  ;;  %v21211_v37 = vld [vmem:[#allocation79_spill] sm:$0xff] }
 0x888   : > { %v12469_v58 = vpack.c.bf16 %v21149_v53, %v21148_v9  ;;  %v21207_v53 = vld [vmem:[#allocation160_spill] sm:$0xff]  ;;  %v21210_v9 = vld [vmem:[#allocation5_spill] sm:$0xff] }
 0x889   : > { %8240 = vmatmul.mubr.f32.gmra.mrb[88].mxu0 %v18098_v59  ;;  %v21163_v59 = vld [vmem:[#allocation177_spill] sm:$0xff] }
 0x88a   : > { %8246 = vmatprep.mubr.f32.mxu0 %v18109_v57  ;;  %12462 = vmatpush1.bf16.msra.mxu0 %v12461_v43  ;;  %v21150_v43 = vpack.c.bf16 %v21069_v5, %v21066_v10  ;;  %v21152_v57 = vld [vmem:[#allocation172_spill] sm:$0xff]  ;;  %v21203_v5 = vld [vmem:[#allocation158_spill] sm:$0xff] }
 0x88b   : > { %12464 = vmatprep.subr.bf16.mxu0 %v12463_v19  ;;  %v21151_v19 = vld [vmem:[#allocation170_spill] sm:$0xff] }
 0x88c   : > { %v21206_v10 = vld [vmem:[#allocation58_spill] sm:$0xff] }
 0x88d   : > { %8248 = vmatmul.mubr.f32.gmra.mrb[90].mxu0 %v18113_v18  ;;  %v21159_v18 = vld [vmem:[#allocation54_spill] sm:$0xff] }
 0x88e   : > { %8254 = vmatprep.mubr.f32.mxu0 %v18141_v56  ;;  %12466 = vmatpush1.bf16.msra.mxu0 %v12465_v47  ;;  %v21153_v47 = vpack.c.bf16 %v21077_v35, %v21075_v50  ;;  %v21154_v56 = vld [vmem:[#allocation83_spill] sm:$0xff]  ;;  %v21199_v35 = vld [vmem:[#allocation193_spill] sm:$0xff] }
 0x88f   : > { %12468 = vmatprep.subr.bf16.mxu0 %v12467_v21  ;;  %v21155_v21 = vld [vmem:[#allocation82_spill] sm:$0xff]  ;;  %v21202_v50 = vld [vmem:[#allocation95_spill] sm:$0xff] }
 0x891   : > { %8256 = vmatmul.mubr.f32.gmra.mrb[92].mxu0 %v18143_v8  ;;  %v21156_v8 = vld [vmem:[#allocation97_spill] sm:$0xff] }
 0x892   : > { %8262 = vmatprep.mubr.f32.mxu0 %v18165_v14  ;;  %12470 = vmatpush1.bf16.msra.mxu0 %v12469_v58  ;;  %v21157_v14 = vld [vmem:[#allocation92_spill] sm:$0xff]  ;;  %v21158_v58 = vld [vmem:[#allocation87_spill] sm:$0xff] }
 0x893   : > { %12472 = vmatprep.subr.bf16.mxu0 %v21150_v43  ;;  %v21160_v43 = vld [vmem:[#allocation28_spill] sm:$0xff] }
 0x895   : > { %8264 = vmatmul.mubr.f32.gmra.mrb[94].mxu0 %v21151_v19  ;;  %v21161_v19 = vld [vmem:[#allocation176_spill] sm:$0xff] }
 0x896   : > { %8270 = vmatprep.mubr.f32.mxu0 %v21152_v57  ;;  %12474 = vmatpush1.bf16.msra.mxu0 %v21153_v47  ;;  %v21162_v57 = vld [vmem:[#allocation42_spill] sm:$0xff]  ;;  %v21164_v47 = vld [vmem:[#allocation197_spill] sm:$0xff] }
 0x897   : > { %12476 = vmatprep.subr.bf16.mxu0 %v21154_v56  ;;  %v21165_v56 = vld [vmem:[#allocation48_spill] sm:$0xff] }
 0x899   : > { %8272 = vmatmul.mubr.f32.gmra.mrb[96].mxu0 %v21155_v21  ;;  %v21166_v21 = vld [vmem:[#allocation3_spill] sm:$0xff] }
 0x89a   : > { %8278 = vmatprep.mubr.f32.mxu0 %v21156_v8  ;;  %v21167_v8 = vld [vmem:[#allocation52_spill] sm:$0xff] }
 0x89d   : > { %8280 = vmatmul.mubr.f32.gmra.mrb[98].mxu0 %v21157_v14  ;;  %v21168_v14 = vld [vmem:[#allocation202_spill] sm:$0xff] }
 0x89e   : > { %8286 = vmatprep.mubr.f32.mxu0 %v21158_v58  ;;  %v21169_v58 = vld [vmem:[#allocation201_spill] sm:$0xff] }
 0x8a1   : > { %8288 = vmatmul.mubr.f32.gmra.mrb[100].mxu0 %v21159_v18  ;;  %v21170_v18 = vld [vmem:[#allocation72_spill] sm:$0xff] }
 0x8a2   : > { %8294 = vmatprep.mubr.f32.mxu0 %v21160_v43  ;;  %v21171_v43 = vld [vmem:[#allocation203_spill] sm:$0xff] }
 0x8a5   : > { %8296 = vmatmul.mubr.f32.gmra.mrb[102].mxu0 %v21161_v19  ;;  %v21172_v19 = vld [vmem:[#allocation204_spill] sm:$0xff] }
 0x8a6   : > { %8302 = vmatprep.mubr.f32.mxu0 %v21162_v57  ;;  %v21173_v57 = vld [vmem:[#allocation206_spill] sm:$0xff] }
 0x8a9   : > { %8304 = vmatmul.mubr.f32.gmra.mrb[104].mxu0 %v21163_v59  ;;  %v21174_v59 = vld [vmem:[#allocation208_spill] sm:$0xff] }
 0x8aa   : > { %8310 = vmatprep.mubr.f32.mxu0 %v21164_v47  ;;  %v21175_v47 = vld [vmem:[#allocation210_spill] sm:$0xff] }
 0x8ad   : > { %8312 = vmatmul.mubr.f32.gmra.mrb[106].mxu0 %v21165_v56  ;;  %v21176_v56 = vld [vmem:[#allocation211_spill] sm:$0xff] }
 0x8ae   : > { %8318 = vmatprep.mubr.f32.mxu0 %v21166_v21  ;;  %v21177_v21 = vld [vmem:[#allocation212_spill] sm:$0xff] }
 0x8b1   : > { %8320 = vmatmul.mubr.f32.gmra.mrb[108].mxu0 %v21167_v8  ;;  %v21178_v8 = vld [vmem:[#allocation213_spill] sm:$0xff] }
 0x8b2   : > { %8326 = vmatprep.mubr.f32.mxu0 %v21168_v14  ;;  %v21179_v14 = vld [vmem:[#allocation11_spill] sm:$0xff] }
 0x8b5   : > { %8328 = vmatmul.mubr.f32.gmra.mrb[110].mxu0 %v21169_v58  ;;  %v21180_v58 = vld [vmem:[#allocation216_spill] sm:$0xff] }
 0x8b6   : > { %8334 = vmatprep.mubr.f32.mxu0 %v21170_v18  ;;  %v21181_v18 = vld [vmem:[#allocation217_spill] sm:$0xff] }
 0x8b9   : > { %8336 = vmatmul.mubr.f32.gmra.mrb[112].mxu0 %v21171_v43  ;;  %v21196_v43 = vld [vmem:[#allocation194_spill] sm:$0xff] }
 0x8ba   : > { %8342 = vmatprep.mubr.f32.mxu0 %v21172_v19  ;;  %v21195_v19 = vld [vmem:[#allocation190_spill] sm:$0xff] }
 0x8bd   : > { %8344 = vmatmul.mubr.f32.gmra.mrb[114].mxu0 %v21173_v57  ;;  %v21194_v57 = vld [vmem:[#allocation101_spill] sm:$0xff] }
 0x8be   : > { %8350 = vmatprep.mubr.f32.mxu0 %v21174_v59  ;;  %v21193_v59 = vld [vmem:[#allocation27_spill] sm:$0xff] }
 0x8c1   : > { %8352 = vmatmul.mubr.f32.gmra.mrb[116].mxu0 %v21175_v47  ;;  %v21182_v47 = vld [vmem:[#allocation62_spill] sm:$0xff] }
 0x8c2   : > { %8358 = vmatprep.mubr.f32.mxu0 %v21176_v56  ;;  %v21183_v56 = vld [vmem:[#allocation84_spill] sm:$0xff] }
 0x8c5   : > { %8360 = vmatmul.mubr.f32.gmra.mrb[118].mxu0 %v21177_v21  ;;  %v21184_v21 = vld [vmem:[#allocation66_spill] sm:$0xff] }
 0x8c6   : > { %8366 = vmatprep.mubr.f32.mxu0 %v21178_v8  ;;  %v21185_v8 = vld [vmem:[#allocation185_spill] sm:$0xff] }
 0x8c9   : > { %8368 = vmatmul.mubr.f32.gmra.mrb[120].mxu0 %v21179_v14  ;;  %v21186_v14 = vld [vmem:[#allocation85_spill] sm:$0xff] }
 0x8ca   : > { %8374 = vmatprep.mubr.f32.mxu0 %v21180_v58  ;;  %v21187_v58 = vld [vmem:[#allocation184_spill] sm:$0xff] }
 0x8cd   : > { %8376 = vmatmul.mubr.f32.gmra.mrb[122].mxu0 %v21181_v18  ;;  %v21188_v18 = vld [vmem:[#allocation188_spill] sm:$0xff] }
 0x8ce   : > { %8382 = vmatprep.mubr.f32.mxu0 %v18499_v3  ;;  %v21189_v3 = vld [vmem:[#allocation14_spill] sm:$0xff] }
 0x8d1   : > { %8384 = vmatmul.mubr.f32.gmra.mrb[124].mxu0 %v18519_v51  ;;  %v21190_v51 = vld [vmem:[#allocation34_spill] sm:$0xff] }
 0x8d2   : > { %8390 = vmatprep.mubr.f32.mxu0 %v18527_v44  ;;  %v21191_v44 = vld [vmem:[#allocation187_spill] sm:$0xff] }
 0x8d5   : > { %8392 = vmatmul.mubr.f32.gmra.mrb[126].mxu0 %v18539_v61  ;;  %v21192_v61 = vld [vmem:[#allocation191_spill] sm:$0xff] }
 0x8d6   : > { %8592 = vmatprep.mubr.f32.mxu0 %v21182_v47 }
 0x8d9   : > { %8595 = vmatmul.mubr.f32.vlgmr.msra.gmra.mrb[64].mxu0 %v21183_v56 }
 0x8da   : > { %12478 = vmatpush1.bf16.msra.mxu0 %v21184_v21  ;;  %8602 = vmatprep.mubr.f32.mxu0 %v21185_v8  ;;  %v21198_v21 = vld [vmem:[#allocation25_spill] sm:$0xff] }
 0x8db   : > { %12480 = vmatprep.subr.bf16.mxu0 %v21186_v14  ;;  %v21197_v14 = vld [vmem:[#allocation104_spill] sm:$0xff] }
 0x8dd   : > { %8605 = vmatmul.mubr.f32.gmra.mrb[66].mxu0 %v21187_v58 }
 0x8de   : > { %8612 = vmatprep.mubr.f32.mxu0 %v21188_v18  ;;  %12482 = vmatpush1.bf16.msra.mxu0 %v21189_v3  ;;  %v21200_v3 = vld [vmem:[#allocation46_spill] sm:$0xff] }
 0x8df   : > { %12484 = vmatprep.subr.bf16.mxu0 %v21190_v51  ;;  %v21201_v51 = vld [vmem:[#allocation89_spill] sm:$0xff] }
 0x8e1   : > { %8615 = vmatmul.mubr.f32.gmra.mrb[68].mxu0 %v21191_v44 }
 0x8e2   : > { %8622 = vmatprep.mubr.f32.mxu0 %v21192_v61  ;;  %12486 = vmatpush1.bf16.msra.mxu0 %v21193_v59  ;;  %v21204_v59 = vld [vmem:[#allocation159_spill] sm:$0xff] }
 0x8e3   : > { %12488 = vmatprep.subr.bf16.mxu0 %v21194_v57  ;;  %v21205_v57 = vld [vmem:[#allocation96_spill] sm:$0xff] }
 0x8e5   : > { %8625 = vmatmul.mubr.f32.gmra.mrb[70].mxu0 %v21195_v19 }
 0x8e6   : > { %8632 = vmatprep.mubr.f32.mxu0 %v21196_v43  ;;  %12490 = vmatpush1.bf16.msra.mxu0 %v21197_v14  ;;  %v21208_v14 = vld [vmem:[#allocation53_spill] sm:$0xff] }
 0x8e7   : > { %12492 = vmatprep.subr.bf16.mxu0 %v21198_v21  ;;  %v21209_v21 = vld [vmem:[#allocation69_spill] sm:$0xff] }
 0x8e9   : > { %8635 = vmatmul.mubr.f32.gmra.mrb[72].mxu0 %v21199_v35 }
 0x8ea   : > { %8642 = vmatprep.mubr.f32.mxu0 %v21200_v3  ;;  %12494 = vmatpush1.bf16.msra.mxu0 %v21201_v51  ;;  %v21212_v51 = vld [vmem:[#allocation182_spill] sm:$0xff] }
 0x8eb   : > { %12496 = vmatprep.subr.bf16.mxu0 %v21202_v50  ;;  %v21213_v50 = vld [vmem:[#allocation107_spill] sm:$0xff] }
 0x8ed   : > { %8645 = vmatmul.mubr.f32.gmra.mrb[74].mxu0 %v21203_v5 }
 0x8ee   : > { %8652 = vmatprep.mubr.f32.mxu0 %v21204_v59  ;;  %12498 = vmatpush1.bf16.msra.mxu0 %v21205_v57  ;;  %v21216_v57 = vld [vmem:[#allocation59_spill] sm:$0xff] }
 0x8ef   : > { %12500 = vmatprep.subr.bf16.mxu0 %v21206_v10  ;;  %v21217_v10 = vld [vmem:[#allocation113_spill] sm:$0xff] }
 0x8f1   : > { %8655 = vmatmul.mubr.f32.gmra.mrb[76].mxu0 %v21207_v53 }
 0x8f2   : > { %8662 = vmatprep.mubr.f32.mxu0 %v21208_v14  ;;  %12502 = vmatpush1.bf16.msra.mxu0 %v21209_v21  ;;  %v21220_v21 = vld [vmem:[#allocation163_spill] sm:$0xff] }
 0x8f3   : > { %12504 = vmatprep.subr.bf16.mxu0 %v21210_v9  ;;  %v21221_v9 = vld [vmem:[#allocation119_spill] sm:$0xff] }
 0x8f5   : > { %8665 = vmatmul.mubr.f32.gmra.mrb[78].mxu0 %v21211_v37 }
 0x8f6   : > { %8672 = vmatprep.mubr.f32.mxu0 %v21212_v51  ;;  %12506 = vmatpush1.bf16.msra.mxu0 %v21213_v50  ;;  %v21224_v50 = vld [vmem:[#allocation7_spill] sm:$0xff] }
 0x8f7   : > { %12508 = vmatprep.subr.bf16.mxu0 %v21214_v6  ;;  %v21225_v6 = vld [vmem:[#allocation125_spill] sm:$0xff] }
 0x8f9   : > { %8675 = vmatmul.mubr.f32.gmra.mrb[80].mxu0 %v21215_v46 }
 0x8fa   : > { %8682 = vmatprep.mubr.f32.mxu0 %v21216_v57  ;;  %12510 = vmatpush1.bf16.msra.mxu0 %v21217_v10  ;;  %v21228_v10 = vld [vmem:[#allocation166_spill] sm:$0xff] }
 0x8fb   : > { %12512 = vmatprep.subr.bf16.mxu0 %v21218_v13  ;;  %v21229_v13 = vld [vmem:[#allocation130_spill] sm:$0xff] }
 0x8fd   : > { %8685 = vmatmul.mubr.f32.gmra.mrb[82].mxu0 %v21219_v17 }
 0x8fe   : > { %8692 = vmatprep.mubr.f32.mxu0 %v21220_v21  ;;  %12514 = vmatpush1.bf16.msra.mxu0 %v21221_v9  ;;  %v21232_v9 = vld [vmem:[#allocation70_spill] sm:$0xff] }
 0x8ff   : > { %12516 = vmatprep.subr.bf16.mxu0 %v21222_v36  ;;  %v21233_v36 = vld [vmem:[#allocation138_spill] sm:$0xff] }
 0x901   : > { %8695 = vmatmul.mubr.f32.gmra.mrb[84].mxu0 %v21223_v54  ;;  %v21234_v54 = vld [vmem:[#allocation139_spill] sm:$0xff] }
 0x902   : > { %8702 = vmatprep.mubr.f32.mxu0 %v21224_v50  ;;  %12518 = vmatpush1.bf16.msra.mxu0 %v21225_v6  ;;  %v21235_v50 = vld [vmem:[#allocation168_spill] sm:$0xff]  ;;  %v21236_v6 = vld [vmem:[#allocation73_spill] sm:$0xff] }
 0x903   : > { %12520 = vmatprep.subr.bf16.mxu0 %v21226_v2  ;;  %v21237_v2 = vld [vmem:[#allocation143_spill] sm:$0xff] }
 0x905   : > { %8705 = vmatmul.mubr.f32.gmra.mrb[86].mxu0 %v21227_v31  ;;  %v21238_v31 = vld [vmem:[#allocation146_spill] sm:$0xff] }
 0x906   : > { %8712 = vmatprep.mubr.f32.mxu0 %v21228_v10  ;;  %12522 = vmatpush1.bf16.msra.mxu0 %v21229_v13  ;;  %v21239_v10 = vld [vmem:[#allocation93_spill] sm:$0xff]  ;;  %v21240_v13 = vld [vmem:[#allocation171_spill] sm:$0xff] }
 0x907   : > { %12524 = vmatprep.subr.bf16.mxu0 %v21230_v52  ;;  %v21241_v52 = vld [vmem:[#allocation150_spill] sm:$0xff] }
 0x909   : > { %8715 = vmatmul.mubr.f32.gmra.mrb[88].mxu0 %v21231_v25  ;;  %v21242_v25 = vld [vmem:[#allocation152_spill] sm:$0xff] }
 0x90a   : > { %8722 = vmatprep.mubr.f32.mxu0 %v21232_v9  ;;  %12526 = vmatpush1.bf16.msra.mxu0 %v21233_v36  ;;  %v21243_v36 = vand.u32 4294901760, %v21086_v40  ;;  %v21253_v40 = vld [vmem:[#allocation35_spill] sm:$0xff] }
 0x90b   : > { %12528 = vmatprep.subr.bf16.mxu0 %v21234_v54  ;;  %v21244_v54 = vand.u32 4294901760, %v21087_v16  ;;  %v21254_v16 = vld [vmem:[#allocation37_spill] sm:$0xff] }
 0x90d   : > { %8725 = vmatmul.mubr.f32.gmra.mrb[90].mxu0 %v21235_v50  ;;  %v12539_v9 = vpack.c.bf16 %v21244_v54, %v21243_v36  ;;  %v21245_v50 = vld [vmem:[#allocation33_spill] sm:$0xff]  ;;  %v21255_v54 = vld [vmem:[#allocation198_spill] sm:$0xff]  ;;  %v21256_v36 = vld [vmem:[#allocation196_spill] sm:$0xff] }
 0x90e   : > { %8732 = vmatprep.mubr.f32.mxu0 %v21236_v6  ;;  %12530 = vmatpush1.bf16.msra.mxu0 %v21237_v2  ;;  %v21246_v6 = vld [vmem:[#allocation173_spill] sm:$0xff]  ;;  %v21247_v2 = vld [vmem:[#allocation155_spill] sm:$0xff] }
 0x90f   : > { %12532 = vmatprep.subr.bf16.mxu0 %v21238_v31  ;;  %v21248_v31 = vld [vmem:[#allocation44_spill] sm:$0xff] }
 0x911   : > { %8735 = vmatmul.mubr.f32.gmra.mrb[92].mxu0 %v21239_v10  ;;  %v21249_v10 = vld [vmem:[#allocation175_spill] sm:$0xff] }
 0x912   : > { %8742 = vmatprep.mubr.f32.mxu0 %v21240_v13  ;;  %12534 = vmatpush1.bf16.msra.mxu0 %v21241_v52  ;;  %v21250_v13 = vld [vmem:[#allocation174_spill] sm:$0xff] }
 0x913   : > { %12536 = vmatprep.subr.bf16.mxu0 %v21242_v25  ;;  %v21251_v52 = vld [vmem:[#allocation50_spill] sm:$0xff]  ;;  %v21252_v25 = vld [vmem:[#allocation21_spill] sm:$0xff] }
 0x915   : > { %8745 = vmatmul.mubr.f32.gmra.mrb[94].mxu0 %v21245_v50 }
 0x916   : > { %8752 = vmatprep.mubr.f32.mxu0 %v21246_v6  ;;  %12538 = vmatpush1.bf16.msra.mxu0 %v21247_v2  ;;  %v21257_v2 = vld [vmem:[#allocation200_spill] sm:$0xff] }
 0x917   : > { %12540 = vmatprep.subr.bf16.mxu0 %v12539_v9  ;;  %v21258_v9 = vld [vmem:[#allocation199_spill] sm:$0xff] }
 0x919   : > { %8755 = vmatmul.mubr.f32.gmra.mrb[96].mxu0 %v21248_v31  ;;  %v21259_v31 = vld [vmem:[#allocation60_spill] sm:$0xff] }
 0x91a   : > { %8762 = vmatprep.mubr.f32.mxu0 %v21249_v10  ;;  %v21260_v10 = vld [vmem:[#allocation178_spill] sm:$0xff] }
 0x91d   : > { %8765 = vmatmul.mubr.f32.gmra.mrb[98].mxu0 %v21250_v13  ;;  %v21261_v13 = vld [vmem:[#allocation80_spill] sm:$0xff] }
 0x91e   : > { %8772 = vmatprep.mubr.f32.mxu0 %v21251_v52  ;;  %v21262_v52 = vld [vmem:[#allocation65_spill] sm:$0xff] }
 0x921   : > { %8775 = vmatmul.mubr.f32.gmra.mrb[100].mxu0 %v21252_v25  ;;  %v21263_v25 = vld [vmem:[#allocation205_spill] sm:$0xff] }
 0x922   : > { %8782 = vmatprep.mubr.f32.mxu0 %v21253_v40  ;;  %v21264_v40 = vld [vmem:[#allocation76_spill] sm:$0xff] }
 0x925   : > { %8785 = vmatmul.mubr.f32.gmra.mrb[102].mxu0 %v21254_v16  ;;  %v21265_v16 = vld [vmem:[#allocation207_spill] sm:$0xff] }
 0x926   : > { %8792 = vmatprep.mubr.f32.mxu0 %v21255_v54  ;;  %v21266_v54 = vld [vmem:[#allocation209_spill] sm:$0xff] }
 0x929   : > { %8795 = vmatmul.mubr.f32.gmra.mrb[104].mxu0 %v21256_v36  ;;  %v21267_v36 = vld [vmem:[#allocation81_spill] sm:$0xff] }
 0x92a   : > { %8802 = vmatprep.mubr.f32.mxu0 %v21257_v2  ;;  %v21268_v2 = vld [vmem:[#allocation4_spill] sm:$0xff] }
 0x92d   : > { %8805 = vmatmul.mubr.f32.gmra.mrb[106].mxu0 %v21258_v9  ;;  %v21269_v9 = vld [vmem:[#allocation8_spill] sm:$0xff] }
 0x92e   : > { %8812 = vmatprep.mubr.f32.mxu0 %v21259_v31  ;;  %v21270_v31 = vld [vmem:[#allocation214_spill] sm:$0xff] }
 0x931   : > { %8815 = vmatmul.mubr.f32.gmra.mrb[108].mxu0 %v21260_v10  ;;  %v21271_v10 = vld [vmem:[#allocation215_spill] sm:$0xff] }
 0x932   : > { %8822 = vmatprep.mubr.f32.mxu0 %v21261_v13 }
 0x935   : > { %8825 = vmatmul.mubr.f32.gmra.mrb[110].mxu0 %v21262_v52 }
 0x936   : > { %8832 = vmatprep.mubr.f32.mxu0 %v21263_v25 }
 0x939   : > { %8835 = vmatmul.mubr.f32.gmra.mrb[112].mxu0 %v21264_v40 }
 0x93a   : > { %8842 = vmatprep.mubr.f32.mxu0 %v21265_v16 }
 0x93d   : > { %8845 = vmatmul.mubr.f32.gmra.mrb[114].mxu0 %v21266_v54 }
 0x93e   : > { %8852 = vmatprep.mubr.f32.mxu0 %v21267_v36 }
 0x941   : > { %8855 = vmatmul.mubr.f32.gmra.mrb[116].mxu0 %v21268_v2 }
 0x942   : > { %8862 = vmatprep.mubr.f32.mxu0 %v21269_v9  ;;  %v21272_v9 = vand.u32 4294901760, %v21182_v47  ;;  %v21279_v47 = vand.u32 4294901760, %v21097_v39 }
 0x945   : > { %8865 = vmatmul.mubr.f32.gmra.mrb[118].mxu0 %v21270_v31  ;;  %v21273_v31 = vand.u32 4294901760, %v21093_v0 }
 0x946   : > { %8872 = vmatprep.mubr.f32.mxu0 %v21271_v10  ;;  %v21274_v10 = vand.u32 4294901760, %v21094_v20  ;;  %v21281_v20 = vld [vmem:[#allocation74_spill] sm:$0xff] }
 0x949   : > { %8875 = vmatmul.mubr.f32.gmra.mrb[120].mxu0 %v18486_v29  ;;  %v12541_v29 = vpack.c.bf16 %v21274_v10, %v21273_v31  ;;  %v21282_v10 = vand.u32 4294901760, %v21281_v20  ;;  %v21283_v31 = vld [vmem:[#allocation98_spill] sm:$0xff] }
 0x94a   : > { %8882 = vmatprep.mubr.f32.mxu0 %v18496_v1  ;;  %v21275_v1 = vand.u32 4294901760, %v21095_v27  ;;  %v21284_v27 = vand.u32 4294901760, %v21283_v31 }
 0x94d   : > { %8885 = vmatmul.mubr.f32.gmra.mrb[122].mxu0 %v18512_v33  ;;  %v21276_v33 = vand.u32 4294901760, %v21096_v62 }
 0x94e   : > { %8892 = vmatprep.mubr.f32.mxu0 %v18525_v26  ;;  %v21277_v26 = vand.u32 4294901760, %v21183_v56  ;;  %v21286_v56 = vand.u32 4294901760, %v21188_v18  ;;  %v21295_v18 = vand.u32 4294901760, %v21105_v60  ;;  %v21304_v60 = vand.u32 4294901760, %v21110_v45  ;;  %v21313_v45 = vld [vmem:[#allocation57_spill] sm:$0xff] }
 0x94f   : > { %v12543_v2 = vpack.c.bf16 %v21276_v33, %v21275_v1  ;;  %v21285_v1 = vand.u32 4294901760, %v21187_v58  ;;  %v21289_v33 = vld [vmem:[#allocation100_spill] sm:$0xff]  ;;  %v21294_v58 = vand.u32 4294901760, %v21192_v61  ;;  %v21303_v61 = vand.u32 4294901760, %v21109_v4 }
 0x950   : > { %v21290_v62 = vand.u32 4294901760, %v21289_v33  ;;  %v21312_v4 = vand.u32 4294901760, %v21114_v28  ;;  %v21314_v33 = vand.u32 4294901760, %v21313_v45  ;;  %v21321_v28 = vld [vmem:[#allocation9_spill] sm:$0xff] }
 0x951   : > { %8895 = vmatmul.mubr.f32.gmra.mrb[124].mxu0 %v18537_v38  ;;  %v12557_v31 = vpack.c.bf16 %v21304_v60, %v21303_v61  ;;  %v21337_v61 = vld [vmem:[#allocation117_spill] sm:$0xff] }
 0x952   : > { %8902 = vmatprep.mubr.f32.mxu0 %v18546_v11  ;;  %v21278_v11 = vand.u32 4294901760, %v21185_v8  ;;  %v21287_v8 = vand.u32 4294901760, %v21101_v23  ;;  %v21296_v23 = vand.u32 4294901760, %v21106_v12  ;;  %v21305_v12 = vld [vmem:[#allocation39_spill] sm:$0xff] }
 0x955   : > { %8905 = vmatmul.mubr.f32.gmra.mrb[126].mxu0 %v18553_v22  ;;  %v12547_v22 = vpack.c.bf16 %v21284_v27, %v21282_v10  ;;  %v21301_v10 = vand.u32 4294901760, %v21195_v19  ;;  %v21306_v27 = vand.u32 4294901760, %v21305_v12  ;;  %v21310_v19 = vand.u32 4294901760, %v21200_v3  ;;  %v21342_v12 = vld [vmem:[#allocation120_spill] sm:$0xff] }
 0x956   : > { %9042 = vmatprep.mubr.f32.mxu0 %v21272_v9  ;;  %v21280_v9 = vand.u32 4294901760, %v21098_v32  ;;  %v21319_v3 = vand.u32 4294901760, %v21117_v7  ;;  %v21328_v7 = vand.u32 4294901760, %v21122_v48  ;;  %v21336_v48 = vand.u32 4294901760, %v21127_v42 }
 0x958   : > { %v12545_v0 = vpack.c.bf16 %v21280_v9, %v21279_v47  ;;  %v12553_v47 = vpack.c.bf16 %v21296_v23, %v21295_v18  ;;  %v21299_v9 = vld [vmem:[#allocation38_spill] sm:$0xff]  ;;  %v21323_v18 = vld [vmem:[#allocation13_spill] sm:$0xff] }
 0x959   : > { %9046 = vmatmul.mubr.f32.vlgmr.msra.gmra.mrb[64].mxu0 %v21277_v26  ;;  %v21324_v23 = vand.u32 4294901760, %v21323_v18 }
 0x95a   : > { %12542 = vmatpush1.bf16.msra.mxu0 %v12541_v29  ;;  %9054 = vmatprep.mubr.f32.mxu0 %v21278_v11  ;;  %v21288_v29 = vand.u32 4294901760, %v21102_v55  ;;  %v21291_v11 = vld [vmem:[#allocation103_spill] sm:$0xff]  ;;  %v21297_v55 = vld [vmem:[#allocation18_spill] sm:$0xff] }
 0x95b   : > { %12544 = vmatprep.subr.bf16.mxu0 %v12543_v2  ;;  %v21292_v39 = vand.u32 4294901760, %v21291_v11  ;;  %v21293_v2 = vand.u32 4294901760, %v21191_v44  ;;  %v21302_v44 = vand.u32 4294901760, %v21196_v43  ;;  %v21311_v43 = vand.u32 4294901760, %v21113_v63 }
 0x95c   : > { %v12549_v26 = vpack.c.bf16 %v21288_v29, %v21287_v8  ;;  %v21309_v29 = vand.u32 4294901760, %v21199_v35  ;;  %v21318_v35 = vand.u32 4294901760, %v21204_v59  ;;  %v21320_v63 = vand.u32 4294901760, %v21118_v49 }
 0x95d   : > { %9058 = vmatmul.mubr.f32.gmra.mrb[66].mxu0 %v21285_v1  ;;  %v12551_v32 = vpack.c.bf16 %v21292_v39, %v21290_v62  ;;  %v21307_v1 = vld [vmem:[#allocation94_spill] sm:$0xff]  ;;  %v21315_v62 = vld [vmem:[#allocation55_spill] sm:$0xff]  ;;  %v21327_v59 = vand.u32 4294901760, %v21121_v30  ;;  %v21329_v49 = vand.u32 4294901760, %v21123_v15  ;;  %v21335_v30 = vand.u32 4294901760, %v21126_v34 }
 0x95e   : > { %9066 = vmatprep.mubr.f32.mxu0 %v21286_v56  ;;  %12546 = vmatpush1.bf16.msra.mxu0 %v12545_v0  ;;  %v21300_v0 = vand.u32 4294901760, %v21299_v9  ;;  %v21308_v56 = vand.u32 4294901760, %v21307_v1  ;;  %v21316_v11 = vand.u32 4294901760, %v21315_v62  ;;  %v21330_v9 = vld [vmem:[#allocation111_spill] sm:$0xff]  ;;  %v21338_v15 = vand.u32 4294901760, %v21337_v61  ;;  %v21344_v34 = vld [vmem:[#allocation122_spill] sm:$0xff] }
 0x95f   : > { %12548 = vmatprep.subr.bf16.mxu0 %v12547_v22  ;;  %v21298_v22 = vand.u32 4294901760, %v21297_v55  ;;  %v21325_v55 = vand.u32 4294901760, %v21207_v53  ;;  %v21333_v53 = vand.u32 4294901760, %v21212_v51  ;;  %v21341_v51 = vand.u32 4294901760, %v21129_v24  ;;  %v21382_v61 = vld [vmem:[#allocation167_spill] sm:$0xff] }
 0x960   : > { %v12559_v8 = vpack.c.bf16 %v21308_v56, %v21306_v27  ;;  %v12563_v39 = vpack.c.bf16 %v21316_v11, %v21314_v33  ;;  %v12575_v60 = vpack.c.bf16 %v21338_v15, %v21336_v48  ;;  %v21345_v1 = vand.u32 4294901760, %v21344_v34  ;;  %v21346_v56 = vld [vmem:[#allocation123_spill] sm:$0xff]  ;;  %v21356_v33 = vld [vmem:[#allocation129_spill] sm:$0xff] }
 0x961   : > { %9070 = vmatmul.mubr.f32.gmra.mrb[68].mxu0 %v21293_v2  ;;  %v12555_v20 = vpack.c.bf16 %v21300_v0, %v21298_v22  ;;  %v12565_v2 = vpack.c.bf16 %v21320_v63, %v21319_v3  ;;  %v12569_v22 = vpack.c.bf16 %v21328_v7, %v21327_v59  ;;  %v21331_v0 = vand.u32 4294901760, %v21330_v9  ;;  %v21364_v63 = vld [vmem:[#allocation132_spill] sm:$0xff]  ;;  %v21372_v7 = vld [vmem:[#allocation166_spill] sm:$0xff]  ;;  %v21390_v34 = vld [vmem:[#allocation147_spill] sm:$0xff] }
 0x962   : > { %9078 = vmatprep.mubr.f32.mxu0 %v21294_v58  ;;  %12550 = vmatpush1.bf16.msra.mxu0 %v12549_v26  ;;  %v12561_v26 = vpack.c.bf16 %v21312_v4, %v21311_v43  ;;  %v21322_v58 = vand.u32 4294901760, %v21321_v28  ;;  %v21347_v42 = vand.u32 4294901760, %v21346_v56  ;;  %v21352_v43 = vld [vmem:[#allocation126_spill] sm:$0xff]  ;;  %v21357_v62 = vand.u32 4294901760, %v21356_v33  ;;  %v21392_v56 = vld [vmem:[#allocation148_spill] sm:$0xff]  ;;  %v21402_v33 = vld [vmem:[#allocation153_spill] sm:$0xff] }
 0x963   : > { %12552 = vmatprep.subr.bf16.mxu0 %v12551_v32  ;;  %v21317_v32 = vand.u32 4294901760, %v21203_v5  ;;  %v21326_v5 = vand.u32 4294901760, %v21208_v14  ;;  %v21334_v14 = vand.u32 4294901760, %v21125_v41  ;;  %v21343_v41 = vand.u32 4294901760, %v21342_v12  ;;  %v21388_v12 = vld [vmem:[#allocation144_spill] sm:$0xff] }
 0x964   : > { %v21353_v24 = vand.u32 4294901760, %v21352_v43  ;;  %v21383_v15 = vand.u32 4294901760, %v21382_v61  ;;  %v21398_v43 = vld [vmem:[#allocation149_spill] sm:$0xff]  ;;  %v21433_v61 = vld [vmem:[#allocation196_spill] sm:$0xff] }
 0x965   : > { %9082 = vmatmul.mubr.f32.gmra.mrb[70].mxu0 %v21301_v10  ;;  %v21332_v10 = vand.u32 4294901760, %v21211_v37  ;;  %v21340_v37 = vand.u32 4294901760, %v21216_v57  ;;  %v12577_v27 = vpack.c.bf16 %v21343_v41, %v21341_v51  ;;  %v21350_v57 = vld [vmem:[#allocation124_spill] sm:$0xff]  ;;  %v21389_v41 = vand.u32 4294901760, %v21388_v12 }
 0x966   : > { %9090 = vmatprep.mubr.f32.mxu0 %v21302_v44  ;;  %12554 = vmatpush1.bf16.msra.mxu0 %v12553_v47  ;;  %v12567_v47 = vpack.c.bf16 %v21324_v23, %v21322_v58  ;;  %v12573_v44 = vpack.c.bf16 %v21335_v30, %v21334_v14  ;;  %v21366_v58 = vld [vmem:[#allocation134_spill] sm:$0xff]  ;;  %v21368_v23 = vld [vmem:[#allocation135_spill] sm:$0xff]  ;;  %v21380_v30 = vld [vmem:[#allocation141_spill] sm:$0xff] }
 0x967   : > { %12556 = vmatprep.subr.bf16.mxu0 %v12555_v20  ;;  %v12571_v20 = vpack.c.bf16 %v21331_v0, %v21329_v49  ;;  %v21367_v18 = vand.u32 4294901760, %v21366_v58  ;;  %v21374_v49 = vld [vmem:[#allocation136_spill] sm:$0xff]  ;;  %v21376_v0 = vld [vmem:[#allocation137_spill] sm:$0xff] }
 0x968   : > { %v21375_v9 = vand.u32 4294901760, %v21374_v49  ;;  %v21421_v49 = vld [vmem:[#allocation174_spill] sm:$0xff]  ;;  %v21439_v12 = vld [vmem:[#allocation60_spill] sm:$0xff] }
 0x969   : > { %9094 = vmatmul.mubr.f32.gmra.mrb[72].mxu0 %v21309_v29  ;;  %v21348_v29 = vand.u32 4294901760, %v21219_v17  ;;  %v21360_v17 = vld [vmem:[#allocation7_spill] sm:$0xff] }
 0x96a   : > { %9102 = vmatprep.mubr.f32.mxu0 %v21310_v19  ;;  %12558 = vmatpush1.bf16.msra.mxu0 %v12557_v31  ;;  %v21339_v31 = vand.u32 4294901760, %v21215_v46  ;;  %v21349_v46 = vand.u32 4294901760, %v21220_v21  ;;  %v21351_v19 = vand.u32 4294901760, %v21350_v57  ;;  %v21362_v21 = vld [vmem:[#allocation131_spill] sm:$0xff]  ;;  %v21396_v57 = vld [vmem:[#allocation73_spill] sm:$0xff] }
 0x96b   : > { %12560 = vmatprep.subr.bf16.mxu0 %v12559_v8  ;;  %v12579_v8 = vpack.c.bf16 %v21347_v42, %v21345_v1  ;;  %v21363_v3 = vand.u32 4294901760, %v21362_v21  ;;  %v21391_v1 = vand.u32 4294901760, %v21390_v34  ;;  %v21393_v42 = vand.u32 4294901760, %v21392_v56  ;;  %v21408_v21 = vld [vmem:[#allocation171_spill] sm:$0xff] }
 0x96c   : > { %v12581_v4 = vpack.c.bf16 %v21353_v24, %v21351_v19  ;;  %v21397_v19 = vand.u32 4294901760, %v21396_v57  ;;  %v21399_v24 = vand.u32 4294901760, %v21398_v43  ;;  %v21444_v56 = vand.u32 4294901760, %v21262_v52  ;;  %v21452_v52 = vld [vmem:[#allocation8_spill] sm:$0xff] }
 0x96d   : > { %9106 = vmatmul.mubr.f32.gmra.mrb[74].mxu0 %v21317_v32  ;;  %v21449_v57 = vand.u32 4294901760, %v21267_v36  ;;  %v21453_v43 = vand.u32 4294901760, %v21452_v52  ;;  %v21462_v36 = vld [vmem:[#allocation15_spill] sm:$0xff]  ;;  %v21516_v52 = vld [vmem:[#allocation64_spill] sm:$0xff] }
 0x96e   : > { %9114 = vmatprep.mubr.f32.mxu0 %v21318_v35  ;;  %12562 = vmatpush1.bf16.msra.mxu0 %v12561_v26  ;;  %v21354_v26 = vld [vmem:[#allocation128_spill] sm:$0xff]  ;;  %v21361_v35 = vand.u32 4294901760, %v21360_v17  ;;  %v21406_v17 = vld [vmem:[#allocation93_spill] sm:$0xff] }
 0x96f   : > { %12564 = vmatprep.subr.bf16.mxu0 %v12563_v39  ;;  %v21355_v45 = vand.u32 4294901760, %v21354_v26  ;;  %v21358_v39 = vld [vmem:[#allocation164_spill] sm:$0xff] }
 0x970   : > { %v21359_v32 = vand.u32 4294901760, %v21358_v39 }
 0x971   : > { %9118 = vmatmul.mubr.f32.gmra.mrb[76].mxu0 %v21325_v55  ;;  %v12583_v11 = vpack.c.bf16 %v21357_v62, %v21355_v45  ;;  %v21403_v62 = vand.u32 4294901760, %v21402_v33  ;;  %v21463_v33 = vand.u32 4294901760, %v21462_v36  ;;  %v21526_v36 = vld [vmem:[#allocation143_spill] sm:$0xff] }
 0x972   : > { %9126 = vmatprep.mubr.f32.mxu0 %v21326_v5  ;;  %12566 = vmatpush1.bf16.msra.mxu0 %v12565_v2  ;;  %v21365_v2 = vand.u32 4294901760, %v21364_v63  ;;  %v21370_v5 = vld [vmem:[#allocation165_spill] sm:$0xff]  ;;  %v21410_v63 = vld [vmem:[#allocation156_spill] sm:$0xff] }
 0x973   : > { %12568 = vmatprep.subr.bf16.mxu0 %v12567_v47  ;;  %v21369_v47 = vand.u32 4294901760, %v21368_v23  ;;  %v21371_v59 = vand.u32 4294901760, %v21370_v5  ;;  %v21414_v23 = vand.u32 4294901760, %v21245_v50  ;;  %v21417_v5 = vld [vmem:[#allocation44_spill] sm:$0xff]  ;;  %v21425_v50 = vld [vmem:[#allocation21_spill] sm:$0xff] }
 0x974   : > { %v12585_v28 = vpack.c.bf16 %v21365_v2, %v21363_v3  ;;  %v21409_v3 = vand.u32 4294901760, %v21408_v21  ;;  %v21411_v2 = vand.u32 4294901760, %v21410_v63  ;;  %v21472_v63 = vld [vmem:[#allocation67_spill] sm:$0xff] }
 0x975   : > { %9130 = vmatmul.mubr.f32.gmra.mrb[78].mxu0 %v21332_v10  ;;  %v12587_v55 = vpack.c.bf16 %v21369_v47, %v21367_v18  ;;  %v21415_v47 = vand.u32 4294901760, %v21246_v6  ;;  %v21427_v6 = vld [vmem:[#allocation35_spill] sm:$0xff] }
 0x976   : > { %9138 = vmatprep.mubr.f32.mxu0 %v21333_v53  ;;  %12570 = vmatpush1.bf16.msra.mxu0 %v12569_v22  ;;  %v21373_v22 = vand.u32 4294901760, %v21372_v7  ;;  %v21378_v53 = vld [vmem:[#allocation140_spill] sm:$0xff]  ;;  %v21419_v7 = vld [vmem:[#allocation175_spill] sm:$0xff] }
 0x977   : > { %12572 = vmatprep.subr.bf16.mxu0 %v12571_v20  ;;  %v21377_v20 = vand.u32 4294901760, %v21376_v0  ;;  %v21379_v14 = vand.u32 4294901760, %v21378_v53  ;;  %v21423_v0 = vld [vmem:[#allocation50_spill] sm:$0xff]  ;;  %v21428_v53 = vand.u32 4294901760, %v21427_v6  ;;  %v21491_v6 = vld [vmem:[#allocation95_spill] sm:$0xff] }
 0x979   : > { %9142 = vmatmul.mubr.f32.gmra.mrb[80].mxu0 %v21339_v31  ;;  %v12589_v10 = vpack.c.bf16 %v21377_v20, %v21375_v9  ;;  %v21422_v9 = vand.u32 4294901760, %v21421_v49  ;;  %v21424_v20 = vand.u32 4294901760, %v21423_v0  ;;  %v21485_v49 = vld [vmem:[#allocation192_spill] sm:$0xff]  ;;  %v21487_v0 = vld [vmem:[#allocation25_spill] sm:$0xff] }
 0x97a   : > { %9150 = vmatprep.mubr.f32.mxu0 %v21340_v37  ;;  %12574 = vmatpush1.bf16.msra.mxu0 %v12573_v44  ;;  %v21381_v44 = vand.u32 4294901760, %v21380_v30  ;;  %v21386_v37 = vld [vmem:[#allocation142_spill] sm:$0xff] }
 0x97b   : > { %12576 = vmatprep.subr.bf16.mxu0 %v12575_v60  ;;  %v21384_v60 = vld [vmem:[#allocation70_spill] sm:$0xff]  ;;  %v21387_v51 = vand.u32 4294901760, %v21386_v37  ;;  %v21437_v37 = vld [vmem:[#allocation199_spill] sm:$0xff] }
 0x97c   : > { %v12591_v48 = vpack.c.bf16 %v21381_v44, %v21379_v14  ;;  %v21385_v31 = vand.u32 4294901760, %v21384_v60  ;;  %v21429_v14 = vld [vmem:[#allocation37_spill] sm:$0xff]  ;;  %v21431_v44 = vld [vmem:[#allocation198_spill] sm:$0xff]  ;;  %v21435_v60 = vld [vmem:[#allocation200_spill] sm:$0xff] }
 0x97d   : > { %9154 = vmatmul.mubr.f32.gmra.mrb[82].mxu0 %v21348_v29  ;;  %v21394_v29 = vld [vmem:[#allocation168_spill] sm:$0xff]  ;;  %v21430_v30 = vand.u32 4294901760, %v21429_v14  ;;  %v21493_v14 = vld [vmem:[#allocation195_spill] sm:$0xff] }
 0x97e   : > { %9162 = vmatprep.mubr.f32.mxu0 %v21349_v46  ;;  %12578 = vmatpush1.bf16.msra.mxu0 %v12577_v27  ;;  %v12593_v27 = vpack.c.bf16 %v21389_v41, %v21387_v51  ;;  %v21395_v46 = vand.u32 4294901760, %v21394_v29  ;;  %v21438_v51 = vand.u32 4294901760, %v21437_v37  ;;  %v21440_v41 = vand.u32 4294901760, %v21439_v12  ;;  %v21501_v37 = vld [vmem:[#allocation161_spill] sm:$0xff] }
 0x97f   : > { %12580 = vmatprep.subr.bf16.mxu0 %v12579_v8  ;;  %v12595_v8 = vpack.c.bf16 %v21393_v42, %v21391_v1  ;;  %v21443_v1 = vand.u32 4294901760, %v21261_v13  ;;  %v21445_v42 = vand.u32 4294901760, %v21263_v25  ;;  %v21447_v29 = vand.u32 4294901760, %v21265_v16  ;;  %v21450_v13 = vld [vmem:[#allocation4_spill] sm:$0xff]  ;;  %v21454_v25 = vld [vmem:[#allocation214_spill] sm:$0xff]  ;;  %v21503_v12 = vld [vmem:[#allocation109_spill] sm:$0xff] }
 0x980   : > { %v21458_v16 = vld [vmem:[#allocation218_spill] sm:$0xff] }
 0x981   : > { %9166 = vmatmul.mubr.f32.gmra.mrb[84].mxu0 %v21359_v32 }
 0x982   : > { %9174 = vmatprep.mubr.f32.mxu0 %v21361_v35  ;;  %12582 = vmatpush1.bf16.msra.mxu0 %v12581_v4  ;;  %v21400_v4 = vld [vmem:[#allocation151_spill] sm:$0xff]  ;;  %v21407_v35 = vand.u32 4294901760, %v21406_v17 }
 0x983   : > { %12584 = vmatprep.subr.bf16.mxu0 %v12583_v11  ;;  %v21401_v26 = vand.u32 4294901760, %v21400_v4  ;;  %v21404_v11 = vld [vmem:[#allocation154_spill] sm:$0xff] }
 0x984   : > { %v21405_v39 = vand.u32 4294901760, %v21404_v11 }
 0x985   : > { %9178 = vmatmul.mubr.f32.gmra.mrb[86].mxu0 %v21371_v59  ;;  %v12597_v45 = vpack.c.bf16 %v21401_v26, %v21399_v24  ;;  %v21418_v59 = vand.u32 4294901760, %v21417_v5  ;;  %v21455_v24 = vand.u32 4294901760, %v21454_v25  ;;  %v21459_v26 = vand.u32 4294901760, %v21458_v16  ;;  %v21481_v5 = vld [vmem:[#allocation189_spill] sm:$0xff]  ;;  %v21518_v25 = vld [vmem:[#allocation130_spill] sm:$0xff] }
 0x986   : > { %9186 = vmatprep.mubr.f32.mxu0 %v21373_v22  ;;  %12586 = vmatpush1.bf16.msra.mxu0 %v12585_v28  ;;  %v12599_v32 = vpack.c.bf16 %v21405_v39, %v21403_v62  ;;  %v21412_v28 = vld [vmem:[#allocation157_spill] sm:$0xff]  ;;  %v21420_v22 = vand.u32 4294901760, %v21419_v7  ;;  %v21464_v62 = vld [vmem:[#allocation222_spill] sm:$0xff]  ;;  %v21466_v39 = vand.u32 4294901760, %v18537_v38 }
 0x987   : > { %12588 = vmatprep.subr.bf16.mxu0 %v12587_v55  ;;  %v21413_v58 = vand.u32 4294901760, %v21412_v28  ;;  %v21416_v55 = vld [vmem:[#allocation83_spill] sm:$0xff]  ;;  %v21465_v11 = vand.u32 4294901760, %v21464_v62  ;;  %v21474_v28 = vld [vmem:[#allocation16_spill] sm:$0xff]  ;;  %v21477_v38 = vld [vmem:[#allocation186_spill] sm:$0xff] }
 0x988   : > { %v21483_v7 = vld [vmem:[#allocation101_spill] sm:$0xff]  ;;  %v21522_v16 = vld [vmem:[#allocation138_spill] sm:$0xff] }
 0x989   : > { %9190 = vmatmul.mubr.f32.gmra.mrb[88].mxu0 %v21383_v15  ;;  %v12601_v18 = vpack.c.bf16 %v21413_v58, %v21411_v2  ;;  %v21434_v15 = vand.u32 4294901760, %v21433_v61  ;;  %v21473_v2 = vld [vmem:[#allocation66_spill] sm:$0xff]  ;;  %v21475_v58 = vld [vmem:[#allocation85_spill] sm:$0xff]  ;;  %v21497_v61 = vld [vmem:[#allocation179_spill] sm:$0xff] }
 0x98a   : > { %9198 = vmatprep.mubr.f32.mxu0 %v21385_v31  ;;  %12590 = vmatpush1.bf16.msra.mxu0 %v12589_v10  ;;  %v21426_v10 = vand.u32 4294901760, %v21425_v50  ;;  %v21436_v31 = vand.u32 4294901760, %v21435_v60  ;;  %v21489_v50 = vld [vmem:[#allocation51_spill] sm:$0xff]  ;;  %v21499_v60 = vld [vmem:[#allocation5_spill] sm:$0xff]  ;;  %v21528_v62 = vld [vmem:[#allocation22_spill] sm:$0xff] }
 0x98b   : > { %12592 = vmatprep.subr.bf16.mxu0 %v12591_v48  ;;  %v21432_v48 = vand.u32 4294901760, %v21431_v44  ;;  %v21495_v44 = vld [vmem:[#allocation58_spill] sm:$0xff] }
 0x98d   : > { %9202 = vmatmul.mubr.f32.gmra.mrb[90].mxu0 %v21395_v46  ;;  %v21448_v46 = vand.u32 4294901760, %v21266_v54  ;;  %v21460_v54 = vld [vmem:[#allocation219_spill] sm:$0xff] }
 0x98e   : > { %9210 = vmatprep.mubr.f32.mxu0 %v21397_v19  ;;  %12594 = vmatpush1.bf16.msra.mxu0 %v12593_v27  ;;  %v21441_v27 = vld [vmem:[#allocation178_spill] sm:$0xff]  ;;  %v21451_v19 = vand.u32 4294901760, %v21450_v13  ;;  %v21514_v13 = vld [vmem:[#allocation125_spill] sm:$0xff] }
 0x98f   : > { %12596 = vmatprep.subr.bf16.mxu0 %v12595_v8  ;;  %v21442_v34 = vand.u32 4294901760, %v21441_v27  ;;  %v21446_v8 = vand.u32 4294901760, %v21264_v40  ;;  %v21456_v40 = vld [vmem:[#allocation215_spill] sm:$0xff]  ;;  %v21505_v27 = vld [vmem:[#allocation86_spill] sm:$0xff] }
 0x990   : > { %v21457_v4 = vand.u32 4294901760, %v21456_v40  ;;  %v21520_v40 = vld [vmem:[#allocation68_spill] sm:$0xff] }
 0x991   : > { %9214 = vmatmul.mubr.f32.gmra.mrb[92].mxu0 %v21407_v35  ;;  %v21469_v35 = vld [vmem:[#allocation224_spill] sm:$0xff] }
 0x992   : > { %9222 = vmatprep.mubr.f32.mxu0 %v21409_v3  ;;  %12598 = vmatpush1.bf16.msra.mxu0 %v12597_v45  ;;  %v21461_v45 = vand.u32 4294901760, %v21460_v54  ;;  %v21470_v21 = vand.u32 4294901760, %v21469_v35  ;;  %v21471_v3 = vld [vmem:[#allocation145_spill] sm:$0xff]  ;;  %v21524_v54 = vld [vmem:[#allocation102_spill] sm:$0xff]  ;;  %v21533_v35 = vld [vmem:[#allocation172_spill] sm:$0xff] }
 0x993   : > { %12600 = vmatprep.subr.bf16.mxu0 %v12599_v32  ;;  %v21467_v32 = vld [vmem:[#allocation71_spill] sm:$0xff] }
 0x994   : > { %v21468_v17 = vand.u32 4294901760, %v21467_v32  ;;  %v21531_v32 = vld [vmem:[#allocation152_spill] sm:$0xff] }
 0x995   : > { %9226 = vmatmul.mubr.f32.gmra.mrb[94].mxu0 %v21414_v23  ;;  %v21478_v23 = vld [vmem:[#allocation14_spill] sm:$0xff] }
 0x996   : > { %9234 = vmatprep.mubr.f32.mxu0 %v21415_v47  ;;  %12602 = vmatpush1.bf16.msra.mxu0 %v12601_v18  ;;  %v21476_v18 = vld [vmem:[#allocation12_spill] sm:$0xff]  ;;  %v21479_v47 = vld [vmem:[#allocation34_spill] sm:$0xff] }
 0x997   : > { %12604 = vmatprep.subr.bf16.mxu0 %v21416_v55  ;;  %v21480_v55 = vld [vmem:[#allocation23_spill] sm:$0xff] }
 0x999   : > { %9238 = vmatmul.mubr.f32.gmra.mrb[96].mxu0 %v21418_v59  ;;  %v21482_v59 = vld [vmem:[#allocation27_spill] sm:$0xff] }
 0x99a   : > { %9246 = vmatprep.mubr.f32.mxu0 %v21420_v22  ;;  %v21484_v22 = vld [vmem:[#allocation29_spill] sm:$0xff] }
 0x99d   : > { %9250 = vmatmul.mubr.f32.gmra.mrb[98].mxu0 %v21422_v9  ;;  %v21486_v9 = vld [vmem:[#allocation104_spill] sm:$0xff] }
 0x99e   : > { %9258 = vmatprep.mubr.f32.mxu0 %v21424_v20  ;;  %v21488_v20 = vld [vmem:[#allocation36_spill] sm:$0xff] }
 0x9a1   : > { %9262 = vmatmul.mubr.f32.gmra.mrb[100].mxu0 %v21426_v10  ;;  %v21490_v10 = vld [vmem:[#allocation89_spill] sm:$0xff] }
 0x9a2   : > { %9270 = vmatprep.mubr.f32.mxu0 %v21428_v53  ;;  %v21492_v53 = vld [vmem:[#allocation41_spill] sm:$0xff] }
 0x9a5   : > { %9274 = vmatmul.mubr.f32.gmra.mrb[102].mxu0 %v21430_v30  ;;  %v21494_v30 = vld [vmem:[#allocation96_spill] sm:$0xff] }
 0x9a6   : > { %9282 = vmatprep.mubr.f32.mxu0 %v21432_v48  ;;  %v21496_v48 = vld [vmem:[#allocation31_spill] sm:$0xff] }
 0x9a9   : > { %9286 = vmatmul.mubr.f32.gmra.mrb[104].mxu0 %v21434_v15  ;;  %v21498_v15 = vld [vmem:[#allocation69_spill] sm:$0xff] }
 0x9aa   : > { %9294 = vmatprep.mubr.f32.mxu0 %v21436_v31  ;;  %v21500_v31 = vld [vmem:[#allocation49_spill] sm:$0xff] }
 0x9ad   : > { %9298 = vmatmul.mubr.f32.gmra.mrb[106].mxu0 %v21438_v51  ;;  %v21502_v51 = vld [vmem:[#allocation107_spill] sm:$0xff] }
 0x9ae   : > { %9306 = vmatprep.mubr.f32.mxu0 %v21440_v41  ;;  %v21504_v41 = vld [vmem:[#allocation180_spill] sm:$0xff] }
 0x9b1   : > { %9310 = vmatmul.mubr.f32.gmra.mrb[108].mxu0 %v21442_v34  ;;  %v21506_v34 = vld [vmem:[#allocation113_spill] sm:$0xff] }
 0x9b2   : > { %9318 = vmatprep.mubr.f32.mxu0 %v21443_v1  ;;  %v21507_v1 = vld [vmem:[#allocation115_spill] sm:$0xff] }
 0x9b5   : > { %9322 = vmatmul.mubr.f32.gmra.mrb[110].mxu0 %v21444_v56  ;;  %v21508_v56 = vld [vmem:[#allocation162_spill] sm:$0xff] }
 0x9b6   : > { %9330 = vmatprep.mubr.f32.mxu0 %v21445_v42  ;;  %v21509_v42 = vld [vmem:[#allocation61_spill] sm:$0xff] }
 0x9b9   : > { %9334 = vmatmul.mubr.f32.gmra.mrb[112].mxu0 %v21446_v8  ;;  %v21510_v8 = vld [vmem:[#allocation119_spill] sm:$0xff] }
 0x9ba   : > { %9342 = vmatprep.mubr.f32.mxu0 %v21447_v29  ;;  %v21511_v29 = vld [vmem:[#allocation121_spill] sm:$0xff] }
 0x9bd   : > { %9346 = vmatmul.mubr.f32.gmra.mrb[114].mxu0 %v21448_v46  ;;  %v21512_v46 = vld [vmem:[#allocation56_spill] sm:$0xff] }
 0x9be   : > { %9354 = vmatprep.mubr.f32.mxu0 %v21449_v57  ;;  %v21513_v57 = vld [vmem:[#allocation99_spill] sm:$0xff] }
 0x9c1   : > { %9358 = vmatmul.mubr.f32.gmra.mrb[116].mxu0 %v21451_v19  ;;  %v21515_v19 = vld [vmem:[#allocation127_spill] sm:$0xff] }
 0x9c2   : > { %9366 = vmatprep.mubr.f32.mxu0 %v21453_v43  ;;  %v21517_v43 = vld [vmem:[#allocation45_spill] sm:$0xff] }
 0x9c5   : > { %9370 = vmatmul.mubr.f32.gmra.mrb[118].mxu0 %v21455_v24  ;;  %v21519_v24 = vld [vmem:[#allocation133_spill] sm:$0xff] }
 0x9c6   : > { %9378 = vmatprep.mubr.f32.mxu0 %v21457_v4  ;;  %v21521_v4 = vld [vmem:[#allocation91_spill] sm:$0xff] }
 0x9c9   : > { %9382 = vmatmul.mubr.f32.gmra.mrb[120].mxu0 %v21459_v26  ;;  %v21523_v26 = vld [vmem:[#allocation139_spill] sm:$0xff] }
 0x9ca   : > { %9390 = vmatprep.mubr.f32.mxu0 %v21461_v45  ;;  %v21525_v45 = vld [vmem:[#allocation169_spill] sm:$0xff] }
 0x9cd   : > { %9394 = vmatmul.mubr.f32.gmra.mrb[122].mxu0 %v21463_v33  ;;  %v21527_v33 = vld [vmem:[#allocation146_spill] sm:$0xff] }
 0x9ce   : > { %9402 = vmatprep.mubr.f32.mxu0 %v21465_v11  ;;  %v21529_v11 = vld [vmem:[#allocation77_spill] sm:$0xff] }
 0x9d1   : > { %9406 = vmatmul.mubr.f32.gmra.mrb[124].mxu0 %v21466_v39  ;;  %v21530_v39 = vld [vmem:[#allocation150_spill] sm:$0xff] }
 0x9d2   : > { %9414 = vmatprep.mubr.f32.mxu0 %v21468_v17  ;;  %v21532_v17 = vld [vmem:[#allocation170_spill] sm:$0xff] }
 0x9d5   : > { %9418 = vmatmul.mubr.f32.gmra.mrb[126].mxu0 %v21470_v21  ;;  %v21534_v21 = vld [vmem:[#allocation155_spill] sm:$0xff] }
 0x9d6   : > { %9681 = vmatprep.mubr.f32.mxu0 %v21471_v3 }
 0x9d9   : > { %9683 = vmatmul.mubr.f32.vlgmr.msra.gmra.mrb[64].mxu0 %v21472_v63 }
 0x9da   : > { %12606 = vmatpush1.bf16.msra.mxu0 %v21473_v2  ;;  %9689 = vmatprep.mubr.f32.mxu0 %v21474_v28  ;;  %v21535_v2 = vld [vmem:[#allocation82_spill] sm:$0xff] }
 0x9db   : > { %12608 = vmatprep.subr.bf16.mxu0 %v21475_v58  ;;  %v21536_v58 = vld [vmem:[#allocation97_spill] sm:$0xff] }
 0x9dd   : > { %9691 = vmatmul.mubr.f32.gmra.mrb[66].mxu0 %v21476_v18 }
 0x9de   : > { %9697 = vmatprep.mubr.f32.mxu0 %v21477_v38  ;;  %12610 = vmatpush1.bf16.msra.mxu0 %v21478_v23  ;;  %v21537_v23 = vld [vmem:[#allocation92_spill] sm:$0xff] }
 0x9df   : > { %12612 = vmatprep.subr.bf16.mxu0 %v21479_v47  ;;  %v21538_v47 = vld [vmem:[#allocation87_spill] sm:$0xff] }
 0x9e1   : > { %9699 = vmatmul.mubr.f32.gmra.mrb[68].mxu0 %v21480_v55 }
 0x9e2   : > { %9705 = vmatprep.mubr.f32.mxu0 %v21481_v5  ;;  %12614 = vmatpush1.bf16.msra.mxu0 %v21482_v59  ;;  %v21539_v59 = vld [vmem:[#allocation54_spill] sm:$0xff] }
 0x9e3   : > { %12616 = vmatprep.subr.bf16.mxu0 %v21483_v7  ;;  %v21540_v7 = vld [vmem:[#allocation28_spill] sm:$0xff] }
 0x9e5   : > { %9707 = vmatmul.mubr.f32.gmra.mrb[70].mxu0 %v21484_v22 }
 0x9e6   : > { %9713 = vmatprep.mubr.f32.mxu0 %v21485_v49  ;;  %12618 = vmatpush1.bf16.msra.mxu0 %v21486_v9  ;;  %v21541_v9 = vld [vmem:[#allocation176_spill] sm:$0xff] }
 0x9e7   : > { %12620 = vmatprep.subr.bf16.mxu0 %v21487_v0  ;;  %v21542_v0 = vld [vmem:[#allocation42_spill] sm:$0xff] }
 0x9e9   : > { %9715 = vmatmul.mubr.f32.gmra.mrb[72].mxu0 %v21488_v20 }
 0x9ea   : > { %9721 = vmatprep.mubr.f32.mxu0 %v21489_v50  ;;  %12622 = vmatpush1.bf16.msra.mxu0 %v21490_v10  ;;  %v21543_v10 = vld [vmem:[#allocation177_spill] sm:$0xff] }
 0x9eb   : > { %12624 = vmatprep.subr.bf16.mxu0 %v21491_v6  ;;  %v21544_v6 = vld [vmem:[#allocation197_spill] sm:$0xff] }
 0x9ed   : > { %9723 = vmatmul.mubr.f32.gmra.mrb[74].mxu0 %v21492_v53 }
 0x9ee   : > { %9729 = vmatprep.mubr.f32.mxu0 %v21493_v14  ;;  %12626 = vmatpush1.bf16.msra.mxu0 %v21494_v30  ;;  %v21545_v30 = vld [vmem:[#allocation48_spill] sm:$0xff] }
 0x9ef   : > { %12628 = vmatprep.subr.bf16.mxu0 %v21495_v44  ;;  %v21546_v44 = vld [vmem:[#allocation3_spill] sm:$0xff] }
 0x9f1   : > { %9731 = vmatmul.mubr.f32.gmra.mrb[76].mxu0 %v21496_v48 }
 0x9f2   : > { %9737 = vmatprep.mubr.f32.mxu0 %v21497_v61  ;;  %12630 = vmatpush1.bf16.msra.mxu0 %v21498_v15  ;;  %v21547_v15 = vld [vmem:[#allocation52_spill] sm:$0xff] }
 0x9f3   : > { %12632 = vmatprep.subr.bf16.mxu0 %v21499_v60  ;;  %v21548_v60 = vld [vmem:[#allocation202_spill] sm:$0xff] }
 0x9f5   : > { %9739 = vmatmul.mubr.f32.gmra.mrb[78].mxu0 %v21500_v31 }
 0x9f6   : > { %9745 = vmatprep.mubr.f32.mxu0 %v21501_v37  ;;  %12634 = vmatpush1.bf16.msra.mxu0 %v21502_v51  ;;  %v21549_v51 = vld [vmem:[#allocation201_spill] sm:$0xff] }
 0x9f7   : > { %12636 = vmatprep.subr.bf16.mxu0 %v21503_v12  ;;  %v21550_v12 = vld [vmem:[#allocation72_spill] sm:$0xff] }
 0x9f9   : > { %9747 = vmatmul.mubr.f32.gmra.mrb[80].mxu0 %v21504_v41 }
 0x9fa   : > { %9753 = vmatprep.mubr.f32.mxu0 %v21505_v27  ;;  %12638 = vmatpush1.bf16.msra.mxu0 %v21506_v34  ;;  %v21551_v34 = vld [vmem:[#allocation203_spill] sm:$0xff] }
 0x9fb   : > { %12640 = vmatprep.subr.bf16.mxu0 %v21507_v1  ;;  %v21552_v1 = vld [vmem:[#allocation204_spill] sm:$0xff] }
 0x9fd   : > { %9755 = vmatmul.mubr.f32.gmra.mrb[82].mxu0 %v21508_v56 }
 0x9fe   : > { %9761 = vmatprep.mubr.f32.mxu0 %v21509_v42  ;;  %12642 = vmatpush1.bf16.msra.mxu0 %v21510_v8  ;;  %v21553_v8 = vld [vmem:[#allocation206_spill] sm:$0xff] }
 0x9ff   : > { %12644 = vmatprep.subr.bf16.mxu0 %v21511_v29  ;;  %v21554_v29 = vld [vmem:[#allocation208_spill] sm:$0xff] }
 0xa01   : > { %9763 = vmatmul.mubr.f32.gmra.mrb[84].mxu0 %v21512_v46 }
 0xa02   : > { %9769 = vmatprep.mubr.f32.mxu0 %v21513_v57  ;;  %12646 = vmatpush1.bf16.msra.mxu0 %v21514_v13  ;;  %v21555_v13 = vld [vmem:[#allocation210_spill] sm:$0xff] }
 0xa03   : > { %12648 = vmatprep.subr.bf16.mxu0 %v21515_v19  ;;  %v21556_v19 = vld [vmem:[#allocation211_spill] sm:$0xff] }
 0xa05   : > { %9771 = vmatmul.mubr.f32.gmra.mrb[86].mxu0 %v21516_v52 }
 0xa06   : > { %9777 = vmatprep.mubr.f32.mxu0 %v21517_v43  ;;  %12650 = vmatpush1.bf16.msra.mxu0 %v21518_v25  ;;  %v21557_v25 = vld [vmem:[#allocation212_spill] sm:$0xff] }
 0xa07   : > { %12652 = vmatprep.subr.bf16.mxu0 %v21519_v24  ;;  %v21558_v24 = vld [vmem:[#allocation213_spill] sm:$0xff] }
 0xa09   : > { %9779 = vmatmul.mubr.f32.gmra.mrb[88].mxu0 %v21520_v40 }
 0xa0a   : > { %9785 = vmatprep.mubr.f32.mxu0 %v21521_v4  ;;  %12654 = vmatpush1.bf16.msra.mxu0 %v21522_v16  ;;  %v21559_v16 = vld [vmem:[#allocation11_spill] sm:$0xff] }
 0xa0b   : > { %12656 = vmatprep.subr.bf16.mxu0 %v21523_v26  ;;  %v21560_v26 = vld [vmem:[#allocation216_spill] sm:$0xff] }
 0xa0d   : > { %9787 = vmatmul.mubr.f32.gmra.mrb[90].mxu0 %v21524_v54 }
 0xa0e   : > { %9793 = vmatprep.mubr.f32.mxu0 %v21525_v45  ;;  %12658 = vmatpush1.bf16.msra.mxu0 %v21526_v36  ;;  %v21561_v36 = vld [vmem:[#allocation217_spill] sm:$0xff] }
 0xa0f   : > { %12660 = vmatprep.subr.bf16.mxu0 %v21527_v33  ;;  %v21562_v33 = vld [vmem:[#allocation220_spill] sm:$0xff] }
 0xa11   : > { %9795 = vmatmul.mubr.f32.gmra.mrb[92].mxu0 %v21528_v62 }
 0xa12   : > { %9801 = vmatprep.mubr.f32.mxu0 %v21529_v11  ;;  %12662 = vmatpush1.bf16.msra.mxu0 %v21530_v39  ;;  %v21563_v39 = vld [vmem:[#allocation221_spill] sm:$0xff] }
 0xa13   : > { %12664 = vmatprep.subr.bf16.mxu0 %v21531_v32  ;;  %v21564_v32 = vld [vmem:[#allocation223_spill] sm:$0xff] }
 0xa15   : > { %9803 = vmatmul.mubr.f32.gmra.mrb[94].mxu0 %v21532_v17 }
 0xa16   : > { %9809 = vmatprep.mubr.f32.mxu0 %v21533_v35  ;;  %12666 = vmatpush1.bf16.msra.mxu0 %v21534_v21  ;;  %v21565_v21 = vld [vmem:[#allocation19_spill] sm:$0xff] }
 0xa19   : > { %9811 = vmatmul.mubr.f32.gmra.mrb[96].mxu0 %v21535_v2 }
 0xa1a   : > { %9817 = vmatprep.mubr.f32.mxu0 %v21536_v58 }
 0xa1d   : > { %9819 = vmatmul.mubr.f32.gmra.mrb[98].mxu0 %v21537_v23 }
 0xa1e   : > { %9825 = vmatprep.mubr.f32.mxu0 %v21538_v47 }
 0xa21   : > { %9827 = vmatmul.mubr.f32.gmra.mrb[100].mxu0 %v21539_v59 }
 0xa22   : > { %9833 = vmatprep.mubr.f32.mxu0 %v21540_v7 }
 0xa25   : > { %9835 = vmatmul.mubr.f32.gmra.mrb[102].mxu0 %v21541_v9 }
 0xa26   : > { %9841 = vmatprep.mubr.f32.mxu0 %v21542_v0 }
 0xa29   : > { %9843 = vmatmul.mubr.f32.gmra.mrb[104].mxu0 %v21543_v10 }
 0xa2a   : > { %9849 = vmatprep.mubr.f32.mxu0 %v21544_v6 }
 0xa2d   : > { %9851 = vmatmul.mubr.f32.gmra.mrb[106].mxu0 %v21545_v30 }
 0xa2e   : > { %9857 = vmatprep.mubr.f32.mxu0 %v21546_v44 }
 0xa31   : > { %9859 = vmatmul.mubr.f32.gmra.mrb[108].mxu0 %v21547_v15 }
 0xa32   : > { %9865 = vmatprep.mubr.f32.mxu0 %v21548_v60 }
 0xa35   : > { %9867 = vmatmul.mubr.f32.gmra.mrb[110].mxu0 %v21549_v51 }
 0xa36   : > { %9873 = vmatprep.mubr.f32.mxu0 %v21550_v12 }
 0xa39   : > { %9875 = vmatmul.mubr.f32.gmra.mrb[112].mxu0 %v21551_v34 }
 0xa3a   : > { %9881 = vmatprep.mubr.f32.mxu0 %v21552_v1 }
 0xa3d   : > { %9883 = vmatmul.mubr.f32.gmra.mrb[114].mxu0 %v21553_v8 }
 0xa3e   : > { %9889 = vmatprep.mubr.f32.mxu0 %v21554_v29 }
 0xa41   : > { %9891 = vmatmul.mubr.f32.gmra.mrb[116].mxu0 %v21555_v13 }
 0xa42   : > { %9897 = vmatprep.mubr.f32.mxu0 %v21556_v19 }
 0xa45   : > { %9899 = vmatmul.mubr.f32.gmra.mrb[118].mxu0 %v21557_v25 }
 0xa46   : > { %9905 = vmatprep.mubr.f32.mxu0 %v21558_v24 }
 0xa49   : > { %9907 = vmatmul.mubr.f32.gmra.mrb[120].mxu0 %v21559_v16 }
 0xa4a   : > { %9913 = vmatprep.mubr.f32.mxu0 %v21560_v26 }
 0xa4d   : > { %9915 = vmatmul.mubr.f32.gmra.mrb[122].mxu0 %v21561_v36 }
 0xa4e   : > { %9921 = vmatprep.mubr.f32.mxu0 %v21562_v33 }
 0xa51   : > { %9923 = vmatmul.mubr.f32.gmra.mrb[124].mxu0 %v21563_v39 }
 0xa52   : > { %9929 = vmatprep.mubr.f32.mxu0 %v21564_v32 }
 0xa55   : > { %9931 = vmatmul.mubr.f32.gmra.mrb[126].mxu0 %v21565_v21 }
 0xa56   : > { %10066 = vmatprep.mubr.f32.mxu0 %v21471_v3 }
 0xa59   : > { %10068 = vmatmul.mubr.f32.vlgmr.msra.gmra.mrb[64].mxu0 %v21472_v63 }
 0xa5a   : > { %10074 = vmatprep.mubr.f32.mxu0 %v21474_v28 }
 0xa5d   : > { %10076 = vmatmul.mubr.f32.gmra.mrb[66].mxu0 %v21476_v18 }
 0xa5e   : > { %10082 = vmatprep.mubr.f32.mxu0 %v21477_v38 }
 0xa61   : > { %10084 = vmatmul.mubr.f32.gmra.mrb[68].mxu0 %v21480_v55 }
 0xa62   : > { %10090 = vmatprep.mubr.f32.mxu0 %v21481_v5 }
 0xa65   : > { %10092 = vmatmul.mubr.f32.gmra.mrb[70].mxu0 %v21484_v22 }
 0xa66   : > { %10098 = vmatprep.mubr.f32.mxu0 %v21485_v49 }
 0xa69   : > { %10100 = vmatmul.mubr.f32.gmra.mrb[72].mxu0 %v21488_v20 }
 0xa6a   : > { %10106 = vmatprep.mubr.f32.mxu0 %v21489_v50 }
 0xa6d   : > { %10108 = vmatmul.mubr.f32.gmra.mrb[74].mxu0 %v21492_v53 }
 0xa6e   : > { %10114 = vmatprep.mubr.f32.mxu0 %v21493_v14 }
 0xa71   : > { %10116 = vmatmul.mubr.f32.gmra.mrb[76].mxu0 %v21496_v48 }
 0xa72   : > { %10122 = vmatprep.mubr.f32.mxu0 %v21497_v61 }
 0xa75   : > { %10124 = vmatmul.mubr.f32.gmra.mrb[78].mxu0 %v21500_v31 }
 0xa76   : > { %10130 = vmatprep.mubr.f32.mxu0 %v21501_v37 }
 0xa79   : > { %10132 = vmatmul.mubr.f32.gmra.mrb[80].mxu0 %v21504_v41 }
 0xa7a   : > { %10138 = vmatprep.mubr.f32.mxu0 %v21505_v27 }
 0xa7d   : > { %10140 = vmatmul.mubr.f32.gmra.mrb[82].mxu0 %v21508_v56 }
 0xa7e   : > { %10146 = vmatprep.mubr.f32.mxu0 %v21509_v42 }
 0xa81   : > { %10148 = vmatmul.mubr.f32.gmra.mrb[84].mxu0 %v21512_v46 }
 0xa82   : > { %10154 = vmatprep.mubr.f32.mxu0 %v21513_v57 }
 0xa85   : > { %10156 = vmatmul.mubr.f32.gmra.mrb[86].mxu0 %v21516_v52 }
 0xa86   : > { %10162 = vmatprep.mubr.f32.mxu0 %v21517_v43 }
 0xa89   : > { %10164 = vmatmul.mubr.f32.gmra.mrb[88].mxu0 %v21520_v40 }
 0xa8a   : > { %10170 = vmatprep.mubr.f32.mxu0 %v21521_v4 }
 0xa8d   : > { %10172 = vmatmul.mubr.f32.gmra.mrb[90].mxu0 %v21524_v54 }
 0xa8e   : > { %10178 = vmatprep.mubr.f32.mxu0 %v21525_v45 }
 0xa91   : > { %10180 = vmatmul.mubr.f32.gmra.mrb[92].mxu0 %v21528_v62 }
 0xa92   : > { %10186 = vmatprep.mubr.f32.mxu0 %v21529_v11 }
 0xa95   : > { %10188 = vmatmul.mubr.f32.gmra.mrb[94].mxu0 %v21532_v17 }
 0xa96   : > { %10194 = vmatprep.mubr.f32.mxu0 %v21533_v35 }
 0xa99   : > { %10196 = vmatmul.mubr.f32.gmra.mrb[96].mxu0 %v21535_v2 }
 0xa9a   : > { %10202 = vmatprep.mubr.f32.mxu0 %v21536_v58 }
 0xa9d   : > { %10204 = vmatmul.mubr.f32.gmra.mrb[98].mxu0 %v21537_v23 }
 0xa9e   : > { %10210 = vmatprep.mubr.f32.mxu0 %v21538_v47 }
 0xaa1   : > { %10212 = vmatmul.mubr.f32.gmra.mrb[100].mxu0 %v21539_v59 }
 0xaa2   : > { %10218 = vmatprep.mubr.f32.mxu0 %v21540_v7 }
 0xaa5   : > { %10220 = vmatmul.mubr.f32.gmra.mrb[102].mxu0 %v21541_v9 }
 0xaa6   : > { %10226 = vmatprep.mubr.f32.mxu0 %v21542_v0 }
 0xaa9   : > { %10228 = vmatmul.mubr.f32.gmra.mrb[104].mxu0 %v21543_v10 }
 0xaaa   : > { %10234 = vmatprep.mubr.f32.mxu0 %v21544_v6 }
 0xaad   : > { %10236 = vmatmul.mubr.f32.gmra.mrb[106].mxu0 %v21545_v30 }
 0xaae   : > { %10242 = vmatprep.mubr.f32.mxu0 %v21546_v44 }
 0xab1   : > { %10244 = vmatmul.mubr.f32.gmra.mrb[108].mxu0 %v21547_v15 }
 0xab2   : > { %10250 = vmatprep.mubr.f32.mxu0 %v21548_v60 }
 0xab5   : > { %10252 = vmatmul.mubr.f32.gmra.mrb[110].mxu0 %v21549_v51 }
 0xab6   : > { %10258 = vmatprep.mubr.f32.mxu0 %v21550_v12 }
 0xab9   : > { %10260 = vmatmul.mubr.f32.gmra.mrb[112].mxu0 %v21551_v34 }
 0xaba   : > { %10266 = vmatprep.mubr.f32.mxu0 %v21552_v1 }
 0xabd   : > { %10268 = vmatmul.mubr.f32.gmra.mrb[114].mxu0 %v21553_v8 }
 0xabe   : > { %10274 = vmatprep.mubr.f32.mxu0 %v21554_v29 }
 0xac1   : > { %10276 = vmatmul.mubr.f32.gmra.mrb[116].mxu0 %v21555_v13 }
 0xac2   : > { %10282 = vmatprep.mubr.f32.mxu0 %v21556_v19 }
 0xac5   : > { %10284 = vmatmul.mubr.f32.gmra.mrb[118].mxu0 %v21557_v25 }
 0xac6   : > { %10290 = vmatprep.mubr.f32.mxu0 %v21558_v24 }
 0xac9   : > { %10292 = vmatmul.mubr.f32.gmra.mrb[120].mxu0 %v21559_v16 }
 0xaca   : > { %10298 = vmatprep.mubr.f32.mxu0 %v21560_v26 }
 0xacd   : > { %10300 = vmatmul.mubr.f32.gmra.mrb[122].mxu0 %v21561_v36 }
 0xace   : > { %10306 = vmatprep.mubr.f32.mxu0 %v21562_v33 }
 0xad1   : > { %10308 = vmatmul.mubr.f32.gmra.mrb[124].mxu0 %v21563_v39 }
 0xad2   : > { %10314 = vmatprep.mubr.f32.mxu0 %v21564_v32 }
 0xad5   : > { %10316 = vmatmul.mubr.f32.gmra.mrb[126].mxu0 %v21565_v21 }
 0xb2c   : > { %v10069_v3 = vpop.f32.mrb[64].mxu0 }
 0xb2d   : > { %13800 = vrcp.f32 %v10069_v3  ;;  %v10071_v63 = vpop.f32.mrb[65].mxu0 }
 0xb30   : > { %v10077_v28 = vpop.f32.mrb[66].mxu0 }
 0xb31   : > { %13802 = vrcp.f32 %v10077_v28  ;;  %v10079_v18 = vpop.f32.mrb[67].mxu0 }
 0xb34   : > { %v10085_v38 = vpop.f32.mrb[68].mxu0 }
 0xb35   : > { %13804 = vrcp.f32 %v10085_v38  ;;  %v10087_v55 = vpop.f32.mrb[69].mxu0 }
 0xb37   : > { %v13801_v5 = vpop.eup %13800 }
 0xb38   : > { %v10354_v22 = vmul.f32 %v13801_v5, %v10069_v3  ;;  %v10093_v49 = vpop.f32.mrb[70].mxu0 }
 0xb39   : > { %13806 = vrcp.f32 %v10093_v49  ;;  %v10095_v20 = vpop.f32.mrb[71].mxu0 }
 0xb3a   : > { %v10386_v50 = vsub.f32 2.0, %v10354_v22 }
 0xb3b   : > { %v13803_v53 = vpop.eup %13802 }
 0xb3c   : > { %v10418_v14 = vmul.f32 %v13801_v5, %v10386_v50  ;;  %v10355_v48 = vmul.f32 %v13803_v53, %v10077_v28  ;;  %v10101_v61 = vpop.f32.mrb[72].mxu0 }
 0xb3d   : > { %13808 = vrcp.f32 %v10101_v61  ;;  %v10103_v31 = vpop.f32.mrb[73].mxu0 }
 0xb3e   : > { %v10450_v37 = vmul.f32 %v10418_v14, %v10071_v63  ;;  %v10387_v41 = vsub.f32 2.0, %v10355_v48 }
 0xb3f   : > { %v13805_v27 = vpop.eup %13804 }
 0xb40   : > { %v10419_v56 = vmul.f32 %v13803_v53, %v10387_v41  ;;  %v10356_v42 = vmul.f32 %v13805_v27, %v10085_v38  ;;  %10482 = vxpose.xlu0.b32.start [1/16] %v10450_v37, 128  ;;  %v10109_v46 = vpop.f32.mrb[74].mxu0 }
 0xb41   : > { %13810 = vrcp.f32 %v10109_v46  ;;  %v10111_v57 = vpop.f32.mrb[75].mxu0 }
 0xb42   : > { %v10451_v52 = vmul.f32 %v10419_v56, %v10079_v18  ;;  %v10388_v43 = vsub.f32 2.0, %v10356_v42 }
 0xb43   : > { %v13807_v40 = vpop.eup %13806 }
 0xb44   : > { %v10420_v4 = vmul.f32 %v13805_v27, %v10388_v43  ;;  %v10357_v54 = vmul.f32 %v13807_v40, %v10093_v49  ;;  %10483 = vxpose.xlu0.b32.cont [2/16] %v10451_v52, 128  ;;  %v10117_v45 = vpop.f32.mrb[76].mxu0 }
 0xb45   : > { %13812 = vrcp.f32 %v10117_v45  ;;  %v10119_v62 = vpop.f32.mrb[77].mxu0 }
 0xb46   : > { %v10452_v11 = vmul.f32 %v10420_v4, %v10087_v55  ;;  %v10389_v17 = vsub.f32 2.0, %v10357_v54 }
 0xb47   : > { %v13809_v35 = vpop.eup %13808 }
 0xb48   : > { %v10421_v2 = vmul.f32 %v13807_v40, %v10389_v17  ;;  %v10358_v58 = vmul.f32 %v13809_v35, %v10101_v61  ;;  %10484 = vxpose.xlu0.b32.cont [3/16] %v10452_v11, 128  ;;  %v10125_v23 = vpop.f32.mrb[78].mxu0 }
 0xb49   : > { %13814 = vrcp.f32 %v10125_v23  ;;  %v10127_v47 = vpop.f32.mrb[79].mxu0 }
 0xb4a   : > { %v10453_v59 = vmul.f32 %v10421_v2, %v10095_v20  ;;  %v10390_v7 = vsub.f32 2.0, %v10358_v58 }
 0xb4b   : > { %v13811_v9 = vpop.eup %13810 }
 0xb4c   : > { %v10422_v0 = vmul.f32 %v13809_v35, %v10390_v7  ;;  %v10359_v10 = vmul.f32 %v13811_v9, %v10109_v46  ;;  %10485 = vxpose.xlu0.b32.cont [4/16] %v10453_v59, 128  ;;  %v10133_v6 = vpop.f32.mrb[80].mxu0 }
 0xb4d   : > { %13816 = vrcp.f32 %v10133_v6  ;;  %v10135_v30 = vpop.f32.mrb[81].mxu0 }
 0xb4e   : > { %v10454_v44 = vmul.f32 %v10422_v0, %v10103_v31  ;;  %v10391_v15 = vsub.f32 2.0, %v10359_v10 }
 0xb4f   : > { %v13813_v60 = vpop.eup %13812 }
 0xb50   : > { %v10423_v51 = vmul.f32 %v13811_v9, %v10391_v15  ;;  %v10360_v12 = vmul.f32 %v13813_v60, %v10117_v45  ;;  %10486 = vxpose.xlu0.b32.cont [5/16] %v10454_v44, 128  ;;  %v10141_v34 = vpop.f32.mrb[82].mxu0 }
 0xb51   : > { %13818 = vrcp.f32 %v10141_v34  ;;  %v10143_v1 = vpop.f32.mrb[83].mxu0 }
 0xb52   : > { %v10455_v8 = vmul.f32 %v10423_v51, %v10111_v57  ;;  %v10392_v29 = vsub.f32 2.0, %v10360_v12 }
 0xb53   : > { %v13815_v13 = vpop.eup %13814 }
 0xb54   : > { %v10424_v19 = vmul.f32 %v13813_v60, %v10392_v29  ;;  %v10361_v25 = vmul.f32 %v13815_v13, %v10125_v23  ;;  %10487 = vxpose.xlu0.b32.cont [6/16] %v10455_v8, 128  ;;  %v10149_v24 = vpop.f32.mrb[84].mxu0 }
 0xb55   : > { %13820 = vrcp.f32 %v10149_v24  ;;  %v10151_v16 = vpop.f32.mrb[85].mxu0 }
 0xb56   : > { %v10456_v26 = vmul.f32 %v10424_v19, %v10119_v62  ;;  %v10393_v36 = vsub.f32 2.0, %v10361_v25 }
 0xb57   : > { %v13817_v33 = vpop.eup %13816 }
 0xb58   : > { %v10425_v39 = vmul.f32 %v13815_v13, %v10393_v36  ;;  %v10362_v32 = vmul.f32 %v13817_v33, %v10133_v6  ;;  %10488 = vxpose.xlu0.b32.cont [7/16] %v10456_v26, 128  ;;  %v10157_v21 = vpop.f32.mrb[86].mxu0 }
 0xb59   : > { %13822 = vrcp.f32 %v10157_v21  ;;  %v10159_v3 = vpop.f32.mrb[87].mxu0 }
 0xb5a   : > { %v10457_v63 = vmul.f32 %v10425_v39, %v10127_v47  ;;  %v10394_v28 = vsub.f32 2.0, %v10362_v32 }
 0xb5b   : > { %v13819_v18 = vpop.eup %13818 }
 0xb5c   : > { %v10426_v38 = vmul.f32 %v13817_v33, %v10394_v28  ;;  %v10363_v55 = vmul.f32 %v13819_v18, %v10141_v34  ;;  %10489 = vxpose.xlu0.b32.cont [8/16] %v10457_v63, 128  ;;  %v10165_v5 = vpop.f32.mrb[88].mxu0 }
 0xb5d   : > { %13824 = vrcp.f32 %v10165_v5  ;;  %v10167_v22 = vpop.f32.mrb[89].mxu0 }
 0xb5e   : > { %v10458_v49 = vmul.f32 %v10426_v38, %v10135_v30  ;;  %v10395_v20 = vsub.f32 2.0, %v10363_v55 }
 0xb5f   : > { %v13821_v50 = vpop.eup %13820 }
 0xb60   : > { %v10427_v53 = vmul.f32 %v13819_v18, %v10395_v20  ;;  %v10364_v14 = vmul.f32 %v13821_v50, %v10149_v24  ;;  %10490 = vxpose.xlu0.b32.cont [9/16] %v10458_v49, 128  ;;  %v10173_v48 = vpop.f32.mrb[90].mxu0 }
 0xb61   : > { %13826 = vrcp.f32 %v10173_v48  ;;  %v10175_v61 = vpop.f32.mrb[91].mxu0 }
 0xb62   : > { %v10459_v31 = vmul.f32 %v10427_v53, %v10143_v1  ;;  %v10396_v37 = vsub.f32 2.0, %v10364_v14 }
 0xb63   : > { %v13823_v41 = vpop.eup %13822 }
 0xb64   : > { %v10428_v27 = vmul.f32 %v13821_v50, %v10396_v37  ;;  %v10365_v56 = vmul.f32 %v13823_v41, %v10157_v21  ;;  %10491 = vxpose.xlu0.b32.cont [10/16] %v10459_v31, 128  ;;  %v10181_v42 = vpop.f32.mrb[92].mxu0 }
 0xb65   : > { %13828 = vrcp.f32 %v10181_v42  ;;  %v10183_v46 = vpop.f32.mrb[93].mxu0 }
 0xb66   : > { %v10460_v57 = vmul.f32 %v10428_v27, %v10151_v16  ;;  %v10397_v52 = vsub.f32 2.0, %v10365_v56 }
 0xb67   : > { %v13825_v43 = vpop.eup %13824 }
 0xb68   : > { %v10429_v40 = vmul.f32 %v13823_v41, %v10397_v52  ;;  %v10366_v4 = vmul.f32 %v13825_v43, %v10165_v5  ;;  %10492 = vxpose.xlu0.b32.cont [11/16] %v10460_v57, 128  ;;  %v10189_v54 = vpop.f32.mrb[94].mxu0 }
 0xb69   : > { %13830 = vrcp.f32 %v10189_v54  ;;  %v10191_v45 = vpop.f32.mrb[95].mxu0 }
 0xb6a   : > { %v10461_v62 = vmul.f32 %v10429_v40, %v10159_v3  ;;  %v10398_v11 = vsub.f32 2.0, %v10366_v4 }
 0xb6b   : > { %v13827_v17 = vpop.eup %13826 }
 0xb6c   : > { %v10430_v35 = vmul.f32 %v13825_v43, %v10398_v11  ;;  %v10367_v2 = vmul.f32 %v13827_v17, %v10173_v48  ;;  %10493 = vxpose.xlu0.b32.cont [12/16] %v10461_v62, 128  ;;  %v10197_v58 = vpop.f32.mrb[96].mxu0 }
 0xb6d   : > { %13832 = vrcp.f32 %v10197_v58  ;;  %v10199_v23 = vpop.f32.mrb[97].mxu0 }
 0xb6e   : > { %v10462_v47 = vmul.f32 %v10430_v35, %v10167_v22  ;;  %v10399_v59 = vsub.f32 2.0, %v10367_v2 }
 0xb6f   : > { %v13829_v7 = vpop.eup %13828 }
 0xb70   : > { %v10431_v9 = vmul.f32 %v13827_v17, %v10399_v59  ;;  %v10368_v0 = vmul.f32 %v13829_v7, %v10181_v42  ;;  %10494 = vxpose.xlu0.b32.cont [13/16] %v10462_v47, 128  ;;  %v10205_v10 = vpop.f32.mrb[98].mxu0 }
 0xb71   : > { %13834 = vrcp.f32 %v10205_v10  ;;  %v10207_v6 = vpop.f32.mrb[99].mxu0 }
 0xb72   : > { %v10463_v30 = vmul.f32 %v10431_v9, %v10175_v61  ;;  %v10400_v44 = vsub.f32 2.0, %v10368_v0 }
 0xb73   : > { %v13831_v15 = vpop.eup %13830 }
 0xb74   : > { %v10432_v60 = vmul.f32 %v13829_v7, %v10400_v44  ;;  %v10369_v51 = vmul.f32 %v13831_v15, %v10189_v54  ;;  %10495 = vxpose.xlu0.b32.cont [14/16] %v10463_v30, 128  ;;  %v10213_v12 = vpop.f32.mrb[100].mxu0 }
 0xb75   : > { %13836 = vrcp.f32 %v10213_v12  ;;  %v10215_v34 = vpop.f32.mrb[101].mxu0 }
 0xb76   : > { %v10464_v1 = vmul.f32 %v10432_v60, %v10183_v46  ;;  %v10401_v8 = vsub.f32 2.0, %v10369_v51 }
 0xb77   : > { %v13833_v29 = vpop.eup %13832 }
 0xb78   : > { %v10433_v13 = vmul.f32 %v13831_v15, %v10401_v8  ;;  %v10370_v19 = vmul.f32 %v13833_v29, %v10197_v58  ;;  %10496 = vxpose.xlu0.b32.cont [15/16] %v10464_v1, 128  ;;  %v10221_v25 = vpop.f32.mrb[102].mxu0 }
 0xb79   : > { %13838 = vrcp.f32 %v10221_v25  ;;  %v10223_v24 = vpop.f32.mrb[103].mxu0 }
 0xb7a   : > { %v10465_v16 = vmul.f32 %v10433_v13, %v10191_v45  ;;  %v10402_v26 = vsub.f32 2.0, %v10370_v19 }
 0xb7b   : > { %v13835_v36 = vpop.eup %13834 }
 0xb7c   : > { %v10434_v33 = vmul.f32 %v13833_v29, %v10402_v26  ;;  %v10371_v39 = vmul.f32 %v13835_v36, %v10205_v10  ;;  %10497 = vxpose.xlu0.b32.end [16/16] %v10465_v16, 128  ;;  %v10229_v32 = vpop.f32.mrb[104].mxu0 }
 0xb7d   : > { %13840 = vrcp.f32 %v10229_v32  ;;  %v10231_v21 = vpop.f32.mrb[105].mxu0 }
 0xb7e   : > { %v10466_v3 = vmul.f32 %v10434_v33, %v10199_v23  ;;  %v10403_v63 = vsub.f32 2.0, %v10371_v39 }
 0xb7f   : > { %v13837_v28 = vpop.eup %13836 }
 0xb80   : > { %v10435_v18 = vmul.f32 %v13835_v36, %v10403_v63  ;;  %v10372_v38 = vmul.f32 %v13837_v28, %v10213_v12  ;;  %10514 = vxpose.xlu1.b32.start [1/16] %v10466_v3, 128  ;;  %v10237_v55 = vpop.f32.mrb[106].mxu0 }
 0xb81   : > { %13842 = vrcp.f32 %v10237_v55  ;;  %v10239_v5 = vpop.f32.mrb[107].mxu0 }
 0xb82   : > { %v10467_v22 = vmul.f32 %v10435_v18, %v10207_v6  ;;  %v10404_v49 = vsub.f32 2.0, %v10372_v38 }
 0xb83   : > { %v13839_v20 = vpop.eup %13838 }
 0xb84   : > { %v10436_v50 = vmul.f32 %v13837_v28, %v10404_v49  ;;  %v10373_v53 = vmul.f32 %v13839_v20, %v10221_v25  ;;  %10515 = vxpose.xlu1.b32.cont [2/16] %v10467_v22, 128  ;;  %v10245_v14 = vpop.f32.mrb[108].mxu0 }
 0xb85   : > { %13844 = vrcp.f32 %v10245_v14  ;;  %v10247_v48 = vpop.f32.mrb[109].mxu0 }
 0xb86   : > { %v10468_v61 = vmul.f32 %v10436_v50, %v10215_v34  ;;  %v10405_v31 = vsub.f32 2.0, %v10373_v53 }
 0xb87   : > { %v13841_v37 = vpop.eup %13840 }
 0xb88   : > { %v10437_v41 = vmul.f32 %v13839_v20, %v10405_v31  ;;  %v10374_v27 = vmul.f32 %v13841_v37, %v10229_v32  ;;  %10516 = vxpose.xlu1.b32.cont [3/16] %v10468_v61, 128  ;;  %v10253_v56 = vpop.f32.mrb[110].mxu0 }
 0xb89   : > { %13846 = vrcp.f32 %v10253_v56  ;;  %v10255_v42 = vpop.f32.mrb[111].mxu0 }
 0xb8a   : > { %v10469_v46 = vmul.f32 %v10437_v41, %v10223_v24  ;;  %v10406_v57 = vsub.f32 2.0, %v10374_v27 }
 0xb8b   : > { %v13843_v52 = vpop.eup %13842 }
 0xb8c   : > { %v10438_v43 = vmul.f32 %v13841_v37, %v10406_v57  ;;  %v10375_v40 = vmul.f32 %v13843_v52, %v10237_v55  ;;  %10517 = vxpose.xlu1.b32.cont [4/16] %v10469_v46, 128  ;;  %v10261_v4 = vpop.f32.mrb[112].mxu0 }
 0xb8d   : > { %13848 = vrcp.f32 %v10261_v4  ;;  %v10263_v54 = vpop.f32.mrb[113].mxu0 }
 0xb8e   : > { %v10470_v45 = vmul.f32 %v10438_v43, %v10231_v21  ;;  %v10407_v62 = vsub.f32 2.0, %v10375_v40 }
 0xb8f   : > { %v13845_v11 = vpop.eup %13844 }
 0xb90   : > { %v10439_v17 = vmul.f32 %v13843_v52, %v10407_v62  ;;  %v10376_v35 = vmul.f32 %v13845_v11, %v10245_v14  ;;  %10518 = vxpose.xlu1.b32.cont [5/16] %v10470_v45, 128  ;;  %v10269_v2 = vpop.f32.mrb[114].mxu0 }
 0xb91   : > { %13850 = vrcp.f32 %v10269_v2  ;;  %v10271_v58 = vpop.f32.mrb[115].mxu0 }
 0xb92   : > { %v10471_v23 = vmul.f32 %v10439_v17, %v10239_v5  ;;  %v10408_v47 = vsub.f32 2.0, %v10376_v35 }
 0xb93   : > { %v13847_v59 = vpop.eup %13846 }
 0xb94   : > { %v10440_v7 = vmul.f32 %v13845_v11, %v10408_v47  ;;  %v10377_v9 = vmul.f32 %v13847_v59, %v10253_v56  ;;  %10519 = vxpose.xlu1.b32.cont [6/16] %v10471_v23, 128  ;;  %v10277_v0 = vpop.f32.mrb[116].mxu0 }
 0xb95   : > { %13852 = vrcp.f32 %v10277_v0  ;;  %v10279_v10 = vpop.f32.mrb[117].mxu0 }
 0xb96   : > { %v10472_v6 = vmul.f32 %v10440_v7, %v10247_v48  ;;  %v10409_v30 = vsub.f32 2.0, %v10377_v9 }
 0xb97   : > { %v13849_v44 = vpop.eup %13848 }
 0xb98   : > { %v10441_v15 = vmul.f32 %v13847_v59, %v10409_v30  ;;  %v10378_v60 = vmul.f32 %v13849_v44, %v10261_v4  ;;  %10520 = vxpose.xlu1.b32.cont [7/16] %v10472_v6, 128  ;;  %v10285_v51 = vpop.f32.mrb[118].mxu0 }
 0xb99   : > { %13854 = vrcp.f32 %v10285_v51  ;;  %v10287_v12 = vpop.f32.mrb[119].mxu0 }
 0xb9a   : > { %v10473_v34 = vmul.f32 %v10441_v15, %v10255_v42  ;;  %v10410_v1 = vsub.f32 2.0, %v10378_v60 }
 0xb9b   : > { %v13851_v8 = vpop.eup %13850 }
 0xb9c   : > { %v10442_v29 = vmul.f32 %v13849_v44, %v10410_v1  ;;  %v10379_v13 = vmul.f32 %v13851_v8, %v10269_v2  ;;  %10521 = vxpose.xlu1.b32.cont [8/16] %v10473_v34, 128  ;;  %v10293_v19 = vpop.f32.mrb[120].mxu0 }
 0xb9d   : > { %13856 = vrcp.f32 %v10293_v19  ;;  %v10295_v25 = vpop.f32.mrb[121].mxu0 }
 0xb9e   : > { %v10474_v24 = vmul.f32 %v10442_v29, %v10263_v54  ;;  %v10411_v16 = vsub.f32 2.0, %v10379_v13 }
 0xb9f   : > { %v13853_v26 = vpop.eup %13852 }
 0xba0   : > { %v10443_v36 = vmul.f32 %v13851_v8, %v10411_v16  ;;  %v10380_v33 = vmul.f32 %v13853_v26, %v10277_v0  ;;  %10522 = vxpose.xlu1.b32.cont [9/16] %v10474_v24, 128  ;;  %v10301_v39 = vpop.f32.mrb[122].mxu0 }
 0xba1   : > { %13858 = vrcp.f32 %v10301_v39  ;;  %v10303_v32 = vpop.f32.mrb[123].mxu0 }
 0xba2   : > { %v10475_v21 = vmul.f32 %v10443_v36, %v10271_v58  ;;  %v10412_v3 = vsub.f32 2.0, %v10380_v33 }
 0xba3   : > { %v13855_v63 = vpop.eup %13854 }
 0xba4   : > { %v10444_v28 = vmul.f32 %v13853_v26, %v10412_v3  ;;  %v10381_v18 = vmul.f32 %v13855_v63, %v10285_v51  ;;  %10523 = vxpose.xlu1.b32.cont [10/16] %v10475_v21, 128  ;;  %v10309_v38 = vpop.f32.mrb[124].mxu0 }
 0xba5   : > { %13860 = vrcp.f32 %v10309_v38  ;;  %v10311_v55 = vpop.f32.mrb[125].mxu0 }
 0xba6   : > { %v10476_v5 = vmul.f32 %v10444_v28, %v10279_v10  ;;  %v10413_v22 = vsub.f32 2.0, %v10381_v18 }
 0xba7   : > { %v13857_v49 = vpop.eup %13856 }
 0xba8   : > { %v10445_v20 = vmul.f32 %v13855_v63, %v10413_v22  ;;  %v10382_v50 = vmul.f32 %v13857_v49, %v10293_v19  ;;  %10524 = vxpose.xlu1.b32.cont [11/16] %v10476_v5, 128  ;;  %v10317_v53 = vpop.f32.mrb[126].mxu0 }
 0xba9   : > { %13862 = vrcp.f32 %v10317_v53  ;;  %v10319_v14 = vpop.f32.mrb[127].mxu0 }
 0xbaa   : > { %v10477_v48 = vmul.f32 %v10445_v20, %v10287_v12  ;;  %v10414_v61 = vsub.f32 2.0, %v10382_v50 }
 0xbab   : > { %v13859_v31 = vpop.eup %13858 }
 0xbac   : > { %v10446_v37 = vmul.f32 %v13857_v49, %v10414_v61  ;;  %v10383_v41 = vmul.f32 %v13859_v31, %v10301_v39  ;;  %10525 = vxpose.xlu1.b32.cont [12/16] %v10477_v48, 128 }
 0xbae   : > { %v10478_v27 = vmul.f32 %v10446_v37, %v10295_v25  ;;  %v10415_v56 = vsub.f32 2.0, %v10383_v41 }
 0xbaf   : > { %v13861_v42 = vpop.eup %13860 }
 0xbb0   : > { %v10447_v46 = vmul.f32 %v13859_v31, %v10415_v56  ;;  %v10384_v57 = vmul.f32 %v13861_v42, %v10309_v38  ;;  %10526 = vxpose.xlu1.b32.cont [13/16] %v10478_v27, 128 }
 0xbb2   : > { %v10479_v52 = vmul.f32 %v10447_v46, %v10303_v32  ;;  %v10416_v43 = vsub.f32 2.0, %v10384_v57 }
 0xbb3   : > { %v13863_v40 = vpop.eup %13862 }
 0xbb4   : > { %v10448_v4 = vmul.f32 %v13861_v42, %v10416_v43  ;;  %v10385_v54 = vmul.f32 %v13863_v40, %v10317_v53  ;;  %10527 = vxpose.xlu1.b32.cont [14/16] %v10479_v52, 128 }
 0xbb6   : > { %v10480_v45 = vmul.f32 %v10448_v4, %v10311_v55  ;;  %v10417_v62 = vsub.f32 2.0, %v10385_v54 }
 0xbb8   : > { %v10449_v11 = vmul.f32 %v13863_v40, %v10417_v62  ;;  %10528 = vxpose.xlu1.b32.cont [15/16] %v10480_v45, 128 }
 0xbba   : > { %v10481_v17 = vmul.f32 %v10449_v11, %v10319_v14 }
 0xbbc   : > { %10529 = vxpose.xlu1.b32.end [16/16] %v10481_v17, 128 }
 0xbc0   : > { %v10498_v35 = vpop.trf.xlu0 }
 0xbc4   : > { %v10499_v2 = vpop.trf.xlu0 }
 0xbc5   : > { %v10546_v9 = vadd.f32 %v10499_v2, %v10498_v35 }
 0xbc8   : > { %v10500_v58 = vpop.trf.xlu0 }
 0xbc9   : > { %v10547_v0 = vadd.f32 %v10546_v9, %v10500_v58 }
 0xbcc   : > { %v10501_v23 = vpop.trf.xlu0 }
 0xbcd   : > { %v10548_v6 = vadd.f32 %v10547_v0, %v10501_v23 }
 0xbd0   : > { %v10502_v47 = vpop.trf.xlu0 }
 0xbd1   : > { %v10549_v15 = vadd.f32 %v10548_v6, %v10502_v47 }
 0xbd4   : > { %v10503_v59 = vpop.trf.xlu0 }
 0xbd5   : > { %v10550_v51 = vadd.f32 %v10549_v15, %v10503_v59  ;;  %v13876_v59 = vmov 1966171168  }
 0xbd8   : > { %v10504_v7 = vpop.trf.xlu0 }
 0xbd9   : > { %v10551_v1 = vadd.f32 %v10550_v51, %v10504_v7  ;;  %v10596_v7 = vunpack.c.l.s4 %v13876_v59  ;;  %v21566_v51 = vld [vmem:[#allocation6_spill] sm:$0xff] }
 0xbdb   : > { %v10597_v6 = vunpack.c.0.s8 %v10596_v7 }
 0xbdc   : > { %v10505_v10 = vpop.trf.xlu0 }
 0xbdd   : > { %v10552_v13 = vadd.f32 %v10551_v1, %v10505_v10 }
 0xbe0   : > { %v10506_v44 = vpop.trf.xlu0 }
 0xbe1   : > { %v10553_v25 = vadd.f32 %v10552_v13, %v10506_v44  ;;  %v10589_v44 = vstv %s10588_s13 }
 0xbe4   : > { %v10507_v12 = vpop.trf.xlu0 }
 0xbe5   : > { %v10554_v26 = vadd.f32 %v10553_v25, %v10507_v12  ;;  %v10600_v12 = vsub.s32 %v10597_v6, %v21566_v51 }
 0xbe8   : > { %v10508_v29 = vpop.trf.xlu0 }
 0xbe9   : > { %v10555_v39 = vadd.f32 %v10554_v26, %v10508_v29  ;;  %v21567_v29 = vlaneseq }
 0xbeb   : > { %vm10612_vm3 = vcmp.lt.s32.totalorder %v21567_v29, 256 }
 0xbec   : > { %v10509_v24 = vpop.trf.xlu0 }
 0xbed   : > { %v10556_v21 = vadd.f32 %v10555_v39, %v10509_v24 }
 0xbf0   : > { %v10510_v33 = vpop.trf.xlu0 }
 0xbf1   : > { %v10557_v38 = vadd.f32 %v10556_v21, %v10510_v33 }
 0xbf4   : > { %v10511_v3 = vpop.trf.xlu0 }
 0xbf5   : > { %v10558_v49 = vadd.f32 %v10557_v38, %v10511_v3 }
 0xbf8   : > { %v10512_v22 = vpop.trf.xlu0 }
 0xbf9   : > { %v10559_v14 = vadd.f32 %v10558_v49, %v10512_v22 }
 0xbfc   : > { %v10513_v61 = vpop.trf.xlu0 }
 0xbfd   : > { %v10560_v41 = vadd.f32 %v10559_v14, %v10513_v61 }
 0xbff   : > { %v10561_v46 = vrot.slane %v10560_v41, 4 }
 0xc00   : > { %v10530_v30 = vpop.trf.xlu1 }
 0xc01   : > { %v10562_v40 = vadd.f32 %v10561_v46, %v10560_v41 }
 0xc03   : > { %v10563_v62 = vrot.slane %v10562_v40, 2 }
 0xc04   : > { %v10531_v60 = vpop.trf.xlu1 }
 0xc05   : > { %v10567_v28 = vadd.f32 %v10531_v60, %v10530_v30  ;;  %v10564_v2 = vadd.f32 %v10563_v62, %v10562_v40 }
 0xc07   : > { %v10565_v47 = vrot.slane %v10564_v2, 1 }
 0xc08   : > { %v10532_v34 = vpop.trf.xlu1 }
 0xc09   : > { %v10568_v18 = vadd.f32 %v10567_v28, %v10532_v34  ;;  %v10566_v10 = vadd.f32 %v10565_v47, %v10564_v2 }
 0xc0b   : > { %v10590_v60 = vadd.f32 %v10589_v44, %v10566_v10 }
 0xc0c   : > { %v10533_v8 = vpop.trf.xlu1 }
 0xc0d   : > { %v10569_v5 = vadd.f32 %v10568_v18, %v10533_v8 }
 0xc10   : > { %v10534_v19 = vpop.trf.xlu1 }
 0xc11   : > { %v10570_v20 = vadd.f32 %v10569_v5, %v10534_v19 }
 0xc14   : > { %v10535_v16 = vpop.trf.xlu1 }
 0xc15   : > { %v10571_v53 = vadd.f32 %v10570_v20, %v10535_v16 }
 0xc18   : > { %v10536_v36 = vpop.trf.xlu1 }
 0xc19   : > { %v10572_v48 = vadd.f32 %v10571_v53, %v10536_v36 }
 0xc1c   : > { %v10537_v32 = vpop.trf.xlu1 }
 0xc1d   : > { %v10573_v37 = vadd.f32 %v10572_v48, %v10537_v32 }
 0xc20   : > { %v10538_v63 = vpop.trf.xlu1 }
 0xc21   : > { %v10574_v27 = vadd.f32 %v10573_v37, %v10538_v63 }
 0xc24   : > { %v10539_v55 = vpop.trf.xlu1 }
 0xc25   : > { %v10575_v42 = vadd.f32 %v10574_v27, %v10539_v55 }
 0xc28   : > { %v10540_v50 = vpop.trf.xlu1 }
 0xc29   : > { %v10576_v57 = vadd.f32 %v10575_v42, %v10540_v50 }
 0xc2c   : > { %v10541_v31 = vpop.trf.xlu1 }
 0xc2d   : > { %v10577_v43 = vadd.f32 %v10576_v57, %v10541_v31 }
 0xc30   : > { %v10542_v56 = vpop.trf.xlu1 }
 0xc31   : > { %v10578_v4 = vadd.f32 %v10577_v43, %v10542_v56 }
 0xc34   : > { %v10543_v52 = vpop.trf.xlu1 }
 0xc35   : > { %v10579_v45 = vadd.f32 %v10578_v4, %v10543_v52 }
 0xc38   : > { %v10544_v54 = vpop.trf.xlu1 }
 0xc39   : > { %v10580_v11 = vadd.f32 %v10579_v45, %v10544_v54 }
 0xc3c   : > { %v10545_v17 = vpop.trf.xlu1 }
 0xc3d   : > { %v10581_v35 = vadd.f32 %v10580_v11, %v10545_v17 }
 0xc3f   : > { %v10582_v58 = vrot.slane %v10581_v35, 4 }
 0xc41   : > { %v10583_v23 = vadd.f32 %v10582_v58, %v10581_v35 }
 0xc43   : > { %v10584_v9 = vrot.slane %v10583_v23, 2 }
 0xc45   : > { %v10585_v0 = vadd.f32 %v10584_v9, %v10583_v23 }
 0xc47   : > { %v10586_v30 = vrot.slane %v10585_v0, 1 }
 0xc49   : > { %v10587_v15 = vadd.f32 %v10586_v30, %v10585_v0 }
 0xc4b   : > { %v10591_v34 = vadd.f32 %v10589_v44, %v10587_v15 }
 0xc4d   : > { %v10594_v1 = vcombine.low %v10590_v60, %v10591_v34 }
 0xc4f   : > { %v10601_v8 = vrot.slane %v10594_v1, %v10600_v12 }
 0xc51   : > { %v10608_v13 = vrot.slane %v10601_v8, %v10600_v12 }
 0xc53   : > { %10614 = vst.msk [vmem:[%s252_s26] sm:$0x3] %vm10612_vm3, %v10608_v13 }
 0xc54 PF: > { %s17_s23 = sadd.s32 1, %s13870_s23  }
 0xc55   : > { %p14_p5 = scmp.ge.s32.totalorder %s17_s23, 4  }
 0xc57   :  { %16 = sbr.rel (!%p14_p5) target bundleno = 2 (0x2), region = 74 }

</bundles_post_ra>
